<compile_context>
chip_gen: v7x
topology: tpu7x:2x2x1
jax: 0.10.0
libtpu: 0.0.40
codegen_flags: <defaults>
</compile_context>

<pallas_src>
import dataclasses

import numpy as np
import jax
import jax.numpy as jnp
from jax import lax
from jax.experimental import pallas as pl
from jax.experimental.pallas import tpu as pltpu


def _ceil8(x):
    return (x + 7) // 8 * 8


# ----------------------------------------------------------------------------- config
@dataclasses.dataclass(frozen=True)
class Config:
    in_channels: int = 3
    n_kernels: int = 24
    vocab_size: int = 16
    n_dim: int = 3
    n_features: int = 32
    n_heads: int = 4
    n_attn_modules: int = 2
    n_linears: int = 4


# ------------------------------------------------------------------------ slab layout
def make_layout(cfg: Config, action_space: int, H: int, W: int, bt: int):
    """Static row layout of the bf16 weight slab and the f32 vector slab."""
    C, V = cfg.in_channels, cfg.vocab_size
    K1, K2 = cfg.n_kernels // 2, cfg.n_kernels
    F = cfg.n_features
    CV, K1P = C * V, _ceil8(K1)
    N2 = (H - 2) * (W - 2)

    wlay, woff = {}, 0

    def addw(name, rows, cols):
        nonlocal woff
        wlay[name] = (woff, rows, cols)
        woff += _ceil8(rows)

    addw("rep", C, CV)            # token replication matrix for the one-hot
    addw("m1", 4 * CV, K1)        # conv1 with embedding folded in (4 shift blocks)
    addw("m2", 4 * K1P, K2)       # conv2 (4 shift blocks, 8-row aligned)
    addw("proj", K2, F)
    for b in range(cfg.n_attn_modules):
        addw(f"wqkv_{b}", F, 3 * F)
        addw(f"wo_{b}", F, F)
        addw(f"w1_{b}", F, F)
        addw(f"w2_{b}", F, F)
    for l in range(cfg.n_linears):
        addw(f"res_{l}", F, F)
    addw("head", F, action_space)
    wrows = _ceil8(woff)

    vlay, voff = {}, 0

    def addv(name, cols, rows=1):
        nonlocal voff
        vlay[name] = (voff, rows, cols)
        voff += rows

    addv("vmod", CV)
    addv("cb1", K1)
    addv("cb2", K2)
    for b in range(cfg.n_attn_modules):
        for nm, c in (("ln1g", F), ("ln1b", F), ("bqkv", 3 * F), ("bo", F), ("g1", F),
                      ("ln2g", F), ("ln2b", F), ("fb1", F), ("fb2", F), ("g2", F)):
            addv(f"{nm}_{b}", c)
    for l in range(cfg.n_linears):
        addv(f"rb_{l}", F)
    addv("headb", action_space)
    voff = _ceil8(voff)
    vlay["pos_bias"] = (voff, bt * N2, F)     # positional encoding folded through proj
    voff += bt * N2
    vrows = _ceil8(voff)
    return wlay, vlay, wrows, vrows


# ------------------------------------------------------------------- fused actor kernel
def _make_actor_kernel(cfg: Config, H: int, W: int, bt: int, wlay, vlay):
    C, V = cfg.in_channels, cfg.vocab_size
    K1, K2 = cfg.n_kernels // 2, cfg.n_kernels
    F, NH = cfg.n_features, cfg.n_heads
    D = F // NH
    N1, N2 = (H - 1) * (W - 1), (H - 2) * (W - 2)
    R = bt * N2
    CV, K1P = C * V, _ceil8(K1)
    nA, nL = cfg.n_attn_modules, cfg.n_linears
    bf, f32 = jnp.bfloat16, jnp.float32

    def mm(a, b):  # bf16 operands, f32 MXU accumulation
        return jnp.dot(a.astype(bf), b.astype(bf), preferred_element_type=f32)

    def layernorm(v, g, b):
        mu = jnp.mean(v, axis=-1, keepdims=True)
        var = jnp.mean((v - mu) ** 2, axis=-1, keepdims=True)
        return (v - mu) * lax.rsqrt(var + 1e-5) * g + b

    def sigmoid(t):  # overflow-free logistic via tanh (EUP slot)
        return 0.5 * (jnp.tanh(0.5 * t) + 1.0)

    def kernel(state_ref, wslab_ref, vslab_ref, mask_ref, sel1_ref, sel2_ref, o_ref):
        def Wm(name):                        # full weight matrix (bf16 slab slice)
            off, r, c = wlay[name]
            return wslab_ref[off:off + r, :c]

        def Wblk(name, s, rows, stride):     # s-th row block of a stacked weight
            off, _, c = wlay[name]
            o = off + s * stride
            return wslab_ref[o:o + rows, :c]

        def Vv(name):                        # f32 bias / gate / LN / const rows
            off, r, c = vlay[name]
            return vslab_ref[off:off + r, :c]

        # ---- ExtractEntities: pixel one-hot via replication GEMM + compare ----
        # tok[r, c*V+v] = state[r, c]; one-hot by comparing with tiled [0..V-1].
        st = state_ref[0].astype(f32)                                # (bt*HW, C)
        tok = mm(st, Wm("rep"))                                      # (bt*HW, C*V)
        oh = jnp.where(tok == Vv("vmod"), 1.0, 0.0)                  # (bt*HW, C*V)

        # ---- conv1 (2x2 valid, embedding folded in): sum over 4 patch shifts ----
        acc = None
        for s in range(4):
            part = mm(sel1_ref[s], mm(oh, Wblk("m1", s, CV, CV)))    # (bt*N1, K1)
            acc = part if acc is None else acc + part
        y1 = jnp.maximum(acc + Vv("cb1"), 0.0)

        # ---- conv2 (2x2 valid): sum over 4 patch shifts ----
        acc = None
        for s in range(4):
            part = mm(sel2_ref[s], mm(y1, Wblk("m2", s, K1, K1P)))   # (bt*N2, K2)
            acc = part if acc is None else acc + part
        y2 = jnp.maximum(acc + Vv("cb2"), 0.0)

        # ---- linear projection; positional encoding folded into a constant bias ----
        x = mm(y2, Wm("proj")) + Vv("pos_bias")                      # (R, F) f32

        # ---- gated multi-head attention blocks (pre-LN, sigmoid-gated residuals) ----
        scale = 1.0 / (D ** 0.5)
        mask = mask_ref[...]                         # (R, R) 0/1 block diag per element
        for b in range(nA):
            xn = layernorm(x, Vv(f"ln1g_{b}"), Vv(f"ln1b_{b}"))
            qkv = mm(xn, Wm(f"wqkv_{b}")) + Vv(f"bqkv_{b}")          # (R, 3F)
            wo = Wm(f"wo_{b}")                                       # (F, F) bf16
            attn = jnp.zeros((R, F), f32)
            for h in range(NH):
                q = qkv[:, h * D:(h + 1) * D]
                k = qkv[:, F + h * D:F + (h + 1) * D]
                v = qkv[:, 2 * F + h * D:2 * F + (h + 1) * D]
                # q @ k^T without an explicit transpose (NT dot_general).
                s_ = lax.dot_general(q.astype(bf), k.astype(bf),
                                     (((1,), (1,)), ((), ())),
                                     preferred_element_type=f32) * scale
                s_ = s_ - jnp.max(s_, axis=-1, keepdims=True)
                e = jnp.exp(s_) * mask               # zero out cross-element scores
                p = e * pl.reciprocal(jnp.sum(e, axis=-1, keepdims=True), approx=True)
                hv = mm(p, v)                                        # (R, D)
                # accumulate through W_O row block -> no head concat needed
                attn = attn + mm(hv, wo[h * D:(h + 1) * D, :])
            x = x + sigmoid(Vv(f"g1_{b}")) * (attn + Vv(f"bo_{b}"))

            xn2 = layernorm(x, Vv(f"ln2g_{b}"), Vv(f"ln2b_{b}"))
            h1 = jnp.maximum(mm(xn2, Wm(f"w1_{b}")) + Vv(f"fb1_{b}"), 0.0)
            x = x + sigmoid(Vv(f"g2_{b}")) * (mm(h1, Wm(f"w2_{b}")) + Vv(f"fb2_{b}"))

        # ---- featurewise max-pool over entities (per stacked batch element) ----
        pooled = jnp.concatenate(
            [jnp.max(x[i * N2:(i + 1) * N2, :], axis=0, keepdims=True)
             for i in range(bt)], axis=0)                            # (bt, F)

        # ---- residual fully-connected stack ----
        z = pooled
        for l in range(nL):
            z = jnp.maximum(mm(z, Wm(f"res_{l}")) + Vv(f"rb_{l}") + z, 0.0)

        # ---- actor head: linear + exact log-softmax ----
        logits = mm(z, Wm("head")) + Vv("headb")                     # (bt, A)
        zz = logits - jnp.max(logits, axis=-1, keepdims=True)
        o_ref[0] = zz - jnp.log(jnp.sum(jnp.exp(zz), axis=-1, keepdims=True))

    return kernel


# ------------------------------------------------------------------------ parameters
def init_params(key, cfg: Config, action_space: int):
    keys = iter(jax.random.split(key, 64))
    f32 = jnp.float32
    C, V, E = cfg.in_channels, cfg.vocab_size, cfg.n_dim
    K1, K2 = cfg.n_kernels // 2, cfg.n_kernels
    F = cfg.n_features

    def nrm(shape, fan_in):
        return jax.random.normal(next(keys), shape, f32) / (float(fan_in) ** 0.5)

    p = {
        "embed": nrm((V, E), V),
        "conv1_w": nrm((4 * C * E, K1), 4 * C * E), "conv1_b": jnp.zeros((K1,), f32),
        "conv2_w": nrm((4 * K1, K2), 4 * K1), "conv2_b": jnp.zeros((K2,), f32),
        "proj_w": nrm((K2 + 2, F), K2 + 2), "proj_b": jnp.zeros((F,), f32),
        "attn": [],
        "res": [(nrm((F, F), F), jnp.zeros((F,), f32)) for _ in range(cfg.n_linears)],
        "head_w": nrm((F, action_space), F), "head_b": jnp.zeros((action_space,), f32),
    }
    for _ in range(cfg.n_attn_modules):
        p["attn"].append({
            "ln1_g": jnp.ones((F,), f32), "ln1_b": jnp.zeros((F,), f32),
            "wqkv": nrm((F, 3 * F), F), "bqkv": jnp.zeros((3 * F,), f32),
            "wo": nrm((F, F), F), "bo": jnp.zeros((F,), f32),
            "gate1": nrm((F,), 1.0),
            "ln2_g": jnp.ones((F,), f32), "ln2_b": jnp.zeros((F,), f32),
            "w1": nrm((F, F), F), "b1": jnp.zeros((F,), f32),
            "w2": nrm((F, F), F), "b2": jnp.zeros((F,), f32),
            "gate2": nrm((F,), 1.0),
        })
    return p


# ----------------------------------------------------------------- host-side packing
def _conv_selectors(hin, win):
    hout, wout = hin - 1, win - 1
    m = np.zeros((4, hout * wout, hin * win), np.float32)
    for di in range(2):
        for dj in range(2):
            s = 2 * di + dj
            for a in range(hout):
                for b in range(wout):
                    m[s, a * wout + b, (a + di) * win + (b + dj)] = 1.0
    return m


def _block_diag(m, bt):
    s4, r, c = m.shape
    out = np.zeros((s4, bt * r, bt * c), np.float32)
    for e in range(bt):
        out[:, e * r:(e + 1) * r, e * c:(e + 1) * c] = m
    return out


def pack_inputs(params, cfg: Config, H: int, W: int, bt: int, action_space: int):
    """Fold embed->conv1 and pos->bias, pack weights into one bf16 slab and all
    bias/gate/LN/const rows into one f32 slab, and build the block-diagonal im2col
    selectors + attention mask for a bt-stacked grid step."""
    C, V, E = cfg.in_channels, cfg.vocab_size, cfg.n_dim
    K1, K2 = cfg.n_kernels // 2, cfg.n_kernels
    F = cfg.n_features
    CV, K1P = C * V, _ceil8(K1)
    N2 = (H - 2) * (W - 2)
    assert V <= 256  # token values must stay exact on the bf16 MXU path

    wlay, vlay, wrows, vrows = make_layout(cfg, action_space, H, W, bt)
    wslab = np.zeros((wrows, 128), np.float32)
    vslab = np.zeros((vrows, 128), np.float32)
    npf = lambda a: np.asarray(a, np.float32)

    def putw(name, mat):
        off = wlay[name][0]
        wslab[off:off + mat.shape[0], :mat.shape[1]] = mat

    def putv(name, vec):
        off = vlay[name][0]
        vslab[off, :vec.shape[0]] = vec

    rep = np.zeros((C, CV), np.float32)
    for c in range(C):
        rep[c, c * V:(c + 1) * V] = 1.0
    putw("rep", rep)

    embed = npf(params["embed"])
    embed_bd = np.zeros((CV, C * E), np.float32)
    for c in range(C):
        embed_bd[c * V:(c + 1) * V, c * E:(c + 1) * E] = embed
    c1w = npf(params["conv1_w"])
    m1 = np.zeros((4 * CV, K1), np.float32)
    for s in range(4):
        m1[s * CV:(s + 1) * CV] = embed_bd @ c1w[s * C * E:(s + 1) * C * E]
    putw("m1", m1)

    c2w = npf(params["conv2_w"])
    off2 = wlay["m2"][0]
    for s in range(4):
        wslab[off2 + s * K1P: off2 + s * K1P + K1, :K2] = c2w[s * K1:(s + 1) * K1]

    putw("proj", npf(params["proj_w"])[:K2])
    for b, blk in enumerate(params["attn"]):
        putw(f"wqkv_{b}", npf(blk["wqkv"]))
        putw(f"wo_{b}", npf(blk["wo"]))
        putw(f"w1_{b}", npf(blk["w1"]))
        putw(f"w2_{b}", npf(blk["w2"]))
        putv(f"ln1g_{b}", npf(blk["ln1_g"])); putv(f"ln1b_{b}", npf(blk["ln1_b"]))
        putv(f"bqkv_{b}", npf(blk["bqkv"]));  putv(f"bo_{b}", npf(blk["bo"]))
        putv(f"g1_{b}", npf(blk["gate1"]))
        putv(f"ln2g_{b}", npf(blk["ln2_g"])); putv(f"ln2b_{b}", npf(blk["ln2_b"]))
        putv(f"fb1_{b}", npf(blk["b1"]));     putv(f"fb2_{b}", npf(blk["b2"]))
        putv(f"g2_{b}", npf(blk["gate2"]))
    for l, (wr, br) in enumerate(params["res"]):
        putw(f"res_{l}", npf(wr))
        putv(f"rb_{l}", npf(br))
    putw("head", npf(params["head_w"]))
    putv("headb", npf(params["head_b"]))

    putv("vmod", np.tile(np.arange(V, dtype=np.float32), C))
    putv("cb1", npf(params["conv1_b"]))
    putv("cb2", npf(params["conv2_b"]))

    # positional encoding folded through the projection into a constant bias
    H2, W2 = H - 2, W - 2
    ys = np.linspace(-1.0, 1.0, H2)
    xs = np.linspace(-1.0, 1.0, W2)
    pos = np.stack([np.broadcast_to(ys[:, None], (H2, W2)),
                    np.broadcast_to(xs[None, :], (H2, W2))], -1).reshape(N2, 2)
    pos_bias = pos.astype(np.float32) @ npf(params["proj_w"])[K2:] + npf(params["proj_b"])[None, :]
    offp = vlay["pos_bias"][0]
    vslab[offp:offp + bt * N2, :F] = np.tile(pos_bias, (bt, 1))

    sel1 = _block_diag(_conv_selectors(H, W), bt)          # (4, bt*N1, bt*HW)
    sel2 = _block_diag(_conv_selectors(H - 1, W - 1), bt)  # (4, bt*N2, bt*N1)

    mask = np.zeros((bt * N2, bt * N2), np.float32)
    for e in range(bt):
        mask[e * N2:(e + 1) * N2, e * N2:(e + 1) * N2] = 1.0

    packed = {
        "wslab": jnp.asarray(wslab, jnp.bfloat16),
        "vslab": jnp.asarray(vslab, jnp.float32),
        "mask": jnp.asarray(mask, jnp.float32),
        "sel1": jnp.asarray(sel1, jnp.bfloat16),   # 0/1 exact in bf16
        "sel2": jnp.asarray(sel2, jnp.bfloat16),
    }
    return packed, wlay, vlay


# ------------------------------------------------------------------------ forward pass
def make_forward(cfg: Config, action_space: int, H: int, W: int, bt: int):
    wlay, vlay, _, _ = make_layout(cfg, action_space, H, W, bt)
    kernel = _make_actor_kernel(cfg, H, W, bt, wlay, vlay)
    C, F, A = cfg.in_channels, cfg.n_features, action_space
    K1, K2 = cfg.n_kernels // 2, cfg.n_kernels
    CV = C * cfg.vocab_size
    HW, N1, N2 = H * W, (H - 1) * (W - 1), (H - 2) * (W - 2)
    R = bt * N2
    D = F // cfg.n_heads

    def forward(packed, state):
        B = state.shape[0]
        G = -(-B // bt)
        if G > 1 and G % 2:          # even grid keeps both v7x TensorCores busy
            G += 1
        Bp = G * bt
        # layout plumbing only: entity-major int grid, padded & stacked bt-per-step
        st = state.transpose(0, 2, 3, 1).reshape(B, HW, C).astype(jnp.int32)
        if Bp != B:
            st = jnp.concatenate([st, jnp.zeros((Bp - B, HW, C), jnp.int32)], axis=0)
        st = st.reshape(G, bt * HW, C)

        flat = [st, packed["wslab"], packed["vslab"], packed["mask"],
                packed["sel1"], packed["sel2"]]
        in_specs = [pl.BlockSpec((1, bt * HW, C), lambda i: (i, 0, 0))]
        for a in flat[1:]:
            in_specs.append(pl.BlockSpec(a.shape, lambda i, nd=a.ndim: (0,) * nd))

        # rough advisory cost so XLA schedules around the call sensibly
        flops = 2 * G * (
            bt * HW * C * CV
            + 4 * (bt * HW * CV * K1 + bt * N1 * bt * HW * K1)
            + 4 * (bt * N1 * K1 * K2 + bt * N2 * bt * N1 * K2)
            + R * K2 * F
            + cfg.n_attn_modules * (R * F * 3 * F + 2 * R * F * F
                                    + cfg.n_heads * (2 * R * R * D + R * D * F))
            + cfg.n_linears * bt * F * F + bt * F * A)
        transc = G * (cfg.n_attn_modules * cfg.n_heads * R * R + 8 * R * F)
        nbytes = G * (sum(int(np.prod(a.shape)) * a.dtype.itemsize for a in flat)
                      + bt * A * 4)

        out = pl.pallas_call(
            kernel,
            grid=(G,),
            in_specs=in_specs,
            out_specs=pl.BlockSpec((1, bt, A), lambda i: (i, 0, 0)),
            out_shape=jax.ShapeDtypeStruct((G, bt, A), jnp.float32),
            compiler_params=pltpu.CompilerParams(dimension_semantics=("parallel",)),
            cost_estimate=pl.CostEstimate(flops=int(flops),
                                          transcendentals=int(transc),
                                          bytes_accessed=int(nbytes)),
        )(*flat)
        return out.reshape(Bp, A)[:B]

    return jax.jit(forward)


# ------------------------------------------------------------------------------- main
if __name__ == "__main__":
    cfg = Config(in_channels=3, n_kernels=24, vocab_size=16, n_dim=3,
                 n_features=32, n_heads=4, n_attn_modules=2, n_linears=4)
    action_space = 4
    batch, height, width = 2, 8, 8
    batch_tile = 2            # rows per grid step = batch_tile * 36 entities

    state = jax.random.randint(jax.random.PRNGKey(0),
                               (batch, cfg.in_channels, height, width),
                               0, cfg.vocab_size, dtype=jnp.int32)
    params = init_params(jax.random.PRNGKey(1), cfg, action_space)
    packed, _, _ = pack_inputs(params, cfg, height, width, batch_tile, action_space)

    forward = make_forward(cfg, action_space, height, width, batch_tile)
    log_probs = forward(packed, state)
    jax.block_until_ready(log_probs)

    assert log_probs.shape == (batch, action_space)
    assert log_probs.dtype == jnp.float32
    assert bool(jnp.all(jnp.isfinite(log_probs)))
    # valid log-softmax: probabilities sum to 1 per row
    assert bool(jnp.allclose(jnp.exp(log_probs).sum(axis=-1), 1.0, atol=1e-3))
    print("KERNEL_OK")
</pallas_src>

<mosaic_0001>
module attributes {stable_mosaic.version = 11 : i64} {
  func.func @kernel(%arg0: i32, %arg1: memref<1x128x3xi32, #tpu.memory_space<vmem>>, %arg2: memref<704x128xbf16, #tpu.memory_space<vmem>>, %arg3: memref<104x128xf32, #tpu.memory_space<vmem>>, %arg4: memref<72x72xf32, #tpu.memory_space<vmem>>, %arg5: memref<4x98x128xbf16, #tpu.memory_space<vmem>>, %arg6: memref<4x72x98xbf16, #tpu.memory_space<vmem>>, %arg7: memref<1x2x4xf32, #tpu.memory_space<vmem>>) attributes {dimension_semantics = [#tpu.dimension_semantics<parallel>], iteration_bounds = array<i64: 1>, scalar_prefetch = 0 : i64, scratch_operands = 0 : i64, tpu.core_type = #tpu.core_type<tc>, window_params = [{transform_indices = @transform_0, window_bounds = array<i64: 1, 128, 3>}, {pipeline_mode = #tpu.pipeline_mode<synchronous>, transform_indices = @transform_1, window_bounds = array<i64: 704, 128>}, {pipeline_mode = #tpu.pipeline_mode<synchronous>, transform_indices = @transform_2, window_bounds = array<i64: 104, 128>}, {pipeline_mode = #tpu.pipeline_mode<synchronous>, transform_indices = @transform_3, window_bounds = array<i64: 72, 72>}, {pipeline_mode = #tpu.pipeline_mode<synchronous>, transform_indices = @transform_4, window_bounds = array<i64: 4, 98, 128>}, {pipeline_mode = #tpu.pipeline_mode<synchronous>, transform_indices = @transform_5, window_bounds = array<i64: 4, 72, 98>}, {transform_indices = @transform_6, window_bounds = array<i64: 1, 2, 4>}]} {
    %c0 = arith.constant 0 : index
    %c0_0 = arith.constant 0 : index
    %c0_1 = arith.constant 0 : index
    %0 = vector.load %arg1[%c0, %c0_0, %c0_1] : memref<1x128x3xi32, #tpu.memory_space<vmem>>, vector<1x128x3xi32>
    %1 = vector.shape_cast %0 : vector<1x128x3xi32> to vector<128x3xi32>
    %2 = arith.sitofp %1 : vector<128x3xi32> to vector<128x3xf32>
    %c0_2 = arith.constant 0 : index
    %c0_3 = arith.constant 0 : index
    %3 = vector.load %arg2[%c0_2, %c0_3] : memref<704x128xbf16, #tpu.memory_space<vmem>>, vector<3x48xbf16>
    %4 = arith.truncf %2 : vector<128x3xf32> to vector<128x3xbf16>
    %cst = arith.constant dense<0.000000e+00> : vector<128x48xf32>
    %5 = tpu.matmul %4, %3, %cst {dimension_numbers = #tpu.dot_dimension_numbers<[1], [0], [0], [1], [0, 0, 1, 1], [], []>} : vector<128x3xbf16>, vector<3x48xbf16>, vector<128x48xf32> -> vector<128x48xf32>
    %c0_4 = arith.constant 0 : index
    %c0_5 = arith.constant 0 : index
    %6 = vector.load %arg3[%c0_4, %c0_5] : memref<104x128xf32, #tpu.memory_space<vmem>>, vector<1x48xf32>
    %7 = vector.broadcast %6 : vector<1x48xf32> to vector<128x48xf32>
    %8 = arith.cmpf oeq, %5, %7 : vector<128x48xf32>
    %cst_6 = arith.constant 1.000000e+00 : f32
    %cst_7 = arith.constant 0.000000e+00 : f32
    %9 = vector.broadcast %cst_6 : f32 to vector<128x48xf32>
    %10 = vector.broadcast %cst_7 : f32 to vector<128x48xf32>
    %11 = arith.select %8, %9, %10 : vector<128x48xi1>, vector<128x48xf32>
    %c0_8 = arith.constant 0 : index
    %c0_9 = arith.constant 0 : index
    %c0_10 = arith.constant 0 : index
    %12 = vector.load %arg5[%c0_8, %c0_9, %c0_10] : memref<4x98x128xbf16, #tpu.memory_space<vmem>>, vector<1x98x128xbf16>
    %13 = vector.shape_cast %12 : vector<1x98x128xbf16> to vector<98x128xbf16>
    %c8 = arith.constant 8 : index
    %c0_11 = arith.constant 0 : index
    %14 = vector.load %arg2[%c8, %c0_11] : memref<704x128xbf16, #tpu.memory_space<vmem>>, vector<48x12xbf16>
    %15 = arith.truncf %11 : vector<128x48xf32> to vector<128x48xbf16>
    %cst_12 = arith.constant dense<0.000000e+00> : vector<128x12xf32>
    %16 = tpu.matmul %15, %14, %cst_12 {dimension_numbers = #tpu.dot_dimension_numbers<[1], [0], [0], [1], [0, 0, 1, 1], [], []>} : vector<128x48xbf16>, vector<48x12xbf16>, vector<128x12xf32> -> vector<128x12xf32>
    %17 = arith.truncf %16 : vector<128x12xf32> to vector<128x12xbf16>
    %cst_13 = arith.constant dense<0.000000e+00> : vector<98x12xf32>
    %18 = tpu.matmul %13, %17, %cst_13 {dimension_numbers = #tpu.dot_dimension_numbers<[1], [0], [0], [1], [0, 0, 1, 1], [], []>} : vector<98x128xbf16>, vector<128x12xbf16>, vector<98x12xf32> -> vector<98x12xf32>
    %c1 = arith.constant 1 : index
    %c0_14 = arith.constant 0 : index
    %c0_15 = arith.constant 0 : index
    %19 = vector.load %arg5[%c1, %c0_14, %c0_15] : memref<4x98x128xbf16, #tpu.memory_space<vmem>>, vector<1x98x128xbf16>
    %20 = vector.shape_cast %19 : vector<1x98x128xbf16> to vector<98x128xbf16>
    %c56 = arith.constant 56 : index
    %c0_16 = arith.constant 0 : index
    %21 = vector.load %arg2[%c56, %c0_16] : memref<704x128xbf16, #tpu.memory_space<vmem>>, vector<48x12xbf16>
    %22 = arith.truncf %11 : vector<128x48xf32> to vector<128x48xbf16>
    %cst_17 = arith.constant dense<0.000000e+00> : vector<128x12xf32>
    %23 = tpu.matmul %22, %21, %cst_17 {dimension_numbers = #tpu.dot_dimension_numbers<[1], [0], [0], [1], [0, 0, 1, 1], [], []>} : vector<128x48xbf16>, vector<48x12xbf16>, vector<128x12xf32> -> vector<128x12xf32>
    %24 = arith.truncf %23 : vector<128x12xf32> to vector<128x12xbf16>
    %cst_18 = arith.constant dense<0.000000e+00> : vector<98x12xf32>
    %25 = tpu.matmul %20, %24, %cst_18 {dimension_numbers = #tpu.dot_dimension_numbers<[1], [0], [0], [1], [0, 0, 1, 1], [], []>} : vector<98x128xbf16>, vector<128x12xbf16>, vector<98x12xf32> -> vector<98x12xf32>
    %26 = arith.addf %18, %25 : vector<98x12xf32>
    %c2 = arith.constant 2 : index
    %c0_19 = arith.constant 0 : index
    %c0_20 = arith.constant 0 : index
    %27 = vector.load %arg5[%c2, %c0_19, %c0_20] : memref<4x98x128xbf16, #tpu.memory_space<vmem>>, vector<1x98x128xbf16>
    %28 = vector.shape_cast %27 : vector<1x98x128xbf16> to vector<98x128xbf16>
    %c104 = arith.constant 104 : index
    %c0_21 = arith.constant 0 : index
    %29 = vector.load %arg2[%c104, %c0_21] : memref<704x128xbf16, #tpu.memory_space<vmem>>, vector<48x12xbf16>
    %30 = arith.truncf %11 : vector<128x48xf32> to vector<128x48xbf16>
    %cst_22 = arith.constant dense<0.000000e+00> : vector<128x12xf32>
    %31 = tpu.matmul %30, %29, %cst_22 {dimension_numbers = #tpu.dot_dimension_numbers<[1], [0], [0], [1], [0, 0, 1, 1], [], []>} : vector<128x48xbf16>, vector<48x12xbf16>, vector<128x12xf32> -> vector<128x12xf32>
    %32 = arith.truncf %31 : vector<128x12xf32> to vector<128x12xbf16>
    %cst_23 = arith.constant dense<0.000000e+00> : vector<98x12xf32>
    %33 = tpu.matmul %28, %32, %cst_23 {dimension_numbers = #tpu.dot_dimension_numbers<[1], [0], [0], [1], [0, 0, 1, 1], [], []>} : vector<98x128xbf16>, vector<128x12xbf16>, vector<98x12xf32> -> vector<98x12xf32>
    %34 = arith.addf %26, %33 : vector<98x12xf32>
    %c3 = arith.constant 3 : index
    %c0_24 = arith.constant 0 : index
    %c0_25 = arith.constant 0 : index
    %35 = vector.load %arg5[%c3, %c0_24, %c0_25] : memref<4x98x128xbf16, #tpu.memory_space<vmem>>, vector<1x98x128xbf16>
    %36 = vector.shape_cast %35 : vector<1x98x128xbf16> to vector<98x128xbf16>
    %c152 = arith.constant 152 : index
    %c0_26 = arith.constant 0 : index
    %37 = vector.load %arg2[%c152, %c0_26] : memref<704x128xbf16, #tpu.memory_space<vmem>>, vector<48x12xbf16>
    %38 = arith.truncf %11 : vector<128x48xf32> to vector<128x48xbf16>
    %cst_27 = arith.constant dense<0.000000e+00> : vector<128x12xf32>
    %39 = tpu.matmul %38, %37, %cst_27 {dimension_numbers = #tpu.dot_dimension_numbers<[1], [0], [0], [1], [0, 0, 1, 1], [], []>} : vector<128x48xbf16>, vector<48x12xbf16>, vector<128x12xf32> -> vector<128x12xf32>
    %40 = arith.truncf %39 : vector<128x12xf32> to vector<128x12xbf16>
    %cst_28 = arith.constant dense<0.000000e+00> : vector<98x12xf32>
    %41 = tpu.matmul %36, %40, %cst_28 {dimension_numbers = #tpu.dot_dimension_numbers<[1], [0], [0], [1], [0, 0, 1, 1], [], []>} : vector<98x128xbf16>, vector<128x12xbf16>, vector<98x12xf32> -> vector<98x12xf32>
    %42 = arith.addf %34, %41 : vector<98x12xf32>
    %c1_29 = arith.constant 1 : index
    %c0_30 = arith.constant 0 : index
    %43 = vector.load %arg3[%c1_29, %c0_30] : memref<104x128xf32, #tpu.memory_space<vmem>>, vector<1x12xf32>
    %44 = vector.broadcast %43 : vector<1x12xf32> to vector<98x12xf32>
    %45 = arith.addf %42, %44 : vector<98x12xf32>
    %cst_31 = arith.constant 0.000000e+00 : f32
    %46 = vector.broadcast %cst_31 : f32 to vector<98x12xf32>
    %47 = arith.maximumf %45, %46 : vector<98x12xf32>
    %c0_32 = arith.constant 0 : index
    %c0_33 = arith.constant 0 : index
    %c0_34 = arith.constant 0 : index
    %48 = vector.load %arg6[%c0_32, %c0_33, %c0_34] : memref<4x72x98xbf16, #tpu.memory_space<vmem>>, vector<1x72x98xbf16>
    %49 = vector.shape_cast %48 : vector<1x72x98xbf16> to vector<72x98xbf16>
    %c200 = arith.constant 200 : index
    %c0_35 = arith.constant 0 : index
    %50 = vector.load %arg2[%c200, %c0_35] : memref<704x128xbf16, #tpu.memory_space<vmem>>, vector<12x24xbf16>
    %51 = arith.truncf %47 : vector<98x12xf32> to vector<98x12xbf16>
    %cst_36 = arith.constant dense<0.000000e+00> : vector<98x24xf32>
    %52 = tpu.matmul %51, %50, %cst_36 {dimension_numbers = #tpu.dot_dimension_numbers<[1], [0], [0], [1], [0, 0, 1, 1], [], []>} : vector<98x12xbf16>, vector<12x24xbf16>, vector<98x24xf32> -> vector<98x24xf32>
    %53 = arith.truncf %52 : vector<98x24xf32> to vector<98x24xbf16>
    %cst_37 = arith.constant dense<0.000000e+00> : vector<72x24xf32>
    %54 = tpu.matmul %49, %53, %cst_37 {dimension_numbers = #tpu.dot_dimension_numbers<[1], [0], [0], [1], [0, 0, 1, 1], [], []>} : vector<72x98xbf16>, vector<98x24xbf16>, vector<72x24xf32> -> vector<72x24xf32>
    %c1_38 = arith.constant 1 : index
    %c0_39 = arith.constant 0 : index
    %c0_40 = arith.constant 0 : index
    %55 = vector.load %arg6[%c1_38, %c0_39, %c0_40] : memref<4x72x98xbf16, #tpu.memory_space<vmem>>, vector<1x72x98xbf16>
    %56 = vector.shape_cast %55 : vector<1x72x98xbf16> to vector<72x98xbf16>
    %c216 = arith.constant 216 : index
    %c0_41 = arith.constant 0 : index
    %57 = vector.load %arg2[%c216, %c0_41] : memref<704x128xbf16, #tpu.memory_space<vmem>>, vector<12x24xbf16>
    %58 = arith.truncf %47 : vector<98x12xf32> to vector<98x12xbf16>
    %cst_42 = arith.constant dense<0.000000e+00> : vector<98x24xf32>
    %59 = tpu.matmul %58, %57, %cst_42 {dimension_numbers = #tpu.dot_dimension_numbers<[1], [0], [0], [1], [0, 0, 1, 1], [], []>} : vector<98x12xbf16>, vector<12x24xbf16>, vector<98x24xf32> -> vector<98x24xf32>
    %60 = arith.truncf %59 : vector<98x24xf32> to vector<98x24xbf16>
    %cst_43 = arith.constant dense<0.000000e+00> : vector<72x24xf32>
    %61 = tpu.matmul %56, %60, %cst_43 {dimension_numbers = #tpu.dot_dimension_numbers<[1], [0], [0], [1], [0, 0, 1, 1], [], []>} : vector<72x98xbf16>, vector<98x24xbf16>, vector<72x24xf32> -> vector<72x24xf32>
    %62 = arith.addf %54, %61 : vector<72x24xf32>
    %c2_44 = arith.constant 2 : index
    %c0_45 = arith.constant 0 : index
    %c0_46 = arith.constant 0 : index
    %63 = vector.load %arg6[%c2_44, %c0_45, %c0_46] : memref<4x72x98xbf16, #tpu.memory_space<vmem>>, vector<1x72x98xbf16>
    %64 = vector.shape_cast %63 : vector<1x72x98xbf16> to vector<72x98xbf16>
    %c232 = arith.constant 232 : index
    %c0_47 = arith.constant 0 : index
    %65 = vector.load %arg2[%c232, %c0_47] : memref<704x128xbf16, #tpu.memory_space<vmem>>, vector<12x24xbf16>
    %66 = arith.truncf %47 : vector<98x12xf32> to vector<98x12xbf16>
    %cst_48 = arith.constant dense<0.000000e+00> : vector<98x24xf32>
    %67 = tpu.matmul %66, %65, %cst_48 {dimension_numbers = #tpu.dot_dimension_numbers<[1], [0], [0], [1], [0, 0, 1, 1], [], []>} : vector<98x12xbf16>, vector<12x24xbf16>, vector<98x24xf32> -> vector<98x24xf32>
    %68 = arith.truncf %67 : vector<98x24xf32> to vector<98x24xbf16>
    %cst_49 = arith.constant dense<0.000000e+00> : vector<72x24xf32>
    %69 = tpu.matmul %64, %68, %cst_49 {dimension_numbers = #tpu.dot_dimension_numbers<[1], [0], [0], [1], [0, 0, 1, 1], [], []>} : vector<72x98xbf16>, vector<98x24xbf16>, vector<72x24xf32> -> vector<72x24xf32>
    %70 = arith.addf %62, %69 : vector<72x24xf32>
    %c3_50 = arith.constant 3 : index
    %c0_51 = arith.constant 0 : index
    %c0_52 = arith.constant 0 : index
    %71 = vector.load %arg6[%c3_50, %c0_51, %c0_52] : memref<4x72x98xbf16, #tpu.memory_space<vmem>>, vector<1x72x98xbf16>
    %72 = vector.shape_cast %71 : vector<1x72x98xbf16> to vector<72x98xbf16>
    %c248 = arith.constant 248 : index
    %c0_53 = arith.constant 0 : index
    %73 = vector.load %arg2[%c248, %c0_53] : memref<704x128xbf16, #tpu.memory_space<vmem>>, vector<12x24xbf16>
    %74 = arith.truncf %47 : vector<98x12xf32> to vector<98x12xbf16>
    %cst_54 = arith.constant dense<0.000000e+00> : vector<98x24xf32>
    %75 = tpu.matmul %74, %73, %cst_54 {dimension_numbers = #tpu.dot_dimension_numbers<[1], [0], [0], [1], [0, 0, 1, 1], [], []>} : vector<98x12xbf16>, vector<12x24xbf16>, vector<98x24xf32> -> vector<98x24xf32>
    %76 = arith.truncf %75 : vector<98x24xf32> to vector<98x24xbf16>
    %cst_55 = arith.constant dense<0.000000e+00> : vector<72x24xf32>
    %77 = tpu.matmul %72, %76, %cst_55 {dimension_numbers = #tpu.dot_dimension_numbers<[1], [0], [0], [1], [0, 0, 1, 1], [], []>} : vector<72x98xbf16>, vector<98x24xbf16>, vector<72x24xf32> -> vector<72x24xf32>
    %78 = arith.addf %70, %77 : vector<72x24xf32>
    %c2_56 = arith.constant 2 : index
    %c0_57 = arith.constant 0 : index
    %79 = vector.load %arg3[%c2_56, %c0_57] : memref<104x128xf32, #tpu.memory_space<vmem>>, vector<1x24xf32>
    %80 = vector.broadcast %79 : vector<1x24xf32> to vector<72x24xf32>
    %81 = arith.addf %78, %80 : vector<72x24xf32>
    %cst_58 = arith.constant 0.000000e+00 : f32
    %82 = vector.broadcast %cst_58 : f32 to vector<72x24xf32>
    %83 = arith.maximumf %81, %82 : vector<72x24xf32>
    %c264 = arith.constant 264 : index
    %c0_59 = arith.constant 0 : index
    %84 = vector.load %arg2[%c264, %c0_59] : memref<704x128xbf16, #tpu.memory_space<vmem>>, vector<24x32xbf16>
    %85 = arith.truncf %83 : vector<72x24xf32> to vector<72x24xbf16>
    %cst_60 = arith.constant dense<0.000000e+00> : vector<72x32xf32>
    %86 = tpu.matmul %85, %84, %cst_60 {dimension_numbers = #tpu.dot_dimension_numbers<[1], [0], [0], [1], [0, 0, 1, 1], [], []>} : vector<72x24xbf16>, vector<24x32xbf16>, vector<72x32xf32> -> vector<72x32xf32>
    %c32 = arith.constant 32 : index
    %c0_61 = arith.constant 0 : index
    %87 = vector.load %arg3[%c32, %c0_61] : memref<104x128xf32, #tpu.memory_space<vmem>>, vector<72x32xf32>
    %88 = arith.addf %86, %87 : vector<72x32xf32>
    %c0_62 = arith.constant 0 : index
    %c0_63 = arith.constant 0 : index
    %89 = vector.load %arg4[%c0_62, %c0_63] : memref<72x72xf32, #tpu.memory_space<vmem>>, vector<72x72xf32>
    %c3_64 = arith.constant 3 : index
    %c0_65 = arith.constant 0 : index
    %90 = vector.load %arg3[%c3_64, %c0_65] : memref<104x128xf32, #tpu.memory_space<vmem>>, vector<1x32xf32>
    %c4 = arith.constant 4 : index
    %c0_66 = arith.constant 0 : index
    %91 = vector.load %arg3[%c4, %c0_66] : memref<104x128xf32, #tpu.memory_space<vmem>>, vector<1x32xf32>
    %cst_67 = arith.constant dense<0.000000e+00> : vector<72xf32>
    %92 = vector.multi_reduction <add>, %88, %cst_67 [1] : vector<72x32xf32> to vector<72xf32>
    %93 = vector.shape_cast %92 : vector<72xf32> to vector<72x1xf32>
    %cst_68 = arith.constant 3.200000e+01 : f32
    %94 = vector.broadcast %cst_68 : f32 to vector<72x1xf32>
    %95 = arith.divf %93, %94 : vector<72x1xf32>
    %96 = vector.broadcast %95 : vector<72x1xf32> to vector<72x32xf32>
    %97 = arith.subf %88, %96 : vector<72x32xf32>
    %98 = arith.mulf %97, %97 : vector<72x32xf32>
    %cst_69 = arith.constant dense<0.000000e+00> : vector<72xf32>
    %99 = vector.multi_reduction <add>, %98, %cst_69 [1] : vector<72x32xf32> to vector<72xf32>
    %100 = vector.shape_cast %99 : vector<72xf32> to vector<72x1xf32>
    %cst_70 = arith.constant 3.200000e+01 : f32
    %101 = vector.broadcast %cst_70 : f32 to vector<72x1xf32>
    %102 = arith.divf %100, %101 : vector<72x1xf32>
    %103 = vector.broadcast %95 : vector<72x1xf32> to vector<72x32xf32>
    %104 = arith.subf %88, %103 : vector<72x32xf32>
    %cst_71 = arith.constant 9.99999974E-6 : f32
    %105 = vector.broadcast %cst_71 : f32 to vector<72x1xf32>
    %106 = arith.addf %102, %105 : vector<72x1xf32>
    %107 = math.rsqrt %106 : vector<72x1xf32>
    %108 = vector.broadcast %107 : vector<72x1xf32> to vector<72x32xf32>
    %109 = arith.mulf %104, %108 : vector<72x32xf32>
    %110 = vector.broadcast %90 : vector<1x32xf32> to vector<72x32xf32>
    %111 = arith.mulf %109, %110 : vector<72x32xf32>
    %112 = vector.broadcast %91 : vector<1x32xf32> to vector<72x32xf32>
    %113 = arith.addf %111, %112 : vector<72x32xf32>
    %c288 = arith.constant 288 : index
    %c0_72 = arith.constant 0 : index
    %114 = vector.load %arg2[%c288, %c0_72] : memref<704x128xbf16, #tpu.memory_space<vmem>>, vector<32x96xbf16>
    %115 = arith.truncf %113 : vector<72x32xf32> to vector<72x32xbf16>
    %cst_73 = arith.constant dense<0.000000e+00> : vector<72x96xf32>
    %116 = tpu.matmul %115, %114, %cst_73 {dimension_numbers = #tpu.dot_dimension_numbers<[1], [0], [0], [1], [0, 0, 1, 1], [], []>} : vector<72x32xbf16>, vector<32x96xbf16>, vector<72x96xf32> -> vector<72x96xf32>
    %c5 = arith.constant 5 : index
    %c0_74 = arith.constant 0 : index
    %117 = vector.load %arg3[%c5, %c0_74] : memref<104x128xf32, #tpu.memory_space<vmem>>, vector<1x96xf32>
    %118 = vector.broadcast %117 : vector<1x96xf32> to vector<72x96xf32>
    %119 = arith.addf %116, %118 : vector<72x96xf32>
    %c320 = arith.constant 320 : index
    %c0_75 = arith.constant 0 : index
    %120 = vector.load %arg2[%c320, %c0_75] : memref<704x128xbf16, #tpu.memory_space<vmem>>, vector<32x32xbf16>
    %cst_76 = arith.constant 0.000000e+00 : f32
    %121 = vector.broadcast %cst_76 : f32 to vector<72x32xf32>
    %122 = vector.extract_strided_slice %119 {offsets = [0, 0], sizes = [72, 8], strides = [1, 1]} : vector<72x96xf32> to vector<72x8xf32>
    %123 = vector.extract_strided_slice %119 {offsets = [0, 32], sizes = [72, 8], strides = [1, 1]} : vector<72x96xf32> to vector<72x8xf32>
    %124 = vector.extract_strided_slice %119 {offsets = [0, 64], sizes = [72, 8], strides = [1, 1]} : vector<72x96xf32> to vector<72x8xf32>
    %125 = arith.truncf %122 : vector<72x8xf32> to vector<72x8xbf16>
    %126 = arith.truncf %123 : vector<72x8xf32> to vector<72x8xbf16>
    %cst_77 = arith.constant dense<0.000000e+00> : vector<72x72xf32>
    %127 = tpu.matmul %125, %126, %cst_77 {dimension_numbers = #tpu.dot_dimension_numbers<[1], [1], [0], [0], [0, 0, 1, 0], [], []>} : vector<72x8xbf16>, vector<72x8xbf16>, vector<72x72xf32> -> vector<72x72xf32>
    %cst_78 = arith.constant 0.353553385 : f32
    %128 = vector.broadcast %cst_78 : f32 to vector<72x72xf32>
    %129 = arith.mulf %127, %128 : vector<72x72xf32>
    %cst_79 = arith.constant dense<0xFF800000> : vector<72xf32>
    %130 = vector.multi_reduction <maximumf>, %129, %cst_79 [1] : vector<72x72xf32> to vector<72xf32>
    %131 = vector.shape_cast %130 : vector<72xf32> to vector<72x1xf32>
    %132 = vector.broadcast %131 : vector<72x1xf32> to vector<72x72xf32>
    %133 = arith.subf %129, %132 : vector<72x72xf32>
    %134 = math.exp %133 : vector<72x72xf32>
    %135 = arith.mulf %134, %89 : vector<72x72xf32>
    %cst_80 = arith.constant dense<0.000000e+00> : vector<72xf32>
    %136 = vector.multi_reduction <add>, %135, %cst_80 [1] : vector<72x72xf32> to vector<72xf32>
    %137 = vector.shape_cast %136 : vector<72xf32> to vector<72x1xf32>
    %138 = tpu.reciprocal %137 {approx = true} : vector<72x1xf32> -> vector<72x1xf32>
    %139 = vector.broadcast %138 : vector<72x1xf32> to vector<72x72xf32>
    %140 = arith.mulf %135, %139 : vector<72x72xf32>
    %141 = arith.truncf %140 : vector<72x72xf32> to vector<72x72xbf16>
    %142 = arith.truncf %124 : vector<72x8xf32> to vector<72x8xbf16>
    %cst_81 = arith.constant dense<0.000000e+00> : vector<72x8xf32>
    %143 = tpu.matmul %141, %142, %cst_81 {dimension_numbers = #tpu.dot_dimension_numbers<[1], [0], [0], [1], [0, 0, 1, 1], [], []>} : vector<72x72xbf16>, vector<72x8xbf16>, vector<72x8xf32> -> vector<72x8xf32>
    %144 = vector.extract_strided_slice %120 {offsets = [0, 0], sizes = [8, 32], strides = [1, 1]} : vector<32x32xbf16> to vector<8x32xbf16>
    %145 = arith.truncf %143 : vector<72x8xf32> to vector<72x8xbf16>
    %cst_82 = arith.constant dense<0.000000e+00> : vector<72x32xf32>
    %146 = tpu.matmul %145, %144, %cst_82 {dimension_numbers = #tpu.dot_dimension_numbers<[1], [0], [0], [1], [0, 0, 1, 1], [], []>} : vector<72x8xbf16>, vector<8x32xbf16>, vector<72x32xf32> -> vector<72x32xf32>
    %147 = arith.addf %121, %146 : vector<72x32xf32>
    %148 = vector.extract_strided_slice %119 {offsets = [0, 8], sizes = [72, 8], strides = [1, 1]} : vector<72x96xf32> to vector<72x8xf32>
    %149 = vector.extract_strided_slice %119 {offsets = [0, 40], sizes = [72, 8], strides = [1, 1]} : vector<72x96xf32> to vector<72x8xf32>
    %150 = vector.extract_strided_slice %119 {offsets = [0, 72], sizes = [72, 8], strides = [1, 1]} : vector<72x96xf32> to vector<72x8xf32>
    %151 = arith.truncf %148 : vector<72x8xf32> to vector<72x8xbf16>
    %152 = arith.truncf %149 : vector<72x8xf32> to vector<72x8xbf16>
    %cst_83 = arith.constant dense<0.000000e+00> : vector<72x72xf32>
    %153 = tpu.matmul %151, %152, %cst_83 {dimension_numbers = #tpu.dot_dimension_numbers<[1], [1], [0], [0], [0, 0, 1, 0], [], []>} : vector<72x8xbf16>, vector<72x8xbf16>, vector<72x72xf32> -> vector<72x72xf32>
    %cst_84 = arith.constant 0.353553385 : f32
    %154 = vector.broadcast %cst_84 : f32 to vector<72x72xf32>
    %155 = arith.mulf %153, %154 : vector<72x72xf32>
    %cst_85 = arith.constant dense<0xFF800000> : vector<72xf32>
    %156 = vector.multi_reduction <maximumf>, %155, %cst_85 [1] : vector<72x72xf32> to vector<72xf32>
    %157 = vector.shape_cast %156 : vector<72xf32> to vector<72x1xf32>
    %158 = vector.broadcast %157 : vector<72x1xf32> to vector<72x72xf32>
    %159 = arith.subf %155, %158 : vector<72x72xf32>
    %160 = math.exp %159 : vector<72x72xf32>
    %161 = arith.mulf %160, %89 : vector<72x72xf32>
    %cst_86 = arith.constant dense<0.000000e+00> : vector<72xf32>
    %162 = vector.multi_reduction <add>, %161, %cst_86 [1] : vector<72x72xf32> to vector<72xf32>
    %163 = vector.shape_cast %162 : vector<72xf32> to vector<72x1xf32>
    %164 = tpu.reciprocal %163 {approx = true} : vector<72x1xf32> -> vector<72x1xf32>
    %165 = vector.broadcast %164 : vector<72x1xf32> to vector<72x72xf32>
    %166 = arith.mulf %161, %165 : vector<72x72xf32>
    %167 = arith.truncf %166 : vector<72x72xf32> to vector<72x72xbf16>
    %168 = arith.truncf %150 : vector<72x8xf32> to vector<72x8xbf16>
    %cst_87 = arith.constant dense<0.000000e+00> : vector<72x8xf32>
    %169 = tpu.matmul %167, %168, %cst_87 {dimension_numbers = #tpu.dot_dimension_numbers<[1], [0], [0], [1], [0, 0, 1, 1], [], []>} : vector<72x72xbf16>, vector<72x8xbf16>, vector<72x8xf32> -> vector<72x8xf32>
    %170 = vector.extract_strided_slice %120 {offsets = [8, 0], sizes = [8, 32], strides = [1, 1]} : vector<32x32xbf16> to vector<8x32xbf16>
    %171 = arith.truncf %169 : vector<72x8xf32> to vector<72x8xbf16>
    %cst_88 = arith.constant dense<0.000000e+00> : vector<72x32xf32>
    %172 = tpu.matmul %171, %170, %cst_88 {dimension_numbers = #tpu.dot_dimension_numbers<[1], [0], [0], [1], [0, 0, 1, 1], [], []>} : vector<72x8xbf16>, vector<8x32xbf16>, vector<72x32xf32> -> vector<72x32xf32>
    %173 = arith.addf %147, %172 : vector<72x32xf32>
    %174 = vector.extract_strided_slice %119 {offsets = [0, 16], sizes = [72, 8], strides = [1, 1]} : vector<72x96xf32> to vector<72x8xf32>
    %175 = vector.extract_strided_slice %119 {offsets = [0, 48], sizes = [72, 8], strides = [1, 1]} : vector<72x96xf32> to vector<72x8xf32>
    %176 = vector.extract_strided_slice %119 {offsets = [0, 80], sizes = [72, 8], strides = [1, 1]} : vector<72x96xf32> to vector<72x8xf32>
    %177 = arith.truncf %174 : vector<72x8xf32> to vector<72x8xbf16>
    %178 = arith.truncf %175 : vector<72x8xf32> to vector<72x8xbf16>
    %cst_89 = arith.constant dense<0.000000e+00> : vector<72x72xf32>
    %179 = tpu.matmul %177, %178, %cst_89 {dimension_numbers = #tpu.dot_dimension_numbers<[1], [1], [0], [0], [0, 0, 1, 0], [], []>} : vector<72x8xbf16>, vector<72x8xbf16>, vector<72x72xf32> -> vector<72x72xf32>
    %cst_90 = arith.constant 0.353553385 : f32
    %180 = vector.broadcast %cst_90 : f32 to vector<72x72xf32>
    %181 = arith.mulf %179, %180 : vector<72x72xf32>
    %cst_91 = arith.constant dense<0xFF800000> : vector<72xf32>
    %182 = vector.multi_reduction <maximumf>, %181, %cst_91 [1] : vector<72x72xf32> to vector<72xf32>
    %183 = vector.shape_cast %182 : vector<72xf32> to vector<72x1xf32>
    %184 = vector.broadcast %183 : vector<72x1xf32> to vector<72x72xf32>
    %185 = arith.subf %181, %184 : vector<72x72xf32>
    %186 = math.exp %185 : vector<72x72xf32>
    %187 = arith.mulf %186, %89 : vector<72x72xf32>
    %cst_92 = arith.constant dense<0.000000e+00> : vector<72xf32>
    %188 = vector.multi_reduction <add>, %187, %cst_92 [1] : vector<72x72xf32> to vector<72xf32>
    %189 = vector.shape_cast %188 : vector<72xf32> to vector<72x1xf32>
    %190 = tpu.reciprocal %189 {approx = true} : vector<72x1xf32> -> vector<72x1xf32>
    %191 = vector.broadcast %190 : vector<72x1xf32> to vector<72x72xf32>
    %192 = arith.mulf %187, %191 : vector<72x72xf32>
    %193 = arith.truncf %192 : vector<72x72xf32> to vector<72x72xbf16>
    %194 = arith.truncf %176 : vector<72x8xf32> to vector<72x8xbf16>
    %cst_93 = arith.constant dense<0.000000e+00> : vector<72x8xf32>
    %195 = tpu.matmul %193, %194, %cst_93 {dimension_numbers = #tpu.dot_dimension_numbers<[1], [0], [0], [1], [0, 0, 1, 1], [], []>} : vector<72x72xbf16>, vector<72x8xbf16>, vector<72x8xf32> -> vector<72x8xf32>
    %196 = vector.extract_strided_slice %120 {offsets = [16, 0], sizes = [8, 32], strides = [1, 1]} : vector<32x32xbf16> to vector<8x32xbf16>
    %197 = arith.truncf %195 : vector<72x8xf32> to vector<72x8xbf16>
    %cst_94 = arith.constant dense<0.000000e+00> : vector<72x32xf32>
    %198 = tpu.matmul %197, %196, %cst_94 {dimension_numbers = #tpu.dot_dimension_numbers<[1], [0], [0], [1], [0, 0, 1, 1], [], []>} : vector<72x8xbf16>, vector<8x32xbf16>, vector<72x32xf32> -> vector<72x32xf32>
    %199 = arith.addf %173, %198 : vector<72x32xf32>
    %200 = vector.extract_strided_slice %119 {offsets = [0, 24], sizes = [72, 8], strides = [1, 1]} : vector<72x96xf32> to vector<72x8xf32>
    %201 = vector.extract_strided_slice %119 {offsets = [0, 56], sizes = [72, 8], strides = [1, 1]} : vector<72x96xf32> to vector<72x8xf32>
    %202 = vector.extract_strided_slice %119 {offsets = [0, 88], sizes = [72, 8], strides = [1, 1]} : vector<72x96xf32> to vector<72x8xf32>
    %203 = arith.truncf %200 : vector<72x8xf32> to vector<72x8xbf16>
    %204 = arith.truncf %201 : vector<72x8xf32> to vector<72x8xbf16>
    %cst_95 = arith.constant dense<0.000000e+00> : vector<72x72xf32>
    %205 = tpu.matmul %203, %204, %cst_95 {dimension_numbers = #tpu.dot_dimension_numbers<[1], [1], [0], [0], [0, 0, 1, 0], [], []>} : vector<72x8xbf16>, vector<72x8xbf16>, vector<72x72xf32> -> vector<72x72xf32>
    %cst_96 = arith.constant 0.353553385 : f32
    %206 = vector.broadcast %cst_96 : f32 to vector<72x72xf32>
    %207 = arith.mulf %205, %206 : vector<72x72xf32>
    %cst_97 = arith.constant dense<0xFF800000> : vector<72xf32>
    %208 = vector.multi_reduction <maximumf>, %207, %cst_97 [1] : vector<72x72xf32> to vector<72xf32>
    %209 = vector.shape_cast %208 : vector<72xf32> to vector<72x1xf32>
    %210 = vector.broadcast %209 : vector<72x1xf32> to vector<72x72xf32>
    %211 = arith.subf %207, %210 : vector<72x72xf32>
    %212 = math.exp %211 : vector<72x72xf32>
    %213 = arith.mulf %212, %89 : vector<72x72xf32>
    %cst_98 = arith.constant dense<0.000000e+00> : vector<72xf32>
    %214 = vector.multi_reduction <add>, %213, %cst_98 [1] : vector<72x72xf32> to vector<72xf32>
    %215 = vector.shape_cast %214 : vector<72xf32> to vector<72x1xf32>
    %216 = tpu.reciprocal %215 {approx = true} : vector<72x1xf32> -> vector<72x1xf32>
    %217 = vector.broadcast %216 : vector<72x1xf32> to vector<72x72xf32>
    %218 = arith.mulf %213, %217 : vector<72x72xf32>
    %219 = arith.truncf %218 : vector<72x72xf32> to vector<72x72xbf16>
    %220 = arith.truncf %202 : vector<72x8xf32> to vector<72x8xbf16>
    %cst_99 = arith.constant dense<0.000000e+00> : vector<72x8xf32>
    %221 = tpu.matmul %219, %220, %cst_99 {dimension_numbers = #tpu.dot_dimension_numbers<[1], [0], [0], [1], [0, 0, 1, 1], [], []>} : vector<72x72xbf16>, vector<72x8xbf16>, vector<72x8xf32> -> vector<72x8xf32>
    %222 = vector.extract_strided_slice %120 {offsets = [24, 0], sizes = [8, 32], strides = [1, 1]} : vector<32x32xbf16> to vector<8x32xbf16>
    %223 = arith.truncf %221 : vector<72x8xf32> to vector<72x8xbf16>
    %cst_100 = arith.constant dense<0.000000e+00> : vector<72x32xf32>
    %224 = tpu.matmul %223, %222, %cst_100 {dimension_numbers = #tpu.dot_dimension_numbers<[1], [0], [0], [1], [0, 0, 1, 1], [], []>} : vector<72x8xbf16>, vector<8x32xbf16>, vector<72x32xf32> -> vector<72x32xf32>
    %225 = arith.addf %199, %224 : vector<72x32xf32>
    %c7 = arith.constant 7 : index
    %c0_101 = arith.constant 0 : index
    %226 = vector.load %arg3[%c7, %c0_101] : memref<104x128xf32, #tpu.memory_space<vmem>>, vector<1x32xf32>
    %cst_102 = arith.constant 5.000000e-01 : f32
    %227 = vector.broadcast %cst_102 : f32 to vector<1x32xf32>
    %228 = arith.mulf %227, %226 : vector<1x32xf32>
    %229 = math.tanh %228 : vector<1x32xf32>
    %cst_103 = arith.constant 1.000000e+00 : f32
    %230 = vector.broadcast %cst_103 : f32 to vector<1x32xf32>
    %231 = arith.addf %229, %230 : vector<1x32xf32>
    %cst_104 = arith.constant 5.000000e-01 : f32
    %232 = vector.broadcast %cst_104 : f32 to vector<1x32xf32>
    %233 = arith.mulf %232, %231 : vector<1x32xf32>
    %c6 = arith.constant 6 : index
    %c0_105 = arith.constant 0 : index
    %234 = vector.load %arg3[%c6, %c0_105] : memref<104x128xf32, #tpu.memory_space<vmem>>, vector<1x32xf32>
    %235 = vector.broadcast %234 : vector<1x32xf32> to vector<72x32xf32>
    %236 = arith.addf %225, %235 : vector<72x32xf32>
    %237 = vector.broadcast %233 : vector<1x32xf32> to vector<72x32xf32>
    %238 = arith.mulf %237, %236 : vector<72x32xf32>
    %239 = arith.addf %88, %238 : vector<72x32xf32>
    %c8_106 = arith.constant 8 : index
    %c0_107 = arith.constant 0 : index
    %240 = vector.load %arg3[%c8_106, %c0_107] : memref<104x128xf32, #tpu.memory_space<vmem>>, vector<1x32xf32>
    %c9 = arith.constant 9 : index
    %c0_108 = arith.constant 0 : index
    %241 = vector.load %arg3[%c9, %c0_108] : memref<104x128xf32, #tpu.memory_space<vmem>>, vector<1x32xf32>
    %cst_109 = arith.constant dense<0.000000e+00> : vector<72xf32>
    %242 = vector.multi_reduction <add>, %239, %cst_109 [1] : vector<72x32xf32> to vector<72xf32>
    %243 = vector.shape_cast %242 : vector<72xf32> to vector<72x1xf32>
    %cst_110 = arith.constant 3.200000e+01 : f32
    %244 = vector.broadcast %cst_110 : f32 to vector<72x1xf32>
    %245 = arith.divf %243, %244 : vector<72x1xf32>
    %246 = vector.broadcast %245 : vector<72x1xf32> to vector<72x32xf32>
    %247 = arith.subf %239, %246 : vector<72x32xf32>
    %248 = arith.mulf %247, %247 : vector<72x32xf32>
    %cst_111 = arith.constant dense<0.000000e+00> : vector<72xf32>
    %249 = vector.multi_reduction <add>, %248, %cst_111 [1] : vector<72x32xf32> to vector<72xf32>
    %250 = vector.shape_cast %249 : vector<72xf32> to vector<72x1xf32>
    %cst_112 = arith.constant 3.200000e+01 : f32
    %251 = vector.broadcast %cst_112 : f32 to vector<72x1xf32>
    %252 = arith.divf %250, %251 : vector<72x1xf32>
    %253 = vector.broadcast %245 : vector<72x1xf32> to vector<72x32xf32>
    %254 = arith.subf %239, %253 : vector<72x32xf32>
    %cst_113 = arith.constant 9.99999974E-6 : f32
    %255 = vector.broadcast %cst_113 : f32 to vector<72x1xf32>
    %256 = arith.addf %252, %255 : vector<72x1xf32>
    %257 = math.rsqrt %256 : vector<72x1xf32>
    %258 = vector.broadcast %257 : vector<72x1xf32> to vector<72x32xf32>
    %259 = arith.mulf %254, %258 : vector<72x32xf32>
    %260 = vector.broadcast %240 : vector<1x32xf32> to vector<72x32xf32>
    %261 = arith.mulf %259, %260 : vector<72x32xf32>
    %262 = vector.broadcast %241 : vector<1x32xf32> to vector<72x32xf32>
    %263 = arith.addf %261, %262 : vector<72x32xf32>
    %c352 = arith.constant 352 : index
    %c0_114 = arith.constant 0 : index
    %264 = vector.load %arg2[%c352, %c0_114] : memref<704x128xbf16, #tpu.memory_space<vmem>>, vector<32x32xbf16>
    %265 = arith.truncf %263 : vector<72x32xf32> to vector<72x32xbf16>
    %cst_115 = arith.constant dense<0.000000e+00> : vector<72x32xf32>
    %266 = tpu.matmul %265, %264, %cst_115 {dimension_numbers = #tpu.dot_dimension_numbers<[1], [0], [0], [1], [0, 0, 1, 1], [], []>} : vector<72x32xbf16>, vector<32x32xbf16>, vector<72x32xf32> -> vector<72x32xf32>
    %c10 = arith.constant 10 : index
    %c0_116 = arith.constant 0 : index
    %267 = vector.load %arg3[%c10, %c0_116] : memref<104x128xf32, #tpu.memory_space<vmem>>, vector<1x32xf32>
    %268 = vector.broadcast %267 : vector<1x32xf32> to vector<72x32xf32>
    %269 = arith.addf %266, %268 : vector<72x32xf32>
    %cst_117 = arith.constant 0.000000e+00 : f32
    %270 = vector.broadcast %cst_117 : f32 to vector<72x32xf32>
    %271 = arith.maximumf %269, %270 : vector<72x32xf32>
    %c12 = arith.constant 12 : index
    %c0_118 = arith.constant 0 : index
    %272 = vector.load %arg3[%c12, %c0_118] : memref<104x128xf32, #tpu.memory_space<vmem>>, vector<1x32xf32>
    %cst_119 = arith.constant 5.000000e-01 : f32
    %273 = vector.broadcast %cst_119 : f32 to vector<1x32xf32>
    %274 = arith.mulf %273, %272 : vector<1x32xf32>
    %275 = math.tanh %274 : vector<1x32xf32>
    %cst_120 = arith.constant 1.000000e+00 : f32
    %276 = vector.broadcast %cst_120 : f32 to vector<1x32xf32>
    %277 = arith.addf %275, %276 : vector<1x32xf32>
    %cst_121 = arith.constant 5.000000e-01 : f32
    %278 = vector.broadcast %cst_121 : f32 to vector<1x32xf32>
    %279 = arith.mulf %278, %277 : vector<1x32xf32>
    %c384 = arith.constant 384 : index
    %c0_122 = arith.constant 0 : index
    %280 = vector.load %arg2[%c384, %c0_122] : memref<704x128xbf16, #tpu.memory_space<vmem>>, vector<32x32xbf16>
    %281 = arith.truncf %271 : vector<72x32xf32> to vector<72x32xbf16>
    %cst_123 = arith.constant dense<0.000000e+00> : vector<72x32xf32>
    %282 = tpu.matmul %281, %280, %cst_123 {dimension_numbers = #tpu.dot_dimension_numbers<[1], [0], [0], [1], [0, 0, 1, 1], [], []>} : vector<72x32xbf16>, vector<32x32xbf16>, vector<72x32xf32> -> vector<72x32xf32>
    %c11 = arith.constant 11 : index
    %c0_124 = arith.constant 0 : index
    %283 = vector.load %arg3[%c11, %c0_124] : memref<104x128xf32, #tpu.memory_space<vmem>>, vector<1x32xf32>
    %284 = vector.broadcast %283 : vector<1x32xf32> to vector<72x32xf32>
    %285 = arith.addf %282, %284 : vector<72x32xf32>
    %286 = vector.broadcast %279 : vector<1x32xf32> to vector<72x32xf32>
    %287 = arith.mulf %286, %285 : vector<72x32xf32>
    %288 = arith.addf %239, %287 : vector<72x32xf32>
    %c13 = arith.constant 13 : index
    %c0_125 = arith.constant 0 : index
    %289 = vector.load %arg3[%c13, %c0_125] : memref<104x128xf32, #tpu.memory_space<vmem>>, vector<1x32xf32>
    %c14 = arith.constant 14 : index
    %c0_126 = arith.constant 0 : index
    %290 = vector.load %arg3[%c14, %c0_126] : memref<104x128xf32, #tpu.memory_space<vmem>>, vector<1x32xf32>
    %cst_127 = arith.constant dense<0.000000e+00> : vector<72xf32>
    %291 = vector.multi_reduction <add>, %288, %cst_127 [1] : vector<72x32xf32> to vector<72xf32>
    %292 = vector.shape_cast %291 : vector<72xf32> to vector<72x1xf32>
    %cst_128 = arith.constant 3.200000e+01 : f32
    %293 = vector.broadcast %cst_128 : f32 to vector<72x1xf32>
    %294 = arith.divf %292, %293 : vector<72x1xf32>
    %295 = vector.broadcast %294 : vector<72x1xf32> to vector<72x32xf32>
    %296 = arith.subf %288, %295 : vector<72x32xf32>
    %297 = arith.mulf %296, %296 : vector<72x32xf32>
    %cst_129 = arith.constant dense<0.000000e+00> : vector<72xf32>
    %298 = vector.multi_reduction <add>, %297, %cst_129 [1] : vector<72x32xf32> to vector<72xf32>
    %299 = vector.shape_cast %298 : vector<72xf32> to vector<72x1xf32>
    %cst_130 = arith.constant 3.200000e+01 : f32
    %300 = vector.broadcast %cst_130 : f32 to vector<72x1xf32>
    %301 = arith.divf %299, %300 : vector<72x1xf32>
    %302 = vector.broadcast %294 : vector<72x1xf32> to vector<72x32xf32>
    %303 = arith.subf %288, %302 : vector<72x32xf32>
    %cst_131 = arith.constant 9.99999974E-6 : f32
    %304 = vector.broadcast %cst_131 : f32 to vector<72x1xf32>
    %305 = arith.addf %301, %304 : vector<72x1xf32>
    %306 = math.rsqrt %305 : vector<72x1xf32>
    %307 = vector.broadcast %306 : vector<72x1xf32> to vector<72x32xf32>
    %308 = arith.mulf %303, %307 : vector<72x32xf32>
    %309 = vector.broadcast %289 : vector<1x32xf32> to vector<72x32xf32>
    %310 = arith.mulf %308, %309 : vector<72x32xf32>
    %311 = vector.broadcast %290 : vector<1x32xf32> to vector<72x32xf32>
    %312 = arith.addf %310, %311 : vector<72x32xf32>
    %c416 = arith.constant 416 : index
    %c0_132 = arith.constant 0 : index
    %313 = vector.load %arg2[%c416, %c0_132] : memref<704x128xbf16, #tpu.memory_space<vmem>>, vector<32x96xbf16>
    %314 = arith.truncf %312 : vector<72x32xf32> to vector<72x32xbf16>
    %cst_133 = arith.constant dense<0.000000e+00> : vector<72x96xf32>
    %315 = tpu.matmul %314, %313, %cst_133 {dimension_numbers = #tpu.dot_dimension_numbers<[1], [0], [0], [1], [0, 0, 1, 1], [], []>} : vector<72x32xbf16>, vector<32x96xbf16>, vector<72x96xf32> -> vector<72x96xf32>
    %c15 = arith.constant 15 : index
    %c0_134 = arith.constant 0 : index
    %316 = vector.load %arg3[%c15, %c0_134] : memref<104x128xf32, #tpu.memory_space<vmem>>, vector<1x96xf32>
    %317 = vector.broadcast %316 : vector<1x96xf32> to vector<72x96xf32>
    %318 = arith.addf %315, %317 : vector<72x96xf32>
    %c448 = arith.constant 448 : index
    %c0_135 = arith.constant 0 : index
    %319 = vector.load %arg2[%c448, %c0_135] : memref<704x128xbf16, #tpu.memory_space<vmem>>, vector<32x32xbf16>
    %cst_136 = arith.constant 0.000000e+00 : f32
    %320 = vector.broadcast %cst_136 : f32 to vector<72x32xf32>
    %321 = vector.extract_strided_slice %318 {offsets = [0, 0], sizes = [72, 8], strides = [1, 1]} : vector<72x96xf32> to vector<72x8xf32>
    %322 = vector.extract_strided_slice %318 {offsets = [0, 32], sizes = [72, 8], strides = [1, 1]} : vector<72x96xf32> to vector<72x8xf32>
    %323 = vector.extract_strided_slice %318 {offsets = [0, 64], sizes = [72, 8], strides = [1, 1]} : vector<72x96xf32> to vector<72x8xf32>
    %324 = arith.truncf %321 : vector<72x8xf32> to vector<72x8xbf16>
    %325 = arith.truncf %322 : vector<72x8xf32> to vector<72x8xbf16>
    %cst_137 = arith.constant dense<0.000000e+00> : vector<72x72xf32>
    %326 = tpu.matmul %324, %325, %cst_137 {dimension_numbers = #tpu.dot_dimension_numbers<[1], [1], [0], [0], [0, 0, 1, 0], [], []>} : vector<72x8xbf16>, vector<72x8xbf16>, vector<72x72xf32> -> vector<72x72xf32>
    %cst_138 = arith.constant 0.353553385 : f32
    %327 = vector.broadcast %cst_138 : f32 to vector<72x72xf32>
    %328 = arith.mulf %326, %327 : vector<72x72xf32>
    %cst_139 = arith.constant dense<0xFF800000> : vector<72xf32>
    %329 = vector.multi_reduction <maximumf>, %328, %cst_139 [1] : vector<72x72xf32> to vector<72xf32>
    %330 = vector.shape_cast %329 : vector<72xf32> to vector<72x1xf32>
    %331 = vector.broadcast %330 : vector<72x1xf32> to vector<72x72xf32>
    %332 = arith.subf %328, %331 : vector<72x72xf32>
    %333 = math.exp %332 : vector<72x72xf32>
    %334 = arith.mulf %333, %89 : vector<72x72xf32>
    %cst_140 = arith.constant dense<0.000000e+00> : vector<72xf32>
    %335 = vector.multi_reduction <add>, %334, %cst_140 [1] : vector<72x72xf32> to vector<72xf32>
    %336 = vector.shape_cast %335 : vector<72xf32> to vector<72x1xf32>
    %337 = tpu.reciprocal %336 {approx = true} : vector<72x1xf32> -> vector<72x1xf32>
    %338 = vector.broadcast %337 : vector<72x1xf32> to vector<72x72xf32>
    %339 = arith.mulf %334, %338 : vector<72x72xf32>
    %340 = arith.truncf %339 : vector<72x72xf32> to vector<72x72xbf16>
    %341 = arith.truncf %323 : vector<72x8xf32> to vector<72x8xbf16>
    %cst_141 = arith.constant dense<0.000000e+00> : vector<72x8xf32>
    %342 = tpu.matmul %340, %341, %cst_141 {dimension_numbers = #tpu.dot_dimension_numbers<[1], [0], [0], [1], [0, 0, 1, 1], [], []>} : vector<72x72xbf16>, vector<72x8xbf16>, vector<72x8xf32> -> vector<72x8xf32>
    %343 = vector.extract_strided_slice %319 {offsets = [0, 0], sizes = [8, 32], strides = [1, 1]} : vector<32x32xbf16> to vector<8x32xbf16>
    %344 = arith.truncf %342 : vector<72x8xf32> to vector<72x8xbf16>
    %cst_142 = arith.constant dense<0.000000e+00> : vector<72x32xf32>
    %345 = tpu.matmul %344, %343, %cst_142 {dimension_numbers = #tpu.dot_dimension_numbers<[1], [0], [0], [1], [0, 0, 1, 1], [], []>} : vector<72x8xbf16>, vector<8x32xbf16>, vector<72x32xf32> -> vector<72x32xf32>
    %346 = arith.addf %320, %345 : vector<72x32xf32>
    %347 = vector.extract_strided_slice %318 {offsets = [0, 8], sizes = [72, 8], strides = [1, 1]} : vector<72x96xf32> to vector<72x8xf32>
    %348 = vector.extract_strided_slice %318 {offsets = [0, 40], sizes = [72, 8], strides = [1, 1]} : vector<72x96xf32> to vector<72x8xf32>
    %349 = vector.extract_strided_slice %318 {offsets = [0, 72], sizes = [72, 8], strides = [1, 1]} : vector<72x96xf32> to vector<72x8xf32>
    %350 = arith.truncf %347 : vector<72x8xf32> to vector<72x8xbf16>
    %351 = arith.truncf %348 : vector<72x8xf32> to vector<72x8xbf16>
    %cst_143 = arith.constant dense<0.000000e+00> : vector<72x72xf32>
    %352 = tpu.matmul %350, %351, %cst_143 {dimension_numbers = #tpu.dot_dimension_numbers<[1], [1], [0], [0], [0, 0, 1, 0], [], []>} : vector<72x8xbf16>, vector<72x8xbf16>, vector<72x72xf32> -> vector<72x72xf32>
    %cst_144 = arith.constant 0.353553385 : f32
    %353 = vector.broadcast %cst_144 : f32 to vector<72x72xf32>
    %354 = arith.mulf %352, %353 : vector<72x72xf32>
    %cst_145 = arith.constant dense<0xFF800000> : vector<72xf32>
    %355 = vector.multi_reduction <maximumf>, %354, %cst_145 [1] : vector<72x72xf32> to vector<72xf32>
    %356 = vector.shape_cast %355 : vector<72xf32> to vector<72x1xf32>
    %357 = vector.broadcast %356 : vector<72x1xf32> to vector<72x72xf32>
    %358 = arith.subf %354, %357 : vector<72x72xf32>
    %359 = math.exp %358 : vector<72x72xf32>
    %360 = arith.mulf %359, %89 : vector<72x72xf32>
    %cst_146 = arith.constant dense<0.000000e+00> : vector<72xf32>
    %361 = vector.multi_reduction <add>, %360, %cst_146 [1] : vector<72x72xf32> to vector<72xf32>
    %362 = vector.shape_cast %361 : vector<72xf32> to vector<72x1xf32>
    %363 = tpu.reciprocal %362 {approx = true} : vector<72x1xf32> -> vector<72x1xf32>
    %364 = vector.broadcast %363 : vector<72x1xf32> to vector<72x72xf32>
    %365 = arith.mulf %360, %364 : vector<72x72xf32>
    %366 = arith.truncf %365 : vector<72x72xf32> to vector<72x72xbf16>
    %367 = arith.truncf %349 : vector<72x8xf32> to vector<72x8xbf16>
    %cst_147 = arith.constant dense<0.000000e+00> : vector<72x8xf32>
    %368 = tpu.matmul %366, %367, %cst_147 {dimension_numbers = #tpu.dot_dimension_numbers<[1], [0], [0], [1], [0, 0, 1, 1], [], []>} : vector<72x72xbf16>, vector<72x8xbf16>, vector<72x8xf32> -> vector<72x8xf32>
    %369 = vector.extract_strided_slice %319 {offsets = [8, 0], sizes = [8, 32], strides = [1, 1]} : vector<32x32xbf16> to vector<8x32xbf16>
    %370 = arith.truncf %368 : vector<72x8xf32> to vector<72x8xbf16>
    %cst_148 = arith.constant dense<0.000000e+00> : vector<72x32xf32>
    %371 = tpu.matmul %370, %369, %cst_148 {dimension_numbers = #tpu.dot_dimension_numbers<[1], [0], [0], [1], [0, 0, 1, 1], [], []>} : vector<72x8xbf16>, vector<8x32xbf16>, vector<72x32xf32> -> vector<72x32xf32>
    %372 = arith.addf %346, %371 : vector<72x32xf32>
    %373 = vector.extract_strided_slice %318 {offsets = [0, 16], sizes = [72, 8], strides = [1, 1]} : vector<72x96xf32> to vector<72x8xf32>
    %374 = vector.extract_strided_slice %318 {offsets = [0, 48], sizes = [72, 8], strides = [1, 1]} : vector<72x96xf32> to vector<72x8xf32>
    %375 = vector.extract_strided_slice %318 {offsets = [0, 80], sizes = [72, 8], strides = [1, 1]} : vector<72x96xf32> to vector<72x8xf32>
    %376 = arith.truncf %373 : vector<72x8xf32> to vector<72x8xbf16>
    %377 = arith.truncf %374 : vector<72x8xf32> to vector<72x8xbf16>
    %cst_149 = arith.constant dense<0.000000e+00> : vector<72x72xf32>
    %378 = tpu.matmul %376, %377, %cst_149 {dimension_numbers = #tpu.dot_dimension_numbers<[1], [1], [0], [0], [0, 0, 1, 0], [], []>} : vector<72x8xbf16>, vector<72x8xbf16>, vector<72x72xf32> -> vector<72x72xf32>
    %cst_150 = arith.constant 0.353553385 : f32
    %379 = vector.broadcast %cst_150 : f32 to vector<72x72xf32>
    %380 = arith.mulf %378, %379 : vector<72x72xf32>
    %cst_151 = arith.constant dense<0xFF800000> : vector<72xf32>
    %381 = vector.multi_reduction <maximumf>, %380, %cst_151 [1] : vector<72x72xf32> to vector<72xf32>
    %382 = vector.shape_cast %381 : vector<72xf32> to vector<72x1xf32>
    %383 = vector.broadcast %382 : vector<72x1xf32> to vector<72x72xf32>
    %384 = arith.subf %380, %383 : vector<72x72xf32>
    %385 = math.exp %384 : vector<72x72xf32>
    %386 = arith.mulf %385, %89 : vector<72x72xf32>
    %cst_152 = arith.constant dense<0.000000e+00> : vector<72xf32>
    %387 = vector.multi_reduction <add>, %386, %cst_152 [1] : vector<72x72xf32> to vector<72xf32>
    %388 = vector.shape_cast %387 : vector<72xf32> to vector<72x1xf32>
    %389 = tpu.reciprocal %388 {approx = true} : vector<72x1xf32> -> vector<72x1xf32>
    %390 = vector.broadcast %389 : vector<72x1xf32> to vector<72x72xf32>
    %391 = arith.mulf %386, %390 : vector<72x72xf32>
    %392 = arith.truncf %391 : vector<72x72xf32> to vector<72x72xbf16>
    %393 = arith.truncf %375 : vector<72x8xf32> to vector<72x8xbf16>
    %cst_153 = arith.constant dense<0.000000e+00> : vector<72x8xf32>
    %394 = tpu.matmul %392, %393, %cst_153 {dimension_numbers = #tpu.dot_dimension_numbers<[1], [0], [0], [1], [0, 0, 1, 1], [], []>} : vector<72x72xbf16>, vector<72x8xbf16>, vector<72x8xf32> -> vector<72x8xf32>
    %395 = vector.extract_strided_slice %319 {offsets = [16, 0], sizes = [8, 32], strides = [1, 1]} : vector<32x32xbf16> to vector<8x32xbf16>
    %396 = arith.truncf %394 : vector<72x8xf32> to vector<72x8xbf16>
    %cst_154 = arith.constant dense<0.000000e+00> : vector<72x32xf32>
    %397 = tpu.matmul %396, %395, %cst_154 {dimension_numbers = #tpu.dot_dimension_numbers<[1], [0], [0], [1], [0, 0, 1, 1], [], []>} : vector<72x8xbf16>, vector<8x32xbf16>, vector<72x32xf32> -> vector<72x32xf32>
    %398 = arith.addf %372, %397 : vector<72x32xf32>
    %399 = vector.extract_strided_slice %318 {offsets = [0, 24], sizes = [72, 8], strides = [1, 1]} : vector<72x96xf32> to vector<72x8xf32>
    %400 = vector.extract_strided_slice %318 {offsets = [0, 56], sizes = [72, 8], strides = [1, 1]} : vector<72x96xf32> to vector<72x8xf32>
    %401 = vector.extract_strided_slice %318 {offsets = [0, 88], sizes = [72, 8], strides = [1, 1]} : vector<72x96xf32> to vector<72x8xf32>
    %402 = arith.truncf %399 : vector<72x8xf32> to vector<72x8xbf16>
    %403 = arith.truncf %400 : vector<72x8xf32> to vector<72x8xbf16>
    %cst_155 = arith.constant dense<0.000000e+00> : vector<72x72xf32>
    %404 = tpu.matmul %402, %403, %cst_155 {dimension_numbers = #tpu.dot_dimension_numbers<[1], [1], [0], [0], [0, 0, 1, 0], [], []>} : vector<72x8xbf16>, vector<72x8xbf16>, vector<72x72xf32> -> vector<72x72xf32>
    %cst_156 = arith.constant 0.353553385 : f32
    %405 = vector.broadcast %cst_156 : f32 to vector<72x72xf32>
    %406 = arith.mulf %404, %405 : vector<72x72xf32>
    %cst_157 = arith.constant dense<0xFF800000> : vector<72xf32>
    %407 = vector.multi_reduction <maximumf>, %406, %cst_157 [1] : vector<72x72xf32> to vector<72xf32>
    %408 = vector.shape_cast %407 : vector<72xf32> to vector<72x1xf32>
    %409 = vector.broadcast %408 : vector<72x1xf32> to vector<72x72xf32>
    %410 = arith.subf %406, %409 : vector<72x72xf32>
    %411 = math.exp %410 : vector<72x72xf32>
    %412 = arith.mulf %411, %89 : vector<72x72xf32>
    %cst_158 = arith.constant dense<0.000000e+00> : vector<72xf32>
    %413 = vector.multi_reduction <add>, %412, %cst_158 [1] : vector<72x72xf32> to vector<72xf32>
    %414 = vector.shape_cast %413 : vector<72xf32> to vector<72x1xf32>
    %415 = tpu.reciprocal %414 {approx = true} : vector<72x1xf32> -> vector<72x1xf32>
    %416 = vector.broadcast %415 : vector<72x1xf32> to vector<72x72xf32>
    %417 = arith.mulf %412, %416 : vector<72x72xf32>
    %418 = arith.truncf %417 : vector<72x72xf32> to vector<72x72xbf16>
    %419 = arith.truncf %401 : vector<72x8xf32> to vector<72x8xbf16>
    %cst_159 = arith.constant dense<0.000000e+00> : vector<72x8xf32>
    %420 = tpu.matmul %418, %419, %cst_159 {dimension_numbers = #tpu.dot_dimension_numbers<[1], [0], [0], [1], [0, 0, 1, 1], [], []>} : vector<72x72xbf16>, vector<72x8xbf16>, vector<72x8xf32> -> vector<72x8xf32>
    %421 = vector.extract_strided_slice %319 {offsets = [24, 0], sizes = [8, 32], strides = [1, 1]} : vector<32x32xbf16> to vector<8x32xbf16>
    %422 = arith.truncf %420 : vector<72x8xf32> to vector<72x8xbf16>
    %cst_160 = arith.constant dense<0.000000e+00> : vector<72x32xf32>
    %423 = tpu.matmul %422, %421, %cst_160 {dimension_numbers = #tpu.dot_dimension_numbers<[1], [0], [0], [1], [0, 0, 1, 1], [], []>} : vector<72x8xbf16>, vector<8x32xbf16>, vector<72x32xf32> -> vector<72x32xf32>
    %424 = arith.addf %398, %423 : vector<72x32xf32>
    %c17 = arith.constant 17 : index
    %c0_161 = arith.constant 0 : index
    %425 = vector.load %arg3[%c17, %c0_161] : memref<104x128xf32, #tpu.memory_space<vmem>>, vector<1x32xf32>
    %cst_162 = arith.constant 5.000000e-01 : f32
    %426 = vector.broadcast %cst_162 : f32 to vector<1x32xf32>
    %427 = arith.mulf %426, %425 : vector<1x32xf32>
    %428 = math.tanh %427 : vector<1x32xf32>
    %cst_163 = arith.constant 1.000000e+00 : f32
    %429 = vector.broadcast %cst_163 : f32 to vector<1x32xf32>
    %430 = arith.addf %428, %429 : vector<1x32xf32>
    %cst_164 = arith.constant 5.000000e-01 : f32
    %431 = vector.broadcast %cst_164 : f32 to vector<1x32xf32>
    %432 = arith.mulf %431, %430 : vector<1x32xf32>
    %c16 = arith.constant 16 : index
    %c0_165 = arith.constant 0 : index
    %433 = vector.load %arg3[%c16, %c0_165] : memref<104x128xf32, #tpu.memory_space<vmem>>, vector<1x32xf32>
    %434 = vector.broadcast %433 : vector<1x32xf32> to vector<72x32xf32>
    %435 = arith.addf %424, %434 : vector<72x32xf32>
    %436 = vector.broadcast %432 : vector<1x32xf32> to vector<72x32xf32>
    %437 = arith.mulf %436, %435 : vector<72x32xf32>
    %438 = arith.addf %288, %437 : vector<72x32xf32>
    %c18 = arith.constant 18 : index
    %c0_166 = arith.constant 0 : index
    %439 = vector.load %arg3[%c18, %c0_166] : memref<104x128xf32, #tpu.memory_space<vmem>>, vector<1x32xf32>
    %c19 = arith.constant 19 : index
    %c0_167 = arith.constant 0 : index
    %440 = vector.load %arg3[%c19, %c0_167] : memref<104x128xf32, #tpu.memory_space<vmem>>, vector<1x32xf32>
    %cst_168 = arith.constant dense<0.000000e+00> : vector<72xf32>
    %441 = vector.multi_reduction <add>, %438, %cst_168 [1] : vector<72x32xf32> to vector<72xf32>
    %442 = vector.shape_cast %441 : vector<72xf32> to vector<72x1xf32>
    %cst_169 = arith.constant 3.200000e+01 : f32
    %443 = vector.broadcast %cst_169 : f32 to vector<72x1xf32>
    %444 = arith.divf %442, %443 : vector<72x1xf32>
    %445 = vector.broadcast %444 : vector<72x1xf32> to vector<72x32xf32>
    %446 = arith.subf %438, %445 : vector<72x32xf32>
    %447 = arith.mulf %446, %446 : vector<72x32xf32>
    %cst_170 = arith.constant dense<0.000000e+00> : vector<72xf32>
    %448 = vector.multi_reduction <add>, %447, %cst_170 [1] : vector<72x32xf32> to vector<72xf32>
    %449 = vector.shape_cast %448 : vector<72xf32> to vector<72x1xf32>
    %cst_171 = arith.constant 3.200000e+01 : f32
    %450 = vector.broadcast %cst_171 : f32 to vector<72x1xf32>
    %451 = arith.divf %449, %450 : vector<72x1xf32>
    %452 = vector.broadcast %444 : vector<72x1xf32> to vector<72x32xf32>
    %453 = arith.subf %438, %452 : vector<72x32xf32>
    %cst_172 = arith.constant 9.99999974E-6 : f32
    %454 = vector.broadcast %cst_172 : f32 to vector<72x1xf32>
    %455 = arith.addf %451, %454 : vector<72x1xf32>
    %456 = math.rsqrt %455 : vector<72x1xf32>
    %457 = vector.broadcast %456 : vector<72x1xf32> to vector<72x32xf32>
    %458 = arith.mulf %453, %457 : vector<72x32xf32>
    %459 = vector.broadcast %439 : vector<1x32xf32> to vector<72x32xf32>
    %460 = arith.mulf %458, %459 : vector<72x32xf32>
    %461 = vector.broadcast %440 : vector<1x32xf32> to vector<72x32xf32>
    %462 = arith.addf %460, %461 : vector<72x32xf32>
    %c480 = arith.constant 480 : index
    %c0_173 = arith.constant 0 : index
    %463 = vector.load %arg2[%c480, %c0_173] : memref<704x128xbf16, #tpu.memory_space<vmem>>, vector<32x32xbf16>
    %464 = arith.truncf %462 : vector<72x32xf32> to vector<72x32xbf16>
    %cst_174 = arith.constant dense<0.000000e+00> : vector<72x32xf32>
    %465 = tpu.matmul %464, %463, %cst_174 {dimension_numbers = #tpu.dot_dimension_numbers<[1], [0], [0], [1], [0, 0, 1, 1], [], []>} : vector<72x32xbf16>, vector<32x32xbf16>, vector<72x32xf32> -> vector<72x32xf32>
    %c20 = arith.constant 20 : index
    %c0_175 = arith.constant 0 : index
    %466 = vector.load %arg3[%c20, %c0_175] : memref<104x128xf32, #tpu.memory_space<vmem>>, vector<1x32xf32>
    %467 = vector.broadcast %466 : vector<1x32xf32> to vector<72x32xf32>
    %468 = arith.addf %465, %467 : vector<72x32xf32>
    %cst_176 = arith.constant 0.000000e+00 : f32
    %469 = vector.broadcast %cst_176 : f32 to vector<72x32xf32>
    %470 = arith.maximumf %468, %469 : vector<72x32xf32>
    %c22 = arith.constant 22 : index
    %c0_177 = arith.constant 0 : index
    %471 = vector.load %arg3[%c22, %c0_177] : memref<104x128xf32, #tpu.memory_space<vmem>>, vector<1x32xf32>
    %cst_178 = arith.constant 5.000000e-01 : f32
    %472 = vector.broadcast %cst_178 : f32 to vector<1x32xf32>
    %473 = arith.mulf %472, %471 : vector<1x32xf32>
    %474 = math.tanh %473 : vector<1x32xf32>
    %cst_179 = arith.constant 1.000000e+00 : f32
    %475 = vector.broadcast %cst_179 : f32 to vector<1x32xf32>
    %476 = arith.addf %474, %475 : vector<1x32xf32>
    %cst_180 = arith.constant 5.000000e-01 : f32
    %477 = vector.broadcast %cst_180 : f32 to vector<1x32xf32>
    %478 = arith.mulf %477, %476 : vector<1x32xf32>
    %c512 = arith.constant 512 : index
    %c0_181 = arith.constant 0 : index
    %479 = vector.load %arg2[%c512, %c0_181] : memref<704x128xbf16, #tpu.memory_space<vmem>>, vector<32x32xbf16>
    %480 = arith.truncf %470 : vector<72x32xf32> to vector<72x32xbf16>
    %cst_182 = arith.constant dense<0.000000e+00> : vector<72x32xf32>
    %481 = tpu.matmul %480, %479, %cst_182 {dimension_numbers = #tpu.dot_dimension_numbers<[1], [0], [0], [1], [0, 0, 1, 1], [], []>} : vector<72x32xbf16>, vector<32x32xbf16>, vector<72x32xf32> -> vector<72x32xf32>
    %c21 = arith.constant 21 : index
    %c0_183 = arith.constant 0 : index
    %482 = vector.load %arg3[%c21, %c0_183] : memref<104x128xf32, #tpu.memory_space<vmem>>, vector<1x32xf32>
    %483 = vector.broadcast %482 : vector<1x32xf32> to vector<72x32xf32>
    %484 = arith.addf %481, %483 : vector<72x32xf32>
    %485 = vector.broadcast %478 : vector<1x32xf32> to vector<72x32xf32>
    %486 = arith.mulf %485, %484 : vector<72x32xf32>
    %487 = arith.addf %438, %486 : vector<72x32xf32>
    %488 = vector.extract_strided_slice %487 {offsets = [0, 0], sizes = [36, 32], strides = [1, 1]} : vector<72x32xf32> to vector<36x32xf32>
    %cst_184 = arith.constant dense<0xFF800000> : vector<32xf32>
    %489 = vector.multi_reduction <maximumf>, %488, %cst_184 [0] : vector<36x32xf32> to vector<32xf32>
    %490 = vector.shape_cast %489 : vector<32xf32> to vector<1x32xf32>
    %491 = vector.extract_strided_slice %487 {offsets = [36, 0], sizes = [36, 32], strides = [1, 1]} : vector<72x32xf32> to vector<36x32xf32>
    %cst_185 = arith.constant dense<0xFF800000> : vector<32xf32>
    %492 = vector.multi_reduction <maximumf>, %491, %cst_185 [0] : vector<36x32xf32> to vector<32xf32>
    %493 = vector.shape_cast %492 : vector<32xf32> to vector<1x32xf32>
    %494 = tpu.concatenate %490, %493 in 0 : vector<1x32xf32>, vector<1x32xf32> -> vector<2x32xf32>
    %c544 = arith.constant 544 : index
    %c0_186 = arith.constant 0 : index
    %495 = vector.load %arg2[%c544, %c0_186] : memref<704x128xbf16, #tpu.memory_space<vmem>>, vector<32x32xbf16>
    %496 = arith.truncf %494 : vector<2x32xf32> to vector<2x32xbf16>
    %cst_187 = arith.constant dense<0.000000e+00> : vector<2x32xf32>
    %497 = tpu.matmul %496, %495, %cst_187 {dimension_numbers = #tpu.dot_dimension_numbers<[1], [0], [0], [1], [0, 0, 1, 1], [], []>} : vector<2x32xbf16>, vector<32x32xbf16>, vector<2x32xf32> -> vector<2x32xf32>
    %c23 = arith.constant 23 : index
    %c0_188 = arith.constant 0 : index
    %498 = vector.load %arg3[%c23, %c0_188] : memref<104x128xf32, #tpu.memory_space<vmem>>, vector<1x32xf32>
    %499 = vector.broadcast %498 : vector<1x32xf32> to vector<2x32xf32>
    %500 = arith.addf %497, %499 : vector<2x32xf32>
    %501 = arith.addf %500, %494 : vector<2x32xf32>
    %cst_189 = arith.constant 0.000000e+00 : f32
    %502 = vector.broadcast %cst_189 : f32 to vector<2x32xf32>
    %503 = arith.maximumf %501, %502 : vector<2x32xf32>
    %c576 = arith.constant 576 : index
    %c0_190 = arith.constant 0 : index
    %504 = vector.load %arg2[%c576, %c0_190] : memref<704x128xbf16, #tpu.memory_space<vmem>>, vector<32x32xbf16>
    %505 = arith.truncf %503 : vector<2x32xf32> to vector<2x32xbf16>
    %cst_191 = arith.constant dense<0.000000e+00> : vector<2x32xf32>
    %506 = tpu.matmul %505, %504, %cst_191 {dimension_numbers = #tpu.dot_dimension_numbers<[1], [0], [0], [1], [0, 0, 1, 1], [], []>} : vector<2x32xbf16>, vector<32x32xbf16>, vector<2x32xf32> -> vector<2x32xf32>
    %c24 = arith.constant 24 : index
    %c0_192 = arith.constant 0 : index
    %507 = vector.load %arg3[%c24, %c0_192] : memref<104x128xf32, #tpu.memory_space<vmem>>, vector<1x32xf32>
    %508 = vector.broadcast %507 : vector<1x32xf32> to vector<2x32xf32>
    %509 = arith.addf %506, %508 : vector<2x32xf32>
    %510 = arith.addf %509, %503 : vector<2x32xf32>
    %cst_193 = arith.constant 0.000000e+00 : f32
    %511 = vector.broadcast %cst_193 : f32 to vector<2x32xf32>
    %512 = arith.maximumf %510, %511 : vector<2x32xf32>
    %c608 = arith.constant 608 : index
    %c0_194 = arith.constant 0 : index
    %513 = vector.load %arg2[%c608, %c0_194] : memref<704x128xbf16, #tpu.memory_space<vmem>>, vector<32x32xbf16>
    %514 = arith.truncf %512 : vector<2x32xf32> to vector<2x32xbf16>
    %cst_195 = arith.constant dense<0.000000e+00> : vector<2x32xf32>
    %515 = tpu.matmul %514, %513, %cst_195 {dimension_numbers = #tpu.dot_dimension_numbers<[1], [0], [0], [1], [0, 0, 1, 1], [], []>} : vector<2x32xbf16>, vector<32x32xbf16>, vector<2x32xf32> -> vector<2x32xf32>
    %c25 = arith.constant 25 : index
    %c0_196 = arith.constant 0 : index
    %516 = vector.load %arg3[%c25, %c0_196] : memref<104x128xf32, #tpu.memory_space<vmem>>, vector<1x32xf32>
    %517 = vector.broadcast %516 : vector<1x32xf32> to vector<2x32xf32>
    %518 = arith.addf %515, %517 : vector<2x32xf32>
    %519 = arith.addf %518, %512 : vector<2x32xf32>
    %cst_197 = arith.constant 0.000000e+00 : f32
    %520 = vector.broadcast %cst_197 : f32 to vector<2x32xf32>
    %521 = arith.maximumf %519, %520 : vector<2x32xf32>
    %c640 = arith.constant 640 : index
    %c0_198 = arith.constant 0 : index
    %522 = vector.load %arg2[%c640, %c0_198] : memref<704x128xbf16, #tpu.memory_space<vmem>>, vector<32x32xbf16>
    %523 = arith.truncf %521 : vector<2x32xf32> to vector<2x32xbf16>
    %cst_199 = arith.constant dense<0.000000e+00> : vector<2x32xf32>
    %524 = tpu.matmul %523, %522, %cst_199 {dimension_numbers = #tpu.dot_dimension_numbers<[1], [0], [0], [1], [0, 0, 1, 1], [], []>} : vector<2x32xbf16>, vector<32x32xbf16>, vector<2x32xf32> -> vector<2x32xf32>
    %c26 = arith.constant 26 : index
    %c0_200 = arith.constant 0 : index
    %525 = vector.load %arg3[%c26, %c0_200] : memref<104x128xf32, #tpu.memory_space<vmem>>, vector<1x32xf32>
    %526 = vector.broadcast %525 : vector<1x32xf32> to vector<2x32xf32>
    %527 = arith.addf %524, %526 : vector<2x32xf32>
    %528 = arith.addf %527, %521 : vector<2x32xf32>
    %cst_201 = arith.constant 0.000000e+00 : f32
    %529 = vector.broadcast %cst_201 : f32 to vector<2x32xf32>
    %530 = arith.maximumf %528, %529 : vector<2x32xf32>
    %c672 = arith.constant 672 : index
    %c0_202 = arith.constant 0 : index
    %531 = vector.load %arg2[%c672, %c0_202] : memref<704x128xbf16, #tpu.memory_space<vmem>>, vector<32x4xbf16>
    %532 = arith.truncf %530 : vector<2x32xf32> to vector<2x32xbf16>
    %cst_203 = arith.constant dense<0.000000e+00> : vector<2x4xf32>
    %533 = tpu.matmul %532, %531, %cst_203 {dimension_numbers = #tpu.dot_dimension_numbers<[1], [0], [0], [1], [0, 0, 1, 1], [], []>} : vector<2x32xbf16>, vector<32x4xbf16>, vector<2x4xf32> -> vector<2x4xf32>
    %c27 = arith.constant 27 : index
    %c0_204 = arith.constant 0 : index
    %534 = vector.load %arg3[%c27, %c0_204] : memref<104x128xf32, #tpu.memory_space<vmem>>, vector<1x4xf32>
    %535 = vector.broadcast %534 : vector<1x4xf32> to vector<2x4xf32>
    %536 = arith.addf %533, %535 : vector<2x4xf32>
    %cst_205 = arith.constant dense<0xFF800000> : vector<2xf32>
    %537 = vector.multi_reduction <maximumf>, %536, %cst_205 [1] : vector<2x4xf32> to vector<2xf32>
    %538 = vector.shape_cast %537 : vector<2xf32> to vector<2x1xf32>
    %539 = vector.broadcast %538 : vector<2x1xf32> to vector<2x4xf32>
    %540 = arith.subf %536, %539 : vector<2x4xf32>
    %541 = math.exp %540 : vector<2x4xf32>
    %cst_206 = arith.constant dense<0.000000e+00> : vector<2xf32>
    %542 = vector.multi_reduction <add>, %541, %cst_206 [1] : vector<2x4xf32> to vector<2xf32>
    %543 = vector.shape_cast %542 : vector<2xf32> to vector<2x1xf32>
    %544 = math.log %543 : vector<2x1xf32>
    %545 = vector.broadcast %544 : vector<2x1xf32> to vector<2x4xf32>
    %546 = arith.subf %540, %545 : vector<2x4xf32>
    %c0_207 = arith.constant 0 : index
    %c0_208 = arith.constant 0 : index
    %c0_209 = arith.constant 0 : index
    %547 = vector.load %arg7[%c0_207, %c0_208, %c0_209] : memref<1x2x4xf32, #tpu.memory_space<vmem>>, vector<1x2x4xf32>
    %548 = vector.shape_cast %547 : vector<1x2x4xf32> to vector<2x4xf32>
    %549 = vector.shape_cast %546 : vector<2x4xf32> to vector<1x2x4xf32>
    tpu.vector_store %arg7[%c0_207, %c0_208, %c0_209], %549 {strides = array<i32>} : memref<1x2x4xf32, #tpu.memory_space<vmem>>, vector<1x2x4xf32>,
    return
  }
  func.func @transform_0(%arg0: i32) -> (i32, i32, i32) {
    %c0_i32 = arith.constant 0 : i32
    %c0_i32_0 = arith.constant 0 : i32
    %c0_i32_1 = arith.constant 0 : i32
    return %arg0, %c0_i32, %c0_i32_0 : i32, i32, i32
  }
  func.func @transform_1(%arg0: i32) -> (i32, i32) {
    %c0_i32 = arith.constant 0 : i32
    %c0_i32_0 = arith.constant 0 : i32
    %c0_i32_1 = arith.constant 0 : i32
    return %c0_i32, %c0_i32_0 : i32, i32
  }
  func.func @transform_2(%arg0: i32) -> (i32, i32) {
    %c0_i32 = arith.constant 0 : i32
    %c0_i32_0 = arith.constant 0 : i32
    %c0_i32_1 = arith.constant 0 : i32
    return %c0_i32, %c0_i32_0 : i32, i32
  }
  func.func @transform_3(%arg0: i32) -> (i32, i32) {
    %c0_i32 = arith.constant 0 : i32
    %c0_i32_0 = arith.constant 0 : i32
    %c0_i32_1 = arith.constant 0 : i32
    return %c0_i32, %c0_i32_0 : i32, i32
  }
  func.func @transform_4(%arg0: i32) -> (i32, i32, i32) {
    %c0_i32 = arith.constant 0 : i32
    %c0_i32_0 = arith.constant 0 : i32
    %c0_i32_1 = arith.constant 0 : i32
    %c0_i32_2 = arith.constant 0 : i32
    return %c0_i32, %c0_i32_0, %c0_i32_1 : i32, i32, i32
  }
  func.func @transform_5(%arg0: i32) -> (i32, i32, i32) {
    %c0_i32 = arith.constant 0 : i32
    %c0_i32_0 = arith.constant 0 : i32
    %c0_i32_1 = arith.constant 0 : i32
    %c0_i32_2 = arith.constant 0 : i32
    return %c0_i32, %c0_i32_0, %c0_i32_1 : i32, i32, i32
  }
  func.func @transform_6(%arg0: i32) -> (i32, i32, i32) {
    %c0_i32 = arith.constant 0 : i32
    %c0_i32_0 = arith.constant 0 : i32
    %c0_i32_1 = arith.constant 0 : i32
    return %arg0, %c0_i32, %c0_i32_0 : i32, i32, i32
  }
}

</mosaic_0001>

<bundles_post_ra>
// kernel: forward.1
= control target key start
LH: loop header
LB: loop body
LE: loop exit
PB: predicated region body
PF: predicated region fallthrough
CT: control target
= control target key end

     0   :  { %11 = vsyncpa [#allocation3], 0  ;;  %s14155_s0 = inlined_call_operand.vmem [shape: s32[1,128,3], index: 0, kind: input, shape index: {}]   ;;  %s14156_s1 = inlined_call_operand.vmem [shape: bf16[704,128], index: 1, kind: input, shape index: {}]   ;;  %s14157_s2 = inlined_call_operand.vmem [shape: f32[104,128], index: 2, kind: input, shape index: {}]   ;;  %s14158_s3 = inlined_call_operand.hbm [shape: f32[72,72], index: 3, kind: input, shape index: {}]   ;;  %s14159_s4 = inlined_call_operand.vmem [shape: bf16[4,98,128], index: 4, kind: input, shape index: {}]   ;;  %s14160_s5 = inlined_call_operand.vmem [shape: bf16[4,72,98], index: 5, kind: input, shape index: {}]   ;;  %s14161_s6 = inlined_call_operand.hbm [shape: f32[1,2,4], index: 6, kind: output, shape index: {}]  }
   0x1   :  { %12 = vsyncpa [#allocation4], 0  ;;  %s10774_s21 = smov [#allocation2]   ;;  %s10726_s25 = scalar_lea.hbm %s14158_s3, 1152 }
   0x2   :  { %s24_s22 = sshll.u32 %s10774_s21, 4  ;;  %p10727_p0 = scmp.ne.s32.totalorder %s14158_s3, %s10726_s25  ;;  %s25_s22 = int_to_ptr.vmem [resolvable:$true] %s24_s22 }
   0x3   :  { %p10730_p1 = scmp.lt.u32.totalorder %s10726_s25, %s14158_s3 }
   0x5   :  { %p10732_p2 = pnand %p10730_p1, %p10727_p0 }
   0x7   :  { %10735 = shalt.err (!%p10732_p2)
}
   0x8   :  { %s10736_s30 = scalar_lea.vmem %s25_s22, 1152  ;;  %p10741_p4 = scmp.lt.s32.totalorder %s25_s22, %s25_s22 }
   0x9   :  { %p10737_p3 = scmp.ne.s32.totalorder %s25_s22, %s10736_s30  ;;  %p10742_p5 = scmp.lt.s32.totalorder %s10736_s30, %s10736_s30 }
   0xb   :  { %p10743_p6 = por %p10742_p5, %p10741_p4 }
   0xd   :  { %p10744_p7 = pnand %p10743_p6, %p10737_p3 }
   0xf   :  { %10747 = shalt.err (!%p10744_p7)
}
  0x10   :  { %s10775_s7 = smov 128   ;;  %s10776_s8 = smov 8  }
  0x11   :  { %30 = dma.hbm_to_vmem [thread:$0]  %s14158_s3, 1152, %s25_s22, [#allocation3], %s10775_s7, %s10775_s7, %s10776_s8  }
  0x12   :  { %10770 = dma.done.wait [#allocation3], 1152  }
  0x13   :  { %10771 = vsyncadd [#allocation3], 4294966144  ;;  %vm105_vm0 = vcmask 1040384   ;;  %vm106_vm1 = vcmask 1041408   ;;  %v10777_v0 = vmov 65535   ;;  %v39_v4 = vld [vmem:[%s14155_s0] sm:$0xff] }
  0x14   :  { %v107_v1 = vsel %vm105_vm0, 4294967295, %v10777_v0  ;;  %v55_v3 = vld [vmem:[%s14156_s1] sm:$0x3]  ;;  %v40_v5 = vld [vmem:[%s14155_s0 + $0x8] sm:$0xff]  ;;  %v56_v7 = vcvt.s32.f32 %v39_v4  ;;  %v41_v9 = vld [vmem:[%s14155_s0 + $0x10] sm:$0xff]  ;;  %vm80_vm2 = vcmask 23552  }
  0x15   :  { %v108_v2 = vsel %vm106_vm1, %v107_v1, 0  ;;  %v57_v8 = vcvt.s32.f32 %v40_v5  ;;  %v42_v10 = vld [vmem:[%s14155_s0 + $0x18] sm:$0xff]  ;;  %v43_v11 = vld [vmem:[%s14155_s0 + $0x20] sm:$0xff]  ;;  %v58_v12 = vcvt.s32.f32 %v41_v9  ;;  %v44_v14 = vld [vmem:[%s14155_s0 + $0x28] sm:$0xff]  ;;  %v10778_v51 = vmov 0.0   ;;  %s10780_s24 = smov 96  }
  0x16   :  { %v110_v6 = vand.u32 %v108_v2, %v55_v3  ;;  %v59_v13 = vcvt.s32.f32 %v42_v10  ;;  %v60_v15 = vcvt.s32.f32 %v43_v11  ;;  %v61_v17 = vcvt.s32.f32 %v44_v14  ;;  %v45_v19 = vld [vmem:[%s14155_s0 + $0x30] sm:$0xff]  ;;  %v46_v20 = vld [vmem:[%s14155_s0 + $0x38] sm:$0xff]  ;;  %v47_v22 = vld [vmem:[%s14155_s0 + $0x40] sm:$0xff]  ;;  %s10781_s25 = smov 88   ;;  %s10782_s26 = smov 120  }
  0x17   :  { %v72_v16 = vpack.c.bf16 %v57_v8, %v56_v7  ;;  %v48_v23 = vld [vmem:[%s14155_s0 + $0x48] sm:$0xff]  ;;  %v10239_v24 = vld [vmem:[%s14156_s1 + $0x1c] sm:$0xff]   ;;  %v62_v25 = vcvt.s32.f32 %v45_v19  ;;  %v63_v26 = vcvt.s32.f32 %v46_v20  ;;  %v64_v28 = vcvt.s32.f32 %v47_v22  ;;  %v49_v31 = vld [vmem:[%s14155_s0 + $0x50] sm:$0xff]  ;;  %s10784_s27 = smov 56   ;;  %s10785_s28 = smov 80  }
  0x18   :  { %8819 = vmatprep.subr.bf16.mxu0 %v110_v6  ;;  %v73_v18 = vpack.c.bf16 %v59_v13, %v58_v12  ;;  %v74_v21 = vpack.c.bf16 %v61_v17, %v60_v15  ;;  %v10240_v27 = vld [vmem:[%s14156_s1 + $0x24] sm:$0xff]   ;;  %v65_v29 = vcvt.s32.f32 %v48_v23  ;;  %v50_v32 = vld [vmem:[%s14155_s0 + $0x58] sm:$0xff]  ;;  %v66_v37 = vcvt.s32.f32 %v49_v31  ;;  %v53_v41 = vld [vmem:[%s14155_s0 + $0x70] sm:$0xff]  ;;  %s10787_s29 = smov 48   ;;  %s10788_s10 = smov 72  }
  0x19   :  { %8820 = vmatpush3.bf16.msra.mxu0 %v110_v6  ;;  %8821 = vmatprep.mubr.msk.bf16.mxu0 %vm80_vm2, %v72_v16  ;;  %v10241_v30 = vld [vmem:[%s14156_s1 + $0x4] sm:$0xff]   ;;  %v75_v33 = vpack.c.bf16 %v63_v26, %v62_v25  ;;  %v67_v38 = vcvt.s32.f32 %v50_v32  ;;  %v54_v42 = vld [vmem:[%s14155_s0 + $0x78] sm:$0xff]  ;;  %v70_v45 = vcvt.s32.f32 %v53_v41  ;;  %v10242_v48 = vld [vmem:[%s14156_s1 + $0xc] sm:$0xff]   ;;  %vm291_vm7 = vcmask 392192   ;;  %s10789_s11 = smov 104   ;;  %s10790_s14 = smov 40  }
  0x1a   :  { %8859 = vmatprep.subr.bf16.mxu0 %v10239_v24  ;;  %8837 = vmatprep.subr.bf16.mxu1 %v10241_v30  ;;  %v51_v34 = vld [vmem:[%s14155_s0 + $0x60] sm:$0xff]  ;;  %v52_v35 = vld [vmem:[%s14155_s0 + $0x68] sm:$0xff]  ;;  %v76_v36 = vpack.c.bf16 %v65_v29, %v64_v28  ;;  %v71_v46 = vcvt.s32.f32 %v54_v42  ;;  %v10244_v50 = vld [vmem:[%s14156_s1 + $0x14] sm:$0xff]   ;;  %s10786_s0 = smov 112  }
  0x1b   :  { %8838 = vmatpush3.bf16.msra.mxu1 %v10241_v30  ;;  %v68_v39 = vcvt.s32.f32 %v51_v34  ;;  %v69_v40 = vcvt.s32.f32 %v52_v35  ;;  %v77_v43 = vpack.c.bf16 %v67_v38, %v66_v37  ;;  %v10243_v49 = vld [vmem:[%s14156_s1 + $0x2c] sm:$0xff]   ;;  %v10922_v52 = vld [vmem:[%s14157_s2] ss:$0 sm:$0xff] }
  0x1c   :  { %8822 = vmatmul.mubr.msk.bf16.vlgmr.msra.gmra.mrb[0].mxu0 %vm80_vm2, %v73_v18  ;;  %v79_v47 = vpack.c.bf16 %v71_v46, %v70_v45  ;;  %8839 = vmatprep.subr.bf16.mxu1 %v10242_v48 }
  0x1d   :  { %8825 = vmatprep.mubr.msk.bf16.mxu0 %vm80_vm2, %v74_v21  ;;  %8860 = vmatpush3.bf16.msra.mxu0 %v10239_v24  ;;  %v78_v44 = vpack.c.bf16 %v69_v40, %v68_v39 }
  0x1e   :  { %8861 = vmatprep.subr.bf16.mxu0 %v10240_v27 }
  0x1f   :  { %8840 = vmatpush3.bf16.msra.mxu1 %v10242_v48 }
  0x20   :  { %8841 = vmatprep.subr.bf16.mxu1 %v10244_v50 }
  0x21   :  { %8862 = vmatpush3.bf16.msra.mxu0 %v10240_v27 }
  0x22   :  { %8863 = vmatprep.subr.bf16.mxu0 %v10243_v49 }
  0x23   :  { %8842 = vmatpush3.bf16.msra.mxu1 %v10244_v50 }
  0x24   :  { %8826 = vmatmul.mubr.msk.bf16.gmra.mrb[4].mxu0 %vm80_vm2, %v75_v33  ;;  %8881 = vmatprep.subr.bf16.mxu1 %v10778_v51 }
  0x25   :  { %8829 = vmatprep.mubr.msk.bf16.mxu0 %vm80_vm2, %v76_v36  ;;  %8864 = vmatpush3.bf16.msra.mxu0 %v10243_v49 }
  0x26   :  { %8925 = vmatprep.subr.bf16.mxu0 %v10778_v51 }
  0x2c   :  { %8830 = vmatmul.mubr.msk.bf16.gmra.mrb[8].mxu0 %vm80_vm2, %v77_v43 }
  0x2d   :  { %8833 = vmatprep.mubr.msk.bf16.mxu0 %vm80_vm2, %v78_v44 }
  0x34   :  { %8834 = vmatmul.mubr.msk.bf16.gmra.mrb[12].mxu0 %vm80_vm2, %v79_v47 }
  0xef   :  { %v8823_v53 = vpop.f32.mrb[0].mxu0 }
  0xf0   :  { %vm216_vm3 = vcmp.eq.f32.partialorder %v8823_v53, %v10922_v52  ;;  %v146_v54 = vpop.f32.mrb[1].mxu0 }
  0xf1   :  { %vm214_vm4 = vcmp.eq.f32.partialorder %v146_v54, %v10922_v52  ;;  %v8824_v55 = vpop.f32.mrb[2].mxu0  ;;  %v232_v57 = vsel %vm216_vm3, 1.0, %v10778_v51 }
  0xf2   :  { %vm217_vm5 = vcmp.eq.f32.partialorder %v8824_v55, %v10922_v52  ;;  %v149_v56 = vpop.f32.mrb[3].mxu0  ;;  %v230_v59 = vsel %vm214_vm4, 1.0, %v10778_v51 }
  0xf3   :  { %v233_v58 = vsel %vm217_vm5, 1.0, %v10778_v51  ;;  %vm215_vm6 = vcmp.eq.f32.partialorder %v149_v56, %v10922_v52  ;;  %vm10779_vm5 = vmmov 0  }
  0xf4   :  { %v10931_v60 = vpack.c.bf16 %v233_v58, %v232_v57  ;;  %v231_v61 = vsel %vm215_vm6, 1.0, %v10778_v51  ;;  %vm1464_vm6 = vcmask 1045504  }
  0xf5   :  { %v10934_v62 = vpack.c.bf16 %v231_v61, %v230_v59 }
  0xf7   :  { %v8827_v63 = vpop.f32.mrb[4].mxu0  ;;  %8843 = vmatprep.mubr.msk.bf16.mxu1 %vm291_vm7, %v10934_v62  ;;  %8865 = vmatprep.mubr.msk.bf16.mxu0 %vm291_vm7, %v10934_v62 }
  0xf8   :  { %vm220_vm8 = vcmp.eq.f32.partialorder %v8827_v63, %v10922_v52  ;;  %v162_v0 = vpop.f32.mrb[5].mxu0  ;;  %8844 = vmatmul.mubr.msk.bf16.vlgmr.msra.gmra.mrb[0].mxu1 %vm291_vm7, %v10931_v60  ;;  %8866 = vmatmul.mubr.msk.bf16.vlgmr.msra.gmra.mrb[16].mxu0 %vm291_vm7, %v10931_v60 }
  0xf9   :  { %vm218_vm9 = vcmp.eq.f32.partialorder %v162_v0, %v10922_v52  ;;  %v8828_v1 = vpop.f32.mrb[6].mxu0  ;;  %v236_v3 = vsel %vm220_vm8, 1.0, %v10778_v51  ;;  %vm1701_vm8 = vcmask 801792  }
  0xfa   :  { %vm221_vm10 = vcmp.eq.f32.partialorder %v8828_v1, %v10922_v52  ;;  %v165_v2 = vpop.f32.mrb[7].mxu0  ;;  %v234_v5 = vsel %vm218_vm9, 1.0, %v10778_v51  ;;  %vm2444_vm9 = vcmask 1043456  }
  0xfb   :  { %v237_v4 = vsel %vm221_vm10, 1.0, %v10778_v51  ;;  %vm219_vm11 = vcmp.eq.f32.partialorder %v165_v2, %v10922_v52  ;;  %vm2428_vm10 = vcmask 195584  }
  0xfc   :  { %v10951_v6 = vpack.c.bf16 %v237_v4, %v236_v3  ;;  %v235_v7 = vsel %vm219_vm11, 1.0, %v10778_v51  ;;  %vm2531_vm11 = vcmask 261120  }
  0xfd   :  { %v10954_v8 = vpack.c.bf16 %v235_v7, %v234_v5 }
  0xff   :  { %v8831_v9 = vpop.f32.mrb[8].mxu0  ;;  %8847 = vmatprep.mubr.msk.bf16.mxu1 %vm291_vm7, %v10954_v8  ;;  %8869 = vmatprep.mubr.msk.bf16.mxu0 %vm291_vm7, %v10954_v8 }
 0x100   :  { %vm224_vm12 = vcmp.eq.f32.partialorder %v8831_v9, %v10922_v52  ;;  %v178_v10 = vpop.f32.mrb[9].mxu0  ;;  %8848 = vmatmul.mubr.msk.bf16.gmra.mrb[4].mxu1 %vm291_vm7, %v10951_v6  ;;  %8870 = vmatmul.mubr.msk.bf16.gmra.mrb[20].mxu0 %vm291_vm7, %v10951_v6 }
 0x101   :  { %vm222_vm13 = vcmp.eq.f32.partialorder %v178_v10, %v10922_v52  ;;  %v8832_v11 = vpop.f32.mrb[10].mxu0  ;;  %v240_v13 = vsel %vm224_vm12, 1.0, %v10778_v51  ;;  %vm2813_vm12 = vcmask 64512  }
 0x102   :  { %vm225_vm14 = vcmp.eq.f32.partialorder %v8832_v11, %v10922_v52  ;;  %v181_v12 = vpop.f32.mrb[11].mxu0  ;;  %v238_v15 = vsel %vm222_vm13, 1.0, %v10778_v51  ;;  %vm2925_vm13 = vcmask 588800  }
 0x103   :  { %v241_v14 = vsel %vm225_vm14, 1.0, %v10778_v51  ;;  %vm223_vm15 = vcmp.eq.f32.partialorder %v181_v12, %v10922_v52  ;;  %vm7537_vm14 = vcmask 257024  }
 0x104   :  { %v10971_v16 = vpack.c.bf16 %v241_v14, %v240_v13  ;;  %v239_v17 = vsel %vm223_vm15, 1.0, %v10778_v51  ;;  %vm7549_vm15 = vcmask 261124  }
 0x105   :  { %v10974_v18 = vpack.c.bf16 %v239_v17, %v238_v15 }
 0x107   :  { %v8835_v19 = vpop.f32.mrb[12].mxu0  ;;  %8851 = vmatprep.mubr.msk.bf16.mxu1 %vm291_vm7, %v10974_v18  ;;  %8873 = vmatprep.mubr.msk.bf16.mxu0 %vm291_vm7, %v10974_v18 }
 0x108   :  { %vm228_vm1 = vcmp.eq.f32.partialorder %v8835_v19, %v10922_v52  ;;  %v194_v20 = vpop.f32.mrb[13].mxu0  ;;  %8852 = vmatmul.mubr.msk.bf16.gmra.mrb[8].mxu1 %vm291_vm7, %v10971_v16  ;;  %8874 = vmatmul.mubr.msk.bf16.gmra.mrb[24].mxu0 %vm291_vm7, %v10971_v16 }
 0x109   :  { %vm226_vm2 = vcmp.eq.f32.partialorder %v194_v20, %v10922_v52  ;;  %v8836_v21 = vpop.f32.mrb[14].mxu0  ;;  %v244_v23 = vsel %vm228_vm1, 1.0, %v10778_v51  ;;  %v10247_v20 = vld [vmem:[%s14156_s1 + $0x34] sm:$0xff]  }
 0x10a   :  { %vm229_vm3 = vcmp.eq.f32.partialorder %v8836_v21, %v10922_v52  ;;  %v197_v22 = vpop.f32.mrb[15].mxu0  ;;  %v242_v25 = vsel %vm226_vm2, 1.0, %v10778_v51  ;;  %v10245_v21 = vld [vmem:[%s14159_s4 + $0x34] sm:$0xff]  }
 0x10b   :  { %v245_v24 = vsel %vm229_vm3, 1.0, %v10778_v51  ;;  %vm227_vm4 = vcmp.eq.f32.partialorder %v197_v22, %v10922_v52  ;;  %v10246_v22 = vld [vmem:[%s14159_s4] sm:$0xff]  }
 0x10c   :  { %v10991_v26 = vpack.c.bf16 %v245_v24, %v244_v23  ;;  %v243_v27 = vsel %vm227_vm4, 1.0, %v10778_v51  ;;  %v10254_v23 = vld [vmem:[%s14156_s1 + $0x3c] sm:$0xff]   ;;  %v10259_v24 = vld [vmem:[%s14156_s1 + $0x44] sm:$0xff]  }
 0x10d   :  { %v10994_v28 = vpack.c.bf16 %v243_v27, %v242_v25  ;;  %v10248_v25 = vld [vmem:[%s14159_s4 + $0x3c] sm:$0xff]   ;;  %v10249_v27 = vld [vmem:[%s14159_s4 + $0x8] sm:$0xff]  }
 0x10f   :  { %8855 = vmatprep.mubr.msk.bf16.mxu1 %vm291_vm7, %v10994_v28  ;;  %8877 = vmatprep.mubr.msk.bf16.mxu0 %vm291_vm7, %v10994_v28 }
 0x110   :  { %8856 = vmatmul.mubr.msk.bf16.gmra.mrb[12].mxu1 %vm291_vm7, %v10991_v26  ;;  %8878 = vmatmul.mubr.msk.bf16.gmra.mrb[28].mxu0 %vm291_vm7, %v10991_v26 }
 0x111   :  { %8897 = vmatprep.mubr.msk.bf16.mxu1 %vm10779_vm5, %v10778_v51  ;;  %8941 = vmatprep.mubr.msk.bf16.mxu0 %vm10779_vm5, %v10778_v51 }
 0x1cb   :  { %v8845_v29 = vpop.f32.mrb[0].mxu1  ;;  %v8867_v30 = vpop.f32.mrb[16].mxu0 }
 0x1cc   :  { %v350_v31 = vpop.f32.mrb[1].mxu1  ;;  %v493_v32 = vpop.f32.mrb[17].mxu0 }
 0x1cd   :  { %v8846_v33 = vpop.f32.mrb[2].mxu1  ;;  %v8868_v34 = vpop.f32.mrb[18].mxu0 }
 0x1ce   :  { %v414_v35 = vpack.c.bf16 %v8846_v33, %v8845_v29  ;;  %v557_v36 = vpack.c.bf16 %v8868_v34, %v8867_v30  ;;  %v353_v37 = vpop.f32.mrb[3].mxu1  ;;  %v496_v38 = vpop.f32.mrb[19].mxu0  ;;  %v10262_v29 = vld [vmem:[%s14156_s1 + $0x4c] sm:$0xff]   ;;  %v10250_v30 = vld [vmem:[%s14159_s4 + $0x44] sm:$0xff]   ;;  %v10253_v33 = vld [vmem:[%s14159_s4 + $0x18] sm:$0xff]  }
 0x1cf   :  { %v413_v39 = vpack.c.bf16 %v353_v37, %v350_v31  ;;  %v556_v40 = vpack.c.bf16 %v496_v38, %v493_v32  ;;  %v10251_v31 = vld [vmem:[%s14159_s4 + $0x10] sm:$0xff]   ;;  %v10258_v37 = vld [vmem:[%s14159_s4 + $0x28] sm:$0xff]   ;;  %v10260_v38 = vld [vmem:[%s14159_s4 + $0x64] ss:$0 sps:$4 sm:$0x11]  }
 0x1d0   :  { %v10252_v32 = vld [vmem:[%s14159_s4 + $0x4c] sm:$0xff]   ;;  %v10255_v34 = vld [vmem:[%s14159_s4 + $0x54] sm:$0xff]  }
 0x1d1   :  { %8882 = vmatpush3.bf16.msra.mxu1 %v556_v40  ;;  %8926 = vmatpush3.bf16.msra.mxu0 %v413_v39  ;;  %v10261_v39 = vld [vmem:[%s14159_s4 + $0x30] ss:$0 sps:$4 sm:$0x11]   ;;  %v10263_v40 = vld [vmem:[%s14156_s1 + $0x54] sm:$0xff]  }
 0x1d2   :  { %8883 = vmatprep.subr.bf16.mxu1 %v10778_v51  ;;  %8927 = vmatprep.subr.bf16.mxu0 %v10778_v51 }
 0x1d3   :  { %v8849_v41 = vpop.f32.mrb[4].mxu1  ;;  %v8871_v42 = vpop.f32.mrb[20].mxu0 }
 0x1d4   :  { %v366_v43 = vpop.f32.mrb[5].mxu1  ;;  %v509_v44 = vpop.f32.mrb[21].mxu0 }
 0x1d5   :  { %v8850_v45 = vpop.f32.mrb[6].mxu1  ;;  %v8872_v46 = vpop.f32.mrb[22].mxu0  ;;  %8884 = vmatpush3.bf16.msra.mxu1 %v557_v36  ;;  %8928 = vmatpush3.bf16.msra.mxu0 %v414_v35  ;;  %v10256_v35 = vld [vmem:[%s14159_s4 + $0x20] sm:$0xff]  }
 0x1d6   :  { %v416_v47 = vpack.c.bf16 %v8850_v45, %v8849_v41  ;;  %v559_v48 = vpack.c.bf16 %v8872_v46, %v8871_v42  ;;  %v369_v49 = vpop.f32.mrb[7].mxu1  ;;  %v512_v50 = vpop.f32.mrb[23].mxu0  ;;  %8885 = vmatprep.subr.bf16.mxu1 %v10778_v51  ;;  %8929 = vmatprep.subr.bf16.mxu0 %v10778_v51  ;;  %v10257_v36 = vld [vmem:[%s14159_s4 + $0x5c] sm:$0xff]  }
 0x1d7   :  { %v415_v52 = vpack.c.bf16 %v369_v49, %v366_v43  ;;  %v558_v53 = vpack.c.bf16 %v512_v50, %v509_v44  ;;  %v10264_v41 = vld [vmem:[%s14156_s1 + $0x5c] sm:$0xff]  }
 0x1d9   :  { %8886 = vmatpush3.bf16.msra.mxu1 %v558_v53  ;;  %8930 = vmatpush3.bf16.msra.mxu0 %v415_v52 }
 0x1da   :  { %8887 = vmatprep.subr.bf16.mxu1 %v10778_v51  ;;  %8931 = vmatprep.subr.bf16.mxu0 %v10778_v51 }
 0x1db   :  { %v8853_v54 = vpop.f32.mrb[8].mxu1  ;;  %v8875_v55 = vpop.f32.mrb[24].mxu0 }
 0x1dc   :  { %v382_v56 = vpop.f32.mrb[9].mxu1  ;;  %v525_v57 = vpop.f32.mrb[25].mxu0 }
 0x1dd   :  { %v8854_v58 = vpop.f32.mrb[10].mxu1  ;;  %v8876_v59 = vpop.f32.mrb[26].mxu0  ;;  %8888 = vmatpush3.bf16.msra.mxu1 %v559_v48  ;;  %8932 = vmatpush3.bf16.msra.mxu0 %v416_v47 }
 0x1de   :  { %v418_v61 = vpack.c.bf16 %v8854_v58, %v8853_v54  ;;  %v561_v63 = vpack.c.bf16 %v8876_v59, %v8875_v55  ;;  %v385_v0 = vpop.f32.mrb[11].mxu1  ;;  %v528_v1 = vpop.f32.mrb[27].mxu0  ;;  %8889 = vmatprep.subr.bf16.mxu1 %v10778_v51  ;;  %8933 = vmatprep.subr.bf16.mxu0 %v10778_v51 }
 0x1df   :  { %v417_v2 = vpack.c.bf16 %v385_v0, %v382_v56  ;;  %v560_v3 = vpack.c.bf16 %v528_v1, %v525_v57 }
 0x1e1   :  { %8890 = vmatpush3.bf16.msra.mxu1 %v560_v3  ;;  %8934 = vmatpush3.bf16.msra.mxu0 %v417_v2 }
 0x1e2   :  { %8891 = vmatprep.subr.bf16.mxu1 %v10778_v51  ;;  %8935 = vmatprep.subr.bf16.mxu0 %v10778_v51 }
 0x1e3   :  { %v8857_v4 = vpop.f32.mrb[12].mxu1  ;;  %v8879_v5 = vpop.f32.mrb[28].mxu0 }
 0x1e4   :  { %v398_v7 = vpop.f32.mrb[13].mxu1  ;;  %v541_v9 = vpop.f32.mrb[29].mxu0 }
 0x1e5   :  { %v8858_v10 = vpop.f32.mrb[14].mxu1  ;;  %v8880_v11 = vpop.f32.mrb[30].mxu0  ;;  %8892 = vmatpush3.bf16.msra.mxu1 %v561_v63  ;;  %8936 = vmatpush3.bf16.msra.mxu0 %v418_v61 }
 0x1e6   :  { %v420_v12 = vpack.c.bf16 %v8858_v10, %v8857_v4  ;;  %v563_v13 = vpack.c.bf16 %v8880_v11, %v8879_v5  ;;  %v401_v14 = vpop.f32.mrb[15].mxu1  ;;  %v544_v15 = vpop.f32.mrb[31].mxu0  ;;  %8893 = vmatprep.subr.bf16.mxu1 %v10778_v51  ;;  %8937 = vmatprep.subr.bf16.mxu0 %v10778_v51 }
 0x1e7   :  { %v419_v17 = vpack.c.bf16 %v401_v14, %v398_v7  ;;  %v562_v19 = vpack.c.bf16 %v544_v15, %v541_v9 }
 0x1e9   :  { %8894 = vmatpush3.bf16.msra.mxu1 %v562_v19  ;;  %8938 = vmatpush3.bf16.msra.mxu0 %v419_v17 }
 0x1ea   :  { %8895 = vmatprep.subr.bf16.mxu1 %v10778_v51  ;;  %8939 = vmatprep.subr.bf16.mxu0 %v10778_v51 }
 0x1ed   :  { %8896 = vmatpush3.bf16.msra.mxu1 %v563_v13  ;;  %8940 = vmatpush3.bf16.msra.mxu0 %v420_v12 }
 0x1ee   :  { %8969 = vmatprep.subr.bf16.mxu1 %v10247_v20  ;;  %8991 = vmatprep.subr.bf16.mxu0 %v10778_v51 }
 0x1f0   :  { %8898 = vmatmul.mubr.bf16.vlgmr.msra.gmra.mrb[16].mxu1 %v10245_v21  ;;  %8942 = vmatmul.mubr.bf16.vlgmr.msra.gmra.mrb[32].mxu0 %v10246_v22 }
 0x1f1   :  { %8970 = vmatpush3.bf16.msra.mxu1 %v10247_v20  ;;  %8901 = vmatprep.mubr.msk.bf16.mxu1 %vm10779_vm5, %v10778_v51 }
 0x1f2   :  { %8945 = vmatprep.mubr.msk.bf16.mxu0 %vm10779_vm5, %v10778_v51  ;;  %8971 = vmatprep.subr.bf16.mxu1 %v10254_v23 }
 0x1f5   :  { %8972 = vmatpush3.bf16.msra.mxu1 %v10254_v23 }
 0x1f6   :  { %8973 = vmatprep.subr.bf16.mxu1 %v10259_v24 }
 0x1f8   :  { %8902 = vmatmul.mubr.bf16.gmra.mrb[20].mxu1 %v10248_v25  ;;  %8946 = vmatmul.mubr.bf16.gmra.mrb[36].mxu0 %v10249_v27 }
 0x1f9   :  { %8905 = vmatprep.mubr.msk.bf16.mxu1 %vm10779_vm5, %v10778_v51  ;;  %8949 = vmatprep.mubr.msk.bf16.mxu0 %vm10779_vm5, %v10778_v51 }
 0x1fa   :  { %8974 = vmatpush3.bf16.msra.mxu1 %v10259_v24 }
 0x1fb   :  { %9035 = vmatprep.subr.bf16.mxu1 %v10262_v29 }
 0x200   :  { %8906 = vmatmul.mubr.bf16.gmra.mrb[24].mxu1 %v10250_v30  ;;  %8950 = vmatmul.mubr.bf16.gmra.mrb[40].mxu0 %v10251_v31 }
 0x201   :  { %8909 = vmatprep.mubr.msk.bf16.mxu1 %vm10779_vm5, %v10778_v51  ;;  %8953 = vmatprep.mubr.msk.bf16.mxu0 %vm10779_vm5, %v10778_v51 }
 0x208   :  { %8910 = vmatmul.mubr.bf16.gmra.mrb[28].mxu1 %v10252_v32  ;;  %8954 = vmatmul.mubr.bf16.gmra.mrb[44].mxu0 %v10253_v33 }
 0x209   :  { %8913 = vmatprep.mubr.msk.bf16.mxu1 %vm10779_vm5, %v10778_v51  ;;  %8957 = vmatprep.mubr.msk.bf16.mxu0 %vm10779_vm5, %v10778_v51 }
 0x210   :  { %8914 = vmatmul.mubr.bf16.gmra.mrb[32].mxu1 %v10255_v34  ;;  %8958 = vmatmul.mubr.bf16.gmra.mrb[48].mxu0 %v10256_v35 }
 0x211   :  { %8917 = vmatprep.mubr.msk.bf16.mxu1 %vm10779_vm5, %v10778_v51  ;;  %8961 = vmatprep.mubr.msk.bf16.mxu0 %vm10779_vm5, %v10778_v51 }
 0x218   :  { %8918 = vmatmul.mubr.bf16.gmra.mrb[36].mxu1 %v10257_v36  ;;  %8962 = vmatmul.mubr.bf16.gmra.mrb[52].mxu0 %v10258_v37 }
 0x219   :  { %8921 = vmatprep.mubr.msk.bf16.mxu1 %vm10779_vm5, %v10778_v51  ;;  %8965 = vmatprep.mubr.msk.bf16.mxu0 %vm10779_vm5, %v10778_v51 }
 0x220   :  { %8922 = vmatmul.mubr.bf16.gmra.mrb[40].mxu1 %v10260_v38  ;;  %8966 = vmatmul.mubr.bf16.gmra.mrb[56].mxu0 %v10261_v39 }
 0x221   :  { %8975 = vmatprep.mubr.msk.bf16.mxu1 %vm291_vm7, %v10934_v62  ;;  %9007 = vmatprep.mubr.msk.bf16.mxu0 %vm10779_vm5, %v10778_v51 }
 0x228   :  { %8976 = vmatmul.mubr.msk.bf16.vlgmr.msra.gmra.mrb[44].mxu1 %vm291_vm7, %v10931_v60 }
 0x229   :  { %8979 = vmatprep.mubr.msk.bf16.mxu1 %vm291_vm7, %v10954_v8  ;;  %9036 = vmatpush3.bf16.msra.mxu1 %v10262_v29 }
 0x22a   :  { %9037 = vmatprep.subr.bf16.mxu1 %v10263_v40 }
 0x22d   :  { %9038 = vmatpush3.bf16.msra.mxu1 %v10263_v40 }
 0x22e   :  { %9039 = vmatprep.subr.bf16.mxu1 %v10264_v41 }
 0x230   :  { %8980 = vmatmul.mubr.msk.bf16.gmra.mrb[48].mxu1 %vm291_vm7, %v10951_v6 }
 0x231   :  { %8983 = vmatprep.mubr.msk.bf16.mxu1 %vm291_vm7, %v10974_v18  ;;  %9040 = vmatpush3.bf16.msra.mxu1 %v10264_v41 }
 0x232   :  { %9057 = vmatprep.subr.bf16.mxu1 %v10778_v51 }
 0x238   :  { %8984 = vmatmul.mubr.msk.bf16.gmra.mrb[52].mxu1 %vm291_vm7, %v10971_v16 }
 0x239   :  { %8987 = vmatprep.mubr.msk.bf16.mxu1 %vm291_vm7, %v10994_v28 }
 0x240   :  { %8988 = vmatmul.mubr.msk.bf16.gmra.mrb[56].mxu1 %vm291_vm7, %v10991_v26 }
 0x241   :  { %9041 = vmatprep.mubr.msk.bf16.mxu1 %vm291_vm7, %v10934_v62 }
 0x248   :  { %9042 = vmatmul.mubr.msk.bf16.vlgmr.msra.gmra.mrb[60].mxu1 %vm291_vm7, %v10931_v60 }
 0x249   :  { %9045 = vmatprep.mubr.msk.bf16.mxu1 %vm291_vm7, %v10954_v8 }
 0x250   :  { %9046 = vmatmul.mubr.msk.bf16.gmra.mrb[64].mxu1 %vm291_vm7, %v10951_v6 }
 0x251   :  { %9049 = vmatprep.mubr.msk.bf16.mxu1 %vm291_vm7, %v10974_v18 }
 0x258   :  { %9050 = vmatmul.mubr.msk.bf16.gmra.mrb[68].mxu1 %vm291_vm7, %v10971_v16 }
 0x259   :  { %9053 = vmatprep.mubr.msk.bf16.mxu1 %vm291_vm7, %v10994_v28 }
 0x260   :  { %9054 = vmatmul.mubr.msk.bf16.gmra.mrb[72].mxu1 %vm291_vm7, %v10991_v26  ;;  %vm1442_vm7 = vcmask 97280  }
 0x261   :  { %9073 = vmatprep.mubr.msk.bf16.mxu1 %vm10779_vm5, %v10778_v51 }
 0x2c3   :  { %v638_v60 = vpop.f32.mrb[16].mxu1  ;;  %v766_v62 = vpop.f32.mrb[32].mxu0 }
 0x2c4   :  { %v11144_v8 = vadd.f32 %v766_v62, %v638_v60  ;;  %v8899_v6 = vpop.f32.mrb[17].mxu1  ;;  %v8943_v42 = vpop.f32.mrb[33].mxu0 }
 0x2c5   :  { %v641_v43 = vpop.f32.mrb[18].mxu1  ;;  %v769_v18 = vpop.f32.mrb[34].mxu0 }
 0x2c6   :  { %v11146_v44 = vadd.f32 %v769_v18, %v641_v43  ;;  %v8900_v16 = vpop.f32.mrb[19].mxu1  ;;  %v8944_v45 = vpop.f32.mrb[35].mxu0 }
 0x2cb   :  { %v646_v46 = vpop.f32.mrb[20].mxu1  ;;  %v774_v28 = vpop.f32.mrb[36].mxu0 }
 0x2cc   :  { %v11148_v47 = vadd.f32 %v774_v28, %v646_v46  ;;  %v8903_v26 = vpop.f32.mrb[21].mxu1  ;;  %v8947_v48 = vpop.f32.mrb[37].mxu0 }
 0x2cd   :  { %v649_v49 = vpop.f32.mrb[22].mxu1  ;;  %v777_v50 = vpop.f32.mrb[38].mxu0 }
 0x2ce   :  { %v11150_v52 = vadd.f32 %v777_v50, %v649_v49  ;;  %v8904_v53 = vpop.f32.mrb[23].mxu1  ;;  %v8948_v54 = vpop.f32.mrb[39].mxu0 }
 0x2d3   :  { %v654_v55 = vpop.f32.mrb[24].mxu1  ;;  %v782_v56 = vpop.f32.mrb[40].mxu0 }
 0x2d4   :  { %v11152_v57 = vadd.f32 %v782_v56, %v654_v55  ;;  %v8907_v58 = vpop.f32.mrb[25].mxu1  ;;  %v8951_v59 = vpop.f32.mrb[41].mxu0 }
 0x2d5   :  { %v657_v61 = vpop.f32.mrb[26].mxu1  ;;  %v785_v63 = vpop.f32.mrb[42].mxu0 }
 0x2d6   :  { %v11154_v0 = vadd.f32 %v785_v63, %v657_v61  ;;  %v8908_v1 = vpop.f32.mrb[27].mxu1  ;;  %v8952_v2 = vpop.f32.mrb[43].mxu0 }
 0x2db   :  { %v662_v3 = vpop.f32.mrb[28].mxu1  ;;  %v790_v4 = vpop.f32.mrb[44].mxu0 }
 0x2dc   :  { %v11156_v5 = vadd.f32 %v790_v4, %v662_v3  ;;  %v8911_v7 = vpop.f32.mrb[29].mxu1  ;;  %v8955_v9 = vpop.f32.mrb[45].mxu0 }
 0x2dd   :  { %v665_v10 = vpop.f32.mrb[30].mxu1  ;;  %v793_v11 = vpop.f32.mrb[46].mxu0 }
 0x2de   :  { %v11158_v12 = vadd.f32 %v793_v11, %v665_v10  ;;  %v8912_v13 = vpop.f32.mrb[31].mxu1  ;;  %v8956_v14 = vpop.f32.mrb[47].mxu0 }
 0x2e3   :  { %v670_v15 = vpop.f32.mrb[32].mxu1  ;;  %v798_v17 = vpop.f32.mrb[48].mxu0 }
 0x2e4   :  { %v11160_v19 = vadd.f32 %v798_v17, %v670_v15  ;;  %v8915_v20 = vpop.f32.mrb[33].mxu1  ;;  %v8959_v21 = vpop.f32.mrb[49].mxu0  ;;  %v10265_v15 = vld [vmem:[%s14159_s4 + $0x68] sm:$0xff]  }
 0x2e5   :  { %v673_v22 = vpop.f32.mrb[34].mxu1  ;;  %v801_v23 = vpop.f32.mrb[50].mxu0 }
 0x2e6   :  { %v11162_v24 = vadd.f32 %v801_v23, %v673_v22  ;;  %v8916_v25 = vpop.f32.mrb[35].mxu1  ;;  %v8960_v27 = vpop.f32.mrb[51].mxu0 }
 0x2e7   :  { %v10266_v27 = vld [vmem:[%s14159_s4 + $0x70] sm:$0xff]  }
 0x2eb   :  { %v678_v29 = vpop.f32.mrb[36].mxu1  ;;  %v806_v30 = vpop.f32.mrb[52].mxu0 }
 0x2ec   :  { %v11164_v31 = vadd.f32 %v806_v30, %v678_v29  ;;  %v8919_v32 = vpop.f32.mrb[37].mxu1  ;;  %v8963_v33 = vpop.f32.mrb[53].mxu0 }
 0x2ed   :  { %v681_v34 = vpop.f32.mrb[38].mxu1  ;;  %v809_v35 = vpop.f32.mrb[54].mxu0 }
 0x2ee   :  { %v11166_v36 = vadd.f32 %v809_v35, %v681_v34  ;;  %v8920_v37 = vpop.f32.mrb[39].mxu1  ;;  %v8964_v38 = vpop.f32.mrb[55].mxu0 }
 0x2ef   :  { %v10267_v37 = vld [vmem:[%s14159_s4 + $0x78] sm:$0xff]  }
 0x2f3   :  { %v686_v39 = vpop.f32.mrb[40].mxu1  ;;  %v814_v40 = vpop.f32.mrb[56].mxu0 }
 0x2f4   :  { %v11168_v41 = vadd.f32 %v814_v40, %v686_v39  ;;  %v8923_v60 = vpop.f32.mrb[41].mxu1  ;;  %v8967_v62 = vpop.f32.mrb[57].mxu0 }
 0x2f5   :  { %v689_v6 = vpop.f32.mrb[42].mxu1  ;;  %v817_v42 = vpop.f32.mrb[58].mxu0 }
 0x2f6   :  { %v8924_v43 = vpop.f32.mrb[43].mxu1  ;;  %v8968_v18 = vpop.f32.mrb[59].mxu0  ;;  %v10268_v42 = vld [vmem:[%s14159_s4 + $0x80] sm:$0xff]  }
 0x2fb   :  { %v8977_v16 = vpop.f32.mrb[44].mxu1 }
 0x2fc   :  { %v892_v45 = vpop.f32.mrb[45].mxu1 }
 0x2fd   :  { %v8978_v46 = vpop.f32.mrb[46].mxu1 }
 0x2fe   :  { %v956_v28 = vpack.c.bf16 %v8978_v46, %v8977_v16  ;;  %v895_v26 = vpop.f32.mrb[47].mxu1  ;;  %v10279_v46 = vld [vmem:[%s14156_s1 + $0x6c] sm:$0x3f]  }
 0x2ff   :  { %v955_v48 = vpack.c.bf16 %v895_v26, %v892_v45  ;;  %v10270_v26 = vld [vmem:[%s14159_s4 + $0x9c] sm:$0xff]  }
 0x301   :  { %8992 = vmatpush3.bf16.msra.mxu0 %v955_v48  ;;  %v1581_v48 = vsel %vm1464_vm6, %v10279_v46, 0 }
 0x302   :  { %8993 = vmatprep.subr.bf16.mxu0 %v10778_v51 }
 0x303   :  { %v8981_v49 = vpop.f32.mrb[48].mxu1 }
 0x304   :  { %v908_v50 = vpop.f32.mrb[49].mxu1 }
 0x305   :  { %v8982_v53 = vpop.f32.mrb[50].mxu1  ;;  %8994 = vmatpush3.bf16.msra.mxu0 %v956_v28  ;;  %v10269_v28 = vld [vmem:[%s14159_s4 + $0x88] sm:$0xff]  }
 0x306   :  { %v958_v54 = vpack.c.bf16 %v8982_v53, %v8981_v49  ;;  %v911_v55 = vpop.f32.mrb[51].mxu1  ;;  %8995 = vmatprep.subr.bf16.mxu0 %v10778_v51  ;;  %v10271_v49 = vld [vmem:[%s14159_s4 + $0x90] sm:$0xff]   ;;  %v10273_v53 = vld [vmem:[%s14159_s4 + $0x98] ss:$0 sps:$4 sm:$0x11]  }
 0x307   :  { %v957_v56 = vpack.c.bf16 %v911_v55, %v908_v50  ;;  %v10272_v50 = vld [vmem:[%s14159_s4 + $0xa4] sm:$0xff]   ;;  %v10275_v55 = vld [vmem:[%s14159_s4 + $0xb4] sm:$0xff]  }
 0x309   :  { %8996 = vmatpush3.bf16.msra.mxu0 %v957_v56  ;;  %v10276_v56 = vld [vmem:[%s14159_s4 + $0xbc] sm:$0xff]  }
 0x30a   :  { %8997 = vmatprep.subr.bf16.mxu0 %v10778_v51 }
 0x30b   :  { %v8985_v58 = vpop.f32.mrb[52].mxu1 }
 0x30c   :  { %v924_v59 = vpop.f32.mrb[53].mxu1 }
 0x30d   :  { %v8986_v61 = vpop.f32.mrb[54].mxu1  ;;  %8998 = vmatpush3.bf16.msra.mxu0 %v958_v54  ;;  %v10274_v54 = vld [vmem:[%s14159_s4 + $0xac] sm:$0xff]  }
 0x30e   :  { %v960_v63 = vpack.c.bf16 %v8986_v61, %v8985_v58  ;;  %v927_v1 = vpop.f32.mrb[55].mxu1  ;;  %8999 = vmatprep.subr.bf16.mxu0 %v10778_v51  ;;  %v10277_v58 = vld [vmem:[%s14159_s4 + $0xc4] sm:$0xff]  }
 0x30f   :  { %v959_v2 = vpack.c.bf16 %v927_v1, %v924_v59  ;;  %v10278_v59 = vld [vmem:[%s14159_s4 + $0xcc] ss:$0 sps:$4 sm:$0x11]   ;;  %v10280_v61 = vld [vmem:[%s14156_s1 + $0x64] sm:$0x3f]   ;;  %s10783_s4 = smov 64  }
 0x311   :  { %9000 = vmatpush3.bf16.msra.mxu0 %v959_v2 }
 0x312   :  { %9001 = vmatprep.subr.bf16.mxu0 %v10778_v51 }
 0x313   :  { %v8989_v3 = vpop.f32.mrb[56].mxu1 }
 0x314   :  { %v940_v4 = vpop.f32.mrb[57].mxu1 }
 0x315   :  { %v8990_v7 = vpop.f32.mrb[58].mxu1  ;;  %9002 = vmatpush3.bf16.msra.mxu0 %v960_v63  ;;  %v1466_v63 = vsel %vm1464_vm6, %v10280_v61, 0 }
 0x316   :  { %v962_v9 = vpack.c.bf16 %v8990_v7, %v8989_v3  ;;  %v943_v10 = vpop.f32.mrb[59].mxu1  ;;  %9003 = vmatprep.subr.bf16.mxu0 %v10778_v51 }
 0x317   :  { %v961_v11 = vpack.c.bf16 %v943_v10, %v940_v4 }
 0x319   :  { %9004 = vmatpush3.bf16.msra.mxu0 %v961_v11 }
 0x31a   :  { %9005 = vmatprep.subr.bf16.mxu0 %v10778_v51 }
 0x31b   :  { %v9043_v13 = vpop.f32.mrb[60].mxu1 }
 0x31c   :  { %v1176_v14 = vpop.f32.mrb[61].mxu1 }
 0x31d   :  { %9006 = vmatpush3.bf16.msra.mxu0 %v962_v9  ;;  %v9044_v17 = vpop.f32.mrb[62].mxu1 }
 0x31e   :  { %v1240_v20 = vpack.c.bf16 %v9044_v17, %v9043_v13  ;;  %v1179_v21 = vpop.f32.mrb[63].mxu1  ;;  %9101 = vmatprep.subr.bf16.mxu0 %v10778_v51 }
 0x31f   :  { %v1239_v22 = vpack.c.bf16 %v1179_v21, %v1176_v14 }
 0x320   :  { %9008 = vmatmul.mubr.bf16.vlgmr.msra.gmra.mrb[60].mxu0 %v10265_v15 }
 0x321   :  { %9058 = vmatpush3.bf16.msra.mxu1 %v1239_v22  ;;  %9011 = vmatprep.mubr.msk.bf16.mxu0 %vm10779_vm5, %v10778_v51 }
 0x322   :  { %9059 = vmatprep.subr.bf16.mxu1 %v10778_v51  ;;  %9102 = vmatpush3.bf16.msra.mxu0 %v1466_v63 }
 0x323   :  { %v9047_v23 = vpop.f32.mrb[64].mxu1  ;;  %9161 = vmatprep.subr.bf16.mxu0 %v10778_v51 }
 0x324   :  { %v1192_v25 = vpop.f32.mrb[65].mxu1 }
 0x325   :  { %v9048_v29 = vpop.f32.mrb[66].mxu1  ;;  %9060 = vmatpush3.bf16.msra.mxu1 %v1240_v20 }
 0x326   :  { %v1242_v30 = vpack.c.bf16 %v9048_v29, %v9047_v23  ;;  %v1195_v32 = vpop.f32.mrb[67].mxu1  ;;  %9061 = vmatprep.subr.bf16.mxu1 %v10778_v51 }
 0x327   :  { %v1241_v33 = vpack.c.bf16 %v1195_v32, %v1192_v25 }
 0x328   :  { %9012 = vmatmul.mubr.bf16.gmra.mrb[64].mxu0 %v10266_v27 }
 0x329   :  { %9062 = vmatpush3.bf16.msra.mxu1 %v1241_v33  ;;  %9015 = vmatprep.mubr.msk.bf16.mxu0 %vm10779_vm5, %v10778_v51 }
 0x32a   :  { %9063 = vmatprep.subr.bf16.mxu1 %v10778_v51 }
 0x32b   :  { %v9051_v34 = vpop.f32.mrb[68].mxu1 }
 0x32c   :  { %v1208_v35 = vpop.f32.mrb[69].mxu1 }
 0x32d   :  { %v9052_v38 = vpop.f32.mrb[70].mxu1  ;;  %9064 = vmatpush3.bf16.msra.mxu1 %v1242_v30 }
 0x32e   :  { %v1244_v39 = vpack.c.bf16 %v9052_v38, %v9051_v34  ;;  %v1211_v40 = vpop.f32.mrb[71].mxu1  ;;  %9065 = vmatprep.subr.bf16.mxu1 %v10778_v51 }
 0x32f   :  { %v1243_v60 = vpack.c.bf16 %v1211_v40, %v1208_v35 }
 0x330   :  { %9016 = vmatmul.mubr.bf16.gmra.mrb[68].mxu0 %v10267_v37 }
 0x331   :  { %9066 = vmatpush3.bf16.msra.mxu1 %v1243_v60  ;;  %9019 = vmatprep.mubr.msk.bf16.mxu0 %vm10779_vm5, %v10778_v51 }
 0x332   :  { %9067 = vmatprep.subr.bf16.mxu1 %v10778_v51 }
 0x333   :  { %v9055_v62 = vpop.f32.mrb[72].mxu1 }
 0x334   :  { %v1224_v6 = vpop.f32.mrb[73].mxu1 }
 0x335   :  { %v9056_v43 = vpop.f32.mrb[74].mxu1  ;;  %9068 = vmatpush3.bf16.msra.mxu1 %v1244_v39 }
 0x336   :  { %v1246_v18 = vpack.c.bf16 %v9056_v43, %v9055_v62  ;;  %v1227_v16 = vpop.f32.mrb[75].mxu1  ;;  %9069 = vmatprep.subr.bf16.mxu1 %v10778_v51 }
 0x337   :  { %v1245_v45 = vpack.c.bf16 %v1227_v16, %v1224_v6 }
 0x338   :  { %9020 = vmatmul.mubr.bf16.gmra.mrb[72].mxu0 %v10268_v42 }
 0x339   :  { %9070 = vmatpush3.bf16.msra.mxu1 %v1245_v45  ;;  %9023 = vmatprep.mubr.msk.bf16.mxu0 %vm10779_vm5, %v10778_v51 }
 0x33a   :  { %9071 = vmatprep.subr.bf16.mxu1 %v10778_v51 }
 0x33d   :  { %9072 = vmatpush3.bf16.msra.mxu1 %v1246_v18 }
 0x33e   :  { %9131 = vmatprep.subr.bf16.mxu1 %v10778_v51 }
 0x340   :  { %9024 = vmatmul.mubr.bf16.gmra.mrb[76].mxu0 %v10269_v28  ;;  %9074 = vmatmul.mubr.bf16.vlgmr.msra.gmra.mrb[76].mxu1 %v10270_v26 }
 0x341   :  { %9027 = vmatprep.mubr.msk.bf16.mxu0 %vm10779_vm5, %v10778_v51  ;;  %9077 = vmatprep.mubr.msk.bf16.mxu1 %vm10779_vm5, %v10778_v51 }
 0x342   :  { %9132 = vmatpush3.bf16.msra.mxu1 %v1581_v48 }
 0x343   :  { %9229 = vmatprep.subr.bf16.mxu1 %v10778_v51 }
 0x348   :  { %9028 = vmatmul.mubr.bf16.gmra.mrb[80].mxu0 %v10271_v49  ;;  %9078 = vmatmul.mubr.bf16.gmra.mrb[80].mxu1 %v10272_v50 }
 0x349   :  { %9031 = vmatprep.mubr.msk.bf16.mxu0 %vm10779_vm5, %v10778_v51  ;;  %9081 = vmatprep.mubr.msk.bf16.mxu1 %vm10779_vm5, %v10778_v51 }
 0x350   :  { %9032 = vmatmul.mubr.bf16.gmra.mrb[84].mxu0 %v10273_v53  ;;  %9082 = vmatmul.mubr.bf16.gmra.mrb[84].mxu1 %v10274_v54 }
 0x351   :  { %9085 = vmatprep.mubr.msk.bf16.mxu1 %vm10779_vm5, %v10778_v51  ;;  %9103 = vmatprep.mubr.msk.bf16.mxu0 %vm10779_vm5, %v10778_v51 }
 0x358   :  { %9086 = vmatmul.mubr.bf16.gmra.mrb[88].mxu1 %v10275_v55 }
 0x359   :  { %9089 = vmatprep.mubr.msk.bf16.mxu1 %vm10779_vm5, %v10778_v51 }
 0x360   :  { %9090 = vmatmul.mubr.bf16.gmra.mrb[92].mxu1 %v10276_v56 }
 0x361   :  { %9093 = vmatprep.mubr.msk.bf16.mxu1 %vm10779_vm5, %v10778_v51 }
 0x368   :  { %9094 = vmatmul.mubr.bf16.gmra.mrb[96].mxu1 %v10277_v58 }
 0x369   :  { %9097 = vmatprep.mubr.msk.bf16.mxu1 %vm10779_vm5, %v10778_v51 }
 0x370   :  { %9098 = vmatmul.mubr.bf16.gmra.mrb[100].mxu1 %v10278_v59 }
 0x371   :  { %9133 = vmatprep.mubr.msk.bf16.mxu1 %vm10779_vm5, %v10778_v51 }
 0x3f3   :  { %v1037_v1 = vpop.f32.mrb[60].mxu0 }
 0x3f4   :  { %v1091_v2 = vadd.f32 %v1037_v1, %v11144_v8  ;;  %v9009_v3 = vpop.f32.mrb[61].mxu0 }
 0x3f5   :  { %v1040_v4 = vpop.f32.mrb[62].mxu0 }
 0x3f6   :  { %v1092_v7 = vadd.f32 %v1040_v4, %v11146_v44  ;;  %v9010_v9 = vpop.f32.mrb[63].mxu0 }
 0x3fb   :  { %v1045_v10 = vpop.f32.mrb[64].mxu0 }
 0x3fc   :  { %v1093_v11 = vadd.f32 %v1045_v10, %v11148_v47  ;;  %v9013_v13 = vpop.f32.mrb[65].mxu0 }
 0x3fd   :  { %v1048_v14 = vpop.f32.mrb[66].mxu0 }
 0x3fe   :  { %v1094_v15 = vadd.f32 %v1048_v14, %v11150_v52  ;;  %v9014_v17 = vpop.f32.mrb[67].mxu0 }
 0x403   :  { %v1053_v20 = vpop.f32.mrb[68].mxu0 }
 0x404   :  { %v1095_v21 = vadd.f32 %v1053_v20, %v11152_v57  ;;  %v9017_v22 = vpop.f32.mrb[69].mxu0  ;;  %v11281_v57 = vld [vmem:[%s14157_s2 + $0x1] ss:$0 sm:$0xff] }
 0x405   :  { %v1056_v23 = vpop.f32.mrb[70].mxu0 }
 0x406   :  { %v1096_v8 = vadd.f32 %v1056_v23, %v11154_v0  ;;  %v9018_v25 = vpop.f32.mrb[71].mxu0 }
 0x40b   :  { %v1061_v27 = vpop.f32.mrb[72].mxu0 }
 0x40c   :  { %v11273_v44 = vadd.f32 %v1061_v27, %v11156_v5  ;;  %v9021_v29 = vpop.f32.mrb[73].mxu0 }
 0x40d   :  { %v1064_v30 = vpop.f32.mrb[74].mxu0 }
 0x40e   :  { %v11276_v47 = vadd.f32 %v1064_v30, %v11158_v12  ;;  %v9022_v32 = vpop.f32.mrb[75].mxu0 }
 0x413   :  { %v1069_v52 = vpop.f32.mrb[76].mxu0  ;;  %v1321_v33 = vpop.f32.mrb[76].mxu1 }
 0x414   :  { %v11284_v0 = vadd.f32 %v1069_v52, %v11160_v19  ;;  %v1375_v34 = vadd.f32 %v1321_v33, %v1091_v2  ;;  %v9025_v35 = vpop.f32.mrb[77].mxu0  ;;  %v9075_v5 = vpop.f32.mrb[77].mxu1  ;;  %v10281_v19 = vld [vmem:[%s14156_s1 + $0x74] sm:$0x3f]  }
 0x415   :  { %v1072_v37 = vpop.f32.mrb[78].mxu0  ;;  %v1324_v38 = vpop.f32.mrb[78].mxu1  ;;  %v1923_v50 = vsel %vm1464_vm6, %v10281_v19, 0 }
 0x416   :  { %v1393_v39 = vadd.f32 %v11281_v57, %v1375_v34  ;;  %v11288_v12 = vadd.f32 %v1072_v37, %v11162_v24  ;;  %v1376_v40 = vadd.f32 %v1324_v38, %v1092_v7  ;;  %v9076_v60 = vpop.f32.mrb[79].mxu1  ;;  %v9026_v62 = vpop.f32.mrb[79].mxu0 }
 0x418   :  { %v1394_v6 = vadd.f32 %v11281_v57, %v1376_v40  ;;  %v1406_v42 = vmax.f32 %v1393_v39, 0.0 }
 0x41a   :  { %v1407_v43 = vmax.f32 %v1394_v6, 0.0 }
 0x41b   :  { %v1077_v18 = vpop.f32.mrb[80].mxu0  ;;  %v1329_v16 = vpop.f32.mrb[80].mxu1 }
 0x41c   :  { %v11294_v45 = vpack.c.bf16 %v1407_v43, %v1406_v42  ;;  %v11297_v46 = vadd.f32 %v1077_v18, %v11164_v31  ;;  %v1377_v24 = vadd.f32 %v1329_v16, %v1093_v11  ;;  %v9029_v28 = vpop.f32.mrb[81].mxu0  ;;  %v9079_v26 = vpop.f32.mrb[81].mxu1 }
 0x41d   :  { %v1080_v48 = vpop.f32.mrb[82].mxu0  ;;  %v1332_v49 = vpop.f32.mrb[82].mxu1 }
 0x41e   :  { %v1395_v53 = vadd.f32 %v11281_v57, %v1377_v24  ;;  %v11302_v54 = vadd.f32 %v1080_v48, %v11166_v36  ;;  %v1378_v55 = vadd.f32 %v1332_v49, %v1094_v15  ;;  %v9080_v56 = vpop.f32.mrb[83].mxu1  ;;  %9104 = vmatmul.mubr.msk.bf16.vlgmr.msra.gmra.mrb[88].mxu0 %vm1442_vm7, %v11294_v45  ;;  %9134 = vmatmul.mubr.msk.bf16.vlgmr.msra.gmra.mrb[104].mxu1 %vm1442_vm7, %v11294_v45  ;;  %v9030_v31 = vpop.f32.mrb[83].mxu0 }
 0x41f   :  { %9107 = vmatprep.mubr.msk.bf16.mxu0 %vm10779_vm5, %v10778_v51  ;;  %9137 = vmatprep.mubr.msk.bf16.mxu1 %vm10779_vm5, %v10778_v51 }
 0x420   :  { %v1396_v58 = vadd.f32 %v11281_v57, %v1378_v55  ;;  %9230 = vmatpush3.bf16.msra.mxu1 %v1923_v50  ;;  %v1408_v36 = vmax.f32 %v1395_v53, 0.0 }
 0x421   :  { %9293 = vmatprep.subr.bf16.mxu1 %v10778_v51 }
 0x422   :  { %v1409_v59 = vmax.f32 %v1396_v58, 0.0 }
 0x423   :  { %v1085_v61 = vpop.f32.mrb[84].mxu0  ;;  %v1337_v63 = vpop.f32.mrb[84].mxu1 }
 0x424   :  { %v11315_v1 = vadd.f32 %v1085_v61, %v11168_v41  ;;  %v1379_v2 = vadd.f32 %v1337_v63, %v1095_v21  ;;  %v9083_v3 = vpop.f32.mrb[85].mxu1  ;;  %v11317_v4 = vpack.c.bf16 %v1409_v59, %v1408_v36  ;;  %v9033_v7 = vpop.f32.mrb[85].mxu0 }
 0x425   :  { %v1340_v9 = vpop.f32.mrb[86].mxu1  ;;  %v1088_v10 = vpop.f32.mrb[86].mxu0 }
 0x426   :  { %v1397_v11 = vadd.f32 %v11281_v57, %v1379_v2  ;;  %v1380_v13 = vadd.f32 %v1340_v9, %v1096_v8  ;;  %v9084_v14 = vpop.f32.mrb[87].mxu1  ;;  %9108 = vmatmul.mubr.msk.bf16.gmra.mrb[92].mxu0 %vm1442_vm7, %v11317_v4  ;;  %9138 = vmatmul.mubr.msk.bf16.gmra.mrb[108].mxu1 %vm1442_vm7, %v11317_v4  ;;  %v9034_v15 = vpop.f32.mrb[87].mxu0 }
 0x427   :  { %9111 = vmatprep.mubr.msk.bf16.mxu0 %vm10779_vm5, %v10778_v51  ;;  %9141 = vmatprep.mubr.msk.bf16.mxu1 %vm10779_vm5, %v10778_v51 }
 0x428   :  { %v1398_v41 = vadd.f32 %v11281_v57, %v1380_v13  ;;  %v1410_v17 = vmax.f32 %v1397_v11, 0.0 }
 0x42a   :  { %v1411_v20 = vmax.f32 %v1398_v41, 0.0 }
 0x42b   :  { %v1345_v21 = vpop.f32.mrb[88].mxu1 }
 0x42c   :  { %v1381_v22 = vadd.f32 %v1345_v21, %v11273_v44  ;;  %v9087_v23 = vpop.f32.mrb[89].mxu1  ;;  %v11330_v8 = vpack.c.bf16 %v1411_v20, %v1410_v17 }
 0x42d   :  { %v1348_v25 = vpop.f32.mrb[90].mxu1 }
 0x42e   :  { %v1399_v27 = vadd.f32 %v11281_v57, %v1381_v22  ;;  %v1382_v29 = vadd.f32 %v1348_v25, %v11276_v47  ;;  %v9088_v30 = vpop.f32.mrb[91].mxu1  ;;  %9112 = vmatmul.mubr.msk.bf16.gmra.mrb[96].mxu0 %vm1442_vm7, %v11330_v8  ;;  %9142 = vmatmul.mubr.msk.bf16.gmra.mrb[112].mxu1 %vm1442_vm7, %v11330_v8 }
 0x42f   :  { %9115 = vmatprep.mubr.msk.bf16.mxu0 %vm10779_vm5, %v10778_v51  ;;  %9145 = vmatprep.mubr.msk.bf16.mxu1 %vm10779_vm5, %v10778_v51 }
 0x430   :  { %v1400_v44 = vadd.f32 %v11281_v57, %v1382_v29  ;;  %v1412_v32 = vmax.f32 %v1399_v27, 0.0 }
 0x432   :  { %v1413_v52 = vmax.f32 %v1400_v44, 0.0 }
 0x433   :  { %v1353_v33 = vpop.f32.mrb[92].mxu1 }
 0x434   :  { %v1383_v47 = vadd.f32 %v1353_v33, %v11284_v0  ;;  %v9091_v34 = vpop.f32.mrb[93].mxu1  ;;  %v11344_v35 = vpack.c.bf16 %v1413_v52, %v1412_v32 }
 0x435   :  { %v1356_v5 = vpop.f32.mrb[94].mxu1 }
 0x436   :  { %v1401_v37 = vadd.f32 %v11281_v57, %v1383_v47  ;;  %v1384_v38 = vadd.f32 %v1356_v5, %v11288_v12  ;;  %v9092_v39 = vpop.f32.mrb[95].mxu1  ;;  %9116 = vmatmul.mubr.msk.bf16.gmra.mrb[100].mxu0 %vm1442_vm7, %v11344_v35  ;;  %9146 = vmatmul.mubr.msk.bf16.gmra.mrb[116].mxu1 %vm1442_vm7, %v11344_v35 }
 0x437   :  { %9119 = vmatprep.mubr.msk.bf16.mxu0 %vm10779_vm5, %v10778_v51  ;;  %9149 = vmatprep.mubr.msk.bf16.mxu1 %vm10779_vm5, %v10778_v51 }
 0x438   :  { %v1402_v0 = vadd.f32 %v11281_v57, %v1384_v38  ;;  %v1414_v40 = vmax.f32 %v1401_v37, 0.0 }
 0x43a   :  { %v1415_v60 = vmax.f32 %v1402_v0, 0.0 }
 0x43b   :  { %v1361_v62 = vpop.f32.mrb[96].mxu1 }
 0x43c   :  { %v1385_v12 = vadd.f32 %v1361_v62, %v11297_v46  ;;  %v9095_v6 = vpop.f32.mrb[97].mxu1  ;;  %v1434_v19 = vpack.c.bf16 %v1415_v60, %v1414_v40 }
 0x43d   :  { %v1364_v42 = vpop.f32.mrb[98].mxu1 }
 0x43e   :  { %v1403_v43 = vadd.f32 %v11281_v57, %v1385_v12  ;;  %v1386_v18 = vadd.f32 %v1364_v42, %v11302_v54  ;;  %v9096_v16 = vpop.f32.mrb[99].mxu1  ;;  %9120 = vmatmul.mubr.msk.bf16.gmra.mrb[104].mxu0 %vm1442_vm7, %v1434_v19  ;;  %9150 = vmatmul.mubr.msk.bf16.gmra.mrb[120].mxu1 %vm1442_vm7, %v1434_v19 }
 0x43f   :  { %9123 = vmatprep.mubr.msk.bf16.mxu0 %vm10779_vm5, %v10778_v51  ;;  %9153 = vmatprep.mubr.msk.bf16.mxu1 %vm10779_vm5, %v10778_v51 }
 0x440   :  { %v1404_v46 = vadd.f32 %v11281_v57, %v1386_v18  ;;  %v1416_v24 = vmax.f32 %v1403_v43, 0.0 }
 0x442   :  { %v1417_v28 = vmax.f32 %v1404_v46, 0.0 }
 0x443   :  { %v1369_v26 = vpop.f32.mrb[100].mxu1 }
 0x444   :  { %v1387_v48 = vadd.f32 %v1369_v26, %v11315_v1  ;;  %v9099_v49 = vpop.f32.mrb[101].mxu1  ;;  %v1435_v50 = vpack.c.bf16 %v1417_v28, %v1416_v24 }
 0x445   :  { %v1372_v53 = vpop.f32.mrb[102].mxu1 }
 0x446   :  { %v1405_v54 = vadd.f32 %v11281_v57, %v1387_v48  ;;  %v9100_v55 = vpop.f32.mrb[103].mxu1  ;;  %9124 = vmatmul.mubr.msk.bf16.gmra.mrb[108].mxu0 %vm1442_vm7, %v1435_v50  ;;  %9154 = vmatmul.mubr.msk.bf16.gmra.mrb[124].mxu1 %vm1442_vm7, %v1435_v50  ;;  %v10282_v57 = vld [vmem:[%s14156_s1 + $0x7c] sm:$0x3f]  }
 0x447   :  { %9127 = vmatprep.mubr.msk.bf16.mxu0 %vm10779_vm5, %v10778_v51  ;;  %9157 = vmatprep.mubr.msk.bf16.mxu1 %vm10779_vm5, %v10778_v51  ;;  %v2160_v58 = vsel %vm1464_vm6, %v10282_v57, 0 }
 0x448   :  { %v1418_v56 = vmax.f32 %v1405_v54, 0.0 }
 0x44a   :  { %v1436_v31 = vpack.c.bf16 %v1418_v56, %v1418_v56 }
 0x44e   :  { %9128 = vmatmul.mubr.msk.bf16.gmra.mrb[112].mxu0 %vm1442_vm7, %v1436_v31  ;;  %9158 = vmatmul.mubr.msk.bf16.gmra.mrb[128].mxu1 %vm1442_vm7, %v1436_v31 }
 0x44f   :  { %9231 = vmatprep.mubr.msk.bf16.mxu1 %vm10779_vm5, %v10778_v51  ;;  %9175 = vmatprep.mubr.msk.bf16.mxu0 %vm10779_vm5, %v10778_v51 }
 0x456   :  { %9232 = vmatmul.mubr.msk.bf16.vlgmr.msra.gmra.mrb[132].mxu1 %vm1442_vm7, %v11294_v45 }
 0x457   :  { %9235 = vmatprep.mubr.msk.bf16.mxu1 %vm10779_vm5, %v10778_v51  ;;  %9294 = vmatpush3.bf16.msra.mxu1 %v2160_v58 }
 0x458   :  { %9357 = vmatprep.subr.bf16.mxu1 %v10778_v51 }
 0x45e   :  { %9236 = vmatmul.mubr.msk.bf16.gmra.mrb[136].mxu1 %vm1442_vm7, %v11317_v4 }
 0x45f   :  { %9239 = vmatprep.mubr.msk.bf16.mxu1 %vm10779_vm5, %v10778_v51 }
 0x466   :  { %9240 = vmatmul.mubr.msk.bf16.gmra.mrb[140].mxu1 %vm1442_vm7, %v11330_v8 }
 0x467   :  { %9243 = vmatprep.mubr.msk.bf16.mxu1 %vm10779_vm5, %v10778_v51 }
 0x46e   :  { %9244 = vmatmul.mubr.msk.bf16.gmra.mrb[144].mxu1 %vm1442_vm7, %v11344_v35 }
 0x46f   :  { %9247 = vmatprep.mubr.msk.bf16.mxu1 %vm10779_vm5, %v10778_v51 }
 0x476   :  { %9248 = vmatmul.mubr.msk.bf16.gmra.mrb[148].mxu1 %vm1442_vm7, %v1434_v19 }
 0x477   :  { %9251 = vmatprep.mubr.msk.bf16.mxu1 %vm10779_vm5, %v10778_v51 }
 0x47e   :  { %9252 = vmatmul.mubr.msk.bf16.gmra.mrb[152].mxu1 %vm1442_vm7, %v1435_v50 }
 0x47f   :  { %9255 = vmatprep.mubr.msk.bf16.mxu1 %vm10779_vm5, %v10778_v51 }
 0x486   :  { %9256 = vmatmul.mubr.msk.bf16.gmra.mrb[156].mxu1 %vm1442_vm7, %v1436_v31 }
 0x487   :  { %9295 = vmatprep.mubr.msk.bf16.mxu1 %vm10779_vm5, %v10778_v51 }
 0x48e   :  { %9296 = vmatmul.mubr.msk.bf16.vlgmr.msra.gmra.mrb[160].mxu1 %vm1442_vm7, %v11294_v45 }
 0x48f   :  { %9299 = vmatprep.mubr.msk.bf16.mxu1 %vm10779_vm5, %v10778_v51 }
 0x496   :  { %9300 = vmatmul.mubr.msk.bf16.gmra.mrb[164].mxu1 %vm1442_vm7, %v11317_v4 }
 0x497   :  { %9303 = vmatprep.mubr.msk.bf16.mxu1 %vm10779_vm5, %v10778_v51 }
 0x49e   :  { %9304 = vmatmul.mubr.msk.bf16.gmra.mrb[168].mxu1 %vm1442_vm7, %v11330_v8 }
 0x49f   :  { %9307 = vmatprep.mubr.msk.bf16.mxu1 %vm10779_vm5, %v10778_v51 }
 0x4a6   :  { %9308 = vmatmul.mubr.msk.bf16.gmra.mrb[172].mxu1 %vm1442_vm7, %v11344_v35 }
 0x4a7   :  { %9311 = vmatprep.mubr.msk.bf16.mxu1 %vm10779_vm5, %v10778_v51 }
 0x4ae   :  { %9312 = vmatmul.mubr.msk.bf16.gmra.mrb[176].mxu1 %vm1442_vm7, %v1434_v19 }
 0x4af   :  { %9315 = vmatprep.mubr.msk.bf16.mxu1 %vm10779_vm5, %v10778_v51 }
 0x4b6   :  { %9316 = vmatmul.mubr.msk.bf16.gmra.mrb[180].mxu1 %vm1442_vm7, %v1435_v50 }
 0x4b7   :  { %9319 = vmatprep.mubr.msk.bf16.mxu1 %vm10779_vm5, %v10778_v51 }
 0x4be   :  { %9320 = vmatmul.mubr.msk.bf16.gmra.mrb[184].mxu1 %vm1442_vm7, %v1436_v31 }
 0x4bf   :  { %9361 = vmatprep.mubr.msk.bf16.mxu1 %vm10779_vm5, %v10778_v51 }
 0x4f1   :  { %v11436_v45 = vpop.f32.mrb[88].mxu0  ;;  %v1617_v36 = vpop.f32.mrb[104].mxu1 }
 0x4f2   :  { %v9105_v59 = vpop.f32.mrb[89].mxu0  ;;  %v9135_v61 = vpop.f32.mrb[105].mxu1 }
 0x4f3   :  { %v11438_v63 = vpop.f32.mrb[90].mxu0  ;;  %v1620_v1 = vpop.f32.mrb[106].mxu1 }
 0x4f4   :  { %v1556_v2 = vpack.c.bf16 %v11438_v63, %v11436_v45  ;;  %v1671_v3 = vpack.c.bf16 %v1620_v1, %v1617_v36  ;;  %v9106_v4 = vpop.f32.mrb[91].mxu0  ;;  %v9136_v7 = vpop.f32.mrb[107].mxu1 }
 0x4f6   :  { %9162 = vmatpush3.bf16.msra.mxu0 %v1671_v3 }
 0x4f7   :  { %9163 = vmatprep.subr.bf16.mxu0 %v10778_v51 }
 0x4f9   :  { %v11443_v9 = vpop.f32.mrb[92].mxu0  ;;  %v1625_v10 = vpop.f32.mrb[108].mxu1 }
 0x4fa   :  { %v9109_v11 = vpop.f32.mrb[93].mxu0  ;;  %v9139_v13 = vpop.f32.mrb[109].mxu1 }
 0x4fb   :  { %v11445_v14 = vpop.f32.mrb[94].mxu0  ;;  %v1628_v15 = vpop.f32.mrb[110].mxu1 }
 0x4fc   :  { %v1557_v41 = vpack.c.bf16 %v11445_v14, %v11443_v9  ;;  %v1672_v17 = vpack.c.bf16 %v1628_v15, %v1625_v10  ;;  %v9110_v20 = vpop.f32.mrb[95].mxu0  ;;  %v9140_v21 = vpop.f32.mrb[111].mxu1  ;;  %v10283_v10 = vld [vmem:[%s14160_s5 + $0x24] sm:$0xff]   ;;  %v10285_v9 = vld [vmem:[%s14160_s5 + $0x34] sm:$0xff]  }
 0x4fd   :  { %v10284_v21 = vld [vmem:[%s14160_s5 + $0x2c] sm:$0xff]  }
 0x4fe   :  { %9164 = vmatpush3.bf16.msra.mxu0 %v1672_v17 }
 0x4ff   :  { %9165 = vmatprep.subr.bf16.mxu0 %v10778_v51 }
 0x501   :  { %v11450_v22 = vpop.f32.mrb[96].mxu0  ;;  %v1633_v23 = vpop.f32.mrb[112].mxu1 }
 0x502   :  { %v9113_v8 = vpop.f32.mrb[97].mxu0  ;;  %v9143_v25 = vpop.f32.mrb[113].mxu1 }
 0x503   :  { %v11452_v27 = vpop.f32.mrb[98].mxu0  ;;  %v1636_v29 = vpop.f32.mrb[114].mxu1 }
 0x504   :  { %v1558_v30 = vpack.c.bf16 %v11452_v27, %v11450_v22  ;;  %v1673_v44 = vpack.c.bf16 %v1636_v29, %v1633_v23  ;;  %v9114_v32 = vpop.f32.mrb[99].mxu0  ;;  %v9144_v52 = vpop.f32.mrb[115].mxu1 }
 0x506   :  { %9166 = vmatpush3.bf16.msra.mxu0 %v1673_v44 }
 0x507   :  { %9167 = vmatprep.subr.bf16.mxu0 %v10778_v51 }
 0x509   :  { %v11457_v33 = vpop.f32.mrb[100].mxu0  ;;  %v1641_v47 = vpop.f32.mrb[116].mxu1 }
 0x50a   :  { %v9117_v34 = vpop.f32.mrb[101].mxu0  ;;  %v9147_v35 = vpop.f32.mrb[117].mxu1 }
 0x50b   :  { %v11459_v5 = vpop.f32.mrb[102].mxu0  ;;  %v1644_v37 = vpop.f32.mrb[118].mxu1  ;;  %v10287_v35 = vld [vmem:[%s14160_s5 + $0x44] ss:$0 sps:$4 sm:$0xff]  }
 0x50c   :  { %v1559_v38 = vpack.c.bf16 %v11459_v5, %v11457_v33  ;;  %v1674_v39 = vpack.c.bf16 %v1644_v37, %v1641_v47  ;;  %v9118_v0 = vpop.f32.mrb[103].mxu0  ;;  %v9148_v40 = vpop.f32.mrb[119].mxu1 }
 0x50d   :  { %v10288_v40 = vld [vmem:[%s14160_s5] sm:$0xff]  }
 0x50e   :  { %9168 = vmatpush3.bf16.msra.mxu0 %v1674_v39 }
 0x50f   :  { %9169 = vmatprep.subr.bf16.mxu0 %v10778_v51 }
 0x511   :  { %v11464_v60 = vpop.f32.mrb[104].mxu0  ;;  %v1649_v62 = vpop.f32.mrb[120].mxu1 }
 0x512   :  { %v9121_v12 = vpop.f32.mrb[105].mxu0  ;;  %v9151_v6 = vpop.f32.mrb[121].mxu1 }
 0x513   :  { %v1537_v19 = vpop.f32.mrb[106].mxu0  ;;  %v1652_v42 = vpop.f32.mrb[122].mxu1 }
 0x514   :  { %v1560_v43 = vpack.c.bf16 %v1537_v19, %v11464_v60  ;;  %v1675_v18 = vpack.c.bf16 %v1652_v42, %v1649_v62  ;;  %v9122_v16 = vpop.f32.mrb[107].mxu0  ;;  %v9152_v46 = vpop.f32.mrb[123].mxu1  ;;  %v10289_v42 = vld [vmem:[%s14160_s5 + $0x8] sm:$0xff]  }
 0x516   :  { %9170 = vmatpush3.bf16.msra.mxu0 %v1675_v18 }
 0x517   :  { %9171 = vmatprep.subr.bf16.mxu0 %v10778_v51 }
 0x519   :  { %v1542_v24 = vpop.f32.mrb[108].mxu0  ;;  %v1657_v28 = vpop.f32.mrb[124].mxu1 }
 0x51a   :  { %v9125_v26 = vpop.f32.mrb[109].mxu0  ;;  %v9155_v48 = vpop.f32.mrb[125].mxu1 }
 0x51b   :  { %v1545_v49 = vpop.f32.mrb[110].mxu0  ;;  %v1660_v50 = vpop.f32.mrb[126].mxu1 }
 0x51c   :  { %v1561_v53 = vpack.c.bf16 %v1545_v49, %v1542_v24  ;;  %v1676_v54 = vpack.c.bf16 %v1660_v50, %v1657_v28  ;;  %v9126_v55 = vpop.f32.mrb[111].mxu0  ;;  %v9156_v56 = vpop.f32.mrb[127].mxu1  ;;  %v10290_v24 = vld [vmem:[%s14160_s5 + $0x10] sm:$0xff]  }
 0x51e   :  { %9172 = vmatpush3.bf16.msra.mxu0 %v1676_v54  ;;  %v10291_v54 = vld [vmem:[%s14160_s5 + $0x18] sm:$0xff]  }
 0x51f   :  { %9173 = vmatprep.subr.bf16.mxu0 %v10778_v51 }
 0x521   :  { %v1550_v31 = vpop.f32.mrb[112].mxu0  ;;  %v1665_v57 = vpop.f32.mrb[128].mxu1 }
 0x522   :  { %v1677_v58 = vpack.c.bf16 %v1665_v57, %v1665_v57  ;;  %v9129_v36 = vpop.f32.mrb[113].mxu0  ;;  %v9159_v59 = vpop.f32.mrb[129].mxu1  ;;  %v1562_v25 = vpack.c.bf16 %v1550_v31, %v1550_v31 }
 0x523   :  { %v1553_v61 = vpop.f32.mrb[114].mxu0  ;;  %v1668_v1 = vpop.f32.mrb[130].mxu1  ;;  %v10292_v59 = vld [vmem:[%s14160_s5 + $0x20] ss:$0 sps:$4 sm:$0xff]  }
 0x524   :  { %v9130_v3 = vpop.f32.mrb[115].mxu0  ;;  %v9160_v4 = vpop.f32.mrb[131].mxu1  ;;  %v1718_v7 = vsel %vm105_vm0, %v1677_v58, 0  ;;  %v1831_v44 = vsel %vm105_vm0, %v1562_v25, 0 }
 0x525   :  { %9174 = vmatpush3.bf16.msra.mxu0 %v1718_v7 }
 0x526   :  { %9195 = vmatprep.subr.bf16.mxu0 %v10778_v51 }
 0x528   :  { %9176 = vmatmul.mubr.msk.bf16.vlgmr.msra.gmra.mrb[116].mxu0 %vm1701_vm8, %v10283_v10  ;;  %v10293_v10 = vld [vmem:[%s14160_s5 + $0x48] sm:$0xff]  }
 0x529   :  { %9196 = vmatpush3.bf16.msra.mxu0 %v1556_v2  ;;  %v1959_v11 = vpop.f32.mrb[132].mxu1  ;;  %9179 = vmatprep.mubr.msk.bf16.mxu0 %vm10779_vm5, %v10778_v51 }
 0x52a   :  { %v9233_v13 = vpop.f32.mrb[133].mxu1  ;;  %9197 = vmatprep.subr.bf16.mxu0 %v10778_v51 }
 0x52b   :  { %v1962_v15 = vpop.f32.mrb[134].mxu1 }
 0x52c   :  { %v2013_v17 = vpack.c.bf16 %v1962_v15, %v1959_v11  ;;  %v9234_v20 = vpop.f32.mrb[135].mxu1 }
 0x52d   :  { %9198 = vmatpush3.bf16.msra.mxu0 %v1557_v41 }
 0x52e   :  { %9199 = vmatprep.subr.bf16.mxu0 %v10778_v51 }
 0x530   :  { %9180 = vmatmul.mubr.msk.bf16.gmra.mrb[120].mxu0 %vm1701_vm8, %v10284_v21  ;;  %v10294_v21 = vld [vmem:[%s14160_s5 + $0x50] sm:$0xff]  }
 0x531   :  { %9200 = vmatpush3.bf16.msra.mxu0 %v1558_v30  ;;  %v1967_v45 = vpop.f32.mrb[136].mxu1  ;;  %9183 = vmatprep.mubr.msk.bf16.mxu0 %vm10779_vm5, %v10778_v51  ;;  %v10286_v30 = vld [vmem:[%s14160_s5 + $0x3c] sm:$0xff]  }
 0x532   :  { %v9237_v63 = vpop.f32.mrb[137].mxu1  ;;  %9201 = vmatprep.subr.bf16.mxu0 %v10778_v51 }
 0x533   :  { %v1970_v2 = vpop.f32.mrb[138].mxu1 }
 0x534   :  { %v2014_v23 = vpack.c.bf16 %v1970_v2, %v1967_v45  ;;  %v9238_v8 = vpop.f32.mrb[139].mxu1 }
 0x535   :  { %9202 = vmatpush3.bf16.msra.mxu0 %v1559_v38 }
 0x536   :  { %9203 = vmatprep.subr.bf16.mxu0 %v10778_v51 }
 0x538   :  { %9184 = vmatmul.mubr.msk.bf16.gmra.mrb[124].mxu0 %vm1701_vm8, %v10285_v9  ;;  %v10295_v9 = vld [vmem:[%s14160_s5 + $0x58] sm:$0xff]  }
 0x539   :  { %9204 = vmatpush3.bf16.msra.mxu0 %v1560_v43  ;;  %v1975_v14 = vpop.f32.mrb[140].mxu1  ;;  %9187 = vmatprep.mubr.msk.bf16.mxu0 %vm10779_vm5, %v10778_v51 }
 0x53a   :  { %v9241_v41 = vpop.f32.mrb[141].mxu1  ;;  %9205 = vmatprep.subr.bf16.mxu0 %v10778_v51 }
 0x53b   :  { %v1978_v22 = vpop.f32.mrb[142].mxu1 }
 0x53c   :  { %v2015_v27 = vpack.c.bf16 %v1978_v22, %v1975_v14  ;;  %v9242_v29 = vpop.f32.mrb[143].mxu1 }
 0x53d   :  { %9206 = vmatpush3.bf16.msra.mxu0 %v1561_v53  ;;  %v10296_v29 = vld [vmem:[%s14160_s5 + $0x60] sm:$0xff]  }
 0x53e   :  { %9207 = vmatprep.subr.bf16.mxu0 %v10778_v51 }
 0x540   :  { %9188 = vmatmul.mubr.msk.bf16.gmra.mrb[128].mxu0 %vm1701_vm8, %v10286_v30 }
 0x541   :  { %9208 = vmatpush3.bf16.msra.mxu0 %v1831_v44  ;;  %v1983_v32 = vpop.f32.mrb[144].mxu1  ;;  %9191 = vmatprep.mubr.msk.bf16.mxu0 %vm10779_vm5, %v10778_v51 }
 0x542   :  { %v9245_v52 = vpop.f32.mrb[145].mxu1  ;;  %9259 = vmatprep.subr.bf16.mxu0 %v10778_v51 }
 0x543   :  { %v1986_v33 = vpop.f32.mrb[146].mxu1 }
 0x544   :  { %v2016_v47 = vpack.c.bf16 %v1986_v33, %v1983_v32  ;;  %v9246_v34 = vpop.f32.mrb[147].mxu1 }
 0x545   :  { %v10297_v34 = vld [vmem:[%s14160_s5 + $0x68] ss:$0 sps:$4 sm:$0xff]  }
 0x548   :  { %9192 = vmatmul.mubr.msk.bf16.gmra.mrb[132].mxu0 %vm1701_vm8, %v10287_v35  ;;  %v10298_v35 = vld [vmem:[%s14160_s5 + $0x6c] sm:$0xff]  }
 0x549   :  { %v1991_v5 = vpop.f32.mrb[148].mxu1  ;;  %9209 = vmatprep.mubr.msk.bf16.mxu0 %vm10779_vm5, %v10778_v51 }
 0x54a   :  { %v9249_v37 = vpop.f32.mrb[149].mxu1 }
 0x54b   :  { %v1994_v38 = vpop.f32.mrb[150].mxu1  ;;  %v10300_v37 = vld [vmem:[%s14160_s5 + $0x7c] sm:$0xff]  }
 0x54c   :  { %v2017_v39 = vpack.c.bf16 %v1994_v38, %v1991_v5  ;;  %v9250_v0 = vpop.f32.mrb[151].mxu1  ;;  %v10299_v5 = vld [vmem:[%s14160_s5 + $0x74] sm:$0xff]   ;;  %v10301_v38 = vld [vmem:[%s14160_s5 + $0x84] sm:$0xff]  }
 0x54d   :  { %v10303_v0 = vld [vmem:[%s14156_s1 + $0x84] sm:$0xff]  }
 0x54e   :  { %9358 = vmatpush3.bf16.msra.mxu1 %v10303_v0 }
 0x54f   :  { %9359 = vmatprep.subr.bf16.mxu1 %v10778_v51 }
 0x550   :  { %9210 = vmatmul.mubr.msk.bf16.vlgmr.msra.gmra.mrb[136].mxu0 %vm1701_vm8, %v10288_v40  ;;  %v10304_v40 = vld [vmem:[%s14156_s1 + $0x8c] ss:$0 sps:$4 sm:$0xff]  }
 0x551   :  { %9260 = vmatpush3.bf16.msra.mxu0 %v2013_v17  ;;  %v1999_v60 = vpop.f32.mrb[152].mxu1  ;;  %9213 = vmatprep.mubr.msk.bf16.mxu0 %vm10779_vm5, %v10778_v51 }
 0x552   :  { %v9253_v62 = vpop.f32.mrb[153].mxu1  ;;  %9261 = vmatprep.subr.bf16.mxu0 %v10778_v51 }
 0x553   :  { %v2002_v12 = vpop.f32.mrb[154].mxu1 }
 0x554   :  { %v2018_v6 = vpack.c.bf16 %v2002_v12, %v1999_v60  ;;  %v9254_v19 = vpop.f32.mrb[155].mxu1  ;;  %v2446_v60 = vsel %vm2444_vm9, %v10304_v40, 0 }
 0x555   :  { %9262 = vmatpush3.bf16.msra.mxu0 %v2014_v23  ;;  %9360 = vmatpush3.bf16.msra.mxu1 %v2446_v60 }
 0x556   :  { %9263 = vmatprep.subr.bf16.mxu0 %v10778_v51  ;;  %9405 = vmatprep.subr.bf16.mxu1 %v10778_v51 }
 0x558   :  { %9214 = vmatmul.mubr.msk.bf16.gmra.mrb[140].mxu0 %vm1701_vm8, %v10289_v42 }
 0x559   :  { %9264 = vmatpush3.bf16.msra.mxu0 %v2015_v27  ;;  %v2007_v43 = vpop.f32.mrb[156].mxu1  ;;  %9217 = vmatprep.mubr.msk.bf16.mxu0 %vm10779_vm5, %v10778_v51 }
 0x55a   :  { %v9257_v18 = vpop.f32.mrb[157].mxu1  ;;  %9265 = vmatprep.subr.bf16.mxu0 %v10778_v51  ;;  %v2019_v49 = vpack.c.bf16 %v2007_v43, %v2007_v43 }
 0x55b   :  { %v2010_v16 = vpop.f32.mrb[158].mxu1 }
 0x55c   :  { %v9258_v46 = vpop.f32.mrb[159].mxu1  ;;  %v2059_v55 = vsel %vm105_vm0, %v2019_v49, 0 }
 0x55d   :  { %9266 = vmatpush3.bf16.msra.mxu0 %v2016_v47 }
 0x55e   :  { %9267 = vmatprep.subr.bf16.mxu0 %v10778_v51 }
 0x560   :  { %9218 = vmatmul.mubr.msk.bf16.gmra.mrb[144].mxu0 %vm1701_vm8, %v10290_v24 }
 0x561   :  { %9268 = vmatpush3.bf16.msra.mxu0 %v2017_v39  ;;  %v2196_v28 = vpop.f32.mrb[160].mxu1  ;;  %9221 = vmatprep.mubr.msk.bf16.mxu0 %vm10779_vm5, %v10778_v51  ;;  %v10302_v39 = vld [vmem:[%s14160_s5 + $0x8c] ss:$0 sps:$4 sm:$0xff]  }
 0x562   :  { %v9297_v26 = vpop.f32.mrb[161].mxu1  ;;  %9269 = vmatprep.subr.bf16.mxu0 %v10778_v51 }
 0x563   :  { %v2199_v48 = vpop.f32.mrb[162].mxu1 }
 0x564   :  { %v2250_v50 = vpack.c.bf16 %v2199_v48, %v2196_v28  ;;  %v9298_v53 = vpop.f32.mrb[163].mxu1 }
 0x565   :  { %9270 = vmatpush3.bf16.msra.mxu0 %v2018_v6 }
 0x566   :  { %9271 = vmatprep.subr.bf16.mxu0 %v10778_v51 }
 0x568   :  { %9222 = vmatmul.mubr.msk.bf16.gmra.mrb[148].mxu0 %vm1701_vm8, %v10291_v54 }
 0x569   :  { %9272 = vmatpush3.bf16.msra.mxu0 %v2059_v55  ;;  %v2204_v56 = vpop.f32.mrb[164].mxu1  ;;  %9225 = vmatprep.mubr.msk.bf16.mxu0 %vm10779_vm5, %v10778_v51 }
 0x56a   :  { %v9301_v31 = vpop.f32.mrb[165].mxu1  ;;  %9323 = vmatprep.subr.bf16.mxu0 %v10778_v51 }
 0x56b   :  { %v2207_v57 = vpop.f32.mrb[166].mxu1 }
 0x56c   :  { %v2251_v58 = vpack.c.bf16 %v2207_v57, %v2204_v56  ;;  %v9302_v36 = vpop.f32.mrb[167].mxu1 }
 0x570   :  { %9226 = vmatmul.mubr.msk.bf16.gmra.mrb[152].mxu0 %vm1701_vm8, %v10292_v59 }
 0x571   :  { %v2212_v61 = vpop.f32.mrb[168].mxu1  ;;  %9273 = vmatprep.mubr.msk.bf16.mxu0 %vm10779_vm5, %v10778_v51 }
 0x572   :  { %v9305_v1 = vpop.f32.mrb[169].mxu1 }
 0x573   :  { %v2215_v3 = vpop.f32.mrb[170].mxu1 }
 0x574   :  { %v2252_v4 = vpack.c.bf16 %v2215_v3, %v2212_v61  ;;  %v9306_v7 = vpop.f32.mrb[171].mxu1 }
 0x578   :  { %9274 = vmatmul.mubr.msk.bf16.vlgmr.msra.gmra.mrb[156].mxu0 %vm1701_vm8, %v10293_v10 }
 0x579   :  { %9324 = vmatpush3.bf16.msra.mxu0 %v2250_v50  ;;  %v2220_v11 = vpop.f32.mrb[172].mxu1  ;;  %9277 = vmatprep.mubr.msk.bf16.mxu0 %vm10779_vm5, %v10778_v51 }
 0x57a   :  { %v9309_v13 = vpop.f32.mrb[173].mxu1  ;;  %9325 = vmatprep.subr.bf16.mxu0 %v10778_v51 }
 0x57b   :  { %v2223_v15 = vpop.f32.mrb[174].mxu1 }
 0x57c   :  { %v2253_v17 = vpack.c.bf16 %v2223_v15, %v2220_v11  ;;  %v9310_v20 = vpop.f32.mrb[175].mxu1 }
 0x57d   :  { %9326 = vmatpush3.bf16.msra.mxu0 %v2251_v58 }
 0x57e   :  { %9327 = vmatprep.subr.bf16.mxu0 %v10778_v51 }
 0x580   :  { %9278 = vmatmul.mubr.msk.bf16.gmra.mrb[160].mxu0 %vm1701_vm8, %v10294_v21 }
 0x581   :  { %9328 = vmatpush3.bf16.msra.mxu0 %v2252_v4  ;;  %v2228_v45 = vpop.f32.mrb[176].mxu1  ;;  %9281 = vmatprep.mubr.msk.bf16.mxu0 %vm10779_vm5, %v10778_v51 }
 0x582   :  { %v9313_v63 = vpop.f32.mrb[177].mxu1  ;;  %9329 = vmatprep.subr.bf16.mxu0 %v10778_v51 }
 0x583   :  { %v2231_v2 = vpop.f32.mrb[178].mxu1 }
 0x584   :  { %v2254_v23 = vpack.c.bf16 %v2231_v2, %v2228_v45  ;;  %v9314_v8 = vpop.f32.mrb[179].mxu1 }
 0x585   :  { %9330 = vmatpush3.bf16.msra.mxu0 %v2253_v17 }
 0x586   :  { %9331 = vmatprep.subr.bf16.mxu0 %v10778_v51 }
 0x588   :  { %9282 = vmatmul.mubr.msk.bf16.gmra.mrb[164].mxu0 %vm1701_vm8, %v10295_v9 }
 0x589   :  { %9332 = vmatpush3.bf16.msra.mxu0 %v2254_v23  ;;  %v2236_v14 = vpop.f32.mrb[180].mxu1  ;;  %9285 = vmatprep.mubr.msk.bf16.mxu0 %vm10779_vm5, %v10778_v51 }
 0x58a   :  { %v9317_v41 = vpop.f32.mrb[181].mxu1  ;;  %9333 = vmatprep.subr.bf16.mxu0 %v10778_v51 }
 0x58b   :  { %v2239_v22 = vpop.f32.mrb[182].mxu1 }
 0x58c   :  { %v2255_v25 = vpack.c.bf16 %v2239_v22, %v2236_v14  ;;  %v9318_v27 = vpop.f32.mrb[183].mxu1 }
 0x58e   :  { %9334 = vmatpush3.bf16.msra.mxu0 %v2255_v25 }
 0x58f   :  { %9335 = vmatprep.subr.bf16.mxu0 %v10778_v51 }
 0x590   :  { %9286 = vmatmul.mubr.msk.bf16.gmra.mrb[168].mxu0 %vm1701_vm8, %v10296_v29 }
 0x591   :  { %v2244_v30 = vpop.f32.mrb[184].mxu1  ;;  %9289 = vmatprep.mubr.msk.bf16.mxu0 %vm10779_vm5, %v10778_v51 }
 0x592   :  { %v2256_v44 = vpack.c.bf16 %v2244_v30, %v2244_v30  ;;  %v9321_v32 = vpop.f32.mrb[185].mxu1 }
 0x593   :  { %v2247_v52 = vpop.f32.mrb[186].mxu1 }
 0x594   :  { %v9322_v33 = vpop.f32.mrb[187].mxu1  ;;  %v2296_v47 = vsel %vm105_vm0, %v2256_v44, 0 }
 0x595   :  { %9336 = vmatpush3.bf16.msra.mxu0 %v2296_v47 }
 0x596   :  { %9381 = vmatprep.subr.bf16.mxu0 %v10778_v51 }
 0x598   :  { %9290 = vmatmul.mubr.msk.bf16.gmra.mrb[172].mxu0 %vm1701_vm8, %v10297_v34 }
 0x599   :  { %9337 = vmatprep.mubr.msk.bf16.mxu0 %vm10779_vm5, %v10778_v51 }
 0x5a0   :  { %9338 = vmatmul.mubr.msk.bf16.vlgmr.msra.gmra.mrb[176].mxu0 %vm1701_vm8, %v10298_v35 }
 0x5a1   :  { %9341 = vmatprep.mubr.msk.bf16.mxu0 %vm10779_vm5, %v10778_v51 }
 0x5a8   :  { %9342 = vmatmul.mubr.msk.bf16.gmra.mrb[180].mxu0 %vm1701_vm8, %v10299_v5 }
 0x5a9   :  { %9345 = vmatprep.mubr.msk.bf16.mxu0 %vm10779_vm5, %v10778_v51 }
 0x5b0   :  { %9346 = vmatmul.mubr.msk.bf16.gmra.mrb[184].mxu0 %vm1701_vm8, %v10300_v37 }
 0x5b1   :  { %9349 = vmatprep.mubr.msk.bf16.mxu0 %vm10779_vm5, %v10778_v51 }
 0x5b8   :  { %9350 = vmatmul.mubr.msk.bf16.gmra.mrb[188].mxu0 %vm1701_vm8, %v10301_v38 }
 0x5b9   :  { %9353 = vmatprep.mubr.msk.bf16.mxu0 %vm10779_vm5, %v10778_v51 }
 0x5c0   :  { %9354 = vmatmul.mubr.msk.bf16.gmra.mrb[192].mxu0 %vm1701_vm8, %v10302_v39 }
 0x5c1   :  { %9385 = vmatprep.mubr.msk.bf16.mxu0 %vm10779_vm5, %v10778_v51 }
 0x5fb   :  { %v1754_v62 = vpop.f32.mrb[116].mxu0 }
 0x5fc   :  { %v9177_v12 = vpop.f32.mrb[117].mxu0 }
 0x5fd   :  { %v1757_v6 = vpop.f32.mrb[118].mxu0 }
 0x5fe   :  { %v9178_v19 = vpop.f32.mrb[119].mxu0 }
 0x603   :  { %v1762_v42 = vpop.f32.mrb[120].mxu0 }
 0x604   :  { %v9181_v43 = vpop.f32.mrb[121].mxu0 }
 0x605   :  { %v1765_v18 = vpop.f32.mrb[122].mxu0 }
 0x606   :  { %v9182_v16 = vpop.f32.mrb[123].mxu0 }
 0x60b   :  { %v1770_v46 = vpop.f32.mrb[124].mxu0 }
 0x60c   :  { %v9185_v24 = vpop.f32.mrb[125].mxu0 }
 0x60d   :  { %v1773_v28 = vpop.f32.mrb[126].mxu0 }
 0x60e   :  { %v9186_v26 = vpop.f32.mrb[127].mxu0 }
 0x613   :  { %v1778_v48 = vpop.f32.mrb[128].mxu0 }
 0x614   :  { %v9189_v49 = vpop.f32.mrb[129].mxu0 }
 0x615   :  { %v1781_v50 = vpop.f32.mrb[130].mxu0 }
 0x616   :  { %v9190_v53 = vpop.f32.mrb[131].mxu0 }
 0x61b   :  { %v1786_v54 = vpop.f32.mrb[132].mxu0 }
 0x61c   :  { %v9193_v55 = vpop.f32.mrb[133].mxu0 }
 0x61d   :  { %v1789_v56 = vpop.f32.mrb[134].mxu0 }
 0x61e   :  { %v9194_v31 = vpop.f32.mrb[135].mxu0 }
 0x623   :  { %v1867_v57 = vpop.f32.mrb[136].mxu0 }
 0x624   :  { %v1868_v58 = vadd.f32 %v1867_v57, %v1754_v62  ;;  %v9211_v36 = vpop.f32.mrb[137].mxu0 }
 0x625   :  { %v1870_v59 = vpop.f32.mrb[138].mxu0 }
 0x626   :  { %v1871_v61 = vadd.f32 %v1870_v59, %v1757_v6  ;;  %v9212_v1 = vpop.f32.mrb[139].mxu0 }
 0x62b   :  { %v1875_v3 = vpop.f32.mrb[140].mxu0 }
 0x62c   :  { %v1876_v4 = vadd.f32 %v1875_v3, %v1762_v42  ;;  %v9215_v7 = vpop.f32.mrb[141].mxu0 }
 0x62d   :  { %v1878_v10 = vpop.f32.mrb[142].mxu0 }
 0x62e   :  { %v1879_v11 = vadd.f32 %v1878_v10, %v1765_v18  ;;  %v9216_v13 = vpop.f32.mrb[143].mxu0 }
 0x633   :  { %v1883_v15 = vpop.f32.mrb[144].mxu0 }
 0x634   :  { %v1884_v17 = vadd.f32 %v1883_v15, %v1770_v46  ;;  %v9219_v20 = vpop.f32.mrb[145].mxu0 }
 0x635   :  { %v1886_v21 = vpop.f32.mrb[146].mxu0 }
 0x636   :  { %v1887_v45 = vadd.f32 %v1886_v21, %v1773_v28  ;;  %v9220_v63 = vpop.f32.mrb[147].mxu0 }
 0x63b   :  { %v1891_v2 = vpop.f32.mrb[148].mxu0 }
 0x63c   :  { %v1892_v23 = vadd.f32 %v1891_v2, %v1778_v48  ;;  %v9223_v8 = vpop.f32.mrb[149].mxu0 }
 0x63d   :  { %v1894_v9 = vpop.f32.mrb[150].mxu0 }
 0x63e   :  { %v1895_v14 = vadd.f32 %v1894_v9, %v1781_v50  ;;  %v9224_v41 = vpop.f32.mrb[151].mxu0 }
 0x643   :  { %v1899_v22 = vpop.f32.mrb[152].mxu0 }
 0x644   :  { %v1900_v25 = vadd.f32 %v1899_v22, %v1786_v54  ;;  %v9227_v27 = vpop.f32.mrb[153].mxu0  ;;  %v8148_v54 = vld [vmem:[%s14157_s2 + $0x2] ss:$0 sm:$0xff] }
 0x645   :  { %v1902_v29 = vpop.f32.mrb[154].mxu0 }
 0x646   :  { %v9228_v30 = vpop.f32.mrb[155].mxu0 }
 0x64b   :  { %v2095_v44 = vpop.f32.mrb[156].mxu0 }
 0x64c   :  { %v2133_v32 = vadd.f32 %v2095_v44, %v1868_v58  ;;  %v9275_v52 = vpop.f32.mrb[157].mxu0 }
 0x64d   :  { %v2098_v33 = vpop.f32.mrb[158].mxu0 }
 0x64e   :  { %v2134_v47 = vadd.f32 %v2098_v33, %v1871_v61  ;;  %v9276_v34 = vpop.f32.mrb[159].mxu0 }
 0x653   :  { %v2103_v35 = vpop.f32.mrb[160].mxu0 }
 0x654   :  { %v2135_v5 = vadd.f32 %v2103_v35, %v1876_v4  ;;  %v9279_v37 = vpop.f32.mrb[161].mxu0 }
 0x655   :  { %v2106_v38 = vpop.f32.mrb[162].mxu0 }
 0x656   :  { %v2136_v39 = vadd.f32 %v2106_v38, %v1879_v11  ;;  %v9280_v0 = vpop.f32.mrb[163].mxu0 }
 0x65b   :  { %v2111_v40 = vpop.f32.mrb[164].mxu0 }
 0x65c   :  { %v2137_v60 = vadd.f32 %v2111_v40, %v1884_v17  ;;  %v9283_v62 = vpop.f32.mrb[165].mxu0 }
 0x65d   :  { %v2114_v12 = vpop.f32.mrb[166].mxu0 }
 0x65e   :  { %v2138_v6 = vadd.f32 %v2114_v12, %v1887_v45  ;;  %v9284_v19 = vpop.f32.mrb[167].mxu0 }
 0x663   :  { %v2119_v42 = vpop.f32.mrb[168].mxu0 }
 0x664   :  { %v2139_v43 = vadd.f32 %v2119_v42, %v1892_v23  ;;  %v9287_v18 = vpop.f32.mrb[169].mxu0 }
 0x665   :  { %v2122_v16 = vpop.f32.mrb[170].mxu0 }
 0x666   :  { %v2140_v46 = vadd.f32 %v2122_v16, %v1895_v14  ;;  %v9288_v24 = vpop.f32.mrb[171].mxu0  ;;  %v2411_v16 = vld [vmem:[%s14157_s2 + $0x28] sm:$0xff] }
 0x66b   :  { %v2127_v28 = vpop.f32.mrb[172].mxu0 }
 0x66c   :  { %v2141_v26 = vadd.f32 %v2127_v28, %v1900_v25  ;;  %v9291_v48 = vpop.f32.mrb[173].mxu0 }
 0x66d   :  { %v2130_v49 = vpop.f32.mrb[174].mxu0 }
 0x66e   :  { %v9292_v50 = vpop.f32.mrb[175].mxu0 }
 0x66f   :  { %v2412_v50 = vld [vmem:[%s14157_s2 + $0x30] sm:$0xff] }
 0x673   :  { %v2332_v53 = vpop.f32.mrb[176].mxu0 }
 0x674   :  { %v2370_v55 = vadd.f32 %v2332_v53, %v2133_v32  ;;  %v9339_v56 = vpop.f32.mrb[177].mxu0 }
 0x675   :  { %v2335_v31 = vpop.f32.mrb[178].mxu0 }
 0x676   :  { %v2384_v57 = vadd.f32 %v8148_v54, %v2370_v55  ;;  %v2371_v58 = vadd.f32 %v2335_v31, %v2134_v47  ;;  %v9340_v36 = vpop.f32.mrb[179].mxu0  ;;  %v2413_v55 = vld [vmem:[%s14157_s2 + $0x38] sm:$0xff] }
 0x678   :  { %v2385_v59 = vadd.f32 %v8148_v54, %v2371_v58  ;;  %v2393_v61 = vmax.f32 %v2384_v57, 0.0 }
 0x67a   :  { %v2394_v1 = vmax.f32 %v2385_v59, 0.0 }
 0x67b   :  { %v2340_v3 = vpop.f32.mrb[180].mxu0 }
 0x67c   :  { %v2405_v4 = vpack.c.bf16 %v2394_v1, %v2393_v61  ;;  %v2372_v7 = vadd.f32 %v2340_v3, %v2135_v5  ;;  %v9343_v10 = vpop.f32.mrb[181].mxu0  ;;  %v2414_v61 = vld [vmem:[%s14157_s2 + $0x40] sm:$0xff] }
 0x67d   :  { %v2343_v11 = vpop.f32.mrb[182].mxu0 }
 0x67e   :  { %v2386_v13 = vadd.f32 %v8148_v54, %v2372_v7  ;;  %v2373_v15 = vadd.f32 %v2343_v11, %v2136_v39  ;;  %9362 = vmatmul.mubr.msk.bf16.vlgmr.msra.gmra.mrb[188].mxu1 %vm2428_vm10, %v2405_v4  ;;  %v9344_v17 = vpop.f32.mrb[183].mxu0  ;;  %v2415_v4 = vld [vmem:[%s14157_s2 + $0x48] sm:$0xff] }
 0x67f   :  { %9365 = vmatprep.mubr.msk.bf16.mxu1 %vm10779_vm5, %v10778_v51 }
 0x680   :  { %v2387_v20 = vadd.f32 %v8148_v54, %v2373_v15  ;;  %v2395_v21 = vmax.f32 %v2386_v13, 0.0 }
 0x682   :  { %v2396_v45 = vmax.f32 %v2387_v20, 0.0 }
 0x683   :  { %v2348_v63 = vpop.f32.mrb[184].mxu0 }
 0x684   :  { %v2374_v2 = vadd.f32 %v2348_v63, %v2137_v60  ;;  %v9347_v23 = vpop.f32.mrb[185].mxu0  ;;  %v2406_v8 = vpack.c.bf16 %v2396_v45, %v2395_v21  ;;  %v2416_v21 = vld [vmem:[%s14157_s2 + $0x50] sm:$0xff]  ;;  %v2417_v63 = vld [vmem:[%s14157_s2 + $0x58] sm:$0xff] }
 0x685   :  { %v2351_v9 = vpop.f32.mrb[186].mxu0 }
 0x686   :  { %v2388_v14 = vadd.f32 %v8148_v54, %v2374_v2  ;;  %v2375_v41 = vadd.f32 %v2351_v9, %v2138_v6  ;;  %9366 = vmatmul.mubr.msk.bf16.gmra.mrb[192].mxu1 %vm2428_vm10, %v2406_v8  ;;  %v9348_v22 = vpop.f32.mrb[187].mxu0 }
 0x687   :  { %9369 = vmatprep.mubr.msk.bf16.mxu1 %vm10779_vm5, %v10778_v51 }
 0x688   :  { %v2389_v25 = vadd.f32 %v8148_v54, %v2375_v41  ;;  %v2397_v27 = vmax.f32 %v2388_v14, 0.0 }
 0x68a   :  { %v2398_v29 = vmax.f32 %v2389_v25, 0.0  ;;  %v2418_v25 = vld [vmem:[%s14157_s2 + $0x60] sm:$0xff] }
 0x68b   :  { %v2356_v30 = vpop.f32.mrb[188].mxu0 }
 0x68c   :  { %v2376_v44 = vadd.f32 %v2356_v30, %v2139_v43  ;;  %v9351_v32 = vpop.f32.mrb[189].mxu0  ;;  %v2407_v52 = vpack.c.bf16 %v2398_v29, %v2397_v27  ;;  %v2410_v43 = vld [vmem:[%s14157_s2 + $0x20] sm:$0xff] }
 0x68d   :  { %v2359_v33 = vpop.f32.mrb[190].mxu0 }
 0x68e   :  { %v2390_v47 = vadd.f32 %v8148_v54, %v2376_v44  ;;  %v2377_v34 = vadd.f32 %v2359_v33, %v2140_v46  ;;  %9370 = vmatmul.mubr.msk.bf16.gmra.mrb[196].mxu1 %vm2428_vm10, %v2407_v52  ;;  %v9352_v35 = vpop.f32.mrb[191].mxu0  ;;  %v10305_v33 = vld [vmem:[%s14156_s1 + $0x90] sm:$0xff]  }
 0x68f   :  { %9373 = vmatprep.mubr.msk.bf16.mxu1 %vm10779_vm5, %v10778_v51  ;;  %9382 = vmatpush3.bf16.msra.mxu0 %v10305_v33 }
 0x690   :  { %v2391_v5 = vadd.f32 %v8148_v54, %v2377_v34  ;;  %v2399_v37 = vmax.f32 %v2390_v47, 0.0  ;;  %9383 = vmatprep.subr.bf16.mxu0 %v10778_v51 }
 0x692   :  { %v2400_v38 = vmax.f32 %v2391_v5, 0.0 }
 0x693   :  { %v2364_v39 = vpop.f32.mrb[192].mxu0 }
 0x694   :  { %v2378_v0 = vadd.f32 %v2364_v39, %v2141_v26  ;;  %v2408_v40 = vpack.c.bf16 %v2400_v38, %v2399_v37  ;;  %v9355_v60 = vpop.f32.mrb[193].mxu0 }
 0x695   :  { %v2367_v62 = vpop.f32.mrb[194].mxu0 }
 0x696   :  { %v2392_v12 = vadd.f32 %v8148_v54, %v2378_v0  ;;  %9374 = vmatmul.mubr.msk.bf16.gmra.mrb[200].mxu1 %vm2428_vm10, %v2408_v40  ;;  %v9356_v6 = vpop.f32.mrb[195].mxu0 }
 0x697   :  { %9377 = vmatprep.mubr.msk.bf16.mxu1 %vm10779_vm5, %v10778_v51 }
 0x698   :  { %v2401_v19 = vmax.f32 %v2392_v12, 0.0 }
 0x69a   :  { %v2409_v42 = vpack.c.bf16 %v2401_v19, %v2401_v19 }
 0x69e   :  { %9378 = vmatmul.mubr.msk.bf16.gmra.mrb[204].mxu1 %vm2428_vm10, %v2409_v42 }
 0x69f   :  { %9415 = vmatprep.mubr.msk.bf16.mxu1 %vm10779_vm5, %v10778_v51 }
 0x751   :  { %v2482_v18 = vpop.f32.mrb[188].mxu1 }
 0x752   :  { %v11660_v46 = vadd.f32 %v2482_v18, %v2410_v43  ;;  %v9363_v24 = vpop.f32.mrb[189].mxu1 }
 0x753   :  { %v2485_v28 = vpop.f32.mrb[190].mxu1 }
 0x754   :  { %v11662_v26 = vadd.f32 %v2485_v28, %v2411_v16  ;;  %v9364_v48 = vpop.f32.mrb[191].mxu1  ;;  %v2532_v49 = vsel %vm2531_vm11, %v11660_v46, 0.0 }
 0x755   :  { %2533 = vadd.xlane.f32.xlu0 %v2532_v49 }
 0x756   :  { %v2535_v53 = vsel %vm2531_vm11, %v11662_v26, 0.0 }
 0x759   :  { %2536 = vadd.xlane.f32.xlu0 %v2535_v53  ;;  %v2490_v54 = vpop.f32.mrb[192].mxu1 }
 0x75a   :  { %v11674_v56 = vadd.f32 %v2490_v54, %v2412_v50  ;;  %v9367_v31 = vpop.f32.mrb[193].mxu1 }
 0x75b   :  { %v2493_v57 = vpop.f32.mrb[194].mxu1 }
 0x75c   :  { %v11676_v58 = vadd.f32 %v2493_v57, %v2413_v55  ;;  %v9368_v36 = vpop.f32.mrb[195].mxu1  ;;  %v2538_v59 = vsel %vm2531_vm11, %v11674_v56, 0.0 }
 0x75d   :  { %2539 = vadd.xlane.f32.xlu1 %v2538_v59 }
 0x75e   :  { %v2541_v1 = vsel %vm2531_vm11, %v11676_v58, 0.0 }
 0x761   :  { %2542 = vadd.xlane.f32.xlu1 %v2541_v1  ;;  %v2498_v3 = vpop.f32.mrb[196].mxu1 }
 0x762   :  { %v11688_v7 = vadd.f32 %v2498_v3, %v2414_v61  ;;  %v9371_v10 = vpop.f32.mrb[197].mxu1 }
 0x763   :  { %v2501_v11 = vpop.f32.mrb[198].mxu1 }
 0x764   :  { %v11690_v13 = vadd.f32 %v2501_v11, %v2415_v4  ;;  %v9372_v15 = vpop.f32.mrb[199].mxu1  ;;  %v2544_v17 = vsel %vm2531_vm11, %v11688_v7, 0.0 }
 0x765   :  { %2545 = vadd.xlane.f32.xlu0 %v2544_v17 }
 0x766   :  { %v2547_v20 = vsel %vm2531_vm11, %v11690_v13, 0.0 }
 0x767   :  { %2548 = vadd.xlane.f32.xlu1 %v2547_v20 }
 0x769   :  { %v2506_v45 = vpop.f32.mrb[200].mxu1 }
 0x76a   :  { %v11702_v2 = vadd.f32 %v2506_v45, %v2416_v21  ;;  %v9375_v23 = vpop.f32.mrb[201].mxu1 }
 0x76b   :  { %v2509_v8 = vpop.f32.mrb[202].mxu1 }
 0x76c   :  { %v11704_v9 = vadd.f32 %v2509_v8, %v2417_v63  ;;  %v9376_v14 = vpop.f32.mrb[203].mxu1  ;;  %v2550_v41 = vsel %vm2531_vm11, %v11702_v2, 0.0 }
 0x76d   :  { %2551 = vadd.xlane.f32.xlu0 %v2550_v41  ;;  %v10306_v41 = vld [vmem:[%s14156_s1 + $0x98] sm:$0xff]  }
 0x76e   :  { %v2553_v22 = vsel %vm2531_vm11, %v11704_v9, 0.0  ;;  %9384 = vmatpush3.bf16.msra.mxu0 %v10306_v41 }
 0x76f   :  { %2554 = vadd.xlane.f32.xlu1 %v2553_v22  ;;  %9435 = vmatprep.subr.bf16.mxu0 %v10778_v51 }
 0x771   :  { %v2514_v27 = vpop.f32.mrb[204].mxu1 }
 0x772   :  { %v11713_v29 = vadd.f32 %v2514_v27, %v2418_v25  ;;  %v9379_v30 = vpop.f32.mrb[205].mxu1 }
 0x773   :  { %v2517_v44 = vpop.f32.mrb[206].mxu1 }
 0x774   :  { %v9380_v32 = vpop.f32.mrb[207].mxu1  ;;  %v2556_v52 = vsel %vm2531_vm11, %v11713_v29, 0.0 }
 0x775   :  { %2557 = vadd.xlane.f32.xlu0 %v2556_v52 }
 0x7e2   :  { %v2534_v47 = vpop.xlane.xlu0 %2533 }
 0x7e3   :  { %v2560_v34 = vmul.f32 0.03125, %v2534_v47 }
 0x7e5   :  { %v11722_v35 = vsub.f32 %v11660_v46, %v2560_v34 }
 0x7e6   :  { %v2537_v5 = vpop.xlane.xlu0 %2536 }
 0x7e7   :  { %v2561_v37 = vmul.f32 0.03125, %v2537_v5  ;;  %v2578_v38 = vmul.f32 %v11722_v35, %v11722_v35 }
 0x7e9   :  { %v11727_v39 = vsub.f32 %v11662_v26, %v2561_v37  ;;  %v2587_v0 = vsel %vm2531_vm11, %v2578_v38, 0.0 }
 0x7ea   :  { %v2540_v40 = vpop.xlane.xlu1 %2539  ;;  %2588 = vadd.xlane.f32.xlu1 %v2587_v0 }
 0x7eb   :  { %v2562_v60 = vmul.f32 0.03125, %v2540_v40  ;;  %v2579_v62 = vmul.f32 %v11727_v39, %v11727_v39 }
 0x7ed   :  { %v11733_v12 = vsub.f32 %v11674_v56, %v2562_v60  ;;  %v2590_v6 = vsel %vm2531_vm11, %v2579_v62, 0.0  ;;  %v11783_v60 = vld [vmem:[%s14157_s2 + $0x3] ss:$0 sm:$0xff] }
 0x7ee   :  { %v2543_v19 = vpop.xlane.xlu1 %2542  ;;  %2591 = vadd.xlane.f32.xlu0 %v2590_v6 }
 0x7ef   :  { %v2563_v42 = vmul.f32 0.03125, %v2543_v19  ;;  %v2580_v43 = vmul.f32 %v11733_v12, %v11733_v12 }
 0x7f1   :  { %v11739_v18 = vsub.f32 %v11676_v58, %v2563_v42  ;;  %v2593_v16 = vsel %vm2531_vm11, %v2580_v43, 0.0 }
 0x7f2   :  { %v2546_v24 = vpop.xlane.xlu0 %2545  ;;  %2594 = vadd.xlane.f32.xlu1 %v2593_v16 }
 0x7f3   :  { %v2564_v28 = vmul.f32 0.03125, %v2546_v24  ;;  %v2581_v48 = vmul.f32 %v11739_v18, %v11739_v18 }
 0x7f4   :  { %v2549_v49 = vpop.xlane.xlu1 %2548 }
 0x7f5   :  { %v11745_v50 = vsub.f32 %v11688_v7, %v2564_v28  ;;  %v2565_v53 = vmul.f32 0.03125, %v2549_v49  ;;  %v2596_v54 = vsel %vm2531_vm11, %v2581_v48, 0.0 }
 0x7f6   :  { %2597 = vadd.xlane.f32.xlu0 %v2596_v54 }
 0x7f7   :  { %v11749_v55 = vsub.f32 %v11690_v13, %v2565_v53  ;;  %v2582_v31 = vmul.f32 %v11745_v50, %v11745_v50 }
 0x7f9   :  { %v2599_v57 = vsel %vm2531_vm11, %v2582_v31, 0.0  ;;  %v2583_v36 = vmul.f32 %v11749_v55, %v11749_v55 }
 0x7fa   :  { %v2552_v59 = vpop.xlane.xlu0 %2551  ;;  %2600 = vadd.xlane.f32.xlu1 %v2599_v57 }
 0x7fb   :  { %v2566_v61 = vmul.f32 0.03125, %v2552_v59  ;;  %v2602_v1 = vsel %vm2531_vm11, %v2583_v36, 0.0 }
 0x7fc   :  { %v2555_v3 = vpop.xlane.xlu1 %2554  ;;  %2603 = vadd.xlane.f32.xlu0 %v2602_v1 }
 0x7fd   :  { %v11758_v4 = vsub.f32 %v11702_v2, %v2566_v61  ;;  %v2567_v10 = vmul.f32 0.03125, %v2555_v3 }
 0x7ff   :  { %v11761_v11 = vsub.f32 %v11704_v9, %v2567_v10  ;;  %v2584_v15 = vmul.f32 %v11758_v4, %v11758_v4 }
 0x801   :  { %v2605_v17 = vsel %vm2531_vm11, %v2584_v15, 0.0  ;;  %v2585_v20 = vmul.f32 %v11761_v11, %v11761_v11 }
 0x802   :  { %2606 = vadd.xlane.f32.xlu1 %v2605_v17  ;;  %v2558_v21 = vpop.xlane.xlu0 %2557 }
 0x803   :  { %v2568_v45 = vmul.f32 0.03125, %v2558_v21  ;;  %v2608_v63 = vsel %vm2531_vm11, %v2585_v20, 0.0 }
 0x804   :  { %2609 = vadd.xlane.f32.xlu0 %v2608_v63 }
 0x805   :  { %v11770_v23 = vsub.f32 %v11713_v29, %v2568_v45 }
 0x807   :  { %v2586_v8 = vmul.f32 %v11770_v23, %v11770_v23 }
 0x809   :  { %v2611_v14 = vsel %vm2531_vm11, %v2586_v8, 0.0 }
 0x80a   :  { %2612 = vadd.xlane.f32.xlu1 %v2611_v14 }
 0x877   :  { %v2589_v22 = vpop.xlane.xlu1 %2588 }
 0x878   :  { %v2614_v25 = vmul.f32 0.03125, %v2589_v22 }
 0x87a   :  { %v2623_v27 = vadd.f32 1e-05, %v2614_v25 }
 0x87b   :  { %v2592_v30 = vpop.xlane.xlu0 %2591 }
 0x87c   :  { %10327 = vrsqrt.f32 %v2623_v27  ;;  %v2615_v44 = vmul.f32 0.03125, %v2592_v30 }
 0x87e   :  { %v2624_v32 = vadd.f32 1e-05, %v2615_v44 }
 0x87f   :  { %v2595_v52 = vpop.xlane.xlu1 %2594 }
 0x880   :  { %10329 = vrsqrt.f32 %v2624_v32  ;;  %v2616_v33 = vmul.f32 0.03125, %v2595_v52 }
 0x882   :  { %v2625_v47 = vadd.f32 1e-05, %v2616_v33 }
 0x883   :  { %v2598_v34 = vpop.xlane.xlu0 %2597 }
 0x884   :  { %10331 = vrsqrt.f32 %v2625_v47  ;;  %v2617_v5 = vmul.f32 0.03125, %v2598_v34 }
 0x886   :  { %v10328_v37 = vpop.eup %10327  ;;  %v2626_v38 = vadd.f32 1e-05, %v2617_v5 }
 0x887   :  { %v2641_v0 = vmul.f32 %v10328_v37, %v11722_v35  ;;  %v2601_v40 = vpop.xlane.xlu1 %2600  ;;  %v8157_v35 = vld [vmem:[%s14157_s2 + $0x4] ss:$0 sm:$0xff] }
 0x888   :  { %10333 = vrsqrt.f32 %v2626_v38  ;;  %v2618_v62 = vmul.f32 0.03125, %v2601_v40 }
 0x889   :  { %v2604_v6 = vpop.xlane.xlu0 %2603  ;;  %v2654_v16 = vmul.f32 %v11783_v60, %v2641_v0 }
 0x88a   :  { %v10330_v19 = vpop.eup %10329  ;;  %v2627_v42 = vadd.f32 1e-05, %v2618_v62  ;;  %v2619_v43 = vmul.f32 0.03125, %v2604_v6 }
 0x88b   :  { %v2642_v24 = vmul.f32 %v10330_v19, %v11727_v39  ;;  %v2667_v53 = vadd.f32 %v8157_v35, %v2654_v16  ;;  %v8158_v19 = vld [vmem:[%s14157_s2 + $0x5] ss:$0 sm:$0xff] }
 0x88c   :  { %10335 = vrsqrt.f32 %v2627_v42  ;;  %v2628_v28 = vadd.f32 1e-05, %v2619_v43 }
 0x88d   :  { %v2655_v48 = vmul.f32 %v11783_v60, %v2642_v24 }
 0x88e   :  { %v10332_v49 = vpop.eup %10331  ;;  %10337 = vrsqrt.f32 %v2628_v28 }
 0x88f   :  { %v2668_v54 = vadd.f32 %v8157_v35, %v2655_v48  ;;  %v2607_v31 = vpop.xlane.xlu1 %2606  ;;  %v2643_v57 = vmul.f32 %v10332_v49, %v11733_v12 }
 0x890   :  { %v2620_v36 = vmul.f32 0.03125, %v2607_v31 }
 0x891   :  { %v2610_v59 = vpop.xlane.xlu0 %2609  ;;  %v2680_v61 = vpack.c.bf16 %v2668_v54, %v2667_v53  ;;  %v2656_v15 = vmul.f32 %v11783_v60, %v2643_v57 }
 0x892   :  { %v10334_v1 = vpop.eup %10333  ;;  %v2629_v39 = vadd.f32 1e-05, %v2620_v36  ;;  %v2621_v3 = vmul.f32 0.03125, %v2610_v59 }
 0x893   :  { %9386 = vmatmul.mubr.msk.bf16.vlgmr.msra.gmra.mrb[196].mxu0 %vm2531_vm11, %v2680_v61  ;;  %v2644_v10 = vmul.f32 %v10334_v1, %v11739_v18  ;;  %v2669_v45 = vadd.f32 %v8157_v35, %v2656_v15 }
 0x894   :  { %10339 = vrsqrt.f32 %v2629_v39  ;;  %v2630_v17 = vadd.f32 1e-05, %v2621_v3  ;;  %9389 = vmatprep.mubr.msk.bf16.mxu0 %vm10779_vm5, %v10778_v51 }
 0x895   :  { %v2657_v20 = vmul.f32 %v11783_v60, %v2644_v10 }
 0x896   :  { %v10336_v12 = vpop.eup %10335  ;;  %10341 = vrsqrt.f32 %v2630_v17 }
 0x897   :  { %v2613_v21 = vpop.xlane.xlu1 %2612  ;;  %v2670_v63 = vadd.f32 %v8157_v35, %v2657_v20  ;;  %v2645_v8 = vmul.f32 %v10336_v12, %v11745_v50 }
 0x898   :  { %v10338_v14 = vpop.eup %10337  ;;  %v2622_v41 = vmul.f32 0.03125, %v2613_v21 }
 0x899   :  { %v2681_v22 = vpack.c.bf16 %v2670_v63, %v2669_v45  ;;  %v2646_v18 = vmul.f32 %v10338_v14, %v11749_v55  ;;  %v2658_v27 = vmul.f32 %v11783_v60, %v2645_v8 }
 0x89a   :  { %v2631_v25 = vadd.f32 1e-05, %v2622_v41 }
 0x89b   :  { %9390 = vmatmul.mubr.msk.bf16.gmra.mrb[200].mxu0 %vm2531_vm11, %v2681_v22  ;;  %v2659_v30 = vmul.f32 %v11783_v60, %v2646_v18  ;;  %v2671_v52 = vadd.f32 %v8157_v35, %v2658_v27 }
 0x89c   :  { %10343 = vrsqrt.f32 %v2631_v25  ;;  %9393 = vmatprep.mubr.msk.bf16.mxu0 %vm10779_vm5, %v10778_v51 }
 0x89d   :  { %v2672_v44 = vadd.f32 %v8157_v35, %v2659_v30 }
 0x89e   :  { %v10340_v32 = vpop.eup %10339 }
 0x89f   :  { %v2647_v50 = vmul.f32 %v10340_v32, %v11758_v4  ;;  %v2682_v47 = vpack.c.bf16 %v2672_v44, %v2671_v52 }
 0x8a0   :  { %v10342_v33 = vpop.eup %10341 }
 0x8a1   :  { %v2648_v55 = vmul.f32 %v10342_v33, %v11761_v11  ;;  %v2660_v34 = vmul.f32 %v11783_v60, %v2647_v50 }
 0x8a3   :  { %9394 = vmatmul.mubr.msk.bf16.gmra.mrb[204].mxu0 %vm2531_vm11, %v2682_v47  ;;  %v2661_v5 = vmul.f32 %v11783_v60, %v2648_v55  ;;  %v2673_v0 = vadd.f32 %v8157_v35, %v2660_v34 }
 0x8a4   :  { %9397 = vmatprep.mubr.msk.bf16.mxu0 %vm10779_vm5, %v10778_v51 }
 0x8a5   :  { %v2674_v37 = vadd.f32 %v8157_v35, %v2661_v5 }
 0x8a6   :  { %v10344_v38 = vpop.eup %10343 }
 0x8a7   :  { %v2649_v40 = vmul.f32 %v10344_v38, %v11770_v23  ;;  %v2683_v62 = vpack.c.bf16 %v2674_v37, %v2673_v0 }
 0x8a9   :  { %v2662_v4 = vmul.f32 %v11783_v60, %v2649_v40 }
 0x8ab   :  { %9398 = vmatmul.mubr.msk.bf16.gmra.mrb[208].mxu0 %vm2531_vm11, %v2683_v62  ;;  %v2675_v11 = vadd.f32 %v8157_v35, %v2662_v4 }
 0x8ac   :  { %9401 = vmatprep.mubr.msk.bf16.mxu0 %vm10779_vm5, %v10778_v51 }
 0x8ad   :  { %v2684_v6 = vpack.c.bf16 %v2675_v11, %v2675_v11 }
 0x8b3   :  { %9402 = vmatmul.mubr.msk.bf16.gmra.mrb[212].mxu0 %vm2531_vm11, %v2684_v6 }
 0x8b4   :  { %9445 = vmatprep.mubr.msk.bf16.mxu0 %vm10779_vm5, %v10778_v51 }
 0x966   :  { %v2751_v23 = vpop.f32.mrb[196].mxu0 }
 0x967   :  { %v9387_v42 = vpop.f32.mrb[197].mxu0  ;;  %v2752_v60 = vadd.f32 %v8158_v19, %v2751_v23 }
 0x968   :  { %v2754_v43 = vpop.f32.mrb[198].mxu0 }
 0x969   :  { %v2755_v16 = vadd.f32 %v8158_v19, %v2754_v43  ;;  %v9388_v24 = vpop.f32.mrb[199].mxu0 }
 0x96b   :  { %v11823_v28 = vpack.c.bf16 %v2755_v16, %v2752_v60 }
 0x96d   :  { %2803 = vrot.lane.b32.xlu0 %v11823_v28, %s10780_s24 }
 0x96e   :  { %v2759_v35 = vpop.f32.mrb[200].mxu0 }
 0x96f   :  { %v9391_v48 = vpop.f32.mrb[201].mxu0  ;;  %v2760_v53 = vadd.f32 %v8158_v19, %v2759_v35 }
 0x970   :  { %v2762_v49 = vpop.f32.mrb[202].mxu0 }
 0x971   :  { %v2763_v54 = vadd.f32 %v8158_v19, %v2762_v49  ;;  %v9392_v31 = vpop.f32.mrb[203].mxu0 }
 0x973   :  { %v11827_v57 = vpack.c.bf16 %v2763_v54, %v2760_v53 }
 0x975   :  { %2805 = vrot.lane.b32.xlu1 %v11827_v57, %s10780_s24 }
 0x976   :  { %v2767_v36 = vpop.f32.mrb[204].mxu0 }
 0x977   :  { %v9395_v59 = vpop.f32.mrb[205].mxu0  ;;  %v2768_v1 = vadd.f32 %v8158_v19, %v2767_v36 }
 0x978   :  { %v2770_v61 = vpop.f32.mrb[206].mxu0 }
 0x979   :  { %v2771_v39 = vadd.f32 %v8158_v19, %v2770_v61  ;;  %v9396_v3 = vpop.f32.mrb[207].mxu0 }
 0x97b   :  { %v11831_v10 = vpack.c.bf16 %v2771_v39, %v2768_v1 }
 0x97d   :  { %2807 = vrot.lane.b32.xlu1 %v11831_v10, %s10780_s24 }
 0x97e   :  { %v2775_v15 = vpop.f32.mrb[208].mxu0 }
 0x97f   :  { %v9399_v17 = vpop.f32.mrb[209].mxu0  ;;  %v2776_v12 = vadd.f32 %v8158_v19, %v2775_v15 }
 0x980   :  { %v2778_v20 = vpop.f32.mrb[210].mxu0 }
 0x981   :  { %v2779_v21 = vadd.f32 %v8158_v19, %v2778_v20  ;;  %v9400_v45 = vpop.f32.mrb[211].mxu0 }
 0x983   :  { %v11835_v63 = vpack.c.bf16 %v2779_v21, %v2776_v12 }
 0x985   :  { %2809 = vrot.lane.b32.xlu1 %v11835_v63, %s10780_s24 }
 0x986   :  { %v2783_v8 = vpop.f32.mrb[212].mxu0 }
 0x987   :  { %v2784_v14 = vadd.f32 %v8158_v19, %v2783_v8  ;;  %v9403_v41 = vpop.f32.mrb[213].mxu0 }
 0x988   :  { %v2786_v22 = vpop.f32.mrb[214].mxu0 }
 0x989   :  { %v11839_v18 = vpack.c.bf16 %v2784_v14, %v2784_v14  ;;  %3158 = vrot.lane.b32.xlu1 %v11823_v28, %s10781_s25  ;;  %v9404_v25 = vpop.f32.mrb[215].mxu0 }
 0x98b   :  { %2811 = vrot.lane.b32.xlu0 %v11839_v18, %s10780_s24 }
 0x98d   :  { %3162 = vrot.lane.b32.xlu1 %v11831_v10, %s10781_s25 }
 0x98f   :  { %3160 = vrot.lane.b32.xlu0 %v11827_v57, %s10781_s25 }
 0x991   :  { %3166 = vrot.lane.b32.xlu1 %v11839_v18, %s10781_s25 }
 0x993   :  { %3164 = vrot.lane.b32.xlu0 %v11835_v63, %s10781_s25 }
 0x995   :  { %3150 = vrot.lane.b32.xlu1 %v11827_v57, %s10782_s26 }
 0x997   :  { %3148 = vrot.lane.b32.xlu0 %v11823_v28, %s10782_s26 }
 0x999   :  { %3154 = vrot.lane.b32.xlu1 %v11835_v63, %s10782_s26 }
 0x99b   :  { %3152 = vrot.lane.b32.xlu0 %v11831_v10, %s10782_s26 }
 0x99d   :  { %3039 = vrot.lane.b32.xlu1 %v11823_v28, %s10783_s4 }
 0x99f   :  { %3156 = vrot.lane.b32.xlu0 %v11839_v18, %s10782_s26 }
 0x9a1   :  { %3043 = vrot.lane.b32.xlu1 %v11831_v10, %s10783_s4 }
 0x9a3   :  { %3041 = vrot.lane.b32.xlu0 %v11827_v57, %s10783_s4 }
 0x9a5   :  { %3047 = vrot.lane.b32.xlu1 %v11839_v18, %s10783_s4 }
 0x9a7   :  { %3045 = vrot.lane.b32.xlu0 %v11835_v63, %s10783_s4 }
 0x9ab   :  { %3392 = vrot.lane.b32.xlu0 %v11823_v28, %s10784_s27 }
 0x9df   :  { %v2804_v27 = vpop.permute.xlu0 %2803 }
 0x9e0   :  { %v2830_v30 = vsel %vm2813_vm12, %v2804_v27, 0 }
 0x9e1   :  { %9406 = vmatpush3.bf16.xpose.msra.mxu1 %v2830_v30 }
 0x9e2   :  { %9407 = vmatprep.subr.bf16.mxu1 %v10778_v51 }
 0x9e7   :  { %v2806_v44 = vpop.permute.xlu1 %2805 }
 0x9e8   :  { %v2833_v32 = vsel %vm2813_vm12, %v2806_v44, 0 }
 0x9e9   :  { %9408 = vmatpush3.bf16.xpose.msra.mxu1 %v2833_v32 }
 0x9ea   :  { %9409 = vmatprep.subr.bf16.mxu1 %v10778_v51 }
 0x9ef   :  { %v2808_v52 = vpop.permute.xlu1 %2807 }
 0x9f0   :  { %v2836_v50 = vsel %vm2813_vm12, %v2808_v52, 0 }
 0x9f1   :  { %9410 = vmatpush3.bf16.xpose.msra.mxu1 %v2836_v50 }
 0x9f2   :  { %9411 = vmatprep.subr.bf16.mxu1 %v10778_v51 }
 0x9f7   :  { %v2810_v33 = vpop.permute.xlu1 %2809 }
 0x9f8   :  { %v2839_v47 = vsel %vm2813_vm12, %v2810_v33, 0 }
 0x9f9   :  { %9412 = vmatpush3.bf16.xpose.msra.mxu1 %v2839_v47 }
 0x9fa   :  { %9413 = vmatprep.subr.bf16.mxu1 %v10778_v51 }
 0x9fb   :  { %v3159_v55 = vpop.permute.xlu1 %3158 }
 0x9fc   :  { %v3184_v4 = vsel %vm2813_vm12, %v3159_v55, 0 }
 0x9fd   :  { %v2812_v34 = vpop.permute.xlu0 %2811 }
 0x9fe   :  { %v2842_v37 = vsel %vm2813_vm12, %v2812_v34, 0 }
 0x9ff   :  { %v3163_v5 = vpop.permute.xlu1 %3162 }
 0xa00   :  { %v3190_v16 = vsel %vm2813_vm12, %v3163_v5, 0 }
 0xa01   :  { %9414 = vmatpush3.bf16.xpose.msra.mxu1 %v2842_v37  ;;  %v3161_v38 = vpop.permute.xlu0 %3160 }
 0xa02   :  { %9465 = vmatprep.subr.bf16.mxu1 %v10778_v51  ;;  %v3187_v42 = vsel %vm2813_vm12, %v3161_v38, 0 }
 0xa03   :  { %v3167_v0 = vpop.permute.xlu1 %3166 }
 0xa04   :  { %v3196_v54 = vsel %vm2813_vm12, %v3167_v0, 0 }
 0xa05   :  { %v3165_v40 = vpop.permute.xlu0 %3164 }
 0xa06   :  { %v3193_v49 = vsel %vm2813_vm12, %v3165_v40, 0 }
 0xa07   :  { %v3151_v62 = vpop.permute.xlu1 %3150 }
 0xa08   :  { %9416 = vmatmul.mubr.msk.bf16.vlgmr.msra.gmra.mrb[208].mxu1 %vm2813_vm12, %v11823_v28 }
 0xa09   :  { %9466 = vmatpush3.bf16.xpose.msra.mxu1 %v3184_v4  ;;  %v3149_v11 = vpop.permute.xlu0 %3148  ;;  %9419 = vmatprep.mubr.msk.bf16.mxu1 %vm10779_vm5, %v10778_v51 }
 0xa0a   :  { %9467 = vmatprep.subr.bf16.mxu1 %v10778_v51 }
 0xa0b   :  { %v3155_v6 = vpop.permute.xlu1 %3154 }
 0xa0d   :  { %v3153_v19 = vpop.permute.xlu0 %3152 }
 0xa0f   :  { %v3040_v23 = vpop.permute.xlu1 %3039 }
 0xa10   :  { %9420 = vmatmul.mubr.msk.bf16.gmra.mrb[212].mxu1 %vm2813_vm12, %v11827_v57  ;;  %9436 = vmatpush3.bf16.msra.mxu0 %v3040_v23 }
 0xa11   :  { %9468 = vmatpush3.bf16.xpose.msra.mxu1 %v3187_v42  ;;  %v3157_v43 = vpop.permute.xlu0 %3156  ;;  %9437 = vmatprep.subr.bf16.mxu0 %v10778_v51 }
 0xa12   :  { %9423 = vmatprep.mubr.msk.bf16.mxu1 %vm10779_vm5, %v10778_v51  ;;  %9469 = vmatprep.subr.bf16.mxu1 %v10778_v51 }
 0xa13   :  { %v3044_v24 = vpop.permute.xlu1 %3043 }
 0xa15   :  { %v3042_v60 = vpop.permute.xlu0 %3041 }
 0xa16   :  { %9438 = vmatpush3.bf16.msra.mxu0 %v3042_v60 }
 0xa17   :  { %9439 = vmatprep.subr.bf16.mxu0 %v10778_v51  ;;  %v3048_v48 = vpop.permute.xlu1 %3047 }
 0xa18   :  { %9424 = vmatmul.mubr.msk.bf16.gmra.mrb[216].mxu1 %vm2813_vm12, %v11831_v10  ;;  %v3069_v53 = vsel %vm2444_vm9, %v3048_v48, 0 }
 0xa19   :  { %9470 = vmatpush3.bf16.xpose.msra.mxu1 %v3190_v16  ;;  %9427 = vmatprep.mubr.msk.bf16.mxu1 %vm10779_vm5, %v10778_v51  ;;  %v3046_v35 = vpop.permute.xlu0 %3045 }
 0xa1a   :  { %9440 = vmatpush3.bf16.msra.mxu0 %v3044_v24  ;;  %9471 = vmatprep.subr.bf16.mxu1 %v10778_v51 }
 0xa1b   :  { %9441 = vmatprep.subr.bf16.mxu0 %v10778_v51 }
 0xa1e   :  { %9442 = vmatpush3.bf16.msra.mxu0 %v3046_v35 }
 0xa1f   :  { %9443 = vmatprep.subr.bf16.mxu0 %v10778_v51 }
 0xa20   :  { %9428 = vmatmul.mubr.msk.bf16.gmra.mrb[220].mxu1 %vm2813_vm12, %v11835_v63 }
 0xa21   :  { %9472 = vmatpush3.bf16.xpose.msra.mxu1 %v3193_v49  ;;  %9431 = vmatprep.mubr.msk.bf16.mxu1 %vm10779_vm5, %v10778_v51 }
 0xa22   :  { %9444 = vmatpush3.bf16.msra.mxu0 %v3069_v53  ;;  %9473 = vmatprep.subr.bf16.mxu1 %v10778_v51 }
 0xa23   :  { %9495 = vmatprep.subr.bf16.mxu0 %v10778_v51 }
 0xa28   :  { %9432 = vmatmul.mubr.msk.bf16.gmra.mrb[224].mxu1 %vm2813_vm12, %v11839_v18 }
 0xa29   :  { %9474 = vmatpush3.bf16.xpose.msra.mxu1 %v3196_v54  ;;  %9475 = vmatprep.mubr.msk.bf16.mxu1 %vm10779_vm5, %v10778_v51 }
 0xa2a   :  { %9525 = vmatprep.subr.bf16.mxu1 %v10778_v51 }
 0xa30   :  { %9476 = vmatmul.mubr.msk.bf16.vlgmr.msra.gmra.mrb[228].mxu1 %vm2813_vm12, %v3149_v11 }
 0xa31   :  { %9479 = vmatprep.mubr.msk.bf16.mxu1 %vm10779_vm5, %v10778_v51 }
 0xa38   :  { %9480 = vmatmul.mubr.msk.bf16.gmra.mrb[232].mxu1 %vm2813_vm12, %v3151_v62 }
 0xa39   :  { %9483 = vmatprep.mubr.msk.bf16.mxu1 %vm10779_vm5, %v10778_v51 }
 0xa40   :  { %9484 = vmatmul.mubr.msk.bf16.gmra.mrb[236].mxu1 %vm2813_vm12, %v3153_v19 }
 0xa41   :  { %9487 = vmatprep.mubr.msk.bf16.mxu1 %vm10779_vm5, %v10778_v51 }
 0xa48   :  { %9488 = vmatmul.mubr.msk.bf16.gmra.mrb[240].mxu1 %vm2813_vm12, %v3155_v6 }
 0xa49   :  { %9491 = vmatprep.mubr.msk.bf16.mxu1 %vm10779_vm5, %v10778_v51 }
 0xa50   :  { %9492 = vmatmul.mubr.msk.bf16.gmra.mrb[244].mxu1 %vm2813_vm12, %v3157_v43 }
 0xa51   :  { %9527 = vmatprep.mubr.msk.bf16.mxu1 %vm10779_vm5, %v10778_v51 }
 0xadb   :  { %v2878_v31 = vpop.f32.mrb[208].mxu1 }
 0xadc   :  { %v9417_v36 = vpop.f32.mrb[209].mxu1  ;;  %v11936_v59 = vmul.f32 0.35355338, %v2878_v31 }
 0xadd   :  { %v2881_v61 = vpop.f32.mrb[210].mxu1 }
 0xade   :  { %v9418_v1 = vpop.f32.mrb[211].mxu1  ;;  %v2926_v39 = vsel %vm2925_vm13, %v11936_v59, -inf  ;;  %v11940_v3 = vmul.f32 0.35355338, %v2881_v61 }
 0xadf   :  { %2927 = vmax.xlane.f32.xlu1 %v2926_v39 }
 0xae0   :  { %v2929_v15 = vsel %vm2925_vm13, %v11940_v3, -inf }
 0xae1   :  { %2930 = vmax.xlane.f32.xlu0 %v2929_v15 }
 0xae3   :  { %v2886_v17 = vpop.f32.mrb[212].mxu1 }
 0xae4   :  { %v9421_v20 = vpop.f32.mrb[213].mxu1  ;;  %v11944_v12 = vmul.f32 0.35355338, %v2886_v17 }
 0xae5   :  { %v2889_v21 = vpop.f32.mrb[214].mxu1 }
 0xae6   :  { %v9422_v45 = vpop.f32.mrb[215].mxu1  ;;  %v2932_v8 = vsel %vm2925_vm13, %v11944_v12, -inf  ;;  %v11948_v14 = vmul.f32 0.35355338, %v2889_v21 }
 0xae7   :  { %2933 = vmax.xlane.f32.xlu0 %v2932_v8 }
 0xae8   :  { %v2935_v41 = vsel %vm2925_vm13, %v11948_v14, -inf }
 0xaeb   :  { %2936 = vmax.xlane.f32.xlu0 %v2935_v41  ;;  %v2894_v22 = vpop.f32.mrb[216].mxu1 }
 0xaec   :  { %v9425_v25 = vpop.f32.mrb[217].mxu1  ;;  %v11952_v27 = vmul.f32 0.35355338, %v2894_v22 }
 0xaed   :  { %v2897_v30 = vpop.f32.mrb[218].mxu1 }
 0xaee   :  { %v9426_v44 = vpop.f32.mrb[219].mxu1  ;;  %v2938_v32 = vsel %vm2925_vm13, %v11952_v27, -inf  ;;  %v11956_v52 = vmul.f32 0.35355338, %v2897_v30 }
 0xaef   :  { %2939 = vmax.xlane.f32.xlu1 %v2938_v32 }
 0xaf0   :  { %v2941_v50 = vsel %vm2925_vm13, %v11956_v52, -inf }
 0xaf1   :  { %2942 = vmax.xlane.f32.xlu0 %v2941_v50 }
 0xaf3   :  { %v2902_v33 = vpop.f32.mrb[220].mxu1 }
 0xaf4   :  { %v9429_v47 = vpop.f32.mrb[221].mxu1  ;;  %v11960_v55 = vmul.f32 0.35355338, %v2902_v33 }
 0xaf5   :  { %v2905_v34 = vpop.f32.mrb[222].mxu1 }
 0xaf6   :  { %v9430_v5 = vpop.f32.mrb[223].mxu1  ;;  %v2944_v37 = vsel %vm2925_vm13, %v11960_v55, -inf  ;;  %v11964_v38 = vmul.f32 0.35355338, %v2905_v34 }
 0xaf7   :  { %2945 = vmax.xlane.f32.xlu1 %v2944_v37 }
 0xaf8   :  { %v2947_v0 = vsel %vm2925_vm13, %v11964_v38, -inf }
 0xaf9   :  { %2948 = vmax.xlane.f32.xlu0 %v2947_v0 }
 0xafb   :  { %v2910_v40 = vpop.f32.mrb[224].mxu1 }
 0xafc   :  { %v9433_v62 = vpop.f32.mrb[225].mxu1  ;;  %v11968_v4 = vmul.f32 0.35355338, %v2910_v40 }
 0xafd   :  { %v2913_v11 = vpop.f32.mrb[226].mxu1 }
 0xafe   :  { %v9434_v6 = vpop.f32.mrb[227].mxu1  ;;  %v2950_v19 = vsel %vm2925_vm13, %v11968_v4, -inf }
 0xaff   :  { %2951 = vmax.xlane.f32.xlu1 %v2950_v19  ;;  %v12012_v6 = vpop.permute.xlu0 %3392 }
 0xb03   :  { %v3232_v23 = vpop.f32.mrb[228].mxu1 }
 0xb04   :  { %v9477_v42 = vpop.f32.mrb[229].mxu1  ;;  %v11972_v43 = vmul.f32 0.35355338, %v3232_v23 }
 0xb05   :  { %v3235_v60 = vpop.f32.mrb[230].mxu1 }
 0xb06   :  { %v9478_v16 = vpop.f32.mrb[231].mxu1  ;;  %v3279_v24 = vsel %vm2925_vm13, %v11972_v43, -inf  ;;  %v11976_v35 = vmul.f32 0.35355338, %v3235_v60 }
 0xb07   :  { %3280 = vmax.xlane.f32.xlu0 %v3279_v24 }
 0xb08   :  { %v3282_v48 = vsel %vm2925_vm13, %v11976_v35, -inf }
 0xb09   :  { %3283 = vmax.xlane.f32.xlu1 %v3282_v48 }
 0xb0b   :  { %v3240_v49 = vpop.f32.mrb[232].mxu1 }
 0xb0c   :  { %v9481_v53 = vpop.f32.mrb[233].mxu1  ;;  %v11980_v54 = vmul.f32 0.35355338, %v3240_v49 }
 0xb0d   :  { %v3243_v31 = vpop.f32.mrb[234].mxu1 }
 0xb0e   :  { %v9482_v36 = vpop.f32.mrb[235].mxu1  ;;  %v3285_v61 = vsel %vm2925_vm13, %v11980_v54, -inf  ;;  %v11984_v1 = vmul.f32 0.35355338, %v3243_v31 }
 0xb0f   :  { %3286 = vmax.xlane.f32.xlu0 %v3285_v61  ;;  %v12018_v61 = vld [vmem:[#allocation2] sm:$0xff] }
 0xb10   :  { %v3288_v39 = vsel %vm2925_vm13, %v11984_v1, -inf }
 0xb11   :  { %3289 = vmax.xlane.f32.xlu1 %v3288_v39 }
 0xb13   :  { %v3248_v15 = vpop.f32.mrb[236].mxu1 }
 0xb14   :  { %v9485_v17 = vpop.f32.mrb[237].mxu1  ;;  %v11988_v20 = vmul.f32 0.35355338, %v3248_v15 }
 0xb15   :  { %v3251_v21 = vpop.f32.mrb[238].mxu1 }
 0xb16   :  { %v9486_v45 = vpop.f32.mrb[239].mxu1  ;;  %v3291_v8 = vsel %vm2925_vm13, %v11988_v20, -inf  ;;  %v11992_v41 = vmul.f32 0.35355338, %v3251_v21 }
 0xb17   :  { %3292 = vmax.xlane.f32.xlu0 %v3291_v8 }
 0xb18   :  { %v3294_v22 = vsel %vm2925_vm13, %v11992_v41, -inf }
 0xb19   :  { %3295 = vmax.xlane.f32.xlu1 %v3294_v22 }
 0xb1b   :  { %v3256_v25 = vpop.f32.mrb[240].mxu1 }
 0xb1c   :  { %v9489_v30 = vpop.f32.mrb[241].mxu1  ;;  %v11996_v44 = vmul.f32 0.35355338, %v3256_v25 }
 0xb1d   :  { %v3259_v32 = vpop.f32.mrb[242].mxu1 }
 0xb1e   :  { %v9490_v50 = vpop.f32.mrb[243].mxu1  ;;  %v3297_v33 = vsel %vm2925_vm13, %v11996_v44, -inf  ;;  %v12000_v47 = vmul.f32 0.35355338, %v3259_v32 }
 0xb1f   :  { %3298 = vmax.xlane.f32.xlu0 %v3297_v33  ;;  %v12034_v50 = vld [vmem:[#allocation2 + $0x10] sm:$0xff] }
 0xb20   :  { %v3300_v34 = vsel %vm2925_vm13, %v12000_v47, -inf }
 0xb21   :  { %3301 = vmax.xlane.f32.xlu1 %v3300_v34 }
 0xb23   :  { %v3264_v5 = vpop.f32.mrb[244].mxu1 }
 0xb24   :  { %v9493_v37 = vpop.f32.mrb[245].mxu1  ;;  %v12008_v62 = vmul.f32 0.35355338, %v3264_v5 }
 0xb25   :  { %v3267_v0 = vpop.f32.mrb[246].mxu1  ;;  %v12040_v37 = vld [vmem:[#allocation2 + $0x18] sm:$0xff] }
 0xb26   :  { %v9494_v40 = vpop.f32.mrb[247].mxu1  ;;  %v3303_v11 = vsel %vm2925_vm13, %v12008_v62, -inf }
 0xb32   :  { %3396 = vrot.lane.b32.xlu1 %v11831_v10, %s10784_s27 }
 0xb35   :  { %3394 = vrot.lane.b32.xlu0 %v11827_v57, %s10784_s27 }
 0xb54   :  { %3304 = vmax.xlane.f32.xlu0 %v3303_v11 }
 0xb6c   :  { %v2928_v19 = vpop.xlane.xlu1 %2927 }
 0xb6d   :  { %v2953_v23 = vsub.f32 %v11936_v59, %v2928_v19  ;;  %v12020_v59 = vld [vmem:[#allocation2 + $0x8] sm:$0xff] }
 0xb6e   :  { %v2931_v42 = vpop.xlane.xlu0 %2930 }
 0xb6f   :  { %v2962_v60 = vmul.f32 1.442695, %v2953_v23  ;;  %v2954_v16 = vsub.f32 %v11940_v3, %v2931_v42 }
 0xb71   :  { %10345 = vpow2.f32 %v2962_v60  ;;  %v2964_v24 = vmul.f32 1.442695, %v2954_v16  ;;  %v12048_v60 = vld [vmem:[#allocation2 + $0x20] sm:$0xff] }
 0xb73   :  { %10347 = vpow2.f32 %v2964_v24  ;;  %v12052_v24 = vld [vmem:[#allocation2 + $0x28] sm:$0xff] }
 0xb74   :  { %v2934_v48 = vpop.xlane.xlu0 %2933 }
 0xb75   :  { %v2955_v49 = vsub.f32 %v11944_v12, %v2934_v48 }
 0xb77   :  { %v2966_v53 = vmul.f32 1.442695, %v2955_v49 }
 0xb78   :  { %v2937_v31 = vpop.xlane.xlu0 %2936 }
 0xb79   :  { %10349 = vpow2.f32 %v2966_v53  ;;  %v2956_v36 = vsub.f32 %v11948_v14, %v2937_v31 }
 0xb7b   :  { %v10346_v39 = vpop.eup %10345  ;;  %v2968_v15 = vmul.f32 1.442695, %v2956_v36 }
 0xb7c   :  { %v2940_v17 = vpop.xlane.xlu1 %2939  ;;  %v12023_v3 = vmul.f32 %v10346_v39, %v12018_v61 }
 0xb7d   :  { %v10348_v21 = vpop.eup %10347  ;;  %10351 = vpow2.f32 %v2968_v15  ;;  %v2957_v45 = vsub.f32 %v11952_v27, %v2940_v17  ;;  %v12065_v17 = vld [vmem:[#allocation2 + $0x30] sm:$0xff] }
 0xb7e   :  { %v2943_v12 = vpop.xlane.xlu0 %2942  ;;  %v2989_v8 = vsel %vm2925_vm13, %v12023_v3, 0.0  ;;  %v12029_v14 = vmul.f32 %v10348_v21, %v12020_v59 }
 0xb7f   :  { %v2970_v22 = vmul.f32 1.442695, %v2957_v45  ;;  %v2958_v25 = vsub.f32 %v11956_v52, %v2943_v12  ;;  %2990 = vadd.xlane.f32.xlu1 %v2989_v8  ;;  %v12067_v45 = vld [vmem:[#allocation2 + $0x38] sm:$0xff] }
 0xb80   :  { %v2992_v30 = vsel %vm2925_vm13, %v12029_v14, 0.0 }
 0xb81   :  { %10353 = vpow2.f32 %v2970_v22  ;;  %v2972_v32 = vmul.f32 1.442695, %v2958_v25  ;;  %2993 = vadd.xlane.f32.xlu0 %v2992_v30 }
 0xb83   :  { %v10350_v27 = vpop.eup %10349  ;;  %10355 = vpow2.f32 %v2972_v32 }
 0xb84   :  { %v2946_v33 = vpop.xlane.xlu1 %2945  ;;  %v12037_v34 = vmul.f32 %v10350_v27, %v12034_v50 }
 0xb85   :  { %v2959_v5 = vsub.f32 %v11960_v55, %v2946_v33 }
 0xb86   :  { %v2949_v52 = vpop.xlane.xlu0 %2948  ;;  %v2995_v0 = vsel %vm2925_vm13, %v12037_v34, 0.0 }
 0xb87   :  { %v10352_v40 = vpop.eup %10351  ;;  %v2974_v11 = vmul.f32 1.442695, %v2959_v5  ;;  %v2960_v19 = vsub.f32 %v11964_v38, %v2949_v52  ;;  %2996 = vadd.xlane.f32.xlu1 %v2995_v0  ;;  %v12081_v0 = vld [vmem:[#allocation2 + $0x40] sm:$0xff] }
 0xb88   :  { %v12046_v23 = vmul.f32 %v10352_v40, %v12040_v37 }
 0xb89   :  { %10357 = vpow2.f32 %v2974_v11  ;;  %v2976_v42 = vmul.f32 1.442695, %v2960_v19 }
 0xb8a   :  { %v2998_v55 = vsel %vm2925_vm13, %v12046_v23, 0.0 }
 0xb8b   :  { %v10354_v16 = vpop.eup %10353  ;;  %10359 = vpow2.f32 %v2976_v42  ;;  %2999 = vadd.xlane.f32.xlu0 %v2998_v55 }
 0xb8c   :  { %v2952_v48 = vpop.xlane.xlu1 %2951  ;;  %v12055_v49 = vmul.f32 %v10354_v16, %v12048_v60 }
 0xb8d   :  { %v10356_v38 = vpop.eup %10355  ;;  %v2961_v53 = vsub.f32 %v11968_v4, %v2952_v48 }
 0xb8e   :  { %v3001_v31 = vsel %vm2925_vm13, %v12055_v49, 0.0  ;;  %v12061_v36 = vmul.f32 %v10356_v38, %v12052_v24 }
 0xb8f   :  { %v2978_v39 = vmul.f32 1.442695, %v2961_v53  ;;  %3002 = vadd.xlane.f32.xlu1 %v3001_v31 }
 0xb90   :  { %v3004_v15 = vsel %vm2925_vm13, %v12061_v36, 0.0 }
 0xb91   :  { %10361 = vpow2.f32 %v2978_v39  ;;  %3005 = vadd.xlane.f32.xlu0 %v3004_v15 }
 0xb93   :  { %v10358_v21 = vpop.eup %10357 }
 0xb94   :  { %v3281_v12 = vpop.xlane.xlu0 %3280  ;;  %v12070_v4 = vmul.f32 %v10358_v21, %v12065_v17 }
 0xb95   :  { %v10360_v8 = vpop.eup %10359  ;;  %v3306_v22 = vsub.f32 %v11972_v43, %v3281_v12 }
 0xb96   :  { %v3284_v25 = vpop.xlane.xlu1 %3283  ;;  %v3007_v30 = vsel %vm2925_vm13, %v12070_v4, 0.0  ;;  %v12076_v32 = vmul.f32 %v10360_v8, %v12067_v45 }
 0xb97   :  { %v3315_v27 = vmul.f32 1.442695, %v3306_v22  ;;  %v3307_v33 = vsub.f32 %v11976_v35, %v3284_v25  ;;  %3008 = vadd.xlane.f32.xlu1 %v3007_v30 }
 0xb98   :  { %v3010_v5 = vsel %vm2925_vm13, %v12076_v32, 0.0 }
 0xb99   :  { %10363 = vpow2.f32 %v3315_v27  ;;  %v3317_v52 = vmul.f32 1.442695, %v3307_v33  ;;  %3011 = vadd.xlane.f32.xlu0 %v3010_v5 }
 0xb9b   :  { %v10362_v43 = vpop.eup %10361  ;;  %10365 = vpow2.f32 %v3317_v52 }
 0xb9c   :  { %v3287_v40 = vpop.xlane.xlu0 %3286  ;;  %v12084_v11 = vmul.f32 %v10362_v43, %v12081_v0 }
 0xb9d   :  { %v3308_v19 = vsub.f32 %v11980_v54, %v3287_v40 }
 0xb9e   :  { %v3290_v42 = vpop.xlane.xlu1 %3289  ;;  %v3013_v35 = vsel %vm2925_vm13, %v12084_v11, 0.0 }
 0xb9f   :  { %v3319_v55 = vmul.f32 1.442695, %v3308_v19  ;;  %v3309_v16 = vsub.f32 %v11984_v1, %v3290_v42  ;;  %3014 = vadd.xlane.f32.xlu0 %v3013_v35 }
 0xba1   :  { %10367 = vpow2.f32 %v3319_v55  ;;  %v3321_v48 = vmul.f32 1.442695, %v3309_v16 }
 0xba3   :  { %v10364_v38 = vpop.eup %10363  ;;  %10369 = vpow2.f32 %v3321_v48 }
 0xba4   :  { %v3293_v53 = vpop.xlane.xlu0 %3292  ;;  %v12091_v31 = vmul.f32 %v10364_v38, %v12018_v61 }
 0xba5   :  { %v10366_v39 = vpop.eup %10365  ;;  %v3310_v15 = vsub.f32 %v11988_v20, %v3293_v53 }
 0xba6   :  { %v3296_v54 = vpop.xlane.xlu1 %3295  ;;  %v3342_v21 = vsel %vm2925_vm13, %v12091_v31, 0.0  ;;  %v12097_v12 = vmul.f32 %v10366_v39, %v12020_v59 }
 0xba7   :  { %v3323_v1 = vmul.f32 1.442695, %v3310_v15  ;;  %v3311_v8 = vsub.f32 %v11992_v41, %v3296_v54  ;;  %3343 = vadd.xlane.f32.xlu0 %v3342_v21 }
 0xba8   :  { %v3345_v25 = vsel %vm2925_vm13, %v12097_v12, 0.0 }
 0xba9   :  { %10371 = vpow2.f32 %v3323_v1  ;;  %v3325_v22 = vmul.f32 1.442695, %v3311_v8 }
 0xbab   :  { %v10368_v30 = vpop.eup %10367  ;;  %10373 = vpow2.f32 %v3325_v22  ;;  %3346 = vadd.xlane.f32.xlu0 %v3345_v25 }
 0xbac   :  { %v3299_v20 = vpop.xlane.xlu0 %3298  ;;  %v12103_v27 = vmul.f32 %v10368_v30, %v12034_v50 }
 0xbad   :  { %v10370_v33 = vpop.eup %10369  ;;  %v3312_v5 = vsub.f32 %v11996_v44, %v3299_v20 }
 0xbae   :  { %v3348_v52 = vsel %vm2925_vm13, %v12103_v27, 0.0  ;;  %v12109_v41 = vmul.f32 %v10370_v33, %v12040_v37  ;;  %v3302_v39 = vpop.xlane.xlu1 %3301 }
 0xbaf   :  { %v3327_v43 = vmul.f32 1.442695, %v3312_v5  ;;  %3349 = vadd.xlane.f32.xlu0 %v3348_v52  ;;  %v3313_v15 = vsub.f32 %v12000_v47, %v3302_v39 }
 0xbb0   :  { %v3351_v40 = vsel %vm2925_vm13, %v12109_v41, 0.0  ;;  %v3395_v21 = vpop.permute.xlu0 %3394 }
 0xbb1   :  { %10375 = vpow2.f32 %v3327_v43  ;;  %3352 = vadd.xlane.f32.xlu1 %v3351_v40  ;;  %v3329_v54 = vmul.f32 1.442695, %v3313_v15 }
 0xbb3   :  { %v10372_v19 = vpop.eup %10371  ;;  %10377 = vpow2.f32 %v3329_v54 }
 0xbb4   :  { %v12114_v42 = vmul.f32 %v10372_v19, %v12048_v60 }
 0xbb5   :  { %v10374_v35 = vpop.eup %10373 }
 0xbb6   :  { %v3354_v44 = vsel %vm2925_vm13, %v12114_v42, 0.0  ;;  %v12119_v55 = vmul.f32 %v10374_v35, %v12052_v24 }
 0xbb7   :  { %3355 = vadd.xlane.f32.xlu0 %v3354_v44 }
 0xbb8   :  { %v3357_v16 = vsel %vm2925_vm13, %v12119_v55, 0.0 }
 0xbb9   :  { %3358 = vadd.xlane.f32.xlu1 %v3357_v16 }
 0xbbb   :  { %v10376_v48 = vpop.eup %10375 }
 0xbbc   :  { %v12124_v38 = vmul.f32 %v10376_v48, %v12065_v17 }
 0xbbd   :  { %v10378_v25 = vpop.eup %10377 }
 0xbbe   :  { %v3360_v53 = vsel %vm2925_vm13, %v12124_v38, 0.0  ;;  %v12135_v30 = vmul.f32 %v10378_v25, %v12067_v45 }
 0xbbf   :  { %3361 = vadd.xlane.f32.xlu0 %v3360_v53 }
 0xbc0   :  { %v3363_v20 = vsel %vm2925_vm13, %v12135_v30, 0.0 }
 0xbca   :  { %3398 = vrot.lane.b32.xlu1 %v11835_v63, %s10784_s27 }
 0xbd5   :  { %3400 = vrot.lane.b32.xlu0 %v11839_v18, %s10784_s27 }
 0xbe1   :  { %v3305_v1 = vpop.xlane.xlu0 %3304 }
 0xbe2   :  { %v3314_v8 = vsub.f32 %v12008_v62, %v3305_v1  ;;  %v3397_v62 = vpop.permute.xlu1 %3396 }
 0xbe4   :  { %v3331_v22 = vmul.f32 1.442695, %v3314_v8 }
 0xbe6   :  { %10379 = vpow2.f32 %v3331_v22 }
 0xbee   :  { %3364 = vadd.xlane.f32.xlu1 %v3363_v20 }
 0xbf0   :  { %v10380_v47 = vpop.eup %10379 }
 0xbf1   :  { %v12140_v33 = vmul.f32 %v10380_v47, %v12081_v0 }
 0xbf3   :  { %v3366_v5 = vsel %vm2925_vm13, %v12140_v33, 0.0 }
 0xbf4   :  { %3367 = vadd.xlane.f32.xlu0 %v3366_v5 }
 0xbff   :  { %3691 = vrot.lane.b32.xlu1 %v11823_v28, %s10785_s28 }
 0xc03   :  { %3693 = vrot.lane.b32.xlu1 %v11827_v57, %s10785_s28 }
 0xc07   :  { %3697 = vrot.lane.b32.xlu1 %v11835_v63, %s10785_s28 }
 0xc0a   :  { %3695 = vrot.lane.b32.xlu0 %v11831_v10, %s10785_s28 }
 0xc0b   :  { %3699 = vrot.lane.b32.xlu1 %v11839_v18, %s10785_s28 }
 0xc0c   :  { %v2991_v45 = vpop.xlane.xlu1 %2990 }
 0xc0d   :  { %10381 = vrcp.f32 %v2991_v45 }
 0xc0e   :  { %3689 = vrot.lane.b32.xlu0 %v11839_v18, %s10786_s0  ;;  %v2994_v52 = vpop.xlane.xlu0 %2993 }
 0xc0f   :  { %10383 = vrcp.f32 %v2994_v52  ;;  %3681 = vrot.lane.b32.xlu1 %v11823_v28, %s10786_s0 }
 0xc12   :  { %3925 = vrot.lane.b32.xlu0 %v11823_v28, %s10787_s29 }
 0xc13   :  { %3683 = vrot.lane.b32.xlu1 %v11827_v57, %s10786_s0 }
 0xc14   :  { %v2997_v43 = vpop.xlane.xlu1 %2996 }
 0xc15   :  { %10385 = vrcp.f32 %v2997_v43 }
 0xc17   :  { %v10382_v40 = vpop.eup %10381  ;;  %3685 = vrot.lane.b32.xlu1 %v11831_v10, %s10786_s0 }
 0xc18   :  { %v3000_v19 = vpop.xlane.xlu0 %2999  ;;  %v3025_v44 = vmul.f32 %v10382_v40, %v12023_v3 }
 0xc19   :  { %v10384_v35 = vpop.eup %10383  ;;  %10387 = vrcp.f32 %v3000_v19 }
 0xc1a   :  { %v3026_v16 = vmul.f32 %v10384_v35, %v12029_v14 }
 0xc1b   :  { %3687 = vrot.lane.b32.xlu1 %v11835_v63, %s10786_s0 }
 0xc1c   :  { %v3034_v48 = vpack.c.bf16 %v3026_v16, %v3025_v44  ;;  %v3003_v53 = vpop.xlane.xlu1 %3002 }
 0xc1d   :  { %10389 = vrcp.f32 %v3003_v53 }
 0xc1e   :  { %9446 = vmatmul.mubr.msk.bf16.vlgmr.msra.gmra.mrb[216].mxu0 %vm2925_vm13, %v3034_v48  ;;  %v3006_v39 = vpop.xlane.xlu0 %3005 }
 0xc1f   :  { %9496 = vmatpush3.bf16.msra.mxu0 %v12012_v6  ;;  %10391 = vrcp.f32 %v3006_v39  ;;  %9449 = vmatprep.mubr.msk.bf16.mxu0 %vm10779_vm5, %v10778_v51  ;;  %v10386_v3 = vpop.eup %10385 }
 0xc20   :  { %9497 = vmatprep.subr.bf16.mxu0 %v10778_v51  ;;  %v3027_v54 = vmul.f32 %v10386_v3, %v12037_v34 }
 0xc23   :  { %v10388_v15 = vpop.eup %10387  ;;  %9498 = vmatpush3.bf16.msra.mxu0 %v3395_v21 }
 0xc24   :  { %v3009_v14 = vpop.xlane.xlu1 %3008  ;;  %9499 = vmatprep.subr.bf16.mxu0 %v10778_v51  ;;  %v3028_v1 = vmul.f32 %v10388_v15, %v12046_v23 }
 0xc25   :  { %10393 = vrcp.f32 %v3009_v14 }
 0xc26   :  { %v3012_v8 = vpop.xlane.xlu0 %3011  ;;  %v3035_v22 = vpack.c.bf16 %v3028_v1, %v3027_v54 }
 0xc27   :  { %9500 = vmatpush3.bf16.msra.mxu0 %v3397_v62  ;;  %10395 = vrcp.f32 %v3012_v8  ;;  %v10390_v6 = vpop.eup %10389 }
 0xc28   :  { %9450 = vmatmul.mubr.msk.bf16.gmra.mrb[220].mxu0 %vm2925_vm13, %v3035_v22  ;;  %9501 = vmatprep.subr.bf16.mxu0 %v10778_v51  ;;  %v3029_v34 = vmul.f32 %v10390_v6, %v12055_v49 }
 0xc29   :  { %v10392_v25 = vpop.eup %10391  ;;  %9453 = vmatprep.mubr.msk.bf16.mxu0 %vm10779_vm5, %v10778_v51 }
 0xc2a   :  { %v3030_v21 = vmul.f32 %v10392_v25, %v12061_v36 }
 0xc2c   :  { %v3015_v20 = vpop.xlane.xlu0 %3014  ;;  %v3036_v23 = vpack.c.bf16 %v3030_v21, %v3029_v34 }
 0xc2d   :  { %10397 = vrcp.f32 %v3015_v20 }
 0xc2f   :  { %v10394_v47 = vpop.eup %10393 }
 0xc30   :  { %9454 = vmatmul.mubr.msk.bf16.gmra.mrb[224].mxu0 %vm2925_vm13, %v3036_v23  ;;  %v3031_v45 = vmul.f32 %v10394_v47, %v12070_v4 }
 0xc31   :  { %v10396_v5 = vpop.eup %10395  ;;  %9457 = vmatprep.mubr.msk.bf16.mxu0 %vm10779_vm5, %v10778_v51 }
 0xc32   :  { %v3032_v62 = vmul.f32 %v10396_v5, %v12076_v32 }
 0xc34   :  { %v3037_v52 = vpack.c.bf16 %v3032_v62, %v3031_v45  ;;  %v3344_v40 = vpop.xlane.xlu0 %3343 }
 0xc37   :  { %v10398_v43 = vpop.eup %10397 }
 0xc38   :  { %9458 = vmatmul.mubr.msk.bf16.gmra.mrb[228].mxu0 %vm2925_vm13, %v3037_v52  ;;  %v3033_v49 = vmul.f32 %v10398_v43, %v12084_v11  ;;  %v3347_v36 = vpop.xlane.xlu0 %3346 }
 0xc39   :  { %9461 = vmatprep.mubr.msk.bf16.mxu0 %vm10779_vm5, %v10778_v51  ;;  %10399 = vrcp.f32 %v3347_v36 }
 0xc3a   :  { %v3038_v19 = vpack.c.bf16 %v3033_v49, %v3033_v49  ;;  %10401 = vrcp.f32 %v3344_v40 }
 0xc3c   :  { %v3350_v4 = vpop.xlane.xlu0 %3349 }
 0xc3e   :  { %v3353_v32 = vpop.xlane.xlu1 %3352 }
 0xc3f   :  { %10403 = vrcp.f32 %v3353_v32 }
 0xc40   :  { %9462 = vmatmul.mubr.msk.bf16.gmra.mrb[232].mxu0 %vm2925_vm13, %v3038_v19  ;;  %10405 = vrcp.f32 %v3350_v4 }
 0xc41   :  { %9505 = vmatprep.mubr.msk.bf16.mxu0 %vm10779_vm5, %v10778_v51 }
 0xc43   :  { %v10400_v48 = vpop.eup %10399 }
 0xc44   :  { %v3356_v44 = vpop.xlane.xlu0 %3355  ;;  %v10402_v11 = vpop.eup %10401  ;;  %v3379_v39 = vmul.f32 %v10400_v48, %v12097_v12 }
 0xc45   :  { %v3378_v15 = vmul.f32 %v10402_v11, %v12091_v31 }
 0xc46   :  { %v3359_v35 = vpop.xlane.xlu1 %3358 }
 0xc47   :  { %10407 = vrcp.f32 %v3359_v35  ;;  %v3387_v54 = vpack.c.bf16 %v3379_v39, %v3378_v15 }
 0xc48   :  { %10409 = vrcp.f32 %v3356_v44 }
 0xc49   :  { %v10404_v1 = vpop.eup %10403 }
 0xc4a   :  { %v3399_v16 = vpop.permute.xlu1 %3398  ;;  %v10406_v8 = vpop.eup %10405  ;;  %v3381_v12 = vmul.f32 %v10404_v1, %v12109_v41 }
 0xc4b   :  { %9502 = vmatpush3.bf16.msra.mxu0 %v3399_v16  ;;  %v3380_v22 = vmul.f32 %v10406_v8, %v12103_v27  ;;  %v2789_v27 = vld [vmem:[%s14156_s1 + $0xa0] sm:$0xf] }
 0xc4c   :  { %v3362_v53 = vpop.xlane.xlu0 %3361  ;;  %9503 = vmatprep.subr.bf16.mxu0 %v10778_v51  ;;  %v3607_v41 = vsel %vm2444_vm9, %v2789_v27, 0 }
 0xc4d   :  { %v3388_v31 = vpack.c.bf16 %v3381_v12, %v3380_v22  ;;  %10411 = vrcp.f32 %v3362_v53 }
 0xc50   :  { %v3401_v3 = vpop.permute.xlu0 %3400 }
 0xc51   :  { %v3422_v14 = vsel %vm2444_vm9, %v3401_v3, 0  ;;  %v10408_v6 = vpop.eup %10407 }
 0xc52   :  { %9504 = vmatpush3.bf16.msra.mxu0 %v3422_v14  ;;  %v10410_v25 = vpop.eup %10409  ;;  %v3383_v21 = vmul.f32 %v10408_v6, %v12119_v55 }
 0xc53   :  { %9547 = vmatprep.subr.bf16.mxu0 %v10778_v51  ;;  %v3382_v20 = vmul.f32 %v10410_v25, %v12114_v42 }
 0xc55   :  { %9506 = vmatmul.mubr.msk.bf16.vlgmr.msra.gmra.mrb[236].mxu0 %vm2925_vm13, %v3387_v54  ;;  %v3389_v34 = vpack.c.bf16 %v3383_v21, %v3382_v20 }
 0xc56   :  { %9509 = vmatprep.mubr.msk.bf16.mxu0 %vm10779_vm5, %v10778_v51  ;;  %9548 = vmatpush3.bf16.msra.mxu0 %v3607_v41 }
 0xc57   :  { %9599 = vmatprep.subr.bf16.mxu0 %v10778_v51  ;;  %v10412_v42 = vpop.eup %10411 }
 0xc58   :  { %v3384_v5 = vmul.f32 %v10412_v42, %v12124_v38  ;;  %v2790_v38 = vld [vmem:[%s14156_s1 + $0xa4] sm:$0xf] }
 0xc5d   :  { %9510 = vmatmul.mubr.msk.bf16.gmra.mrb[240].mxu0 %vm2925_vm13, %v3388_v31 }
 0xc5e   :  { %9513 = vmatprep.mubr.msk.bf16.mxu0 %vm10779_vm5, %v10778_v51 }
 0xc65   :  { %9514 = vmatmul.mubr.msk.bf16.gmra.mrb[244].mxu0 %vm2925_vm13, %v3389_v34 }
 0xc66   :  { %9517 = vmatprep.mubr.msk.bf16.mxu0 %vm10779_vm5, %v10778_v51 }
 0xc7b   :  { %v3365_v23 = vpop.xlane.xlu1 %3364 }
 0xc7c   :  { %10413 = vrcp.f32 %v3365_v23 }
 0xc81   :  { %v3368_v55 = vpop.xlane.xlu0 %3367 }
 0xc82   :  { %10415 = vrcp.f32 %v3368_v55  ;;  %v3692_v55 = vpop.permute.xlu1 %3691 }
 0xc85   :  { %v12231_v49 = vpop.permute.xlu0 %3695 }
 0xc86   :  { %v10414_v47 = vpop.eup %10413 }
 0xc87   :  { %v3385_v62 = vmul.f32 %v10414_v47, %v12135_v30  ;;  %v3517_v30 = vsel %vm2444_vm9, %v2790_v38, 0 }
 0xc88   :  { %9526 = vmatpush3.bf16.msra.mxu1 %v3517_v30 }
 0xc89   :  { %v3390_v45 = vpack.c.bf16 %v3385_v62, %v3384_v5  ;;  %9569 = vmatprep.subr.bf16.mxu1 %v10778_v51  ;;  %v12233_v36 = vpop.permute.xlu0 %3689  ;;  %v3717_v62 = vsel %vm2813_vm12, %v3692_v55, 0 }
 0xc8b   :  { %9518 = vmatmul.mubr.msk.bf16.gmra.mrb[248].mxu0 %vm2925_vm13, %v3390_v45 }
 0xc8c   :  { %v10416_v52 = vpop.eup %10415  ;;  %9521 = vmatprep.mubr.msk.bf16.mxu0 %vm10779_vm5, %v10778_v51 }
 0xc8d   :  { %v3386_v43 = vmul.f32 %v10416_v52, %v12140_v33  ;;  %v3926_v44 = vpop.permute.xlu0 %3925 }
 0xc8f   :  { %v3391_v40 = vpack.c.bf16 %v3386_v43, %v3386_v43  ;;  %v3694_v43 = vpop.permute.xlu1 %3693 }
 0xc93   :  { %9522 = vmatmul.mubr.msk.bf16.gmra.mrb[252].mxu0 %vm2925_vm13, %v3391_v40 }
 0xc94   :  { %9549 = vmatprep.mubr.msk.bf16.mxu0 %vm10779_vm5, %v10778_v51 }
 0xcf1   :  { %v3105_v33 = vpop.f32.mrb[216].mxu0 }
 0xcf2   :  { %v9447_v19 = vpop.f32.mrb[217].mxu0 }
 0xcf3   :  { %v3108_v32 = vpop.f32.mrb[218].mxu0 }
 0xcf4   :  { %v3143_v4 = vpack.c.bf16 %v3108_v32, %v3105_v33  ;;  %v9448_v35 = vpop.f32.mrb[219].mxu0  ;;  %v3720_v33 = vsel %vm2813_vm12, %v3694_v43, 0 }
 0xcf6   :  { %9550 = vmatmul.mubr.msk.bf16.vlgmr.msra.gmra.mrb[0].mxu0 %vm2813_vm12, %v3143_v4 }
 0xcf7   :  { %9600 = vmatpush3.bf16.msra.mxu0 %v3926_v44  ;;  %9553 = vmatprep.mubr.msk.bf16.mxu0 %vm10779_vm5, %v10778_v51 }
 0xcf8   :  { %9601 = vmatprep.subr.bf16.mxu0 %v10778_v51 }
 0xcfb   :  { %v3113_v16 = vpop.f32.mrb[220].mxu0 }
 0xcfc   :  { %v9451_v48 = vpop.f32.mrb[221].mxu0 }
 0xcfd   :  { %v3116_v53 = vpop.f32.mrb[222].mxu0  ;;  %v3698_v48 = vpop.permute.xlu1 %3697 }
 0xcfe   :  { %v3144_v11 = vpack.c.bf16 %v3116_v53, %v3113_v16  ;;  %v9452_v39 = vpop.f32.mrb[223].mxu0  ;;  %v3723_v16 = vsel %vm2813_vm12, %v12231_v49, 0  ;;  %v3726_v53 = vsel %vm2813_vm12, %v3698_v48, 0 }
 0xd00   :  { %9554 = vmatmul.mubr.msk.bf16.gmra.mrb[4].mxu0 %vm2813_vm12, %v3144_v11 }
 0xd01   :  { %9557 = vmatprep.mubr.msk.bf16.mxu0 %vm10779_vm5, %v10778_v51  ;;  %v3700_v11 = vpop.permute.xlu1 %3699 }
 0xd02   :  { %v3729_v39 = vsel %vm2813_vm12, %v3700_v11, 0 }
 0xd03   :  { %v3121_v3 = vpop.f32.mrb[224].mxu0 }
 0xd04   :  { %v9455_v15 = vpop.f32.mrb[225].mxu0 }
 0xd05   :  { %v3124_v14 = vpop.f32.mrb[226].mxu0 }
 0xd06   :  { %v3145_v54 = vpack.c.bf16 %v3124_v14, %v3121_v3  ;;  %v9456_v1 = vpop.f32.mrb[227].mxu0 }
 0xd08   :  { %9558 = vmatmul.mubr.msk.bf16.gmra.mrb[8].mxu0 %vm2813_vm12, %v3145_v54 }
 0xd09   :  { %9561 = vmatprep.mubr.msk.bf16.mxu0 %vm10779_vm5, %v10778_v51 }
 0xd0b   :  { %v3129_v8 = vpop.f32.mrb[228].mxu0 }
 0xd0c   :  { %v9459_v12 = vpop.f32.mrb[229].mxu0 }
 0xd0d   :  { %v3132_v22 = vpop.f32.mrb[230].mxu0 }
 0xd0e   :  { %v3146_v31 = vpack.c.bf16 %v3132_v22, %v3129_v8  ;;  %v9460_v6 = vpop.f32.mrb[231].mxu0 }
 0xd0f   :  { %v3682_v6 = vpop.permute.xlu1 %3681 }
 0xd10   :  { %9562 = vmatmul.mubr.msk.bf16.gmra.mrb[12].mxu0 %vm2813_vm12, %v3146_v31 }
 0xd11   :  { %9565 = vmatprep.mubr.msk.bf16.mxu0 %vm10779_vm5, %v10778_v51 }
 0xd13   :  { %v3137_v25 = vpop.f32.mrb[232].mxu0 }
 0xd14   :  { %v9463_v21 = vpop.f32.mrb[233].mxu0  ;;  %v3147_v34 = vpack.c.bf16 %v3137_v25, %v3137_v25  ;;  %v3684_v25 = vpop.permute.xlu1 %3683 }
 0xd15   :  { %v3140_v20 = vpop.f32.mrb[234].mxu0 }
 0xd16   :  { %v9464_v27 = vpop.f32.mrb[235].mxu0 }
 0xd18   :  { %9566 = vmatmul.mubr.msk.bf16.gmra.mrb[16].mxu0 %vm2813_vm12, %v3147_v34  ;;  %v3686_v21 = vpop.permute.xlu1 %3685 }
 0xd19   :  { %9609 = vmatprep.mubr.msk.bf16.mxu0 %vm10779_vm5, %v10778_v51 }
 0xd1c   :  { %v3688_v20 = vpop.permute.xlu1 %3687 }
 0xd28   :  { %v3458_v41 = vpop.f32.mrb[236].mxu0 }
 0xd29   :  { %v9507_v23 = vpop.f32.mrb[237].mxu0 }
 0xd2a   :  { %v3461_v42 = vpop.f32.mrb[238].mxu0 }
 0xd2b   :  { %v3496_v47 = vpack.c.bf16 %v3461_v42, %v3458_v41  ;;  %v9508_v5 = vpop.f32.mrb[239].mxu0 }
 0xd2d   :  { %9528 = vmatmul.mubr.msk.bf16.vlgmr.msra.gmra.mrb[248].mxu1 %vm2813_vm12, %v3496_v47 }
 0xd2e   :  { %9570 = vmatpush3.bf16.xpose.msra.mxu1 %v3717_v62  ;;  %9531 = vmatprep.mubr.msk.bf16.mxu1 %vm10779_vm5, %v10778_v51 }
 0xd2f   :  { %9571 = vmatprep.subr.bf16.mxu1 %v10778_v51 }
 0xd30   :  { %v3466_v45 = vpop.f32.mrb[240].mxu0 }
 0xd31   :  { %v9511_v52 = vpop.f32.mrb[241].mxu0 }
 0xd32   :  { %v3469_v40 = vpop.f32.mrb[242].mxu0 }
 0xd33   :  { %v3497_v38 = vpack.c.bf16 %v3469_v40, %v3466_v45  ;;  %v9512_v30 = vpop.f32.mrb[243].mxu0 }
 0xd35   :  { %9532 = vmatmul.mubr.msk.bf16.gmra.mrb[252].mxu1 %vm2813_vm12, %v3497_v38 }
 0xd36   :  { %9572 = vmatpush3.bf16.xpose.msra.mxu1 %v3720_v33  ;;  %9535 = vmatprep.mubr.msk.bf16.mxu1 %vm10779_vm5, %v10778_v51 }
 0xd37   :  { %9573 = vmatprep.subr.bf16.mxu1 %v10778_v51 }
 0xd38   :  { %v3474_v19 = vpop.f32.mrb[244].mxu0 }
 0xd39   :  { %v9515_v32 = vpop.f32.mrb[245].mxu0 }
 0xd3a   :  { %v3477_v4 = vpop.f32.mrb[246].mxu0 }
 0xd3b   :  { %v3498_v35 = vpack.c.bf16 %v3477_v4, %v3474_v19  ;;  %v9516_v44 = vpop.f32.mrb[247].mxu0 }
 0xd3d   :  { %9536 = vmatmul.mubr.msk.bf16.gmra.mrb[0].mxu1 %vm2813_vm12, %v3498_v35 }
 0xd3e   :  { %9574 = vmatpush3.bf16.xpose.msra.mxu1 %v3723_v16  ;;  %9539 = vmatprep.mubr.msk.bf16.mxu1 %vm10779_vm5, %v10778_v51 }
 0xd3f   :  { %9575 = vmatprep.subr.bf16.mxu1 %v10778_v51 }
 0xd46   :  { %9576 = vmatpush3.bf16.xpose.msra.mxu1 %v3726_v53 }
 0xd47   :  { %9577 = vmatprep.subr.bf16.mxu1 %v10778_v51 }
 0xd4e   :  { %9578 = vmatpush3.bf16.xpose.msra.mxu1 %v3729_v39 }
 0xd4f   :  { %9629 = vmatprep.subr.bf16.mxu1 %v10778_v51 }
 0xd5e   :  { %v3482_v49 = vpop.f32.mrb[248].mxu0 }
 0xd5f   :  { %v9519_v3 = vpop.f32.mrb[249].mxu0 }
 0xd60   :  { %v3485_v15 = vpop.f32.mrb[250].mxu0 }
 0xd61   :  { %v3499_v14 = vpack.c.bf16 %v3485_v15, %v3482_v49  ;;  %v9520_v54 = vpop.f32.mrb[251].mxu0 }
 0xd63   :  { %9540 = vmatmul.mubr.msk.bf16.gmra.mrb[4].mxu1 %vm2813_vm12, %v3499_v14 }
 0xd64   :  { %9543 = vmatprep.mubr.msk.bf16.mxu1 %vm10779_vm5, %v10778_v51 }
 0xd66   :  { %v3490_v1 = vpop.f32.mrb[252].mxu0 }
 0xd67   :  { %v9523_v8 = vpop.f32.mrb[253].mxu0  ;;  %v3500_v22 = vpack.c.bf16 %v3490_v1, %v3490_v1 }
 0xd68   :  { %v3493_v12 = vpop.f32.mrb[254].mxu0 }
 0xd69   :  { %v9524_v31 = vpop.f32.mrb[255].mxu0 }
 0xd6b   :  { %9544 = vmatmul.mubr.msk.bf16.gmra.mrb[8].mxu1 %vm2813_vm12, %v3500_v22 }
 0xd6c   :  { %9579 = vmatprep.mubr.msk.bf16.mxu1 %vm10779_vm5, %v10778_v51 }
 0xd73   :  { %9580 = vmatmul.mubr.msk.bf16.vlgmr.msra.gmra.mrb[12].mxu1 %vm2813_vm12, %v3682_v6 }
 0xd74   :  { %9583 = vmatprep.mubr.msk.bf16.mxu1 %vm10779_vm5, %v10778_v51 }
 0xd7b   :  { %9584 = vmatmul.mubr.msk.bf16.gmra.mrb[16].mxu1 %vm2813_vm12, %v3684_v25 }
 0xd7c   :  { %9587 = vmatprep.mubr.msk.bf16.mxu1 %vm10779_vm5, %v10778_v51 }
 0xd83   :  { %9588 = vmatmul.mubr.msk.bf16.gmra.mrb[20].mxu1 %vm2813_vm12, %v3686_v21 }
 0xd84   :  { %9591 = vmatprep.mubr.msk.bf16.mxu1 %vm10779_vm5, %v10778_v51 }
 0xd8b   :  { %9592 = vmatmul.mubr.msk.bf16.gmra.mrb[24].mxu1 %vm2813_vm12, %v3688_v20 }
 0xd8c   :  { %9595 = vmatprep.mubr.msk.bf16.mxu1 %vm10779_vm5, %v10778_v51 }
 0xd93   :  { %9596 = vmatmul.mubr.msk.bf16.gmra.mrb[28].mxu1 %vm2813_vm12, %v12233_v36 }
 0xd94   :  { %9631 = vmatprep.mubr.msk.bf16.mxu1 %vm10779_vm5, %v10778_v51 }
 0xdc9   :  { %v3643_v34 = vpop.f32.mrb[0].mxu0 }
 0xdca   :  { %v9551_v27 = vpop.f32.mrb[1].mxu0 }
 0xdcb   :  { %v3646_v41 = vpop.f32.mrb[2].mxu0 }
 0xdcc   :  { %v9552_v23 = vpop.f32.mrb[3].mxu0 }
 0xdd3   :  { %v3651_v55 = vpop.f32.mrb[4].mxu0 }
 0xdd4   :  { %v9555_v42 = vpop.f32.mrb[5].mxu0 }
 0xdd5   :  { %v3654_v47 = vpop.f32.mrb[6].mxu0 }
 0xdd6   :  { %v9556_v5 = vpop.f32.mrb[7].mxu0 }
 0xddb   :  { %v3659_v62 = vpop.f32.mrb[8].mxu0 }
 0xddc   :  { %v9559_v45 = vpop.f32.mrb[9].mxu0 }
 0xddd   :  { %v3662_v52 = vpop.f32.mrb[10].mxu0 }
 0xdde   :  { %v9560_v43 = vpop.f32.mrb[11].mxu0 }
 0xde3   :  { %v3667_v40 = vpop.f32.mrb[12].mxu0 }
 0xde4   :  { %v9563_v38 = vpop.f32.mrb[13].mxu0 }
 0xde5   :  { %v3670_v30 = vpop.f32.mrb[14].mxu0 }
 0xde6   :  { %v9564_v33 = vpop.f32.mrb[15].mxu0 }
 0xdeb   :  { %v3675_v36 = vpop.f32.mrb[16].mxu0 }
 0xdec   :  { %v9567_v19 = vpop.f32.mrb[17].mxu0 }
 0xded   :  { %v3678_v32 = vpop.f32.mrb[18].mxu0 }
 0xdee   :  { %v9568_v4 = vpop.f32.mrb[19].mxu0 }
 0xe00   :  { %v3553_v35 = vpop.f32.mrb[248].mxu1 }
 0xe01   :  { %v9529_v44 = vpop.f32.mrb[249].mxu1  ;;  %v12293_v16 = vadd.f32 %v3643_v34, %v3553_v35 }
 0xe02   :  { %v3556_v48 = vpop.f32.mrb[250].mxu1 }
 0xe03   :  { %v9530_v53 = vpop.f32.mrb[251].mxu1  ;;  %v12295_v11 = vadd.f32 %v3646_v41, %v3556_v48 }
 0xe08   :  { %v3561_v39 = vpop.f32.mrb[252].mxu1 }
 0xe09   :  { %v12297_v49 = vadd.f32 %v3651_v55, %v3561_v39  ;;  %v9533_v3 = vpop.f32.mrb[253].mxu1 }
 0xe0a   :  { %v3564_v15 = vpop.f32.mrb[254].mxu1 }
 0xe0b   :  { %v12299_v14 = vadd.f32 %v3654_v47, %v3564_v15  ;;  %v9534_v54 = vpop.f32.mrb[255].mxu1 }
 0xe10   :  { %v3569_v1 = vpop.f32.mrb[0].mxu1 }
 0xe11   :  { %v12301_v8 = vadd.f32 %v3659_v62, %v3569_v1  ;;  %v9537_v12 = vpop.f32.mrb[1].mxu1 }
 0xe12   :  { %v3572_v22 = vpop.f32.mrb[2].mxu1 }
 0xe13   :  { %v12303_v31 = vadd.f32 %v3662_v52, %v3572_v22  ;;  %v9538_v6 = vpop.f32.mrb[3].mxu1 }
 0xe36   :  { %v3577_v25 = vpop.f32.mrb[4].mxu1 }
 0xe37   :  { %v12305_v21 = vadd.f32 %v3667_v40, %v3577_v25  ;;  %v9541_v20 = vpop.f32.mrb[5].mxu1 }
 0xe38   :  { %v3580_v34 = vpop.f32.mrb[6].mxu1 }
 0xe39   :  { %v12307_v27 = vadd.f32 %v3670_v30, %v3580_v34  ;;  %v9542_v41 = vpop.f32.mrb[7].mxu1 }
 0xe3e   :  { %v3585_v23 = vpop.f32.mrb[8].mxu1 }
 0xe3f   :  { %v12309_v55 = vadd.f32 %v3675_v36, %v3585_v23  ;;  %v9545_v42 = vpop.f32.mrb[9].mxu1 }
 0xe40   :  { %v3588_v47 = vpop.f32.mrb[10].mxu1 }
 0xe41   :  { %v9546_v5 = vpop.f32.mrb[11].mxu1 }
 0xe46   :  { %v3765_v62 = vpop.f32.mrb[12].mxu1 }
 0xe47   :  { %v3803_v45 = vmul.f32 0.35355338, %v3765_v62  ;;  %v9581_v43 = vpop.f32.mrb[13].mxu1 }
 0xe48   :  { %v3768_v52 = vpop.f32.mrb[14].mxu1 }
 0xe49   :  { %v3804_v38 = vmul.f32 0.35355338, %v3768_v52  ;;  %v9582_v33 = vpop.f32.mrb[15].mxu1  ;;  %v3812_v40 = vsel %vm2925_vm13, %v3803_v45, -inf }
 0xe4a   :  { %3813 = vmax.xlane.f32.xlu1 %v3812_v40 }
 0xe4b   :  { %v3815_v19 = vsel %vm2925_vm13, %v3804_v38, -inf }
 0xe4c   :  { %3816 = vmax.xlane.f32.xlu0 %v3815_v19 }
 0xe4e   :  { %v3773_v30 = vpop.f32.mrb[16].mxu1 }
 0xe4f   :  { %v3805_v32 = vmul.f32 0.35355338, %v3773_v30  ;;  %v9585_v4 = vpop.f32.mrb[17].mxu1 }
 0xe50   :  { %v3776_v36 = vpop.f32.mrb[18].mxu1 }
 0xe51   :  { %v3806_v35 = vmul.f32 0.35355338, %v3776_v36  ;;  %v9586_v44 = vpop.f32.mrb[19].mxu1  ;;  %v3818_v48 = vsel %vm2925_vm13, %v3805_v32, -inf }
 0xe52   :  { %3819 = vmax.xlane.f32.xlu0 %v3818_v48 }
 0xe53   :  { %v3821_v53 = vsel %vm2925_vm13, %v3806_v35, -inf }
 0xe56   :  { %3822 = vmax.xlane.f32.xlu0 %v3821_v53  ;;  %v3781_v39 = vpop.f32.mrb[20].mxu1 }
 0xe57   :  { %v3807_v3 = vmul.f32 0.35355338, %v3781_v39  ;;  %v9589_v15 = vpop.f32.mrb[21].mxu1 }
 0xe58   :  { %v3784_v54 = vpop.f32.mrb[22].mxu1 }
 0xe59   :  { %v12315_v1 = vmul.f32 0.35355338, %v3784_v54  ;;  %v9590_v12 = vpop.f32.mrb[23].mxu1  ;;  %v3824_v22 = vsel %vm2925_vm13, %v3807_v3, -inf }
 0xe5a   :  { %3825 = vmax.xlane.f32.xlu1 %v3824_v22 }
 0xe5b   :  { %v3827_v6 = vsel %vm2925_vm13, %v12315_v1, -inf }
 0xe5c   :  { %3828 = vmax.xlane.f32.xlu0 %v3827_v6 }
 0xe5e   :  { %v3789_v25 = vpop.f32.mrb[24].mxu1 }
 0xe5f   :  { %v3809_v20 = vmul.f32 0.35355338, %v3789_v25  ;;  %v9593_v34 = vpop.f32.mrb[25].mxu1 }
 0xe60   :  { %v3792_v41 = vpop.f32.mrb[26].mxu1 }
 0xe61   :  { %v9594_v23 = vpop.f32.mrb[27].mxu1  ;;  %v3830_v42 = vsel %vm2925_vm13, %v3809_v20, -inf  ;;  %v12325_v52 = vmul.f32 0.35355338, %v3792_v41 }
 0xe62   :  { %3831 = vmax.xlane.f32.xlu1 %v3830_v42 }
 0xe63   :  { %v3833_v33 = vsel %vm2925_vm13, %v12325_v52, -inf }
 0xe66   :  { %v3797_v47 = vpop.f32.mrb[28].mxu1 }
 0xe67   :  { %v9597_v5 = vpop.f32.mrb[29].mxu1  ;;  %v12329_v40 = vmul.f32 0.35355338, %v3797_v47 }
 0xe68   :  { %v3800_v62 = vpop.f32.mrb[30].mxu1 }
 0xe69   :  { %v9598_v43 = vpop.f32.mrb[31].mxu1  ;;  %v3836_v19 = vsel %vm2925_vm13, %v12329_v40, -inf }
 0xe72   :  { %3929 = vrot.lane.b32.xlu0 %v11831_v10, %s10787_s29 }
 0xe73   :  { %3927 = vrot.lane.b32.xlu1 %v11827_v57, %s10787_s29 }
 0xe91   :  { %3834 = vmax.xlane.f32.xlu0 %v3833_v33 }
 0xe97   :  { %3837 = vmax.xlane.f32.xlu1 %v3836_v19 }
 0xea7   :  { %3931 = vrot.lane.b32.xlu0 %v11835_v63, %s10787_s29 }
 0xea8   :  { %3933 = vrot.lane.b32.xlu1 %v11839_v18, %s10787_s29 }
 0xeac   :  { %4145 = vrot.lane.b32.xlu1 %v11827_v57, %s10788_s10 }
 0xed7   :  { %v3814_v30 = vpop.xlane.xlu1 %3813 }
 0xed8   :  { %v3839_v4 = vsub.f32 %v3803_v45, %v3814_v30 }
 0xed9   :  { %v3817_v36 = vpop.xlane.xlu0 %3816 }
 0xeda   :  { %v3848_v44 = vmul.f32 1.442695, %v3839_v4  ;;  %v3840_v48 = vsub.f32 %v3804_v38, %v3817_v36 }
 0xedc   :  { %10417 = vpow2.f32 %v3848_v44  ;;  %v3850_v53 = vmul.f32 1.442695, %v3840_v48 }
 0xede   :  { %10419 = vpow2.f32 %v3850_v53 }
 0xedf   :  { %v3820_v39 = vpop.xlane.xlu0 %3819 }
 0xee0   :  { %v3841_v15 = vsub.f32 %v3805_v32, %v3820_v39 }
 0xee2   :  { %v3852_v54 = vmul.f32 1.442695, %v3841_v15 }
 0xee3   :  { %v3823_v12 = vpop.xlane.xlu0 %3822 }
 0xee4   :  { %10421 = vpow2.f32 %v3852_v54  ;;  %v3842_v22 = vsub.f32 %v3806_v35, %v3823_v12 }
 0xee6   :  { %v10418_v6 = vpop.eup %10417  ;;  %v3854_v25 = vmul.f32 1.442695, %v3842_v22 }
 0xee7   :  { %v3826_v34 = vpop.xlane.xlu1 %3825  ;;  %v12340_v41 = vmul.f32 %v10418_v6, %v12018_v61 }
 0xee8   :  { %v10420_v23 = vpop.eup %10419  ;;  %10423 = vpow2.f32 %v3854_v25  ;;  %v3843_v45 = vsub.f32 %v3807_v3, %v3826_v34 }
 0xee9   :  { %v3875_v38 = vsel %vm2925_vm13, %v12340_v41, 0.0  ;;  %v12345_v42 = vmul.f32 %v10420_v23, %v12020_v59  ;;  %v3829_v3 = vpop.xlane.xlu0 %3828 }
 0xeea   :  { %v3856_v32 = vmul.f32 1.442695, %v3843_v45  ;;  %3876 = vadd.xlane.f32.xlu0 %v3875_v38 }
 0xeeb   :  { %v3878_v35 = vsel %vm2925_vm13, %v12345_v42, 0.0 }
 0xeec   :  { %10425 = vpow2.f32 %v3856_v32  ;;  %3879 = vadd.xlane.f32.xlu1 %v3878_v35 }
 0xeee   :  { %v10422_v47 = vpop.eup %10421 }
 0xeef   :  { %v3832_v5 = vpop.xlane.xlu1 %3831  ;;  %v12350_v61 = vmul.f32 %v10422_v47, %v12034_v50 }
 0xef0   :  { %v3845_v62 = vsub.f32 %v3809_v20, %v3832_v5  ;;  %v3930_v20 = vpop.permute.xlu0 %3929 }
 0xef1   :  { %v3881_v43 = vsel %vm2925_vm13, %v12350_v61, 0.0 }
 0xef2   :  { %v10424_v33 = vpop.eup %10423  ;;  %v3860_v59 = vmul.f32 1.442695, %v3845_v62  ;;  %3882 = vadd.xlane.f32.xlu1 %v3881_v43 }
 0xef3   :  { %v3928_v19 = vpop.permute.xlu1 %3927  ;;  %v12355_v30 = vmul.f32 %v10424_v33, %v12040_v37 }
 0xef4   :  { %10427 = vpow2.f32 %v3860_v59  ;;  %9602 = vmatpush3.bf16.msra.mxu0 %v3928_v19 }
 0xef5   :  { %v3884_v4 = vsel %vm2925_vm13, %v12355_v30, 0.0  ;;  %9603 = vmatprep.subr.bf16.mxu0 %v10778_v51 }
 0xef6   :  { %v10426_v50 = vpop.eup %10425  ;;  %3885 = vadd.xlane.f32.xlu1 %v3884_v4 }
 0xef7   :  { %v12361_v36 = vmul.f32 %v10426_v50, %v12048_v60  ;;  %v3844_v60 = vsub.f32 %v12315_v1, %v3829_v3 }
 0xef8   :  { %9604 = vmatpush3.bf16.msra.mxu0 %v3930_v20 }
 0xef9   :  { %v3887_v44 = vsel %vm2925_vm13, %v12361_v36, 0.0  ;;  %9605 = vmatprep.subr.bf16.mxu0 %v10778_v51  ;;  %v3858_v39 = vmul.f32 1.442695, %v3844_v60 }
 0xefa   :  { %3888 = vadd.xlane.f32.xlu1 %v3887_v44 }
 0xefb   :  { %10429 = vpow2.f32 %v3858_v39 }
 0xefe   :  { %v10428_v37 = vpop.eup %10427 }
 0xeff   :  { %v12367_v48 = vmul.f32 %v10428_v37, %v12065_v17 }
 0xf00   :  { %4143 = vrot.lane.b32.xlu0 %v11823_v28, %s10788_s10 }
 0xf01   :  { %v3893_v53 = vsel %vm2925_vm13, %v12367_v48, 0.0 }
 0xf02   :  { %3894 = vadd.xlane.f32.xlu1 %v3893_v53 }
 0xf05   :  { %v10430_v15 = vpop.eup %10429 }
 0xf06   :  { %v12375_v54 = vmul.f32 %v10430_v15, %v12052_v24 }
 0xf08   :  { %v3890_v17 = vsel %vm2925_vm13, %v12375_v54, 0.0 }
 0xf1e   :  { %v3835_v12 = vpop.xlane.xlu0 %3834 }
 0xf1f   :  { %v3846_v22 = vsub.f32 %v12325_v52, %v3835_v12  ;;  %3891 = vadd.xlane.f32.xlu0 %v3890_v17  ;;  %v12384_v52 = vld [vmem:[#allocation2 + $0x38] sm:$0xff] }
 0xf21   :  { %v3862_v6 = vmul.f32 1.442695, %v3846_v22 }
 0xf22   :  { %v3932_v25 = vpop.permute.xlu0 %3931 }
 0xf23   :  { %10431 = vpow2.f32 %v3862_v6  ;;  %9606 = vmatpush3.bf16.msra.mxu0 %v3932_v25 }
 0xf24   :  { %v3838_v34 = vpop.xlane.xlu1 %3837  ;;  %9607 = vmatprep.subr.bf16.mxu0 %v10778_v51 }
 0xf25   :  { %v3847_v1 = vsub.f32 %v12329_v40, %v3838_v34 }
 0xf27   :  { %v3864_v23 = vmul.f32 1.442695, %v3847_v1 }
 0xf28   :  { %v3934_v45 = vpop.permute.xlu1 %3933 }
 0xf29   :  { %10433 = vpow2.f32 %v3864_v23  ;;  %v3955_v24 = vsel %vm2444_vm9, %v3934_v45, 0 }
 0xf2a   :  { %9608 = vmatpush3.bf16.msra.mxu0 %v3955_v24 }
 0xf2b   :  { %9651 = vmatprep.subr.bf16.mxu0 %v10778_v51 }
 0xf2d   :  { %v10432_v38 = vpop.eup %10431 }
 0xf2e   :  { %v12387_v32 = vmul.f32 %v12384_v52, %v10432_v38 }
 0xf30   :  { %v3896_v35 = vsel %vm2925_vm13, %v12387_v32, 0.0 }
 0xf31   :  { %3897 = vadd.xlane.f32.xlu0 %v3896_v35 }
 0xf33   :  { %v10434_v47 = vpop.eup %10433 }
 0xf34   :  { %v12392_v40 = vmul.f32 %v10434_v47, %v12081_v0  ;;  %v4146_v0 = vpop.permute.xlu1 %4145 }
 0xf36   :  { %v3899_v5 = vsel %vm2925_vm13, %v12392_v40, 0.0 }
 0xf37   :  { %3900 = vadd.xlane.f32.xlu1 %v3899_v5 }
 0xf47   :  { %4147 = vrot.lane.b32.xlu0 %v11831_v10, %s10788_s10 }
 0xf48   :  { %4149 = vrot.lane.b32.xlu1 %v11835_v63, %s10788_s10 }
 0xf4b   :  { %4151 = vrot.lane.b32.xlu0 %v11839_v18, %s10788_s10 }
 0xf4c   :  { %4133 = vrot.lane.b32.xlu1 %v11823_v28, %s10789_s11 }
 0xf4f   :  { %4135 = vrot.lane.b32.xlu0 %v11827_v57, %s10789_s11 }
 0xf50   :  { %4137 = vrot.lane.b32.xlu1 %v11831_v10, %s10789_s11 }
 0xf53   :  { %4139 = vrot.lane.b32.xlu0 %v11835_v63, %s10789_s11 }
 0xf54   :  { %4141 = vrot.lane.b32.xlu1 %v11839_v18, %s10789_s11 }
 0xf77   :  { %v3877_v62 = vpop.xlane.xlu0 %3876 }
 0xf78   :  { %10435 = vrcp.f32 %v3877_v62 }
 0xf79   :  { %v3880_v3 = vpop.xlane.xlu1 %3879 }
 0xf7a   :  { %10437 = vrcp.f32 %v3880_v3 }
 0xf7b   :  { %v4144_v20 = vpop.permute.xlu0 %4143 }
 0xf7c   :  { %v4169_v37 = vsel %vm2813_vm12, %v4144_v20, 0 }
 0xf7f   :  { %v3883_v43 = vpop.xlane.xlu1 %3882 }
 0xf80   :  { %10439 = vrcp.f32 %v3883_v43 }
 0xf82   :  { %v10436_v33 = vpop.eup %10435 }
 0xf83   :  { %v3886_v59 = vpop.xlane.xlu1 %3885  ;;  %v3911_v4 = vmul.f32 %v10436_v33, %v12340_v41 }
 0xf84   :  { %v10438_v19 = vpop.eup %10437  ;;  %10441 = vrcp.f32 %v3886_v59  ;;  %v2791_v59 = vld [vmem:[%s14156_s1 + $0xa8] sm:$0xf] }
 0xf85   :  { %v3912_v50 = vmul.f32 %v10438_v19, %v12345_v42  ;;  %v4172_v42 = vsel %vm2813_vm12, %v4146_v0, 0 }
 0xf87   :  { %v3920_v44 = vpack.c.bf16 %v3912_v50, %v3911_v4  ;;  %v3889_v12 = vpop.xlane.xlu1 %3888 }
 0xf88   :  { %10443 = vrcp.f32 %v3889_v12 }
 0xf89   :  { %9610 = vmatmul.mubr.msk.bf16.vlgmr.msra.gmra.mrb[20].mxu0 %vm2925_vm13, %v3920_v44 }
 0xf8a   :  { %9652 = vmatpush3.bf16.xpose.msra.mxu0 %v4169_v37  ;;  %9613 = vmatprep.mubr.msk.bf16.mxu0 %vm10779_vm5, %v10778_v51  ;;  %v10440_v53 = vpop.eup %10439 }
 0xf8b   :  { %9653 = vmatprep.subr.bf16.mxu0 %v10778_v51  ;;  %v3913_v39 = vmul.f32 %v10440_v53, %v12350_v61 }
 0xf8e   :  { %v10442_v60 = vpop.eup %10441 }
 0xf8f   :  { %v3914_v41 = vmul.f32 %v10442_v60, %v12355_v30  ;;  %v3895_v25 = vpop.xlane.xlu1 %3894 }
 0xf91   :  { %v3921_v15 = vpack.c.bf16 %v3914_v41, %v3913_v39 }
 0xf92   :  { %9654 = vmatpush3.bf16.xpose.msra.mxu0 %v4172_v42  ;;  %v10444_v22 = vpop.eup %10443 }
 0xf93   :  { %9614 = vmatmul.mubr.msk.bf16.gmra.mrb[24].mxu0 %vm2925_vm13, %v3921_v15  ;;  %9655 = vmatprep.subr.bf16.mxu0 %v10778_v51  ;;  %v3915_v61 = vmul.f32 %v10444_v22, %v12361_v36 }
 0xf94   :  { %9617 = vmatprep.mubr.msk.bf16.mxu0 %vm10779_vm5, %v10778_v51 }
 0xfac   :  { %v3892_v17 = vpop.xlane.xlu0 %3891 }
 0xfad   :  { %10445 = vrcp.f32 %v3892_v17 }
 0xfae   :  { %10447 = vrcp.f32 %v3895_v25 }
 0xfb7   :  { %v10446_v6 = vpop.eup %10445 }
 0xfb8   :  { %v3916_v30 = vmul.f32 %v10446_v6, %v12375_v54  ;;  %v10448_v36 = vpop.eup %10447 }
 0xfb9   :  { %v3917_v35 = vmul.f32 %v10448_v36, %v12367_v48 }
 0xfba   :  { %v3922_v34 = vpack.c.bf16 %v3916_v30, %v3915_v61 }
 0xfbc   :  { %9618 = vmatmul.mubr.msk.bf16.gmra.mrb[28].mxu0 %vm2925_vm13, %v3922_v34 }
 0xfbd   :  { %9621 = vmatprep.mubr.msk.bf16.mxu0 %vm10779_vm5, %v10778_v51 }
 0xfbe   :  { %v3898_v1 = vpop.xlane.xlu0 %3897 }
 0xfbf   :  { %10449 = vrcp.f32 %v3898_v1 }
 0xfc2   :  { %v4148_v23 = vpop.permute.xlu0 %4147 }
 0xfc3   :  { %v4175_v45 = vsel %vm2813_vm12, %v4148_v23, 0 }
 0xfc4   :  { %9656 = vmatpush3.bf16.xpose.msra.mxu0 %v4175_v45  ;;  %v3901_v24 = vpop.xlane.xlu1 %3900 }
 0xfc5   :  { %10451 = vrcp.f32 %v3901_v24  ;;  %9657 = vmatprep.subr.bf16.mxu0 %v10778_v51 }
 0xfc6   :  { %v4152_v43 = vpop.permute.xlu0 %4151 }
 0xfc7   :  { %v4181_v33 = vsel %vm2813_vm12, %v4152_v43, 0 }
 0xfc8   :  { %v4150_v54 = vpop.permute.xlu1 %4149 }
 0xfc9   :  { %v10450_v38 = vpop.eup %10449  ;;  %v4178_v5 = vsel %vm2813_vm12, %v4150_v54, 0 }
 0xfca   :  { %v3918_v47 = vmul.f32 %v10450_v38, %v12387_v32  ;;  %v4136_v19 = vpop.permute.xlu0 %4135 }
 0xfcc   :  { %v3923_v0 = vpack.c.bf16 %v3918_v47, %v3917_v35  ;;  %9658 = vmatpush3.bf16.xpose.msra.mxu0 %v4178_v5  ;;  %v4134_v32 = vpop.permute.xlu1 %4133 }
 0xfcd   :  { %9659 = vmatprep.subr.bf16.mxu0 %v10778_v51 }
 0xfce   :  { %9622 = vmatmul.mubr.msk.bf16.gmra.mrb[32].mxu0 %vm2925_vm13, %v3923_v0  ;;  %v4140_v50 = vpop.permute.xlu0 %4139 }
 0xfcf   :  { %v10452_v62 = vpop.eup %10451  ;;  %9625 = vmatprep.mubr.msk.bf16.mxu0 %vm10779_vm5, %v10778_v51 }
 0xfd0   :  { %v3919_v3 = vmul.f32 %v10452_v62, %v12392_v40  ;;  %v4050_v40 = vsel %vm2444_vm9, %v2791_v59, 0  ;;  %v4138_v4 = vpop.permute.xlu1 %4137 }
 0xfd1   :  { %9630 = vmatpush3.bf16.msra.mxu1 %v4050_v40 }
 0xfd2   :  { %v3924_v48 = vpack.c.bf16 %v3919_v3, %v3919_v3  ;;  %9681 = vmatprep.subr.bf16.mxu1 %v10778_v51 }
 0xfd4   :  { %9660 = vmatpush3.bf16.xpose.msra.mxu0 %v4181_v33  ;;  %v4142_v20 = vpop.permute.xlu1 %4141 }
 0xfd5   :  { %9711 = vmatprep.subr.bf16.mxu0 %v10778_v51 }
 0xfd6   :  { %9626 = vmatmul.mubr.msk.bf16.gmra.mrb[36].mxu0 %vm2925_vm13, %v3924_v48 }
 0xfd7   :  { %9661 = vmatprep.mubr.msk.bf16.mxu0 %vm10779_vm5, %v10778_v51 }
 0xfde   :  { %9662 = vmatmul.mubr.msk.bf16.vlgmr.msra.gmra.mrb[40].mxu0 %vm2813_vm12, %v4134_v32 }
 0xfdf   :  { %9665 = vmatprep.mubr.msk.bf16.mxu0 %vm10779_vm5, %v10778_v51 }
 0xfe6   :  { %9666 = vmatmul.mubr.msk.bf16.gmra.mrb[44].mxu0 %vm2813_vm12, %v4136_v19 }
 0xfe7   :  { %9669 = vmatprep.mubr.msk.bf16.mxu0 %vm10779_vm5, %v10778_v51 }
 0xfee   :  { %9670 = vmatmul.mubr.msk.bf16.gmra.mrb[48].mxu0 %vm2813_vm12, %v4138_v4 }
 0xfef   :  { %9673 = vmatprep.mubr.msk.bf16.mxu0 %vm10779_vm5, %v10778_v51 }
 0xff6   :  { %9674 = vmatmul.mubr.msk.bf16.gmra.mrb[52].mxu0 %vm2813_vm12, %v4140_v50 }
 0xff7   :  { %9677 = vmatprep.mubr.msk.bf16.mxu0 %vm10779_vm5, %v10778_v51 }
 0xffe   :  { %9678 = vmatmul.mubr.msk.bf16.gmra.mrb[56].mxu0 %vm2813_vm12, %v4142_v20 }
 0xfff   :  { %9713 = vmatprep.mubr.msk.bf16.mxu0 %vm10779_vm5, %v10778_v51 }
0x105c   :  { %v3991_v44 = vpop.f32.mrb[20].mxu0 }
0x105d   :  { %v9611_v37 = vpop.f32.mrb[21].mxu0 }
0x105e   :  { %v3994_v53 = vpop.f32.mrb[22].mxu0 }
0x105f   :  { %v4029_v60 = vpack.c.bf16 %v3994_v53, %v3991_v44  ;;  %v9612_v39 = vpop.f32.mrb[23].mxu0 }
0x1061   :  { %9632 = vmatmul.mubr.msk.bf16.vlgmr.msra.gmra.mrb[32].mxu1 %vm2813_vm12, %v4029_v60 }
0x1062   :  { %9635 = vmatprep.mubr.msk.bf16.mxu1 %vm10779_vm5, %v10778_v51 }
0x1066   :  { %v3999_v41 = vpop.f32.mrb[24].mxu0 }
0x1067   :  { %v9615_v42 = vpop.f32.mrb[25].mxu0 }
0x1068   :  { %v4002_v15 = vpop.f32.mrb[26].mxu0 }
0x1069   :  { %v4030_v12 = vpack.c.bf16 %v4002_v15, %v3999_v41  ;;  %v9616_v17 = vpop.f32.mrb[27].mxu0 }
0x106b   :  { %9636 = vmatmul.mubr.msk.bf16.gmra.mrb[36].mxu1 %vm2813_vm12, %v4030_v12 }
0x106c   :  { %9639 = vmatprep.mubr.msk.bf16.mxu1 %vm10779_vm5, %v10778_v51 }
0x108f   :  { %v4007_v22 = vpop.f32.mrb[28].mxu0 }
0x1090   :  { %v9619_v6 = vpop.f32.mrb[29].mxu0 }
0x1091   :  { %v4010_v61 = vpop.f32.mrb[30].mxu0 }
0x1092   :  { %v4031_v30 = vpack.c.bf16 %v4010_v61, %v4007_v22  ;;  %v9620_v25 = vpop.f32.mrb[31].mxu0 }
0x1094   :  { %9640 = vmatmul.mubr.msk.bf16.gmra.mrb[40].mxu1 %vm2813_vm12, %v4031_v30 }
0x1095   :  { %9643 = vmatprep.mubr.msk.bf16.mxu1 %vm10779_vm5, %v10778_v51 }
0x10a1   :  { %v4015_v34 = vpop.f32.mrb[32].mxu0 }
0x10a2   :  { %v9623_v1 = vpop.f32.mrb[33].mxu0 }
0x10a3   :  { %v4018_v23 = vpop.f32.mrb[34].mxu0 }
0x10a4   :  { %v4032_v45 = vpack.c.bf16 %v4018_v23, %v4015_v34  ;;  %v9624_v24 = vpop.f32.mrb[35].mxu0 }
0x10a6   :  { %9644 = vmatmul.mubr.msk.bf16.gmra.mrb[44].mxu1 %vm2813_vm12, %v4032_v45 }
0x10a7   :  { %9647 = vmatprep.mubr.msk.bf16.mxu1 %vm10779_vm5, %v10778_v51 }
0x10a9   :  { %v4023_v36 = vpop.f32.mrb[36].mxu0 }
0x10aa   :  { %v9627_v54 = vpop.f32.mrb[37].mxu0  ;;  %v4033_v35 = vpack.c.bf16 %v4023_v36, %v4023_v36 }
0x10ab   :  { %v4026_v38 = vpop.f32.mrb[38].mxu0 }
0x10ac   :  { %v9628_v47 = vpop.f32.mrb[39].mxu0 }
0x10ae   :  { %9648 = vmatmul.mubr.msk.bf16.gmra.mrb[48].mxu1 %vm2813_vm12, %v4033_v35 }
0x10af   :  { %9691 = vmatprep.mubr.msk.bf16.mxu1 %vm10779_vm5, %v10778_v51 }
0x10b1   :  { %v4217_v5 = vpop.f32.mrb[40].mxu0 }
0x10b2   :  { %v12481_v0 = vmul.f32 0.35355338, %v4217_v5  ;;  %v9663_v62 = vpop.f32.mrb[41].mxu0 }
0x10b3   :  { %v4220_v3 = vpop.f32.mrb[42].mxu0 }
0x10b4   :  { %v12483_v43 = vmul.f32 0.35355338, %v4220_v3  ;;  %v9664_v33 = vpop.f32.mrb[43].mxu0  ;;  %v4264_v48 = vsel %vm2925_vm13, %v12481_v0, -inf }
0x10b5   :  { %4265 = vmax.xlane.f32.xlu0 %v4264_v48 }
0x10b6   :  { %v4267_v32 = vsel %vm2925_vm13, %v12483_v43, -inf }
0x10b7   :  { %4268 = vmax.xlane.f32.xlu1 %v4267_v32 }
0x10b9   :  { %v4225_v59 = vpop.f32.mrb[44].mxu0 }
0x10ba   :  { %v12489_v40 = vmul.f32 0.35355338, %v4225_v59  ;;  %v9667_v19 = vpop.f32.mrb[45].mxu0 }
0x10bb   :  { %v4228_v4 = vpop.f32.mrb[46].mxu0 }
0x10bc   :  { %v12491_v50 = vmul.f32 0.35355338, %v4228_v4  ;;  %v9668_v20 = vpop.f32.mrb[47].mxu0  ;;  %v4270_v44 = vsel %vm2925_vm13, %v12489_v40, -inf }
0x10bd   :  { %4271 = vmax.xlane.f32.xlu0 %v4270_v44 }
0x10be   :  { %v4273_v37 = vsel %vm2925_vm13, %v12491_v50, -inf }
0x10c1   :  { %4274 = vmax.xlane.f32.xlu0 %v4273_v37  ;;  %v4233_v53 = vpop.f32.mrb[48].mxu0 }
0x10c2   :  { %v12497_v60 = vmul.f32 0.35355338, %v4233_v53  ;;  %v9671_v39 = vpop.f32.mrb[49].mxu0 }
0x10c3   :  { %v4236_v41 = vpop.f32.mrb[50].mxu0 }
0x10c4   :  { %v9672_v42 = vpop.f32.mrb[51].mxu0  ;;  %v4276_v15 = vsel %vm2925_vm13, %v12497_v60, -inf }
0x10c5   :  { %4277 = vmax.xlane.f32.xlu0 %v4276_v15 }
0x10c8   :  { %4377 = vrot.lane.b32.xlu1 %v11823_v28, %s10790_s14  ;;  %v12511_v28 = vmul.f32 0.35355338, %v4236_v41 }
0x10c9   :  { %v4241_v12 = vpop.f32.mrb[52].mxu0 }
0x10ca   :  { %v12503_v17 = vmul.f32 0.35355338, %v4241_v12  ;;  %v9675_v22 = vpop.f32.mrb[53].mxu0  ;;  %v4279_v54 = vsel %vm2925_vm13, %v12511_v28, -inf }
0x10cb   :  { %v4244_v6 = vpop.f32.mrb[54].mxu0  ;;  %v10700_v22 = vld [vmem:[#allocation2] sm:$0xff] }
0x10cc   :  { %v9676_v61 = vpop.f32.mrb[55].mxu0  ;;  %v4282_v30 = vsel %vm2925_vm13, %v12503_v17, -inf  ;;  %v12513_v36 = vmul.f32 0.35355338, %v4244_v6 }
0x10cd   :  { %4283 = vmax.xlane.f32.xlu0 %v4282_v30 }
0x10ce   :  { %v4285_v38 = vsel %vm2925_vm13, %v12513_v36, -inf }
0x10d1   :  { %v4249_v25 = vpop.f32.mrb[56].mxu0 }
0x10d2   :  { %v12507_v34 = vmul.f32 0.35355338, %v4249_v25  ;;  %v9679_v1 = vpop.f32.mrb[57].mxu0  ;;  %v10701_v25 = vld [vmem:[#allocation2 + $0x8] sm:$0xff] }
0x10d3   :  { %v4252_v23 = vpop.f32.mrb[58].mxu0 }
0x10d4   :  { %v9680_v45 = vpop.f32.mrb[59].mxu0  ;;  %v4288_v24 = vsel %vm2925_vm13, %v12507_v34, -inf }
0x10d5   :  { %4289 = vmax.xlane.f32.xlu0 %v4288_v24  ;;  %v10702_v24 = vld [vmem:[#allocation2 + $0x10] sm:$0xff] }
0x10eb   :  { %4379 = vrot.lane.b32.xlu0 %v11827_v57, %s10790_s14 }
0x10ec   :  { %4280 = vmax.xlane.f32.xlu1 %v4279_v54 }
0x10f0   :  { %4286 = vmax.xlane.f32.xlu1 %v4285_v38 }
0x1101   :  { %4381 = vrot.lane.b32.xlu1 %v11831_v10, %s10790_s14 }
0x1134   :  { %v4086_v35 = vpop.f32.mrb[32].mxu1 }
0x1135   :  { %v12524_v47 = vadd.f32 %v4086_v35, %v12293_v16  ;;  %v9633_v5 = vpop.f32.mrb[33].mxu1 }
0x1136   :  { %v4089_v62 = vpop.f32.mrb[34].mxu1 }
0x1137   :  { %v12527_v3 = vadd.f32 %v4089_v62, %v12295_v11  ;;  %v9634_v57 = vpop.f32.mrb[35].mxu1  ;;  %v10703_v62 = vld [vmem:[#allocation2 + $0x18] sm:$0xff] }
0x113e   :  { %v4094_v33 = vpop.f32.mrb[36].mxu1 }
0x113f   :  { %v12530_v48 = vadd.f32 %v4094_v33, %v12297_v49  ;;  %v9637_v32 = vpop.f32.mrb[37].mxu1 }
0x1140   :  { %v4097_v59 = vpop.f32.mrb[38].mxu1 }
0x1141   :  { %v12533_v19 = vadd.f32 %v4097_v59, %v12299_v14  ;;  %v9638_v10 = vpop.f32.mrb[39].mxu1 }
0x1142   :  { %v4266_v4 = vpop.xlane.xlu0 %4265  ;;  %v10704_v10 = vld [vmem:[#allocation2 + $0x20] sm:$0xff] }
0x1143   :  { %v4291_v16 = vsub.f32 %v12481_v0, %v4266_v4 }
0x1144   :  { %v4269_v20 = vpop.xlane.xlu1 %4268 }
0x1145   :  { %v4300_v44 = vmul.f32 1.442695, %v4291_v16  ;;  %v4292_v37 = vsub.f32 %v12483_v43, %v4269_v20 }
0x1147   :  { %10453 = vpow2.f32 %v4300_v44  ;;  %v4302_v11 = vmul.f32 1.442695, %v4292_v37 }
0x1148   :  { %v4378_v53 = vpop.permute.xlu1 %4377 }
0x1149   :  { %10455 = vpow2.f32 %v4302_v11  ;;  %9682 = vmatpush3.bf16.msra.mxu1 %v4378_v53 }
0x114a   :  { %v4272_v49 = vpop.xlane.xlu0 %4271  ;;  %9683 = vmatprep.subr.bf16.mxu1 %v10778_v51 }
0x114b   :  { %v4293_v39 = vsub.f32 %v12489_v40, %v4272_v49 }
0x114d   :  { %v4304_v14 = vmul.f32 1.442695, %v4293_v39 }
0x114e   :  { %v4275_v41 = vpop.xlane.xlu0 %4274 }
0x114f   :  { %10457 = vpow2.f32 %v4304_v14  ;;  %v4294_v42 = vsub.f32 %v12491_v50, %v4275_v41  ;;  %v10705_v14 = vld [vmem:[#allocation2 + $0x30] sm:$0xff] }
0x1151   :  { %v10454_v0 = vpop.eup %10453  ;;  %v4306_v15 = vmul.f32 1.442695, %v4294_v42 }
0x1152   :  { %v4278_v12 = vpop.xlane.xlu0 %4277  ;;  %v12540_v43 = vmul.f32 %v10700_v22, %v10454_v0 }
0x1153   :  { %v10456_v6 = vpop.eup %10455  ;;  %10459 = vpow2.f32 %v4306_v15  ;;  %v4295_v61 = vsub.f32 %v12497_v60, %v4278_v12 }
0x1154   :  { %v4327_v30 = vsel %vm2925_vm13, %v12540_v43, 0.0  ;;  %v12545_v40 = vmul.f32 %v10701_v25, %v10456_v6 }
0x1155   :  { %v4308_v1 = vmul.f32 1.442695, %v4295_v61  ;;  %4328 = vadd.xlane.f32.xlu1 %v4327_v30 }
0x1156   :  { %v4330_v50 = vsel %vm2925_vm13, %v12545_v40, 0.0 }
0x1157   :  { %10461 = vpow2.f32 %v4308_v1  ;;  %4331 = vadd.xlane.f32.xlu0 %v4330_v50 }
0x1159   :  { %v10458_v23 = vpop.eup %10457 }
0x115a   :  { %v4284_v45 = vpop.xlane.xlu0 %4283  ;;  %v12549_v54 = vmul.f32 %v10702_v24, %v10458_v23 }
0x115b   :  { %v4297_v60 = vsub.f32 %v12503_v17, %v4284_v45 }
0x115c   :  { %v4333_v38 = vsel %vm2925_vm13, %v12549_v54, 0.0 }
0x115d   :  { %v10460_v35 = vpop.eup %10459  ;;  %v4312_v5 = vmul.f32 1.442695, %v4297_v60  ;;  %4334 = vadd.xlane.f32.xlu1 %v4333_v38 }
0x115e   :  { %v12554_v57 = vmul.f32 %v10703_v62, %v10460_v35 }
0x115f   :  { %10463 = vpow2.f32 %v4312_v5 }
0x1160   :  { %v4336_v33 = vsel %vm2925_vm13, %v12554_v57, 0.0 }
0x1161   :  { %v10462_v32 = vpop.eup %10461  ;;  %4337 = vadd.xlane.f32.xlu0 %v4336_v33 }
0x1162   :  { %v4290_v59 = vpop.xlane.xlu0 %4289  ;;  %v12558_v4 = vmul.f32 %v10704_v10, %v10462_v32 }
0x1164   :  { %v4339_v17 = vsel %vm2925_vm13, %v12558_v4, 0.0 }
0x1165   :  { %4340 = vadd.xlane.f32.xlu1 %v4339_v17  ;;  %v10707_v17 = vld [vmem:[#allocation2 + $0x40] sm:$0xff] }
0x1166   :  { %v4380_v16 = vpop.permute.xlu0 %4379 }
0x1167   :  { %v4102_v20 = vpop.f32.mrb[40].mxu1  ;;  %9684 = vmatpush3.bf16.msra.mxu1 %v4380_v16 }
0x1168   :  { %v12563_v44 = vadd.f32 %v4102_v20, %v12301_v8  ;;  %v9641_v37 = vpop.f32.mrb[41].mxu1  ;;  %9685 = vmatprep.subr.bf16.mxu1 %v10778_v51 }
0x1169   :  { %v10464_v11 = vpop.eup %10463  ;;  %v4105_v53 = vpop.f32.mrb[42].mxu1 }
0x116a   :  { %v12567_v49 = vadd.f32 %v4105_v53, %v12303_v31  ;;  %v9642_v39 = vpop.f32.mrb[43].mxu1  ;;  %v12569_v41 = vmul.f32 %v10705_v14, %v10464_v11 }
0x116c   :  { %v4345_v42 = vsel %vm2925_vm13, %v12569_v41, 0.0 }
0x116d   :  { %4346 = vadd.xlane.f32.xlu1 %v4345_v42 }
0x1179   :  { %v4110_v0 = vpop.f32.mrb[44].mxu1  ;;  %v4281_v15 = vpop.xlane.xlu1 %4280 }
0x117a   :  { %v12574_v8 = vadd.f32 %v4110_v0, %v12305_v21  ;;  %v4296_v12 = vsub.f32 %v12511_v28, %v4281_v15  ;;  %v9645_v22 = vpop.f32.mrb[45].mxu1 }
0x117b   :  { %v4113_v6 = vpop.f32.mrb[46].mxu1 }
0x117c   :  { %v4310_v61 = vmul.f32 1.442695, %v4296_v12  ;;  %v12578_v31 = vadd.f32 %v4113_v6, %v12307_v27  ;;  %v9646_v30 = vpop.f32.mrb[47].mxu1  ;;  %v10706_v27 = vld [vmem:[#allocation2 + $0x28] sm:$0xff] }
0x117d   :  { %v4287_v25 = vpop.xlane.xlu1 %4286 }
0x117e   :  { %10465 = vpow2.f32 %v4310_v61  ;;  %4385 = vrot.lane.b32.xlu1 %v11839_v18, %s10790_s14  ;;  %v4298_v18 = vsub.f32 %v12513_v36, %v4287_v25 }
0x1180   :  { %v4314_v35 = vmul.f32 1.442695, %v4298_v18 }
0x1181   :  { %v4118_v1 = vpop.f32.mrb[48].mxu1  ;;  %v4382_v50 = vpop.permute.xlu1 %4381 }
0x1182   :  { %v12583_v23 = vadd.f32 %v4118_v1, %v12309_v55  ;;  %v9649_v21 = vpop.f32.mrb[49].mxu1  ;;  %9686 = vmatpush3.bf16.msra.mxu1 %v4382_v50  ;;  %v4299_v55 = vsub.f32 %v12507_v34, %v4290_v59  ;;  %10467 = vpow2.f32 %v4314_v35  ;;  %v2792_v35 = vld [vmem:[%s14156_s1 + $0xac] sm:$0xf] }
0x1183   :  { %v4121_v28 = vpop.f32.mrb[50].mxu1  ;;  %9687 = vmatprep.subr.bf16.mxu1 %v10778_v51 }
0x1184   :  { %v9650_v45 = vpop.f32.mrb[51].mxu1  ;;  %v4316_v5 = vmul.f32 1.442695, %v4299_v55 }
0x1186   :  { %10469 = vpow2.f32 %v4316_v5 }
0x1188   :  { %v10466_v24 = vpop.eup %10465 }
0x1189   :  { %v4323_v60 = vmul.f32 %v10706_v27, %v10466_v24 }
0x118b   :  { %v4342_v38 = vsel %vm2925_vm13, %v4323_v60, 0.0 }
0x118c   :  { %4343 = vadd.xlane.f32.xlu0 %v4342_v38  ;;  %v10468_v62 = vpop.eup %10467 }
0x118d   :  { %v4325_v33 = vmul.f32 %v12384_v52, %v10468_v62 }
0x118f   :  { %v4348_v10 = vsel %vm2925_vm13, %v4325_v33, 0.0 }
0x1190   :  { %v10470_v32 = vpop.eup %10469 }
0x1191   :  { %v4326_v16 = vmul.f32 %v10707_v17, %v10470_v32 }
0x1193   :  { %v4351_v20 = vsel %vm2925_vm13, %v4326_v16, 0.0 }
0x11a2   :  { %4383 = vrot.lane.b32.xlu0 %v11835_v63, %s10790_s14 }
0x11c1   :  { %4349 = vadd.xlane.f32.xlu0 %v4348_v10 }
0x11c5   :  { %4352 = vadd.xlane.f32.xlu0 %v4351_v20 }
0x11e2   :  { %v4329_v63 = vpop.xlane.xlu1 %4328 }
0x11e4   :  { %v4332_v36 = vpop.xlane.xlu0 %4331 }
0x11e5   :  { %10471 = vrcp.f32 %v4332_v36 }
0x11e6   :  { %10473 = vrcp.f32 %v4329_v63 }
0x11ea   :  { %v4335_v37 = vpop.xlane.xlu1 %4334 }
0x11ee   :  { %v4338_v59 = vpop.xlane.xlu0 %4337 }
0x11ef   :  { %10475 = vrcp.f32 %v4338_v59  ;;  %v10472_v52 = vpop.eup %10471 }
0x11f0   :  { %10477 = vrcp.f32 %v4335_v37  ;;  %v10474_v14 = vpop.eup %10473  ;;  %v4364_v0 = vmul.f32 %v10472_v52, %v12545_v40 }
0x11f1   :  { %v4363_v15 = vmul.f32 %v10474_v14, %v12540_v43 }
0x11f2   :  { %v4341_v34 = vpop.xlane.xlu1 %4340 }
0x11f3   :  { %v4372_v22 = vpack.c.bf16 %v4364_v0, %v4363_v15 }
0x11f9   :  { %v10476_v6 = vpop.eup %10475 }
0x11fa   :  { %v4347_v11 = vpop.xlane.xlu1 %4346  ;;  %v10478_v61 = vpop.eup %10477  ;;  %v4366_v40 = vmul.f32 %v10476_v6, %v12554_v57 }
0x11fb   :  { %v4365_v30 = vmul.f32 %v10478_v61, %v12549_v54 }
0x11fd   :  { %v4373_v43 = vpack.c.bf16 %v4366_v40, %v4365_v30  ;;  %v4585_v40 = vld [vmem:[%s14157_s2 + $0x7] sm:$0x1] }
0x11fe   :  { %v4386_v42 = vpop.permute.xlu1 %4385  ;;  %v4586_v30 = vmul.f32 0.5, %v4585_v40 }
0x11ff   :  { %v4407_v12 = vsel %vm2444_vm9, %v4386_v42, 0 }
0x1219   :  { %v4344_v53 = vpop.xlane.xlu0 %4343 }
0x121a   :  { %10479 = vrcp.f32 %v4344_v53 }
0x121b   :  { %10481 = vrcp.f32 %v4341_v34 }
0x121c   :  { %10483 = vrcp.f32 %v4347_v11 }
0x121d   :  { %v4384_v39 = vpop.permute.xlu0 %4383 }
0x121e   :  { %9688 = vmatpush3.bf16.msra.mxu1 %v4384_v39 }
0x121f   :  { %9689 = vmatprep.subr.bf16.mxu1 %v10778_v51 }
0x1222   :  { %9690 = vmatpush3.bf16.msra.mxu1 %v4407_v12 }
0x1223   :  { %9733 = vmatprep.subr.bf16.mxu1 %v10778_v51 }
0x1224   :  { %v10480_v25 = vpop.eup %10479 }
0x1225   :  { %9692 = vmatmul.mubr.msk.bf16.vlgmr.msra.gmra.mrb[52].mxu1 %vm2925_vm13, %v4372_v22  ;;  %v10482_v1 = vpop.eup %10481  ;;  %v4368_v50 = vmul.f32 %v10480_v25, %v4323_v60 }
0x1226   :  { %9695 = vmatprep.mubr.msk.bf16.mxu1 %vm10779_vm5, %v10778_v51  ;;  %v4367_v21 = vmul.f32 %v10482_v1, %v12558_v4  ;;  %v10484_v45 = vpop.eup %10483 }
0x1227   :  { %v4369_v27 = vmul.f32 %v10484_v45, %v12569_v41  ;;  %v4502_v41 = vsel %vm2444_vm9, %v2792_v35, 0 }
0x1228   :  { %v4374_v28 = vpack.c.bf16 %v4368_v50, %v4367_v21  ;;  %9712 = vmatpush3.bf16.msra.mxu0 %v4502_v41 }
0x1229   :  { %9757 = vmatprep.subr.bf16.mxu0 %v10778_v51 }
0x122d   :  { %9696 = vmatmul.mubr.msk.bf16.gmra.mrb[56].mxu1 %vm2925_vm13, %v4373_v43  ;;  %v4604_v43 = vlaneseq }
0x122e   :  { %9699 = vmatprep.mubr.msk.bf16.mxu1 %vm10779_vm5, %v10778_v51 }
0x122f   :  { %v4605_v50 = vshrl.u32 %v4604_v43, 7 }
0x1235   :  { %9700 = vmatmul.mubr.msk.bf16.gmra.mrb[60].mxu1 %vm2925_vm13, %v4374_v28  ;;  %v12641_v28 = vsub.s32 0, %v4605_v50 }
0x1236   :  { %9703 = vmatprep.mubr.msk.bf16.mxu1 %vm10779_vm5, %v10778_v51 }
0x124e   :  { %v4350_v57 = vpop.xlane.xlu0 %4349 }
0x124f   :  { %10485 = vrcp.f32 %v4350_v57 }
0x1252   :  { %v4353_v54 = vpop.xlane.xlu0 %4352 }
0x1253   :  { %10487 = vrcp.f32 %v4353_v54  ;;  %v12646_v54 = vld [vmem:[%s14157_s2 + $0x6] ss:$0 sm:$0xff] }
0x1254   :  { %10489 = vtanh.f32 %v4586_v30 }
0x1259   :  { %v10486_v24 = vpop.eup %10485 }
0x125a   :  { %v4370_v38 = vmul.f32 %v10486_v24, %v4325_v33 }
0x125c   :  { %v4375_v18 = vpack.c.bf16 %v4370_v38, %v4369_v27 }
0x125d   :  { %v10488_v60 = vpop.eup %10487 }
0x125e   :  { %9704 = vmatmul.mubr.msk.bf16.gmra.mrb[64].mxu1 %vm2925_vm13, %v4375_v18  ;;  %v4371_v4 = vmul.f32 %v10488_v60, %v4326_v16  ;;  %v10490_v25 = vpop.eup %10489 }
0x125f   :  { %9707 = vmatprep.mubr.msk.bf16.mxu1 %vm10779_vm5, %v10778_v51  ;;  %v4588_v1 = vadd.f32 1.0, %v10490_v25 }
0x1260   :  { %v4376_v55 = vpack.c.bf16 %v4371_v4, %v4371_v4 }
0x1261   :  { %v4589_v21 = vmul.f32 0.5, %v4588_v1 }
0x1263   :  { %v12650_v24 = vrot.slane %v4589_v21, %v12641_v28 }
0x1266   :  { %9708 = vmatmul.mubr.msk.bf16.gmra.mrb[68].mxu1 %vm2925_vm13, %v4376_v55 }
0x1267   :  { %9737 = vmatprep.mubr.msk.bf16.mxu1 %vm10779_vm5, %v10778_v51 }
0x12f8   :  { %v4443_v5 = vpop.f32.mrb[52].mxu1 }
0x12f9   :  { %v9693_v62 = vpop.f32.mrb[53].mxu1 }
0x12fa   :  { %v4446_v33 = vpop.f32.mrb[54].mxu1 }
0x12fb   :  { %v4481_v32 = vpack.c.bf16 %v4446_v33, %v4443_v5  ;;  %v9694_v10 = vpop.f32.mrb[55].mxu1 }
0x12fd   :  { %9714 = vmatmul.mubr.msk.bf16.vlgmr.msra.gmra.mrb[60].mxu0 %vm2813_vm12, %v4481_v32 }
0x12fe   :  { %9717 = vmatprep.mubr.msk.bf16.mxu0 %vm10779_vm5, %v10778_v51 }
0x1300   :  { %v4451_v17 = vpop.f32.mrb[56].mxu1 }
0x1301   :  { %v9697_v16 = vpop.f32.mrb[57].mxu1 }
0x1302   :  { %v4454_v20 = vpop.f32.mrb[58].mxu1 }
0x1303   :  { %v4482_v63 = vpack.c.bf16 %v4454_v20, %v4451_v17  ;;  %v9698_v36 = vpop.f32.mrb[59].mxu1 }
0x1305   :  { %9718 = vmatmul.mubr.msk.bf16.gmra.mrb[64].mxu0 %vm2813_vm12, %v4482_v63 }
0x1306   :  { %9721 = vmatprep.mubr.msk.bf16.mxu0 %vm10779_vm5, %v10778_v51 }
0x1308   :  { %v4459_v37 = vpop.f32.mrb[60].mxu1 }
0x1309   :  { %v9701_v34 = vpop.f32.mrb[61].mxu1 }
0x130a   :  { %v4462_v59 = vpop.f32.mrb[62].mxu1 }
0x130b   :  { %v4483_v11 = vpack.c.bf16 %v4462_v59, %v4459_v37  ;;  %v9702_v53 = vpop.f32.mrb[63].mxu1 }
0x130d   :  { %9722 = vmatmul.mubr.msk.bf16.gmra.mrb[68].mxu0 %vm2813_vm12, %v4483_v11 }
0x130e   :  { %9725 = vmatprep.mubr.msk.bf16.mxu0 %vm10779_vm5, %v10778_v51 }
0x1331   :  { %v4467_v52 = vpop.f32.mrb[64].mxu1 }
0x1332   :  { %v9705_v39 = vpop.f32.mrb[65].mxu1 }
0x1333   :  { %v4470_v14 = vpop.f32.mrb[66].mxu1 }
0x1334   :  { %v4484_v42 = vpack.c.bf16 %v4470_v14, %v4467_v52  ;;  %v9706_v0 = vpop.f32.mrb[67].mxu1 }
0x1336   :  { %9726 = vmatmul.mubr.msk.bf16.gmra.mrb[72].mxu0 %vm2813_vm12, %v4484_v42 }
0x1337   :  { %9729 = vmatprep.mubr.msk.bf16.mxu0 %vm10779_vm5, %v10778_v51 }
0x1339   :  { %v4475_v15 = vpop.f32.mrb[68].mxu1 }
0x133a   :  { %v9709_v12 = vpop.f32.mrb[69].mxu1  ;;  %v4485_v6 = vpack.c.bf16 %v4475_v15, %v4475_v15 }
0x133b   :  { %v4478_v22 = vpop.f32.mrb[70].mxu1 }
0x133c   :  { %v9710_v61 = vpop.f32.mrb[71].mxu1 }
0x133e   :  { %9730 = vmatmul.mubr.msk.bf16.gmra.mrb[76].mxu0 %vm2813_vm12, %v4485_v6 }
0x133f   :  { %9761 = vmatprep.mubr.msk.bf16.mxu0 %vm10779_vm5, %v10778_v51 }
0x13d0   :  { %v4538_v57 = vpop.f32.mrb[60].mxu0 }
0x13d1   :  { %v4576_v45 = vadd.f32 %v4538_v57, %v12524_v47  ;;  %v9715_v27 = vpop.f32.mrb[61].mxu0 }
0x13d2   :  { %v4541_v38 = vpop.f32.mrb[62].mxu0 }
0x13d3   :  { %v4595_v18 = vadd.f32 %v12646_v54, %v4576_v45  ;;  %v4577_v60 = vadd.f32 %v4541_v38, %v12527_v3  ;;  %v9716_v4 = vpop.f32.mrb[63].mxu0 }
0x13d5   :  { %v4608_v55 = vmul.f32 %v12650_v24, %v4595_v18  ;;  %v4596_v35 = vadd.f32 %v12646_v54, %v4577_v60 }
0x13d7   :  { %v4609_v41 = vmul.f32 %v12650_v24, %v4596_v35  ;;  %v12658_v5 = vadd.f32 %v4608_v55, %v11660_v46 }
0x13d8   :  { %v4546_v47 = vpop.f32.mrb[64].mxu0 }
0x13d9   :  { %v4578_v62 = vadd.f32 %v4546_v47, %v12530_v48  ;;  %v9719_v33 = vpop.f32.mrb[65].mxu0  ;;  %v4628_v32 = vsel %vm2531_vm11, %v12658_v5, 0.0  ;;  %v12664_v10 = vadd.f32 %v4609_v41, %v11662_v26 }
0x13da   :  { %4629 = vadd.xlane.f32.xlu0 %v4628_v32  ;;  %v4549_v3 = vpop.f32.mrb[66].mxu0 }
0x13db   :  { %v4597_v17 = vadd.f32 %v12646_v54, %v4578_v62  ;;  %v4579_v16 = vadd.f32 %v4549_v3, %v12533_v19  ;;  %v9720_v20 = vpop.f32.mrb[67].mxu0  ;;  %v4631_v48 = vsel %vm2531_vm11, %v12664_v10, 0.0 }
0x13dd   :  { %v4610_v46 = vmul.f32 %v12650_v24, %v4597_v17  ;;  %v4598_v63 = vadd.f32 %v12646_v54, %v4579_v16 }
0x13de   :  { %4632 = vadd.xlane.f32.xlu0 %v4631_v48 }
0x13df   :  { %v4611_v36 = vmul.f32 %v12650_v24, %v4598_v63  ;;  %v12674_v26 = vadd.f32 %v4610_v46, %v11674_v56 }
0x13e0   :  { %v4554_v37 = vpop.f32.mrb[68].mxu0 }
0x13e1   :  { %v4580_v34 = vadd.f32 %v4554_v37, %v12563_v44  ;;  %v9723_v59 = vpop.f32.mrb[69].mxu0  ;;  %v4634_v19 = vsel %vm2531_vm11, %v12674_v26, 0.0  ;;  %v12680_v11 = vadd.f32 %v4611_v36, %v11676_v58 }
0x13e2   :  { %4635 = vadd.xlane.f32.xlu0 %v4634_v19  ;;  %v4557_v53 = vpop.f32.mrb[70].mxu0 }
0x13e3   :  { %v4599_v52 = vadd.f32 %v12646_v54, %v4580_v34  ;;  %v4581_v39 = vadd.f32 %v4557_v53, %v12567_v49  ;;  %v9724_v14 = vpop.f32.mrb[71].mxu0  ;;  %v4637_v56 = vsel %vm2531_vm11, %v12680_v11, 0.0 }
0x13e4   :  { %4638 = vadd.xlane.f32.xlu1 %v4637_v56 }
0x13e5   :  { %v4612_v44 = vmul.f32 %v12650_v24, %v4599_v52  ;;  %v4600_v42 = vadd.f32 %v12646_v54, %v4581_v39 }
0x13e7   :  { %v4613_v0 = vmul.f32 %v12650_v24, %v4600_v42  ;;  %v12690_v58 = vadd.f32 %v4612_v44, %v11688_v7 }
0x13e9   :  { %v4640_v15 = vsel %vm2531_vm11, %v12690_v58, 0.0  ;;  %v12695_v12 = vadd.f32 %v4613_v0, %v11690_v13  ;;  %v10307_v0 = vld [vmem:[%s14156_s1 + $0xb0] sm:$0xff]  }
0x13ea   :  { %4641 = vadd.xlane.f32.xlu0 %v4640_v15  ;;  %9734 = vmatpush3.bf16.msra.mxu1 %v10307_v0  ;;  %v10308_v15 = vld [vmem:[%s14156_s1 + $0xb8] sm:$0xff]  }
0x13eb   :  { %v4643_v49 = vsel %vm2531_vm11, %v12695_v12, 0.0  ;;  %9735 = vmatprep.subr.bf16.mxu1 %v10778_v51 }
0x13ee   :  { %4644 = vadd.xlane.f32.xlu0 %v4643_v49  ;;  %9736 = vmatpush3.bf16.msra.mxu1 %v10308_v15 }
0x13ef   :  { %9781 = vmatprep.subr.bf16.mxu1 %v10778_v51 }
0x1409   :  { %v4562_v22 = vpop.f32.mrb[72].mxu0 }
0x140a   :  { %v4582_v6 = vadd.f32 %v4562_v22, %v12574_v8  ;;  %v9727_v61 = vpop.f32.mrb[73].mxu0 }
0x140b   :  { %v4565_v40 = vpop.f32.mrb[74].mxu0 }
0x140c   :  { %v4601_v30 = vadd.f32 %v12646_v54, %v4582_v6  ;;  %v4583_v7 = vadd.f32 %v4565_v40, %v12578_v31  ;;  %v9728_v43 = vpop.f32.mrb[75].mxu0 }
0x140e   :  { %v4614_v25 = vmul.f32 %v12650_v24, %v4601_v30  ;;  %v4602_v13 = vadd.f32 %v12646_v54, %v4583_v7 }
0x1410   :  { %v4615_v1 = vmul.f32 %v12650_v24, %v4602_v13  ;;  %v12706_v50 = vadd.f32 %v4614_v25, %v11702_v2 }
0x1411   :  { %v4570_v21 = vpop.f32.mrb[76].mxu0 }
0x1412   :  { %v4584_v57 = vadd.f32 %v4570_v21, %v12583_v23  ;;  %v9731_v8 = vpop.f32.mrb[77].mxu0  ;;  %v4646_v45 = vsel %vm2531_vm11, %v12706_v50, 0.0  ;;  %v12712_v27 = vadd.f32 %v4615_v1, %v11704_v9 }
0x1413   :  { %4647 = vadd.xlane.f32.xlu0 %v4646_v45  ;;  %v4573_v31 = vpop.f32.mrb[78].mxu0 }
0x1414   :  { %v4603_v38 = vadd.f32 %v12646_v54, %v4584_v57  ;;  %v9732_v18 = vpop.f32.mrb[79].mxu0  ;;  %v4649_v2 = vsel %vm2531_vm11, %v12712_v27, 0.0 }
0x1416   :  { %v4616_v60 = vmul.f32 %v12650_v24, %v4603_v38 }
0x1417   :  { %4650 = vadd.xlane.f32.xlu0 %v4649_v2 }
0x1418   :  { %v12719_v23 = vadd.f32 %v4616_v60, %v11713_v29 }
0x141a   :  { %v4652_v4 = vsel %vm2531_vm11, %v12719_v23, 0.0 }
0x141b   :  { %4653 = vadd.xlane.f32.xlu0 %v4652_v4 }
0x1467   :  { %v4630_v9 = vpop.xlane.xlu0 %4629 }
0x1468   :  { %v4655_v55 = vmul.f32 0.03125, %v4630_v9 }
0x146a   :  { %v12724_v35 = vsub.f32 %v12658_v5, %v4655_v55 }
0x146b   :  { %v4633_v54 = vpop.xlane.xlu0 %4632 }
0x146c   :  { %v4656_v41 = vmul.f32 0.03125, %v4633_v54  ;;  %v4673_v24 = vmul.f32 %v12724_v35, %v12724_v35 }
0x146e   :  { %v12729_v47 = vsub.f32 %v12664_v10, %v4656_v41  ;;  %v4682_v29 = vsel %vm2531_vm11, %v4673_v24, 0.0 }
0x146f   :  { %v4636_v62 = vpop.xlane.xlu0 %4635  ;;  %4683 = vadd.xlane.f32.xlu0 %v4682_v29 }
0x1470   :  { %v4657_v33 = vmul.f32 0.03125, %v4636_v62  ;;  %v4674_v32 = vmul.f32 %v12729_v47, %v12729_v47 }
0x1471   :  { %v4639_v3 = vpop.xlane.xlu1 %4638 }
0x1472   :  { %v12735_v17 = vsub.f32 %v12674_v26, %v4657_v33  ;;  %v4658_v16 = vmul.f32 0.03125, %v4639_v3  ;;  %v4685_v20 = vsel %vm2531_vm11, %v4674_v32, 0.0  ;;  %v12789_v3 = vld [vmem:[%s14157_s2 + $0x8] ss:$0 sm:$0xff] }
0x1473   :  { %4686 = vadd.xlane.f32.xlu0 %v4685_v20 }
0x1474   :  { %v12739_v46 = vsub.f32 %v12680_v11, %v4658_v16  ;;  %v4675_v63 = vmul.f32 %v12735_v17, %v12735_v17 }
0x1476   :  { %v4688_v48 = vsel %vm2531_vm11, %v4675_v63, 0.0  ;;  %v4676_v36 = vmul.f32 %v12739_v46, %v12739_v46 }
0x1477   :  { %v4642_v37 = vpop.xlane.xlu0 %4641  ;;  %4689 = vadd.xlane.f32.xlu0 %v4688_v48 }
0x1478   :  { %v4659_v34 = vmul.f32 0.03125, %v4642_v37  ;;  %v4691_v19 = vsel %vm2531_vm11, %v4676_v36, 0.0 }
0x147a   :  { %v12747_v59 = vsub.f32 %v12690_v58, %v4659_v34  ;;  %v8228_v34 = vld [vmem:[%s14157_s2 + $0x9] ss:$0 sm:$0xff] }
0x147b   :  { %v4645_v53 = vpop.xlane.xlu0 %4644  ;;  %4692 = vadd.xlane.f32.xlu0 %v4691_v19 }
0x147c   :  { %v4660_v52 = vmul.f32 0.03125, %v4645_v53  ;;  %v4677_v39 = vmul.f32 %v12747_v59, %v12747_v59 }
0x147e   :  { %v12753_v14 = vsub.f32 %v12695_v12, %v4660_v52  ;;  %v4694_v56 = vsel %vm2531_vm11, %v4677_v39, 0.0 }
0x147f   :  { %4695 = vadd.xlane.f32.xlu1 %v4694_v56 }
0x1480   :  { %v4678_v44 = vmul.f32 %v12753_v14, %v12753_v14 }
0x1482   :  { %v4697_v42 = vsel %vm2531_vm11, %v4678_v44, 0.0 }
0x1483   :  { %4698 = vadd.xlane.f32.xlu0 %v4697_v42 }
0x14a0   :  { %v4648_v49 = vpop.xlane.xlu0 %4647 }
0x14a1   :  { %v4661_v22 = vmul.f32 0.03125, %v4648_v49 }
0x14a3   :  { %v12768_v6 = vsub.f32 %v12706_v50, %v4661_v22 }
0x14a4   :  { %v4651_v61 = vpop.xlane.xlu0 %4650 }
0x14a5   :  { %v4662_v40 = vmul.f32 0.03125, %v4651_v61  ;;  %v4679_v30 = vmul.f32 %v12768_v6, %v12768_v6 }
0x14a7   :  { %v12773_v7 = vsub.f32 %v12712_v27, %v4662_v40  ;;  %v4700_v43 = vsel %vm2531_vm11, %v4679_v30, 0.0 }
0x14a8   :  { %4701 = vadd.xlane.f32.xlu1 %v4700_v43  ;;  %v4654_v25 = vpop.xlane.xlu0 %4653 }
0x14a9   :  { %v4663_v13 = vmul.f32 0.03125, %v4654_v25  ;;  %v4680_v1 = vmul.f32 %v12773_v7, %v12773_v7 }
0x14ab   :  { %v12779_v21 = vsub.f32 %v12719_v23, %v4663_v13  ;;  %v4703_v57 = vsel %vm2531_vm11, %v4680_v1, 0.0 }
0x14ac   :  { %4704 = vadd.xlane.f32.xlu0 %v4703_v57 }
0x14ad   :  { %v4681_v8 = vmul.f32 %v12779_v21, %v12779_v21 }
0x14af   :  { %v4706_v45 = vsel %vm2531_vm11, %v4681_v8, 0.0 }
0x14b0   :  { %4707 = vadd.xlane.f32.xlu1 %v4706_v45 }
0x14fc   :  { %v4684_v31 = vpop.xlane.xlu0 %4683 }
0x14fd   :  { %v4709_v38 = vmul.f32 0.03125, %v4684_v31 }
0x14ff   :  { %v4718_v18 = vadd.f32 1e-05, %v4709_v38 }
0x1500   :  { %v4687_v60 = vpop.xlane.xlu0 %4686 }
0x1501   :  { %10491 = vrsqrt.f32 %v4718_v18  ;;  %v4710_v2 = vmul.f32 0.03125, %v4687_v60 }
0x1503   :  { %v4719_v4 = vadd.f32 1e-05, %v4710_v2 }
0x1504   :  { %v4690_v9 = vpop.xlane.xlu0 %4689 }
0x1505   :  { %10493 = vrsqrt.f32 %v4719_v4  ;;  %v4711_v55 = vmul.f32 0.03125, %v4690_v9 }
0x1507   :  { %v4720_v54 = vadd.f32 1e-05, %v4711_v55 }
0x1508   :  { %v4693_v41 = vpop.xlane.xlu0 %4692 }
0x1509   :  { %10495 = vrsqrt.f32 %v4720_v54  ;;  %v4712_v24 = vmul.f32 0.03125, %v4693_v41 }
0x150b   :  { %v10492_v29 = vpop.eup %10491  ;;  %v4721_v62 = vadd.f32 1e-05, %v4712_v24 }
0x150c   :  { %v4736_v33 = vmul.f32 %v10492_v29, %v12724_v35  ;;  %v4696_v32 = vpop.xlane.xlu1 %4695 }
0x150d   :  { %10497 = vrsqrt.f32 %v4721_v62  ;;  %v4713_v16 = vmul.f32 0.03125, %v4696_v32 }
0x150e   :  { %v4749_v48 = vmul.f32 %v12789_v3, %v4736_v33 }
0x150f   :  { %v10494_v20 = vpop.eup %10493  ;;  %v4722_v63 = vadd.f32 1e-05, %v4713_v16 }
0x1510   :  { %v4737_v36 = vmul.f32 %v10494_v20, %v12729_v47  ;;  %v4699_v37 = vpop.xlane.xlu0 %4698  ;;  %v4762_v39 = vadd.f32 %v8228_v34, %v4749_v48 }
0x1511   :  { %10499 = vrsqrt.f32 %v4722_v63  ;;  %v4714_v35 = vmul.f32 0.03125, %v4699_v37 }
0x1512   :  { %v4750_v19 = vmul.f32 %v12789_v3, %v4737_v36 }
0x1513   :  { %v10496_v53 = vpop.eup %10495  ;;  %v4723_v52 = vadd.f32 1e-05, %v4714_v35 }
0x1514   :  { %v4763_v56 = vadd.f32 %v8228_v34, %v4750_v19  ;;  %v4738_v44 = vmul.f32 %v10496_v53, %v12735_v17 }
0x1515   :  { %10501 = vrsqrt.f32 %v4723_v52 }
0x1516   :  { %v4775_v42 = vpack.c.bf16 %v4763_v56, %v4762_v39  ;;  %v4751_v47 = vmul.f32 %v12789_v3, %v4738_v44 }
0x1517   :  { %v10498_v0 = vpop.eup %10497 }
0x1518   :  { %v4739_v15 = vmul.f32 %v10498_v0, %v12739_v46  ;;  %9738 = vmatmul.mubr.msk.bf16.vlgmr.msra.gmra.mrb[72].mxu1 %vm2531_vm11, %v4775_v42  ;;  %v4764_v61 = vadd.f32 %v8228_v34, %v4751_v47 }
0x1519   :  { %9741 = vmatprep.mubr.msk.bf16.mxu1 %vm10779_vm5, %v10778_v51 }
0x151a   :  { %v4752_v49 = vmul.f32 %v12789_v3, %v4739_v15 }
0x151b   :  { %v10500_v22 = vpop.eup %10499 }
0x151c   :  { %v4765_v40 = vadd.f32 %v8228_v34, %v4752_v49  ;;  %v4740_v30 = vmul.f32 %v10500_v22, %v12747_v59 }
0x151e   :  { %v4776_v17 = vpack.c.bf16 %v4765_v40, %v4764_v61  ;;  %v4753_v25 = vmul.f32 %v12789_v3, %v4740_v30 }
0x151f   :  { %v10502_v43 = vpop.eup %10501 }
0x1520   :  { %v4741_v13 = vmul.f32 %v10502_v43, %v12753_v14  ;;  %9742 = vmatmul.mubr.msk.bf16.gmra.mrb[76].mxu1 %vm2531_vm11, %v4776_v17  ;;  %v4766_v1 = vadd.f32 %v8228_v34, %v4753_v25 }
0x1521   :  { %9745 = vmatprep.mubr.msk.bf16.mxu1 %vm10779_vm5, %v10778_v51 }
0x1522   :  { %v4754_v46 = vmul.f32 %v12789_v3, %v4741_v13 }
0x1524   :  { %v4767_v57 = vadd.f32 %v8228_v34, %v4754_v46 }
0x1526   :  { %v4777_v8 = vpack.c.bf16 %v4767_v57, %v4766_v1 }
0x1528   :  { %9746 = vmatmul.mubr.msk.bf16.gmra.mrb[80].mxu1 %vm2531_vm11, %v4777_v8 }
0x1529   :  { %9749 = vmatprep.mubr.msk.bf16.mxu1 %vm10779_vm5, %v10778_v51 }
0x1535   :  { %v4702_v59 = vpop.xlane.xlu1 %4701 }
0x1536   :  { %v4715_v45 = vmul.f32 0.03125, %v4702_v59 }
0x1538   :  { %v4724_v31 = vadd.f32 1e-05, %v4715_v45 }
0x1539   :  { %v4705_v38 = vpop.xlane.xlu0 %4704 }
0x153a   :  { %10503 = vrsqrt.f32 %v4724_v31  ;;  %v4716_v14 = vmul.f32 0.03125, %v4705_v38 }
0x153c   :  { %v4725_v18 = vadd.f32 1e-05, %v4716_v14 }
0x153d   :  { %v4708_v60 = vpop.xlane.xlu1 %4707 }
0x153e   :  { %10505 = vrsqrt.f32 %v4725_v18  ;;  %v4717_v2 = vmul.f32 0.03125, %v4708_v60 }
0x1540   :  { %v4726_v4 = vadd.f32 1e-05, %v4717_v2 }
0x1542   :  { %10507 = vrsqrt.f32 %v4726_v4 }
0x1544   :  { %v10504_v9 = vpop.eup %10503 }
0x1545   :  { %v4742_v55 = vmul.f32 %v10504_v9, %v12768_v6 }
0x1547   :  { %v4755_v41 = vmul.f32 %v12789_v3, %v4742_v55 }
0x1548   :  { %v10506_v54 = vpop.eup %10505 }
0x1549   :  { %v4743_v24 = vmul.f32 %v10506_v54, %v12773_v7  ;;  %v4768_v33 = vadd.f32 %v8228_v34, %v4755_v41  ;;  %v10309_v7 = vld [vmem:[%s14156_s1 + $0xc0] sm:$0xff]  }
0x154a   :  { %9758 = vmatpush3.bf16.msra.mxu0 %v10309_v7 }
0x154b   :  { %v4756_v29 = vmul.f32 %v12789_v3, %v4743_v24  ;;  %9759 = vmatprep.subr.bf16.mxu0 %v10778_v51 }
0x154c   :  { %v10508_v62 = vpop.eup %10507 }
0x154d   :  { %v4769_v32 = vadd.f32 %v8228_v34, %v4756_v29  ;;  %v4744_v16 = vmul.f32 %v10508_v62, %v12779_v21  ;;  %v10310_v21 = vld [vmem:[%s14156_s1 + $0xc8] sm:$0xff]  }
0x154e   :  { %9760 = vmatpush3.bf16.msra.mxu0 %v10310_v21 }
0x154f   :  { %v4778_v20 = vpack.c.bf16 %v4769_v32, %v4768_v33  ;;  %v4757_v63 = vmul.f32 %v12789_v3, %v4744_v16  ;;  %9805 = vmatprep.subr.bf16.mxu0 %v10778_v51  ;;  %v8229_v3 = vld [vmem:[%s14157_s2 + $0xa] ss:$0 sm:$0xff]  ;;  %v4893_v33 = vld [vmem:[%s14157_s2 + $0xc] sm:$0x1] }
0x1550   :  { %v4894_v32 = vmul.f32 0.5, %v4893_v33 }
0x1551   :  { %9750 = vmatmul.mubr.msk.bf16.gmra.mrb[84].mxu1 %vm2531_vm11, %v4778_v20  ;;  %v4770_v6 = vadd.f32 %v8228_v34, %v4757_v63 }
0x1552   :  { %9753 = vmatprep.mubr.msk.bf16.mxu1 %vm10779_vm5, %v10778_v51  ;;  %10509 = vtanh.f32 %v4894_v32 }
0x1553   :  { %v4779_v48 = vpack.c.bf16 %v4770_v6, %v4770_v6  ;;  %v8237_v6 = vld [vmem:[%s14157_s2 + $0xb] ss:$0 sm:$0xff] }
0x1559   :  { %9754 = vmatmul.mubr.msk.bf16.gmra.mrb[88].mxu1 %vm2531_vm11, %v4779_v48 }
0x155a   :  { %9785 = vmatprep.mubr.msk.bf16.mxu1 %vm10779_vm5, %v10778_v51 }
0x155c   :  { %v10510_v16 = vpop.eup %10509 }
0x155d   :  { %v4896_v20 = vadd.f32 1.0, %v10510_v16 }
0x155f   :  { %v4897_v63 = vmul.f32 0.5, %v4896_v20 }
0x1561   :  { %v5014_v48 = vrot.slane %v4897_v63, %v12641_v28 }
0x15eb   :  { %v4846_v36 = vpop.f32.mrb[72].mxu1 }
0x15ec   :  { %v4847_v37 = vadd.f32 %v8229_v3, %v4846_v36  ;;  %v9739_v34 = vpop.f32.mrb[73].mxu1 }
0x15ed   :  { %v4849_v35 = vpop.f32.mrb[74].mxu1 }
0x15ee   :  { %v4850_v19 = vadd.f32 %v8229_v3, %v4849_v35  ;;  %v9740_v53 = vpop.f32.mrb[75].mxu1  ;;  %v4884_v52 = vmax.f32 %v4847_v37, 0.0 }
0x15f0   :  { %v4885_v39 = vmax.f32 %v4850_v19, 0.0 }
0x15f2   :  { %v4902_v56 = vpack.c.bf16 %v4885_v39, %v4884_v52 }
0x15f3   :  { %v4854_v44 = vpop.f32.mrb[76].mxu1 }
0x15f4   :  { %v4855_v42 = vadd.f32 %v8229_v3, %v4854_v44  ;;  %v9743_v0 = vpop.f32.mrb[77].mxu1  ;;  %9762 = vmatmul.mubr.msk.bf16.vlgmr.msra.gmra.mrb[80].mxu0 %vm2531_vm11, %v4902_v56 }
0x15f5   :  { %v4857_v47 = vpop.f32.mrb[78].mxu1  ;;  %9765 = vmatprep.mubr.msk.bf16.mxu0 %vm10779_vm5, %v10778_v51 }
0x15f6   :  { %v4858_v15 = vadd.f32 %v8229_v3, %v4857_v47  ;;  %v9744_v49 = vpop.f32.mrb[79].mxu1  ;;  %v4886_v22 = vmax.f32 %v4855_v42, 0.0 }
0x15f8   :  { %v4887_v61 = vmax.f32 %v4858_v15, 0.0 }
0x15fa   :  { %v4903_v40 = vpack.c.bf16 %v4887_v61, %v4886_v22 }
0x15fb   :  { %v4862_v30 = vpop.f32.mrb[80].mxu1 }
0x15fc   :  { %v4863_v17 = vadd.f32 %v8229_v3, %v4862_v30  ;;  %v9747_v43 = vpop.f32.mrb[81].mxu1  ;;  %9766 = vmatmul.mubr.msk.bf16.gmra.mrb[84].mxu0 %vm2531_vm11, %v4903_v40 }
0x15fd   :  { %v4865_v25 = vpop.f32.mrb[82].mxu1  ;;  %9769 = vmatprep.mubr.msk.bf16.mxu0 %vm10779_vm5, %v10778_v51 }
0x15fe   :  { %v4866_v13 = vadd.f32 %v8229_v3, %v4865_v25  ;;  %v9748_v46 = vpop.f32.mrb[83].mxu1  ;;  %v4888_v1 = vmax.f32 %v4863_v17, 0.0 }
0x1600   :  { %v4889_v57 = vmax.f32 %v4866_v13, 0.0 }
0x1602   :  { %v4904_v8 = vpack.c.bf16 %v4889_v57, %v4888_v1 }
0x1604   :  { %9770 = vmatmul.mubr.msk.bf16.gmra.mrb[88].mxu0 %vm2531_vm11, %v4904_v8 }
0x1605   :  { %9773 = vmatprep.mubr.msk.bf16.mxu0 %vm10779_vm5, %v10778_v51 }
0x1624   :  { %v4870_v59 = vpop.f32.mrb[84].mxu1 }
0x1625   :  { %v4871_v45 = vadd.f32 %v8229_v3, %v4870_v59  ;;  %v9751_v31 = vpop.f32.mrb[85].mxu1 }
0x1626   :  { %v4873_v38 = vpop.f32.mrb[86].mxu1 }
0x1627   :  { %v4874_v14 = vadd.f32 %v8229_v3, %v4873_v38  ;;  %v9752_v18 = vpop.f32.mrb[87].mxu1  ;;  %v4890_v60 = vmax.f32 %v4871_v45, 0.0 }
0x1629   :  { %v4891_v2 = vmax.f32 %v4874_v14, 0.0 }
0x162b   :  { %v4905_v4 = vpack.c.bf16 %v4891_v2, %v4890_v60 }
0x162c   :  { %v4878_v9 = vpop.f32.mrb[88].mxu1 }
0x162d   :  { %v4879_v55 = vadd.f32 %v8229_v3, %v4878_v9  ;;  %v9755_v54 = vpop.f32.mrb[89].mxu1  ;;  %9774 = vmatmul.mubr.msk.bf16.gmra.mrb[92].mxu0 %vm2531_vm11, %v4905_v4 }
0x162e   :  { %v4881_v41 = vpop.f32.mrb[90].mxu1  ;;  %9777 = vmatprep.mubr.msk.bf16.mxu0 %vm10779_vm5, %v10778_v51 }
0x162f   :  { %v4892_v24 = vmax.f32 %v4879_v55, 0.0  ;;  %v9756_v29 = vpop.f32.mrb[91].mxu1 }
0x1631   :  { %v4906_v62 = vpack.c.bf16 %v4892_v24, %v4892_v24 }
0x1635   :  { %9778 = vmatmul.mubr.msk.bf16.gmra.mrb[96].mxu0 %vm2531_vm11, %v4906_v62 }
0x1636   :  { %9815 = vmatprep.mubr.msk.bf16.mxu0 %vm10779_vm5, %v10778_v51 }
0x16c7   :  { %v4973_v7 = vpop.f32.mrb[80].mxu0 }
0x16c8   :  { %v4974_v21 = vadd.f32 %v8237_v6, %v4973_v7  ;;  %v9763_v3 = vpop.f32.mrb[81].mxu0 }
0x16c9   :  { %v4976_v36 = vpop.f32.mrb[82].mxu0 }
0x16ca   :  { %v5015_v37 = vmul.f32 %v5014_v48, %v4974_v21  ;;  %v4977_v34 = vadd.f32 %v8237_v6, %v4976_v36  ;;  %v9764_v35 = vpop.f32.mrb[83].mxu0 }
0x16cc   :  { %v12860_v19 = vadd.f32 %v5015_v37, %v12658_v5  ;;  %v5016_v53 = vmul.f32 %v5014_v48, %v4977_v34 }
0x16ce   :  { %v12863_v52 = vadd.f32 %v5016_v53, %v12664_v10  ;;  %v5035_v39 = vsel %vm2531_vm11, %v12860_v19, 0.0 }
0x16cf   :  { %5036 = vadd.xlane.f32.xlu0 %v5035_v39  ;;  %v4981_v56 = vpop.f32.mrb[84].mxu0 }
0x16d0   :  { %v4982_v44 = vadd.f32 %v8237_v6, %v4981_v56  ;;  %v9767_v42 = vpop.f32.mrb[85].mxu0  ;;  %v5038_v0 = vsel %vm2531_vm11, %v12863_v52, 0.0 }
0x16d1   :  { %5039 = vadd.xlane.f32.xlu1 %v5038_v0  ;;  %v4984_v47 = vpop.f32.mrb[86].mxu0 }
0x16d2   :  { %v5017_v15 = vmul.f32 %v5014_v48, %v4982_v44  ;;  %v4985_v49 = vadd.f32 %v8237_v6, %v4984_v47  ;;  %v9768_v5 = vpop.f32.mrb[87].mxu0 }
0x16d4   :  { %v12870_v22 = vadd.f32 %v5017_v15, %v12674_v26  ;;  %v5018_v10 = vmul.f32 %v5014_v48, %v4985_v49 }
0x16d6   :  { %v12873_v61 = vadd.f32 %v5018_v10, %v12680_v11  ;;  %v5041_v40 = vsel %vm2531_vm11, %v12870_v22, 0.0 }
0x16d7   :  { %5042 = vadd.xlane.f32.xlu0 %v5041_v40  ;;  %v4989_v30 = vpop.f32.mrb[88].mxu0 }
0x16d8   :  { %v4990_v17 = vadd.f32 %v8237_v6, %v4989_v30  ;;  %v9771_v43 = vpop.f32.mrb[89].mxu0  ;;  %v5044_v25 = vsel %vm2531_vm11, %v12873_v61, 0.0 }
0x16d9   :  { %5045 = vadd.xlane.f32.xlu1 %v5044_v25  ;;  %v4992_v13 = vpop.f32.mrb[90].mxu0 }
0x16da   :  { %v5019_v46 = vmul.f32 %v5014_v48, %v4990_v17  ;;  %v4993_v1 = vadd.f32 %v8237_v6, %v4992_v13  ;;  %v9772_v26 = vpop.f32.mrb[91].mxu0 }
0x16dc   :  { %v12880_v57 = vadd.f32 %v5019_v46, %v12690_v58  ;;  %v5020_v11 = vmul.f32 %v5014_v48, %v4993_v1  ;;  %v10311_v46 = vld [vmem:[%s14156_s1 + $0xd0] sm:$0xff]   ;;  %v10312_v1 = vld [vmem:[%s14156_s1 + $0xd8] sm:$0xff]  }
0x16dd   :  { %9782 = vmatpush3.bf16.msra.mxu1 %v10311_v46 }
0x16de   :  { %v12883_v8 = vadd.f32 %v5020_v11, %v12695_v12  ;;  %v5047_v59 = vsel %vm2531_vm11, %v12880_v57, 0.0  ;;  %9783 = vmatprep.subr.bf16.mxu1 %v10778_v51 }
0x16df   :  { %5048 = vadd.xlane.f32.xlu0 %v5047_v59 }
0x16e0   :  { %v5050_v45 = vsel %vm2531_vm11, %v12883_v8, 0.0 }
0x16e1   :  { %5051 = vadd.xlane.f32.xlu1 %v5050_v45  ;;  %9784 = vmatpush3.bf16.msra.mxu1 %v10312_v1 }
0x16e2   :  { %9835 = vmatprep.subr.bf16.mxu1 %v10778_v51 }
0x1700   :  { %v4997_v31 = vpop.f32.mrb[92].mxu0 }
0x1701   :  { %v4998_v38 = vadd.f32 %v8237_v6, %v4997_v31  ;;  %v9775_v14 = vpop.f32.mrb[93].mxu0 }
0x1702   :  { %v5000_v18 = vpop.f32.mrb[94].mxu0 }
0x1703   :  { %v5021_v60 = vmul.f32 %v5014_v48, %v4998_v38  ;;  %v5001_v2 = vadd.f32 %v8237_v6, %v5000_v18  ;;  %v9776_v58 = vpop.f32.mrb[95].mxu0 }
0x1705   :  { %v12890_v4 = vadd.f32 %v5021_v60, %v12706_v50  ;;  %v5022_v12 = vmul.f32 %v5014_v48, %v5001_v2 }
0x1707   :  { %v12893_v9 = vadd.f32 %v5022_v12, %v12712_v27  ;;  %v5053_v55 = vsel %vm2531_vm11, %v12890_v4, 0.0 }
0x1708   :  { %5054 = vadd.xlane.f32.xlu0 %v5053_v55  ;;  %v5005_v54 = vpop.f32.mrb[96].mxu0 }
0x1709   :  { %v5006_v41 = vadd.f32 %v8237_v6, %v5005_v54  ;;  %v9779_v24 = vpop.f32.mrb[97].mxu0  ;;  %v5056_v29 = vsel %vm2531_vm11, %v12893_v9, 0.0 }
0x170a   :  { %5057 = vadd.xlane.f32.xlu1 %v5056_v29  ;;  %v5008_v62 = vpop.f32.mrb[98].mxu0 }
0x170b   :  { %v5023_v33 = vmul.f32 %v5014_v48, %v5006_v41  ;;  %v9780_v32 = vpop.f32.mrb[99].mxu0 }
0x170d   :  { %v12900_v50 = vadd.f32 %v5023_v33, %v12719_v23 }
0x170f   :  { %v5059_v27 = vsel %vm2531_vm11, %v12900_v50, 0.0 }
0x1710   :  { %5060 = vadd.xlane.f32.xlu0 %v5059_v27 }
0x175c   :  { %v5037_v16 = vpop.xlane.xlu0 %5036 }
0x175d   :  { %v5062_v20 = vmul.f32 0.03125, %v5037_v16 }
0x175e   :  { %v5040_v63 = vpop.xlane.xlu1 %5039 }
0x175f   :  { %v12905_v6 = vsub.f32 %v12860_v19, %v5062_v20  ;;  %v5063_v7 = vmul.f32 0.03125, %v5040_v63 }
0x1761   :  { %v12908_v21 = vsub.f32 %v12863_v52, %v5063_v7  ;;  %v5080_v48 = vmul.f32 %v12905_v6, %v12905_v6 }
0x1763   :  { %v5089_v23 = vsel %vm2531_vm11, %v5080_v48, 0.0  ;;  %v5081_v3 = vmul.f32 %v12908_v21, %v12908_v21 }
0x1764   :  { %v5043_v36 = vpop.xlane.xlu0 %5042  ;;  %5090 = vadd.xlane.f32.xlu1 %v5089_v23 }
0x1765   :  { %v5064_v37 = vmul.f32 0.03125, %v5043_v36  ;;  %v5092_v34 = vsel %vm2531_vm11, %v5081_v3, 0.0  ;;  %v12969_v36 = vld [vmem:[%s14157_s2 + $0xd] ss:$0 sm:$0xff] }
0x1766   :  { %v5046_v35 = vpop.xlane.xlu1 %5045  ;;  %5093 = vadd.xlane.f32.xlu0 %v5092_v34 }
0x1767   :  { %v12917_v53 = vsub.f32 %v12870_v22, %v5064_v37  ;;  %v5065_v39 = vmul.f32 0.03125, %v5046_v35 }
0x1769   :  { %v12920_v56 = vsub.f32 %v12873_v61, %v5065_v39  ;;  %v5082_v44 = vmul.f32 %v12917_v53, %v12917_v53 }
0x176b   :  { %v5095_v42 = vsel %vm2531_vm11, %v5082_v44, 0.0  ;;  %v5083_v0 = vmul.f32 %v12920_v56, %v12920_v56 }
0x176c   :  { %v5049_v47 = vpop.xlane.xlu0 %5048  ;;  %5096 = vadd.xlane.f32.xlu1 %v5095_v42 }
0x176d   :  { %v5066_v15 = vmul.f32 0.03125, %v5049_v47  ;;  %v5098_v49 = vsel %vm2531_vm11, %v5083_v0, 0.0  ;;  %v8246_v47 = vld [vmem:[%s14157_s2 + $0xe] ss:$0 sm:$0xff] }
0x176e   :  { %v5052_v5 = vpop.xlane.xlu1 %5051  ;;  %5099 = vadd.xlane.f32.xlu0 %v5098_v49 }
0x176f   :  { %v12929_v10 = vsub.f32 %v12880_v57, %v5066_v15  ;;  %v5067_v40 = vmul.f32 0.03125, %v5052_v5 }
0x1771   :  { %v12932_v30 = vsub.f32 %v12883_v8, %v5067_v40  ;;  %v5084_v17 = vmul.f32 %v12929_v10, %v12929_v10 }
0x1773   :  { %v5101_v43 = vsel %vm2531_vm11, %v5084_v17, 0.0  ;;  %v5085_v25 = vmul.f32 %v12932_v30, %v12932_v30 }
0x1774   :  { %5102 = vadd.xlane.f32.xlu1 %v5101_v43 }
0x1775   :  { %v5104_v13 = vsel %vm2531_vm11, %v5085_v25, 0.0 }
0x1776   :  { %5105 = vadd.xlane.f32.xlu0 %v5104_v13 }
0x1795   :  { %v5055_v26 = vpop.xlane.xlu0 %5054 }
0x1796   :  { %v5068_v11 = vmul.f32 0.03125, %v5055_v26 }
0x1797   :  { %v5058_v59 = vpop.xlane.xlu1 %5057 }
0x1798   :  { %v12949_v45 = vsub.f32 %v12890_v4, %v5068_v11  ;;  %v5069_v31 = vmul.f32 0.03125, %v5058_v59 }
0x179a   :  { %v12952_v38 = vsub.f32 %v12893_v9, %v5069_v31  ;;  %v5086_v14 = vmul.f32 %v12949_v45, %v12949_v45 }
0x179c   :  { %v5107_v18 = vsel %vm2531_vm11, %v5086_v14, 0.0  ;;  %v5087_v60 = vmul.f32 %v12952_v38, %v12952_v38 }
0x179d   :  { %5108 = vadd.xlane.f32.xlu1 %v5107_v18  ;;  %v5061_v2 = vpop.xlane.xlu0 %5060 }
0x179e   :  { %v5070_v58 = vmul.f32 0.03125, %v5061_v2  ;;  %v5110_v12 = vsel %vm2531_vm11, %v5087_v60, 0.0 }
0x179f   :  { %5111 = vadd.xlane.f32.xlu0 %v5110_v12 }
0x17a0   :  { %v12961_v55 = vsub.f32 %v12900_v50, %v5070_v58 }
0x17a2   :  { %v5088_v54 = vmul.f32 %v12961_v55, %v12961_v55 }
0x17a4   :  { %v5113_v41 = vsel %vm2531_vm11, %v5088_v54, 0.0 }
0x17a5   :  { %5114 = vadd.xlane.f32.xlu1 %v5113_v41 }
0x17f1   :  { %v5091_v24 = vpop.xlane.xlu1 %5090 }
0x17f2   :  { %v5116_v29 = vmul.f32 0.03125, %v5091_v24 }
0x17f3   :  { %v5094_v62 = vpop.xlane.xlu0 %5093 }
0x17f4   :  { %v5125_v33 = vadd.f32 1e-05, %v5116_v29  ;;  %v5117_v32 = vmul.f32 0.03125, %v5094_v62 }
0x17f6   :  { %10511 = vrsqrt.f32 %v5125_v33  ;;  %v5126_v27 = vadd.f32 1e-05, %v5117_v32 }
0x17f8   :  { %10513 = vrsqrt.f32 %v5126_v27 }
0x17f9   :  { %v5097_v16 = vpop.xlane.xlu1 %5096 }
0x17fa   :  { %v5118_v20 = vmul.f32 0.03125, %v5097_v16 }
0x17fb   :  { %v5100_v63 = vpop.xlane.xlu0 %5099 }
0x17fc   :  { %v5127_v7 = vadd.f32 1e-05, %v5118_v20  ;;  %v5119_v48 = vmul.f32 0.03125, %v5100_v63 }
0x17fe   :  { %10515 = vrsqrt.f32 %v5127_v7  ;;  %v5128_v23 = vadd.f32 1e-05, %v5119_v48 }
0x1800   :  { %v10512_v3 = vpop.eup %10511  ;;  %10517 = vrsqrt.f32 %v5128_v23 }
0x1801   :  { %v5143_v37 = vmul.f32 %v10512_v3, %v12905_v6  ;;  %v5103_v34 = vpop.xlane.xlu1 %5102 }
0x1802   :  { %v10514_v35 = vpop.eup %10513  ;;  %v5120_v39 = vmul.f32 0.03125, %v5103_v34 }
0x1803   :  { %v5156_v44 = vmul.f32 %v12969_v36, %v5143_v37  ;;  %v5144_v42 = vmul.f32 %v10514_v35, %v12908_v21  ;;  %v5106_v0 = vpop.xlane.xlu0 %5105 }
0x1804   :  { %v5129_v15 = vadd.f32 1e-05, %v5120_v39  ;;  %v5121_v49 = vmul.f32 0.03125, %v5106_v0 }
0x1805   :  { %v5157_v5 = vmul.f32 %v12969_v36, %v5144_v42  ;;  %v5169_v17 = vadd.f32 %v8246_v47, %v5156_v44 }
0x1806   :  { %10519 = vrsqrt.f32 %v5129_v15  ;;  %v5130_v40 = vadd.f32 1e-05, %v5121_v49 }
0x1807   :  { %v5170_v6 = vadd.f32 %v8246_v47, %v5157_v5 }
0x1808   :  { %v10516_v43 = vpop.eup %10515  ;;  %10521 = vrsqrt.f32 %v5130_v40 }
0x1809   :  { %v5182_v25 = vpack.c.bf16 %v5170_v6, %v5169_v17  ;;  %v5145_v13 = vmul.f32 %v10516_v43, %v12917_v53 }
0x180a   :  { %v10518_v46 = vpop.eup %10517 }
0x180b   :  { %v5158_v21 = vmul.f32 %v12969_v36, %v5145_v13  ;;  %v5146_v1 = vmul.f32 %v10518_v46, %v12920_v56  ;;  %9786 = vmatmul.mubr.msk.bf16.vlgmr.msra.gmra.mrb[92].mxu1 %vm2531_vm11, %v5182_v25 }
0x180c   :  { %9789 = vmatprep.mubr.msk.bf16.mxu1 %vm10779_vm5, %v10778_v51 }
0x180d   :  { %v5159_v26 = vmul.f32 %v12969_v36, %v5146_v1  ;;  %v5171_v11 = vadd.f32 %v8246_v47, %v5158_v21 }
0x180f   :  { %v5172_v59 = vadd.f32 %v8246_v47, %v5159_v26 }
0x1810   :  { %v10520_v31 = vpop.eup %10519 }
0x1811   :  { %v5183_v14 = vpack.c.bf16 %v5172_v59, %v5171_v11  ;;  %v5147_v18 = vmul.f32 %v10520_v31, %v12929_v10 }
0x1812   :  { %v10522_v60 = vpop.eup %10521 }
0x1813   :  { %v5160_v53 = vmul.f32 %v12969_v36, %v5147_v18  ;;  %v5148_v2 = vmul.f32 %v10522_v60, %v12932_v30  ;;  %9790 = vmatmul.mubr.msk.bf16.gmra.mrb[96].mxu1 %vm2531_vm11, %v5183_v14 }
0x1814   :  { %9793 = vmatprep.mubr.msk.bf16.mxu1 %vm10779_vm5, %v10778_v51 }
0x1815   :  { %v5161_v56 = vmul.f32 %v12969_v36, %v5148_v2  ;;  %v5173_v58 = vadd.f32 %v8246_v47, %v5160_v53 }
0x1817   :  { %v5174_v12 = vadd.f32 %v8246_v47, %v5161_v56 }
0x1819   :  { %v5184_v54 = vpack.c.bf16 %v5174_v12, %v5173_v58 }
0x181b   :  { %9794 = vmatmul.mubr.msk.bf16.gmra.mrb[100].mxu1 %vm2531_vm11, %v5184_v54 }
0x181c   :  { %9797 = vmatprep.mubr.msk.bf16.mxu1 %vm10779_vm5, %v10778_v51 }
0x182a   :  { %v5109_v10 = vpop.xlane.xlu1 %5108 }
0x182b   :  { %v5122_v41 = vmul.f32 0.03125, %v5109_v10 }
0x182c   :  { %v5112_v24 = vpop.xlane.xlu0 %5111 }
0x182d   :  { %v5131_v29 = vadd.f32 1e-05, %v5122_v41  ;;  %v5123_v30 = vmul.f32 0.03125, %v5112_v24 }
0x182f   :  { %10523 = vrsqrt.f32 %v5131_v29  ;;  %v5132_v62 = vadd.f32 1e-05, %v5123_v30 }
0x1831   :  { %10525 = vrsqrt.f32 %v5132_v62 }
0x1832   :  { %v5115_v33 = vpop.xlane.xlu1 %5114 }
0x1833   :  { %v5124_v32 = vmul.f32 0.03125, %v5115_v33 }
0x1835   :  { %v5133_v27 = vadd.f32 1e-05, %v5124_v32 }
0x1837   :  { %10527 = vrsqrt.f32 %v5133_v27 }
0x1839   :  { %v10524_v16 = vpop.eup %10523 }
0x183a   :  { %v5149_v20 = vmul.f32 %v10524_v16, %v12949_v45 }
0x183b   :  { %v10526_v63 = vpop.eup %10525 }
0x183c   :  { %v5162_v7 = vmul.f32 %v12969_v36, %v5149_v20  ;;  %v5150_v48 = vmul.f32 %v10526_v63, %v12952_v38  ;;  %v8247_v38 = vld [vmem:[%s14157_s2 + $0xf] ss:$0 sm:$0xff] }
0x183e   :  { %v5163_v23 = vmul.f32 %v12969_v36, %v5150_v48  ;;  %v5175_v3 = vadd.f32 %v8246_v47, %v5162_v7 }
0x1840   :  { %v5176_v37 = vadd.f32 %v8246_v47, %v5163_v23 }
0x1841   :  { %v10528_v34 = vpop.eup %10527 }
0x1842   :  { %v5185_v35 = vpack.c.bf16 %v5176_v37, %v5175_v3  ;;  %v5151_v39 = vmul.f32 %v10528_v34, %v12961_v55 }
0x1844   :  { %v5164_v44 = vmul.f32 %v12969_v36, %v5151_v39  ;;  %9798 = vmatmul.mubr.msk.bf16.gmra.mrb[104].mxu1 %vm2531_vm11, %v5185_v35 }
0x1845   :  { %9801 = vmatprep.mubr.msk.bf16.mxu1 %vm10779_vm5, %v10778_v51 }
0x1846   :  { %v5177_v45 = vadd.f32 %v8246_v47, %v5164_v44 }
0x1848   :  { %v5186_v42 = vpack.c.bf16 %v5177_v45, %v5177_v45 }
0x184c   :  { %9802 = vmatmul.mubr.msk.bf16.gmra.mrb[108].mxu1 %vm2531_vm11, %v5186_v42 }
0x184d   :  { %9845 = vmatprep.mubr.msk.bf16.mxu1 %vm10779_vm5, %v10778_v51 }
0x18de   :  { %v5253_v0 = vpop.f32.mrb[92].mxu1 }
0x18df   :  { %v9787_v55 = vpop.f32.mrb[93].mxu1  ;;  %v5254_v36 = vadd.f32 %v8247_v38, %v5253_v0 }
0x18e0   :  { %v5256_v15 = vpop.f32.mrb[94].mxu1 }
0x18e1   :  { %v5257_v49 = vadd.f32 %v8247_v38, %v5256_v15  ;;  %v9788_v5 = vpop.f32.mrb[95].mxu1 }
0x18e3   :  { %v13010_v40 = vpack.c.bf16 %v5257_v49, %v5254_v36 }
0x18e5   :  { %5305 = vrot.lane.b32.xlu0 %v13010_v40, %s10780_s24 }
0x18e6   :  { %v5261_v47 = vpop.f32.mrb[96].mxu1 }
0x18e7   :  { %v9791_v17 = vpop.f32.mrb[97].mxu1  ;;  %v5262_v43 = vadd.f32 %v8247_v38, %v5261_v47 }
0x18e8   :  { %v5264_v6 = vpop.f32.mrb[98].mxu1 }
0x18e9   :  { %v5265_v25 = vadd.f32 %v8247_v38, %v5264_v6  ;;  %v9792_v13 = vpop.f32.mrb[99].mxu1 }
0x18eb   :  { %v13014_v46 = vpack.c.bf16 %v5265_v25, %v5262_v43 }
0x18ed   :  { %5307 = vrot.lane.b32.xlu1 %v13014_v46, %s10780_s24 }
0x18ee   :  { %v5269_v21 = vpop.f32.mrb[100].mxu1 }
0x18ef   :  { %v9795_v1 = vpop.f32.mrb[101].mxu1  ;;  %v5270_v11 = vadd.f32 %v8247_v38, %v5269_v21 }
0x18f0   :  { %v5272_v26 = vpop.f32.mrb[102].mxu1 }
0x18f1   :  { %v5273_v59 = vadd.f32 %v8247_v38, %v5272_v26  ;;  %v9796_v31 = vpop.f32.mrb[103].mxu1 }
0x18f3   :  { %v13018_v14 = vpack.c.bf16 %v5273_v59, %v5270_v11 }
0x18f5   :  { %5309 = vrot.lane.b32.xlu1 %v13018_v14, %s10780_s24 }
0x1917   :  { %v5277_v18 = vpop.f32.mrb[104].mxu1 }
0x1918   :  { %v9799_v60 = vpop.f32.mrb[105].mxu1  ;;  %v5278_v2 = vadd.f32 %v8247_v38, %v5277_v18 }
0x1919   :  { %v5280_v53 = vpop.f32.mrb[106].mxu1 }
0x191a   :  { %v5281_v56 = vadd.f32 %v8247_v38, %v5280_v53  ;;  %v9800_v58 = vpop.f32.mrb[107].mxu1 }
0x191c   :  { %v13022_v12 = vpack.c.bf16 %v5281_v56, %v5278_v2 }
0x191e   :  { %5311 = vrot.lane.b32.xlu0 %v13022_v12, %s10780_s24 }
0x191f   :  { %v5285_v54 = vpop.f32.mrb[108].mxu1 }
0x1920   :  { %v5286_v10 = vadd.f32 %v8247_v38, %v5285_v54  ;;  %v9803_v41 = vpop.f32.mrb[109].mxu1 }
0x1921   :  { %v5288_v24 = vpop.f32.mrb[110].mxu1 }
0x1922   :  { %v13026_v29 = vpack.c.bf16 %v5286_v10, %v5286_v10  ;;  %5658 = vrot.lane.b32.xlu0 %v13010_v40, %s10781_s25  ;;  %v9804_v30 = vpop.f32.mrb[111].mxu1 }
0x1924   :  { %5313 = vrot.lane.b32.xlu1 %v13026_v29, %s10780_s24 }
0x1926   :  { %5662 = vrot.lane.b32.xlu0 %v13018_v14, %s10781_s25 }
0x1928   :  { %5660 = vrot.lane.b32.xlu1 %v13014_v46, %s10781_s25 }
0x192a   :  { %5666 = vrot.lane.b32.xlu0 %v13026_v29, %s10781_s25 }
0x192c   :  { %5664 = vrot.lane.b32.xlu1 %v13022_v12, %s10781_s25 }
0x192e   :  { %5650 = vrot.lane.b32.xlu0 %v13014_v46, %s10782_s26 }
0x1930   :  { %5648 = vrot.lane.b32.xlu1 %v13010_v40, %s10782_s26 }
0x1932   :  { %5654 = vrot.lane.b32.xlu0 %v13022_v12, %s10782_s26 }
0x1934   :  { %5652 = vrot.lane.b32.xlu1 %v13018_v14, %s10782_s26 }
0x1936   :  { %5541 = vrot.lane.b32.xlu0 %v13014_v46, %s10783_s4 }
0x1938   :  { %5656 = vrot.lane.b32.xlu1 %v13026_v29, %s10782_s26 }
0x193a   :  { %5545 = vrot.lane.b32.xlu0 %v13022_v12, %s10783_s4 }
0x193c   :  { %5539 = vrot.lane.b32.xlu1 %v13010_v40, %s10783_s4 }
0x193e   :  { %5892 = vrot.lane.b32.xlu0 %v13010_v40, %s10784_s27 }
0x1940   :  { %5543 = vrot.lane.b32.xlu1 %v13018_v14, %s10783_s4 }
0x1944   :  { %5547 = vrot.lane.b32.xlu1 %v13026_v29, %s10783_s4 }
0x1957   :  { %v5306_v62 = vpop.permute.xlu0 %5305 }
0x1958   :  { %v5331_v33 = vsel %vm2813_vm12, %v5306_v62, 0 }
0x1959   :  { %9806 = vmatpush3.bf16.xpose.msra.mxu0 %v5331_v33 }
0x195a   :  { %9807 = vmatprep.subr.bf16.mxu0 %v10778_v51 }
0x195f   :  { %v5308_v32 = vpop.permute.xlu1 %5307 }
0x1960   :  { %v5334_v27 = vsel %vm2813_vm12, %v5308_v32, 0 }
0x1961   :  { %9808 = vmatpush3.bf16.xpose.msra.mxu0 %v5334_v27 }
0x1962   :  { %9809 = vmatprep.subr.bf16.mxu0 %v10778_v51 }
0x1967   :  { %v5310_v16 = vpop.permute.xlu1 %5309 }
0x1968   :  { %v5337_v20 = vsel %vm2813_vm12, %v5310_v16, 0 }
0x1969   :  { %9810 = vmatpush3.bf16.xpose.msra.mxu0 %v5337_v20 }
0x196a   :  { %9811 = vmatprep.subr.bf16.mxu0 %v10778_v51 }
0x1990   :  { %v5312_v63 = vpop.permute.xlu0 %5311 }
0x1991   :  { %v5340_v7 = vsel %vm2813_vm12, %v5312_v63, 0 }
0x1992   :  { %9812 = vmatpush3.bf16.xpose.msra.mxu0 %v5340_v7 }
0x1993   :  { %9813 = vmatprep.subr.bf16.mxu0 %v10778_v51 }
0x1994   :  { %v5659_v48 = vpop.permute.xlu0 %5658 }
0x1995   :  { %v5684_v44 = vsel %vm2813_vm12, %v5659_v48, 0 }
0x1996   :  { %v5314_v23 = vpop.permute.xlu1 %5313 }
0x1997   :  { %v5343_v3 = vsel %vm2813_vm12, %v5314_v23, 0 }
0x1998   :  { %v5663_v37 = vpop.permute.xlu0 %5662 }
0x1999   :  { %v5690_v49 = vsel %vm2813_vm12, %v5663_v37, 0 }
0x199a   :  { %v5661_v34 = vpop.permute.xlu1 %5660  ;;  %9814 = vmatpush3.bf16.xpose.msra.mxu0 %v5343_v3 }
0x199b   :  { %9865 = vmatprep.subr.bf16.mxu0 %v10778_v51  ;;  %v5687_v0 = vsel %vm2813_vm12, %v5661_v34, 0 }
0x199c   :  { %v5667_v39 = vpop.permute.xlu0 %5666 }
0x199d   :  { %v5696_v13 = vsel %vm2813_vm12, %v5667_v39, 0 }
0x199e   :  { %v5665_v35 = vpop.permute.xlu1 %5664 }
0x199f   :  { %v5693_v17 = vsel %vm2813_vm12, %v5665_v35, 0 }
0x19a0   :  { %v5651_v42 = vpop.permute.xlu0 %5650 }
0x19a1   :  { %9816 = vmatmul.mubr.msk.bf16.vlgmr.msra.gmra.mrb[100].mxu0 %vm2813_vm12, %v13010_v40 }
0x19a2   :  { %v5649_v45 = vpop.permute.xlu1 %5648  ;;  %9866 = vmatpush3.bf16.xpose.msra.mxu0 %v5684_v44  ;;  %9819 = vmatprep.mubr.msk.bf16.mxu0 %vm10779_vm5, %v10778_v51 }
0x19a3   :  { %9867 = vmatprep.subr.bf16.mxu0 %v10778_v51 }
0x19a4   :  { %v5655_v15 = vpop.permute.xlu0 %5654 }
0x19a6   :  { %v5653_v38 = vpop.permute.xlu1 %5652 }
0x19a8   :  { %v5542_v5 = vpop.permute.xlu0 %5541 }
0x19a9   :  { %9820 = vmatmul.mubr.msk.bf16.gmra.mrb[104].mxu0 %vm2813_vm12, %v13014_v46 }
0x19aa   :  { %v5657_v55 = vpop.permute.xlu1 %5656  ;;  %9868 = vmatpush3.bf16.xpose.msra.mxu0 %v5687_v0  ;;  %9823 = vmatprep.mubr.msk.bf16.mxu0 %vm10779_vm5, %v10778_v51 }
0x19ab   :  { %9869 = vmatprep.subr.bf16.mxu0 %v10778_v51 }
0x19ac   :  { %v5546_v6 = vpop.permute.xlu0 %5545 }
0x19ae   :  { %v5540_v36 = vpop.permute.xlu1 %5539 }
0x19af   :  { %9836 = vmatpush3.bf16.msra.mxu1 %v5540_v36 }
0x19b0   :  { %9837 = vmatprep.subr.bf16.mxu1 %v10778_v51 }
0x19b1   :  { %9824 = vmatmul.mubr.msk.bf16.gmra.mrb[108].mxu0 %vm2813_vm12, %v13018_v14 }
0x19b2   :  { %9870 = vmatpush3.bf16.xpose.msra.mxu0 %v5690_v49  ;;  %9827 = vmatprep.mubr.msk.bf16.mxu0 %vm10779_vm5, %v10778_v51  ;;  %v5544_v47 = vpop.permute.xlu1 %5543 }
0x19b3   :  { %9838 = vmatpush3.bf16.msra.mxu1 %v5542_v5  ;;  %9871 = vmatprep.subr.bf16.mxu0 %v10778_v51 }
0x19b4   :  { %9839 = vmatprep.subr.bf16.mxu1 %v10778_v51 }
0x19b6   :  { %v5548_v43 = vpop.permute.xlu1 %5547 }
0x19b7   :  { %9840 = vmatpush3.bf16.msra.mxu1 %v5544_v47  ;;  %v5569_v25 = vsel %vm2444_vm9, %v5548_v43, 0 }
0x19b8   :  { %9841 = vmatprep.subr.bf16.mxu1 %v10778_v51 }
0x19b9   :  { %9828 = vmatmul.mubr.msk.bf16.gmra.mrb[112].mxu0 %vm2813_vm12, %v13022_v12 }
0x19ba   :  { %9872 = vmatpush3.bf16.xpose.msra.mxu0 %v5693_v17  ;;  %9831 = vmatprep.mubr.msk.bf16.mxu0 %vm10779_vm5, %v10778_v51 }
0x19bb   :  { %9842 = vmatpush3.bf16.msra.mxu1 %v5546_v6  ;;  %9873 = vmatprep.subr.bf16.mxu0 %v10778_v51 }
0x19bc   :  { %9843 = vmatprep.subr.bf16.mxu1 %v10778_v51 }
0x19bf   :  { %9844 = vmatpush3.bf16.msra.mxu1 %v5569_v25 }
0x19c0   :  { %9895 = vmatprep.subr.bf16.mxu1 %v10778_v51 }
0x19c1   :  { %9832 = vmatmul.mubr.msk.bf16.gmra.mrb[116].mxu0 %vm2813_vm12, %v13026_v29 }
0x19c2   :  { %9874 = vmatpush3.bf16.xpose.msra.mxu0 %v5696_v13  ;;  %9875 = vmatprep.mubr.msk.bf16.mxu0 %vm10779_vm5, %v10778_v51 }
0x19c3   :  { %9925 = vmatprep.subr.bf16.mxu0 %v10778_v51 }
0x19c9   :  { %9876 = vmatmul.mubr.msk.bf16.vlgmr.msra.gmra.mrb[120].mxu0 %vm2813_vm12, %v5649_v45 }
0x19ca   :  { %9879 = vmatprep.mubr.msk.bf16.mxu0 %vm10779_vm5, %v10778_v51 }
0x19d1   :  { %9880 = vmatmul.mubr.msk.bf16.gmra.mrb[124].mxu0 %vm2813_vm12, %v5651_v42 }
0x19d2   :  { %9883 = vmatprep.mubr.msk.bf16.mxu0 %vm10779_vm5, %v10778_v51 }
0x19d9   :  { %9884 = vmatmul.mubr.msk.bf16.gmra.mrb[128].mxu0 %vm2813_vm12, %v5653_v38 }
0x19da   :  { %9887 = vmatprep.mubr.msk.bf16.mxu0 %vm10779_vm5, %v10778_v51 }
0x19e1   :  { %9888 = vmatmul.mubr.msk.bf16.gmra.mrb[132].mxu0 %vm2813_vm12, %v5655_v15 }
0x19e2   :  { %9891 = vmatprep.mubr.msk.bf16.mxu0 %vm10779_vm5, %v10778_v51 }
0x19e9   :  { %9892 = vmatmul.mubr.msk.bf16.gmra.mrb[136].mxu0 %vm2813_vm12, %v5657_v55 }
0x19ea   :  { %9927 = vmatprep.mubr.msk.bf16.mxu0 %vm10779_vm5, %v10778_v51 }
0x1a74   :  { %v5379_v21 = vpop.f32.mrb[100].mxu0 }
0x1a75   :  { %v13123_v1 = vmul.f32 0.35355338, %v5379_v21  ;;  %v9817_v26 = vpop.f32.mrb[101].mxu0 }
0x1a76   :  { %v5382_v11 = vpop.f32.mrb[102].mxu0 }
0x1a77   :  { %v13125_v59 = vmul.f32 0.35355338, %v5382_v11  ;;  %v9818_v31 = vpop.f32.mrb[103].mxu0  ;;  %v5426_v18 = vsel %vm2925_vm13, %v13123_v1, -inf }
0x1a78   :  { %5427 = vmax.xlane.f32.xlu0 %v5426_v18 }
0x1a79   :  { %v5429_v60 = vsel %vm2925_vm13, %v13125_v59, -inf }
0x1a7a   :  { %5430 = vmax.xlane.f32.xlu1 %v5429_v60 }
0x1a7c   :  { %v5387_v53 = vpop.f32.mrb[104].mxu0 }
0x1a7d   :  { %v13131_v2 = vmul.f32 0.35355338, %v5387_v53  ;;  %v9821_v56 = vpop.f32.mrb[105].mxu0 }
0x1a7e   :  { %v5390_v58 = vpop.f32.mrb[106].mxu0 }
0x1a7f   :  { %v13133_v54 = vmul.f32 0.35355338, %v5390_v58  ;;  %v9822_v10 = vpop.f32.mrb[107].mxu0  ;;  %v5432_v41 = vsel %vm2925_vm13, %v13131_v2, -inf }
0x1a80   :  { %5433 = vmax.xlane.f32.xlu0 %v5432_v41 }
0x1a81   :  { %v5435_v24 = vsel %vm2925_vm13, %v13133_v54, -inf }
0x1a84   :  { %5436 = vmax.xlane.f32.xlu0 %v5435_v24  ;;  %v5395_v30 = vpop.f32.mrb[108].mxu0 }
0x1a85   :  { %v13139_v62 = vmul.f32 0.35355338, %v5395_v30  ;;  %v9825_v33 = vpop.f32.mrb[109].mxu0 }
0x1a86   :  { %v5398_v32 = vpop.f32.mrb[110].mxu0 }
0x1a87   :  { %v13141_v27 = vmul.f32 0.35355338, %v5398_v32  ;;  %v9826_v16 = vpop.f32.mrb[111].mxu0  ;;  %v5438_v20 = vsel %vm2925_vm13, %v13139_v62, -inf }
0x1a88   :  { %5439 = vmax.xlane.f32.xlu1 %v5438_v20 }
0x1a89   :  { %v5441_v63 = vsel %vm2925_vm13, %v13141_v27, -inf }
0x1a8a   :  { %5442 = vmax.xlane.f32.xlu0 %v5441_v63 }
0x1a8c   :  { %v5403_v7 = vpop.f32.mrb[112].mxu0 }
0x1a8d   :  { %v13147_v48 = vmul.f32 0.35355338, %v5403_v7  ;;  %v9829_v23 = vpop.f32.mrb[113].mxu0 }
0x1a8e   :  { %v5406_v3 = vpop.f32.mrb[114].mxu0 }
0x1a8f   :  { %v13149_v37 = vmul.f32 0.35355338, %v5406_v3  ;;  %v9830_v34 = vpop.f32.mrb[115].mxu0  ;;  %v5444_v35 = vsel %vm2925_vm13, %v13147_v48, -inf }
0x1a90   :  { %5445 = vmax.xlane.f32.xlu1 %v5444_v35 }
0x1a91   :  { %v5447_v39 = vsel %vm2925_vm13, %v13149_v37, -inf }
0x1a92   :  { %5448 = vmax.xlane.f32.xlu0 %v5447_v39 }
0x1a94   :  { %v5411_v44 = vpop.f32.mrb[116].mxu0 }
0x1a95   :  { %v13155_v45 = vmul.f32 0.35355338, %v5411_v44  ;;  %v9833_v42 = vpop.f32.mrb[117].mxu0 }
0x1a96   :  { %v5414_v38 = vpop.f32.mrb[118].mxu0 }
0x1a97   :  { %v9834_v0 = vpop.f32.mrb[119].mxu0  ;;  %v5450_v55 = vsel %vm2925_vm13, %v13155_v45, -inf }
0x1a98   :  { %5451 = vmax.xlane.f32.xlu1 %v5450_v55  ;;  %v13199_v55 = vpop.permute.xlu0 %5892 }
0x1a9c   :  { %v5732_v15 = vpop.f32.mrb[120].mxu0 }
0x1a9d   :  { %v13159_v36 = vmul.f32 0.35355338, %v5732_v15  ;;  %v9877_v49 = vpop.f32.mrb[121].mxu0 }
0x1a9e   :  { %v5735_v5 = vpop.f32.mrb[122].mxu0 }
0x1a9f   :  { %v13161_v47 = vmul.f32 0.35355338, %v5735_v5  ;;  %v9878_v17 = vpop.f32.mrb[123].mxu0  ;;  %v5779_v6 = vsel %vm2925_vm13, %v13159_v36, -inf }
0x1aa0   :  { %5780 = vmax.xlane.f32.xlu0 %v5779_v6 }
0x1aa1   :  { %v5782_v43 = vsel %vm2925_vm13, %v13161_v47, -inf }
0x1aa2   :  { %5783 = vmax.xlane.f32.xlu1 %v5782_v43 }
0x1aa4   :  { %v5740_v25 = vpop.f32.mrb[124].mxu0 }
0x1aa5   :  { %v13167_v13 = vmul.f32 0.35355338, %v5740_v25  ;;  %v9881_v21 = vpop.f32.mrb[125].mxu0 }
0x1aa6   :  { %v5743_v26 = vpop.f32.mrb[126].mxu0 }
0x1aa7   :  { %v13169_v11 = vmul.f32 0.35355338, %v5743_v26  ;;  %v9882_v31 = vpop.f32.mrb[127].mxu0  ;;  %v5785_v18 = vsel %vm2925_vm13, %v13167_v13, -inf }
0x1aa8   :  { %5786 = vmax.xlane.f32.xlu0 %v5785_v18 }
0x1aa9   :  { %v5788_v60 = vsel %vm2925_vm13, %v13169_v11, -inf }
0x1aaa   :  { %5789 = vmax.xlane.f32.xlu1 %v5788_v60 }
0x1aac   :  { %v5748_v53 = vpop.f32.mrb[128].mxu0 }
0x1aad   :  { %v13175_v56 = vmul.f32 0.35355338, %v5748_v53  ;;  %v9885_v58 = vpop.f32.mrb[129].mxu0 }
0x1aae   :  { %v5751_v10 = vpop.f32.mrb[130].mxu0 }
0x1aaf   :  { %v13177_v41 = vmul.f32 0.35355338, %v5751_v10  ;;  %v9886_v24 = vpop.f32.mrb[131].mxu0  ;;  %v5791_v30 = vsel %vm2925_vm13, %v13175_v56, -inf  ;;  %v13205_v10 = vld [vmem:[#allocation2] sm:$0xff] }
0x1ab0   :  { %5792 = vmax.xlane.f32.xlu0 %v5791_v30 }
0x1ab1   :  { %v5794_v33 = vsel %vm2925_vm13, %v13177_v41, -inf }
0x1ab2   :  { %5795 = vmax.xlane.f32.xlu1 %v5794_v33  ;;  %v13213_v33 = vld [vmem:[#allocation2 + $0x8] sm:$0xff] }
0x1ab4   :  { %v5756_v32 = vpop.f32.mrb[132].mxu0 }
0x1ab5   :  { %v13183_v16 = vmul.f32 0.35355338, %v5756_v32  ;;  %v9889_v20 = vpop.f32.mrb[133].mxu0 }
0x1ab6   :  { %v5759_v63 = vpop.f32.mrb[134].mxu0 }
0x1ab7   :  { %v13185_v7 = vmul.f32 0.35355338, %v5759_v63  ;;  %v9890_v23 = vpop.f32.mrb[135].mxu0  ;;  %v5797_v3 = vsel %vm2925_vm13, %v13183_v16, -inf }
0x1ab8   :  { %5798 = vmax.xlane.f32.xlu0 %v5797_v3 }
0x1ab9   :  { %v5800_v34 = vsel %vm2925_vm13, %v13185_v7, -inf }
0x1aba   :  { %5801 = vmax.xlane.f32.xlu1 %v5800_v34  ;;  %v13221_v34 = vld [vmem:[#allocation2 + $0x10] sm:$0xff] }
0x1abc   :  { %v5764_v35 = vpop.f32.mrb[136].mxu0 }
0x1abd   :  { %v9893_v39 = vpop.f32.mrb[137].mxu0  ;;  %v13195_v38 = vmul.f32 0.35355338, %v5764_v35 }
0x1abe   :  { %v5767_v44 = vpop.f32.mrb[138].mxu0 }
0x1abf   :  { %v9894_v42 = vpop.f32.mrb[139].mxu0  ;;  %v5803_v0 = vsel %vm2925_vm13, %v13195_v38, -inf }
0x1acb   :  { %5896 = vrot.lane.b32.xlu1 %v13018_v14, %s10784_s27 }
0x1ace   :  { %5894 = vrot.lane.b32.xlu0 %v13014_v46, %s10784_s27 }
0x1aed   :  { %5804 = vmax.xlane.f32.xlu0 %v5803_v0 }
0x1b05   :  { %v5428_v15 = vpop.xlane.xlu0 %5427 }
0x1b06   :  { %v5453_v49 = vsub.f32 %v13123_v1, %v5428_v15 }
0x1b07   :  { %v5431_v5 = vpop.xlane.xlu1 %5430 }
0x1b08   :  { %v5462_v17 = vmul.f32 1.442695, %v5453_v49  ;;  %v5454_v6 = vsub.f32 %v13125_v59, %v5431_v5  ;;  %v13230_v49 = vld [vmem:[#allocation2 + $0x18] sm:$0xff] }
0x1b0a   :  { %10529 = vpow2.f32 %v5462_v17  ;;  %v5464_v43 = vmul.f32 1.442695, %v5454_v6 }
0x1b0c   :  { %10531 = vpow2.f32 %v5464_v43 }
0x1b0d   :  { %v5434_v25 = vpop.xlane.xlu0 %5433 }
0x1b0e   :  { %v5455_v21 = vsub.f32 %v13131_v2, %v5434_v25  ;;  %v13237_v25 = vld [vmem:[#allocation2 + $0x20] sm:$0xff] }
0x1b10   :  { %v5466_v26 = vmul.f32 1.442695, %v5455_v21 }
0x1b11   :  { %v5437_v31 = vpop.xlane.xlu0 %5436 }
0x1b12   :  { %10533 = vpow2.f32 %v5466_v26  ;;  %v5456_v18 = vsub.f32 %v13133_v54, %v5437_v31 }
0x1b14   :  { %v10530_v60 = vpop.eup %10529  ;;  %v5468_v53 = vmul.f32 1.442695, %v5456_v18  ;;  %v13245_v18 = vld [vmem:[#allocation2 + $0x28] sm:$0xff] }
0x1b15   :  { %v5440_v58 = vpop.xlane.xlu1 %5439  ;;  %v13208_v1 = vmul.f32 %v13205_v10, %v10530_v60 }
0x1b16   :  { %v10532_v59 = vpop.eup %10531  ;;  %10535 = vpow2.f32 %v5468_v53  ;;  %v5457_v24 = vsub.f32 %v13139_v62, %v5440_v58 }
0x1b17   :  { %v5443_v30 = vpop.xlane.xlu0 %5442  ;;  %v5489_v2 = vsel %vm2925_vm13, %v13208_v1, 0.0  ;;  %v13216_v54 = vmul.f32 %v13213_v33, %v10532_v59 }
0x1b18   :  { %v5470_v32 = vmul.f32 1.442695, %v5457_v24  ;;  %v5458_v20 = vsub.f32 %v13141_v27, %v5443_v30  ;;  %5490 = vadd.xlane.f32.xlu1 %v5489_v2  ;;  %v13252_v30 = vld [vmem:[#allocation2 + $0x30] sm:$0xff] }
0x1b19   :  { %v5492_v63 = vsel %vm2925_vm13, %v13216_v54, 0.0 }
0x1b1a   :  { %10537 = vpow2.f32 %v5470_v32  ;;  %v5472_v23 = vmul.f32 1.442695, %v5458_v20  ;;  %5493 = vadd.xlane.f32.xlu0 %v5492_v63 }
0x1b1c   :  { %v10534_v62 = vpop.eup %10533  ;;  %10539 = vpow2.f32 %v5472_v23  ;;  %v13260_v23 = vld [vmem:[#allocation2 + $0x38] sm:$0xff] }
0x1b1d   :  { %v5446_v3 = vpop.xlane.xlu1 %5445  ;;  %v13224_v35 = vmul.f32 %v13221_v34, %v10534_v62 }
0x1b1e   :  { %v5459_v39 = vsub.f32 %v13147_v48, %v5446_v3 }
0x1b1f   :  { %v5449_v44 = vpop.xlane.xlu0 %5448  ;;  %v5495_v27 = vsel %vm2925_vm13, %v13224_v35, 0.0 }
0x1b20   :  { %v10536_v42 = vpop.eup %10535  ;;  %v5474_v0 = vmul.f32 1.442695, %v5459_v39  ;;  %v5460_v15 = vsub.f32 %v13149_v37, %v5449_v44  ;;  %5496 = vadd.xlane.f32.xlu1 %v5495_v27 }
0x1b21   :  { %v13233_v5 = vmul.f32 %v13230_v49, %v10536_v42 }
0x1b22   :  { %10541 = vpow2.f32 %v5474_v0  ;;  %v5476_v17 = vmul.f32 1.442695, %v5460_v15  ;;  %v13268_v0 = vld [vmem:[#allocation2 + $0x40] sm:$0xff] }
0x1b23   :  { %v5498_v6 = vsel %vm2925_vm13, %v13233_v5, 0.0 }
0x1b24   :  { %v10538_v48 = vpop.eup %10537  ;;  %10543 = vpow2.f32 %v5476_v17  ;;  %5499 = vadd.xlane.f32.xlu0 %v5498_v6 }
0x1b25   :  { %v5452_v43 = vpop.xlane.xlu1 %5451  ;;  %v13240_v21 = vmul.f32 %v13237_v25, %v10538_v48 }
0x1b26   :  { %v10540_v37 = vpop.eup %10539  ;;  %v5461_v26 = vsub.f32 %v13155_v45, %v5452_v43 }
0x1b27   :  { %v5501_v31 = vsel %vm2925_vm13, %v13240_v21, 0.0  ;;  %v13248_v60 = vmul.f32 %v13245_v18, %v10540_v37 }
0x1b28   :  { %v5478_v53 = vmul.f32 1.442695, %v5461_v26  ;;  %5502 = vadd.xlane.f32.xlu1 %v5501_v31 }
0x1b29   :  { %v5504_v58 = vsel %vm2925_vm13, %v13248_v60, 0.0 }
0x1b2a   :  { %10545 = vpow2.f32 %v5478_v53  ;;  %5505 = vadd.xlane.f32.xlu0 %v5504_v58 }
0x1b2c   :  { %v10542_v59 = vpop.eup %10541 }
0x1b2d   :  { %v5781_v24 = vpop.xlane.xlu0 %5780  ;;  %v13255_v45 = vmul.f32 %v13252_v30, %v10542_v59 }
0x1b2e   :  { %v10544_v2 = vpop.eup %10543  ;;  %v5806_v32 = vsub.f32 %v13159_v36, %v5781_v24 }
0x1b2f   :  { %v5784_v20 = vpop.xlane.xlu1 %5783  ;;  %v5507_v63 = vsel %vm2925_vm13, %v13255_v45, 0.0  ;;  %v13263_v62 = vmul.f32 %v13260_v23, %v10544_v2 }
0x1b30   :  { %v5815_v3 = vmul.f32 1.442695, %v5806_v32  ;;  %v5807_v39 = vsub.f32 %v13161_v47, %v5784_v20  ;;  %5508 = vadd.xlane.f32.xlu1 %v5507_v63 }
0x1b31   :  { %v5510_v44 = vsel %vm2925_vm13, %v13263_v62, 0.0 }
0x1b32   :  { %10547 = vpow2.f32 %v5815_v3  ;;  %v5817_v27 = vmul.f32 1.442695, %v5807_v39  ;;  %5511 = vadd.xlane.f32.xlu0 %v5510_v44 }
0x1b34   :  { %v10546_v36 = vpop.eup %10545  ;;  %10549 = vpow2.f32 %v5817_v27 }
0x1b35   :  { %v5787_v42 = vpop.xlane.xlu0 %5786  ;;  %v13271_v15 = vmul.f32 %v13268_v0, %v10546_v36 }
0x1b36   :  { %v5808_v17 = vsub.f32 %v13167_v13, %v5787_v42 }
0x1b37   :  { %v5790_v6 = vpop.xlane.xlu1 %5789  ;;  %v5513_v47 = vsel %vm2925_vm13, %v13271_v15, 0.0 }
0x1b38   :  { %v5819_v48 = vmul.f32 1.442695, %v5808_v17  ;;  %v5809_v43 = vsub.f32 %v13169_v11, %v5790_v6  ;;  %5514 = vadd.xlane.f32.xlu0 %v5513_v47 }
0x1b3a   :  { %10551 = vpow2.f32 %v5819_v48  ;;  %v5821_v37 = vmul.f32 1.442695, %v5809_v43 }
0x1b3c   :  { %v10548_v26 = vpop.eup %10547  ;;  %10553 = vpow2.f32 %v5821_v37 }
0x1b3d   :  { %v5793_v31 = vpop.xlane.xlu0 %5792  ;;  %v13278_v53 = vmul.f32 %v13205_v10, %v10548_v26 }
0x1b3e   :  { %v10550_v58 = vpop.eup %10549  ;;  %v5810_v59 = vsub.f32 %v13175_v56, %v5793_v31 }
0x1b3f   :  { %v5796_v13 = vpop.xlane.xlu1 %5795  ;;  %v5842_v24 = vsel %vm2925_vm13, %v13278_v53, 0.0  ;;  %v13284_v2 = vmul.f32 %v13213_v33, %v10550_v58 }
0x1b40   :  { %v5823_v11 = vmul.f32 1.442695, %v5810_v59  ;;  %v5811_v32 = vsub.f32 %v13177_v41, %v5796_v13  ;;  %5843 = vadd.xlane.f32.xlu0 %v5842_v24 }
0x1b41   :  { %v5845_v63 = vsel %vm2925_vm13, %v13284_v2, 0.0 }
0x1b42   :  { %10555 = vpow2.f32 %v5823_v11  ;;  %v5825_v20 = vmul.f32 1.442695, %v5811_v32 }
0x1b44   :  { %v10552_v3 = vpop.eup %10551  ;;  %10557 = vpow2.f32 %v5825_v20  ;;  %5846 = vadd.xlane.f32.xlu0 %v5845_v63 }
0x1b45   :  { %v5799_v56 = vpop.xlane.xlu0 %5798  ;;  %v13290_v39 = vmul.f32 %v13221_v34, %v10552_v3 }
0x1b46   :  { %v10554_v44 = vpop.eup %10553  ;;  %v5812_v27 = vsub.f32 %v13183_v16, %v5799_v56 }
0x1b47   :  { %v5848_v36 = vsel %vm2925_vm13, %v13290_v39, 0.0  ;;  %v13296_v41 = vmul.f32 %v13230_v49, %v10554_v44  ;;  %v5802_v59 = vpop.xlane.xlu1 %5801 }
0x1b48   :  { %v5827_v42 = vmul.f32 1.442695, %v5812_v27  ;;  %5849 = vadd.xlane.f32.xlu0 %v5848_v36  ;;  %v5813_v13 = vsub.f32 %v13185_v7, %v5802_v59 }
0x1b49   :  { %v5851_v17 = vsel %vm2925_vm13, %v13296_v41, 0.0  ;;  %v5895_v11 = vpop.permute.xlu0 %5894 }
0x1b4a   :  { %10559 = vpow2.f32 %v5827_v42  ;;  %5852 = vadd.xlane.f32.xlu1 %v5851_v17  ;;  %v5829_v24 = vmul.f32 1.442695, %v5813_v13 }
0x1b4c   :  { %v10556_v6 = vpop.eup %10555  ;;  %10561 = vpow2.f32 %v5829_v24 }
0x1b4d   :  { %v13301_v47 = vmul.f32 %v13237_v25, %v10556_v6 }
0x1b4e   :  { %v10558_v48 = vpop.eup %10557 }
0x1b4f   :  { %v5854_v16 = vsel %vm2925_vm13, %v13301_v47, 0.0  ;;  %v13306_v43 = vmul.f32 %v13245_v18, %v10558_v48 }
0x1b50   :  { %5855 = vadd.xlane.f32.xlu0 %v5854_v16 }
0x1b51   :  { %v5857_v37 = vsel %vm2925_vm13, %v13306_v43, 0.0 }
0x1b52   :  { %5858 = vadd.xlane.f32.xlu1 %v5857_v37 }
0x1b54   :  { %v10560_v26 = vpop.eup %10559 }
0x1b55   :  { %v13311_v31 = vmul.f32 %v13252_v30, %v10560_v26 }
0x1b56   :  { %v10562_v3 = vpop.eup %10561 }
0x1b57   :  { %v5860_v58 = vsel %vm2925_vm13, %v13311_v31, 0.0  ;;  %v13322_v56 = vmul.f32 %v13260_v23, %v10562_v3 }
0x1b58   :  { %5861 = vadd.xlane.f32.xlu0 %v5860_v58 }
0x1b59   :  { %v5863_v44 = vsel %vm2925_vm13, %v13322_v56, 0.0 }
0x1b63   :  { %5898 = vrot.lane.b32.xlu1 %v13022_v12, %s10784_s27 }
0x1b6e   :  { %5900 = vrot.lane.b32.xlu0 %v13026_v29, %s10784_s27 }
0x1b7a   :  { %v5805_v32 = vpop.xlane.xlu0 %5804 }
0x1b7b   :  { %v5814_v20 = vsub.f32 %v13195_v38, %v5805_v32  ;;  %v5897_v38 = vpop.permute.xlu1 %5896 }
0x1b7d   :  { %v5831_v63 = vmul.f32 1.442695, %v5814_v20 }
0x1b7f   :  { %10563 = vpow2.f32 %v5831_v63 }
0x1b87   :  { %5864 = vadd.xlane.f32.xlu1 %v5863_v44 }
0x1b89   :  { %v10564_v7 = vpop.eup %10563 }
0x1b8a   :  { %v13327_v27 = vmul.f32 %v13268_v0, %v10564_v7 }
0x1b8c   :  { %v5866_v36 = vsel %vm2925_vm13, %v13327_v27, 0.0 }
0x1b8d   :  { %5867 = vadd.xlane.f32.xlu0 %v5866_v36 }
0x1b98   :  { %6191 = vrot.lane.b32.xlu1 %v13010_v40, %s10785_s28 }
0x1b9c   :  { %6193 = vrot.lane.b32.xlu1 %v13014_v46, %s10785_s28 }
0x1ba0   :  { %6197 = vrot.lane.b32.xlu1 %v13022_v12, %s10785_s28 }
0x1ba3   :  { %6195 = vrot.lane.b32.xlu0 %v13018_v14, %s10785_s28 }
0x1ba4   :  { %6199 = vrot.lane.b32.xlu1 %v13026_v29, %s10785_s28 }
0x1ba5   :  { %v5491_v42 = vpop.xlane.xlu1 %5490 }
0x1ba6   :  { %10565 = vrcp.f32 %v5491_v42 }
0x1ba7   :  { %6187 = vrot.lane.b32.xlu0 %v13022_v12, %s10786_s0  ;;  %v5494_v17 = vpop.xlane.xlu0 %5493 }
0x1ba8   :  { %10567 = vrcp.f32 %v5494_v17  ;;  %6181 = vrot.lane.b32.xlu1 %v13010_v40, %s10786_s0 }
0x1bab   :  { %6425 = vrot.lane.b32.xlu0 %v13010_v40, %s10787_s29 }
0x1bac   :  { %6183 = vrot.lane.b32.xlu1 %v13014_v46, %s10786_s0 }
0x1bad   :  { %v5497_v6 = vpop.xlane.xlu1 %5496 }
0x1bae   :  { %10569 = vrcp.f32 %v5497_v6 }
0x1baf   :  { %6429 = vrot.lane.b32.xlu0 %v13018_v14, %s10787_s29 }
0x1bb0   :  { %v10566_v48 = vpop.eup %10565  ;;  %6185 = vrot.lane.b32.xlu1 %v13018_v14, %s10786_s0 }
0x1bb1   :  { %v5500_v16 = vpop.xlane.xlu0 %5499  ;;  %v5525_v26 = vmul.f32 %v10566_v48, %v13208_v1 }
0x1bb2   :  { %v10568_v37 = vpop.eup %10567  ;;  %10571 = vrcp.f32 %v5500_v16 }
0x1bb3   :  { %v5526_v58 = vmul.f32 %v10568_v37, %v13216_v54  ;;  %6431 = vrot.lane.b32.xlu0 %v13022_v12, %s10787_s29 }
0x1bb4   :  { %6189 = vrot.lane.b32.xlu1 %v13026_v29, %s10786_s0 }
0x1bb5   :  { %v5534_v59 = vpack.c.bf16 %v5526_v58, %v5525_v26  ;;  %v5503_v13 = vpop.xlane.xlu1 %5502 }
0x1bb6   :  { %10573 = vrcp.f32 %v5503_v13 }
0x1bb7   :  { %9846 = vmatmul.mubr.msk.bf16.vlgmr.msra.gmra.mrb[112].mxu1 %vm2925_vm13, %v5534_v59  ;;  %v5506_v24 = vpop.xlane.xlu0 %5505 }
0x1bb8   :  { %9896 = vmatpush3.bf16.msra.mxu1 %v13199_v55  ;;  %10575 = vrcp.f32 %v5506_v24  ;;  %6427 = vrot.lane.b32.xlu1 %v13014_v46, %s10787_s29  ;;  %v10570_v1 = vpop.eup %10569 }
0x1bb9   :  { %9897 = vmatprep.subr.bf16.mxu1 %v10778_v51  ;;  %9849 = vmatprep.mubr.msk.bf16.mxu1 %vm10779_vm5, %v10778_v51  ;;  %v5527_v32 = vmul.f32 %v10570_v1, %v13224_v35 }
0x1bbc   :  { %v10572_v54 = vpop.eup %10571  ;;  %9898 = vmatpush3.bf16.msra.mxu1 %v5895_v11 }
0x1bbd   :  { %v5528_v20 = vmul.f32 %v10572_v54, %v13233_v5  ;;  %v5509_v63 = vpop.xlane.xlu1 %5508  ;;  %9899 = vmatprep.subr.bf16.mxu1 %v10778_v51 }
0x1bbe   :  { %10577 = vrcp.f32 %v5509_v63 }
0x1bbf   :  { %v5535_v55 = vpack.c.bf16 %v5528_v20, %v5527_v32  ;;  %v5512_v3 = vpop.xlane.xlu0 %5511 }
0x1bc0   :  { %9900 = vmatpush3.bf16.msra.mxu1 %v5897_v38  ;;  %10579 = vrcp.f32 %v5512_v3  ;;  %v10574_v44 = vpop.eup %10573 }
0x1bc1   :  { %9850 = vmatmul.mubr.msk.bf16.gmra.mrb[116].mxu1 %vm2925_vm13, %v5535_v55  ;;  %9901 = vmatprep.subr.bf16.mxu1 %v10778_v51  ;;  %v5529_v5 = vmul.f32 %v10574_v44, %v13240_v21 }
0x1bc2   :  { %v10576_v7 = vpop.eup %10575  ;;  %9853 = vmatprep.mubr.msk.bf16.mxu1 %vm10779_vm5, %v10778_v51 }
0x1bc3   :  { %v5530_v35 = vmul.f32 %v10576_v7, %v13248_v60 }
0x1bc5   :  { %v5515_v11 = vpop.xlane.xlu0 %5514  ;;  %v5536_v36 = vpack.c.bf16 %v5530_v35, %v5529_v5 }
0x1bc6   :  { %10581 = vrcp.f32 %v5515_v11 }
0x1bc8   :  { %v10578_v42 = vpop.eup %10577 }
0x1bc9   :  { %9854 = vmatmul.mubr.msk.bf16.gmra.mrb[120].mxu1 %vm2925_vm13, %v5536_v36  ;;  %v5531_v6 = vmul.f32 %v10578_v42, %v13255_v45 }
0x1bca   :  { %v10580_v38 = vpop.eup %10579  ;;  %9857 = vmatprep.mubr.msk.bf16.mxu1 %vm10779_vm5, %v10778_v51 }
0x1bcb   :  { %v5532_v17 = vmul.f32 %v10580_v38, %v13263_v62 }
0x1bcd   :  { %v5537_v48 = vpack.c.bf16 %v5532_v17, %v5531_v6  ;;  %v5844_v37 = vpop.xlane.xlu0 %5843 }
0x1bd0   :  { %v10582_v16 = vpop.eup %10581 }
0x1bd1   :  { %9858 = vmatmul.mubr.msk.bf16.gmra.mrb[124].mxu1 %vm2925_vm13, %v5537_v48  ;;  %v5533_v21 = vmul.f32 %v10582_v16, %v13271_v15  ;;  %v5847_v26 = vpop.xlane.xlu0 %5846 }
0x1bd2   :  { %9861 = vmatprep.mubr.msk.bf16.mxu1 %vm10779_vm5, %v10778_v51  ;;  %10583 = vrcp.f32 %v5847_v26 }
0x1bd3   :  { %v5538_v60 = vpack.c.bf16 %v5533_v21, %v5533_v21  ;;  %10585 = vrcp.f32 %v5844_v37 }
0x1bd5   :  { %v5850_v45 = vpop.xlane.xlu0 %5849 }
0x1bd7   :  { %v5853_v62 = vpop.xlane.xlu1 %5852 }
0x1bd8   :  { %10587 = vrcp.f32 %v5853_v62 }
0x1bd9   :  { %9862 = vmatmul.mubr.msk.bf16.gmra.mrb[128].mxu1 %vm2925_vm13, %v5538_v60  ;;  %10589 = vrcp.f32 %v5850_v45 }
0x1bda   :  { %9905 = vmatprep.mubr.msk.bf16.mxu1 %vm10779_vm5, %v10778_v51 }
0x1bdc   :  { %v10584_v24 = vpop.eup %10583 }
0x1bdd   :  { %v5856_v59 = vpop.xlane.xlu0 %5855  ;;  %v10586_v15 = vpop.eup %10585  ;;  %v5879_v54 = vmul.f32 %v10584_v24, %v13284_v2 }
0x1bde   :  { %v5878_v20 = vmul.f32 %v10586_v15, %v13278_v53 }
0x1bdf   :  { %v5859_v58 = vpop.xlane.xlu1 %5858 }
0x1be0   :  { %10591 = vrcp.f32 %v5859_v58  ;;  %v5887_v55 = vpack.c.bf16 %v5879_v54, %v5878_v20 }
0x1be1   :  { %10593 = vrcp.f32 %v5856_v59 }
0x1be2   :  { %v10588_v3 = vpop.eup %10587 }
0x1be3   :  { %v5899_v13 = vpop.permute.xlu1 %5898  ;;  %v10590_v44 = vpop.eup %10589  ;;  %v5881_v2 = vmul.f32 %v10588_v3, %v13296_v41 }
0x1be4   :  { %9902 = vmatpush3.bf16.msra.mxu1 %v5899_v13  ;;  %v5880_v7 = vmul.f32 %v10590_v44, %v13290_v39  ;;  %v5291_v39 = vld [vmem:[%s14156_s1 + $0xe0] sm:$0xf] }
0x1be5   :  { %v5862_v1 = vpop.xlane.xlu0 %5861  ;;  %9903 = vmatprep.subr.bf16.mxu1 %v10778_v51  ;;  %v6107_v41 = vsel %vm2444_vm9, %v5291_v39, 0 }
0x1be6   :  { %v5888_v53 = vpack.c.bf16 %v5881_v2, %v5880_v7  ;;  %10595 = vrcp.f32 %v5862_v1 }
0x1be9   :  { %v5901_v32 = vpop.permute.xlu0 %5900 }
0x1bea   :  { %v5922_v63 = vsel %vm2444_vm9, %v5901_v32, 0  ;;  %v10592_v35 = vpop.eup %10591 }
0x1beb   :  { %9904 = vmatpush3.bf16.msra.mxu1 %v5922_v63  ;;  %v10594_v5 = vpop.eup %10593  ;;  %v5883_v11 = vmul.f32 %v10592_v35, %v13306_v43 }
0x1bec   :  { %9947 = vmatprep.subr.bf16.mxu1 %v10778_v51  ;;  %v5882_v36 = vmul.f32 %v10594_v5, %v13301_v47 }
0x1bee   :  { %9906 = vmatmul.mubr.msk.bf16.vlgmr.msra.gmra.mrb[132].mxu1 %vm2925_vm13, %v5887_v55  ;;  %v5889_v42 = vpack.c.bf16 %v5883_v11, %v5882_v36 }
0x1bef   :  { %9909 = vmatprep.mubr.msk.bf16.mxu1 %vm10779_vm5, %v10778_v51  ;;  %9948 = vmatpush3.bf16.msra.mxu1 %v6107_v41 }
0x1bf0   :  { %9999 = vmatprep.subr.bf16.mxu1 %v10778_v51  ;;  %v10596_v47 = vpop.eup %10595 }
0x1bf1   :  { %v5884_v6 = vmul.f32 %v10596_v47, %v13311_v31  ;;  %v5292_v31 = vld [vmem:[%s14156_s1 + $0xe4] sm:$0xf] }
0x1bf6   :  { %9910 = vmatmul.mubr.msk.bf16.gmra.mrb[136].mxu1 %vm2925_vm13, %v5888_v53 }
0x1bf7   :  { %9913 = vmatprep.mubr.msk.bf16.mxu1 %vm10779_vm5, %v10778_v51 }
0x1bfe   :  { %9914 = vmatmul.mubr.msk.bf16.gmra.mrb[140].mxu1 %vm2925_vm13, %v5889_v42 }
0x1bff   :  { %9917 = vmatprep.mubr.msk.bf16.mxu1 %vm10779_vm5, %v10778_v51 }
0x1c14   :  { %v5865_v38 = vpop.xlane.xlu1 %5864 }
0x1c15   :  { %10597 = vrcp.f32 %v5865_v38 }
0x1c18   :  { %v6192_v26 = vpop.permute.xlu1 %6191 }
0x1c1a   :  { %v5868_v43 = vpop.xlane.xlu0 %5867 }
0x1c1b   :  { %10599 = vrcp.f32 %v5868_v43 }
0x1c1c   :  { %v13424_v62 = vpop.permute.xlu1 %6193 }
0x1c1e   :  { %v13434_v13 = vpop.permute.xlu0 %6195 }
0x1c1f   :  { %v10598_v17 = vpop.eup %10597 }
0x1c20   :  { %v5885_v48 = vmul.f32 %v10598_v17, %v13322_v56  ;;  %v6017_v56 = vsel %vm2444_vm9, %v5292_v31, 0  ;;  %v13426_v45 = vpop.permute.xlu1 %6197 }
0x1c21   :  { %9926 = vmatpush3.bf16.msra.mxu0 %v6017_v56 }
0x1c22   :  { %v5890_v16 = vpack.c.bf16 %v5885_v48, %v5884_v6  ;;  %9969 = vmatprep.subr.bf16.mxu0 %v10778_v51  ;;  %v13438_v1 = vpop.permute.xlu0 %6187 }
0x1c24   :  { %9918 = vmatmul.mubr.msk.bf16.gmra.mrb[144].mxu1 %vm2925_vm13, %v5890_v16 }
0x1c25   :  { %v10600_v37 = vpop.eup %10599  ;;  %9921 = vmatprep.mubr.msk.bf16.mxu1 %vm10779_vm5, %v10778_v51 }
0x1c26   :  { %v5886_v21 = vmul.f32 %v10600_v37, %v13327_v27  ;;  %v13428_v27 = vpop.permute.xlu1 %6199  ;;  %v6426_v3 = vpop.permute.xlu0 %6425 }
0x1c28   :  { %v5891_v60 = vpack.c.bf16 %v5886_v21, %v5886_v21 }
0x1c2a   :  { %v13430_v58 = vpop.permute.xlu1 %6181  ;;  %v6430_v7 = vpop.permute.xlu0 %6429 }
0x1c2c   :  { %9922 = vmatmul.mubr.msk.bf16.gmra.mrb[148].mxu1 %vm2925_vm13, %v5891_v60 }
0x1c2d   :  { %9949 = vmatprep.mubr.msk.bf16.mxu1 %vm10779_vm5, %v10778_v51 }
0x1c2e   :  { %v13432_v59 = vpop.permute.xlu1 %6183  ;;  %v6432_v36 = vpop.permute.xlu0 %6431 }
0x1c32   :  { %v13436_v24 = vpop.permute.xlu1 %6185 }
0x1c36   :  { %v13440_v20 = vpop.permute.xlu1 %6189 }
0x1c3a   :  { %v6428_v44 = vpop.permute.xlu1 %6427 }
0x1c8a   :  { %v5605_v15 = vpop.f32.mrb[112].mxu1 }
0x1c8b   :  { %v9847_v54 = vpop.f32.mrb[113].mxu1 }
0x1c8c   :  { %v5608_v32 = vpop.f32.mrb[114].mxu1 }
0x1c8d   :  { %v5643_v63 = vpack.c.bf16 %v5608_v32, %v5605_v15  ;;  %v9848_v55 = vpop.f32.mrb[115].mxu1 }
0x1c8f   :  { %9950 = vmatmul.mubr.msk.bf16.vlgmr.msra.gmra.mrb[152].mxu1 %vm2813_vm12, %v5643_v63 }
0x1c90   :  { %10000 = vmatpush3.bf16.msra.mxu1 %v6426_v3  ;;  %9953 = vmatprep.mubr.msk.bf16.mxu1 %vm10779_vm5, %v10778_v51  ;;  %v6217_v3 = vsel %vm2813_vm12, %v6192_v26, 0 }
0x1c91   :  { %10001 = vmatprep.subr.bf16.mxu1 %v10778_v51 }
0x1c94   :  { %10002 = vmatpush3.bf16.msra.mxu1 %v6428_v44  ;;  %v5613_v2 = vpop.f32.mrb[116].mxu1 }
0x1c95   :  { %v9851_v53 = vpop.f32.mrb[117].mxu1  ;;  %10003 = vmatprep.subr.bf16.mxu1 %v10778_v51 }
0x1c96   :  { %v5616_v35 = vpop.f32.mrb[118].mxu1 }
0x1c97   :  { %v5644_v5 = vpack.c.bf16 %v5616_v35, %v5613_v2  ;;  %v9852_v11 = vpop.f32.mrb[119].mxu1 }
0x1c98   :  { %10004 = vmatpush3.bf16.msra.mxu1 %v6430_v7 }
0x1c99   :  { %9954 = vmatmul.mubr.msk.bf16.gmra.mrb[156].mxu1 %vm2813_vm12, %v5644_v5  ;;  %10005 = vmatprep.subr.bf16.mxu1 %v10778_v51  ;;  %v6220_v5 = vsel %vm2813_vm12, %v13424_v62, 0  ;;  %v6226_v62 = vsel %vm2813_vm12, %v13426_v45, 0 }
0x1c9a   :  { %9957 = vmatprep.mubr.msk.bf16.mxu1 %vm10779_vm5, %v10778_v51 }
0x1c9c   :  { %10006 = vmatpush3.bf16.msra.mxu1 %v6432_v36  ;;  %v5621_v42 = vpop.f32.mrb[120].mxu1 }
0x1c9d   :  { %v9855_v39 = vpop.f32.mrb[121].mxu1  ;;  %10007 = vmatprep.subr.bf16.mxu1 %v10778_v51 }
0x1c9e   :  { %v5624_v41 = vpop.f32.mrb[122].mxu1 }
0x1c9f   :  { %v5645_v38 = vpack.c.bf16 %v5624_v41, %v5621_v42  ;;  %v9856_v43 = vpop.f32.mrb[123].mxu1  ;;  %v6223_v41 = vsel %vm2813_vm12, %v13434_v13, 0 }
0x1ca1   :  { %9958 = vmatmul.mubr.msk.bf16.gmra.mrb[160].mxu1 %vm2813_vm12, %v5645_v38  ;;  %v6229_v38 = vsel %vm2813_vm12, %v13428_v27, 0 }
0x1ca2   :  { %9961 = vmatprep.mubr.msk.bf16.mxu1 %vm10779_vm5, %v10778_v51 }
0x1ca4   :  { %v5629_v47 = vpop.f32.mrb[124].mxu1 }
0x1ca5   :  { %v9859_v17 = vpop.f32.mrb[125].mxu1 }
0x1ca6   :  { %v5632_v6 = vpop.f32.mrb[126].mxu1 }
0x1ca7   :  { %v5646_v48 = vpack.c.bf16 %v5632_v6, %v5629_v47  ;;  %v9860_v16 = vpop.f32.mrb[127].mxu1 }
0x1ca9   :  { %9962 = vmatmul.mubr.msk.bf16.gmra.mrb[164].mxu1 %vm2813_vm12, %v5646_v48 }
0x1caa   :  { %9965 = vmatprep.mubr.msk.bf16.mxu1 %vm10779_vm5, %v10778_v51 }
0x1cac   :  { %v5637_v37 = vpop.f32.mrb[128].mxu1 }
0x1cad   :  { %v9863_v21 = vpop.f32.mrb[129].mxu1  ;;  %v5647_v31 = vpack.c.bf16 %v5637_v37, %v5637_v37 }
0x1cae   :  { %v5640_v60 = vpop.f32.mrb[130].mxu1 }
0x1caf   :  { %v9864_v56 = vpop.f32.mrb[131].mxu1 }
0x1cb1   :  { %9966 = vmatmul.mubr.msk.bf16.gmra.mrb[168].mxu1 %vm2813_vm12, %v5647_v31 }
0x1cb2   :  { %10009 = vmatprep.mubr.msk.bf16.mxu1 %vm10779_vm5, %v10778_v51 }
0x1cc1   :  { %v5958_v15 = vpop.f32.mrb[132].mxu1 }
0x1cc2   :  { %v9907_v54 = vpop.f32.mrb[133].mxu1 }
0x1cc3   :  { %v5961_v32 = vpop.f32.mrb[134].mxu1 }
0x1cc4   :  { %v5996_v63 = vpack.c.bf16 %v5961_v32, %v5958_v15  ;;  %v9908_v55 = vpop.f32.mrb[135].mxu1 }
0x1cc6   :  { %9928 = vmatmul.mubr.msk.bf16.vlgmr.msra.gmra.mrb[140].mxu0 %vm2813_vm12, %v5996_v63 }
0x1cc7   :  { %9970 = vmatpush3.bf16.xpose.msra.mxu0 %v6217_v3  ;;  %9931 = vmatprep.mubr.msk.bf16.mxu0 %vm10779_vm5, %v10778_v51 }
0x1cc8   :  { %9971 = vmatprep.subr.bf16.mxu0 %v10778_v51 }
0x1cc9   :  { %v5966_v44 = vpop.f32.mrb[136].mxu1 }
0x1cca   :  { %v9911_v2 = vpop.f32.mrb[137].mxu1 }
0x1ccb   :  { %v5969_v7 = vpop.f32.mrb[138].mxu1 }
0x1ccc   :  { %v5997_v53 = vpack.c.bf16 %v5969_v7, %v5966_v44  ;;  %v9912_v35 = vpop.f32.mrb[139].mxu1 }
0x1cce   :  { %9932 = vmatmul.mubr.msk.bf16.gmra.mrb[144].mxu0 %vm2813_vm12, %v5997_v53 }
0x1ccf   :  { %9972 = vmatpush3.bf16.xpose.msra.mxu0 %v6220_v5  ;;  %9935 = vmatprep.mubr.msk.bf16.mxu0 %vm10779_vm5, %v10778_v51 }
0x1cd0   :  { %9973 = vmatprep.subr.bf16.mxu0 %v10778_v51 }
0x1cd1   :  { %v5974_v26 = vpop.f32.mrb[140].mxu1 }
0x1cd2   :  { %v9915_v11 = vpop.f32.mrb[141].mxu1 }
0x1cd3   :  { %v5977_v36 = vpop.f32.mrb[142].mxu1 }
0x1cd4   :  { %v5998_v42 = vpack.c.bf16 %v5977_v36, %v5974_v26  ;;  %v9916_v39 = vpop.f32.mrb[143].mxu1 }
0x1cd6   :  { %9936 = vmatmul.mubr.msk.bf16.gmra.mrb[148].mxu0 %vm2813_vm12, %v5998_v42 }
0x1cd7   :  { %9974 = vmatpush3.bf16.xpose.msra.mxu0 %v6223_v41  ;;  %9939 = vmatprep.mubr.msk.bf16.mxu0 %vm10779_vm5, %v10778_v51 }
0x1cd8   :  { %9975 = vmatprep.subr.bf16.mxu0 %v10778_v51 }
0x1cdf   :  { %9976 = vmatpush3.bf16.xpose.msra.mxu0 %v6226_v62 }
0x1ce0   :  { %9977 = vmatprep.subr.bf16.mxu0 %v10778_v51 }
0x1ce7   :  { %9978 = vmatpush3.bf16.xpose.msra.mxu0 %v6229_v38 }
0x1ce8   :  { %10029 = vmatprep.subr.bf16.mxu0 %v10778_v51 }
0x1cf7   :  { %v5982_v13 = vpop.f32.mrb[144].mxu1 }
0x1cf8   :  { %v9919_v43 = vpop.f32.mrb[145].mxu1 }
0x1cf9   :  { %v5985_v47 = vpop.f32.mrb[146].mxu1 }
0x1cfa   :  { %v5999_v17 = vpack.c.bf16 %v5985_v47, %v5982_v13  ;;  %v9920_v6 = vpop.f32.mrb[147].mxu1 }
0x1cfc   :  { %9940 = vmatmul.mubr.msk.bf16.gmra.mrb[152].mxu0 %vm2813_vm12, %v5999_v17 }
0x1cfd   :  { %9943 = vmatprep.mubr.msk.bf16.mxu0 %vm10779_vm5, %v10778_v51 }
0x1cff   :  { %v5990_v45 = vpop.f32.mrb[148].mxu1 }
0x1d00   :  { %v9923_v48 = vpop.f32.mrb[149].mxu1  ;;  %v6000_v37 = vpack.c.bf16 %v5990_v45, %v5990_v45 }
0x1d01   :  { %v5993_v16 = vpop.f32.mrb[150].mxu1 }
0x1d02   :  { %v9924_v21 = vpop.f32.mrb[151].mxu1 }
0x1d04   :  { %9944 = vmatmul.mubr.msk.bf16.gmra.mrb[156].mxu0 %vm2813_vm12, %v6000_v37 }
0x1d05   :  { %9979 = vmatprep.mubr.msk.bf16.mxu0 %vm10779_vm5, %v10778_v51 }
0x1d0c   :  { %9980 = vmatmul.mubr.msk.bf16.vlgmr.msra.gmra.mrb[160].mxu0 %vm2813_vm12, %v13430_v58 }
0x1d0d   :  { %9983 = vmatprep.mubr.msk.bf16.mxu0 %vm10779_vm5, %v10778_v51 }
0x1d14   :  { %9984 = vmatmul.mubr.msk.bf16.gmra.mrb[164].mxu0 %vm2813_vm12, %v13432_v59 }
0x1d15   :  { %9987 = vmatprep.mubr.msk.bf16.mxu0 %vm10779_vm5, %v10778_v51 }
0x1d1c   :  { %9988 = vmatmul.mubr.msk.bf16.gmra.mrb[168].mxu0 %vm2813_vm12, %v13436_v24 }
0x1d1d   :  { %9991 = vmatprep.mubr.msk.bf16.mxu0 %vm10779_vm5, %v10778_v51 }
0x1d24   :  { %9992 = vmatmul.mubr.msk.bf16.gmra.mrb[172].mxu0 %vm2813_vm12, %v13438_v1 }
0x1d25   :  { %9995 = vmatprep.mubr.msk.bf16.mxu0 %vm10779_vm5, %v10778_v51 }
0x1d2c   :  { %9996 = vmatmul.mubr.msk.bf16.gmra.mrb[176].mxu0 %vm2813_vm12, %v13440_v20 }
0x1d2d   :  { %10031 = vmatprep.mubr.msk.bf16.mxu0 %vm10779_vm5, %v10778_v51 }
0x1d62   :  { %v6143_v27 = vpop.f32.mrb[152].mxu1 }
0x1d63   :  { %v9951_v58 = vpop.f32.mrb[153].mxu1 }
0x1d64   :  { %v6146_v59 = vpop.f32.mrb[154].mxu1 }
0x1d65   :  { %v9952_v60 = vpop.f32.mrb[155].mxu1 }
0x1d6c   :  { %v6151_v24 = vpop.f32.mrb[156].mxu1 }
0x1d6d   :  { %v9955_v31 = vpop.f32.mrb[157].mxu1 }
0x1d6e   :  { %v6154_v56 = vpop.f32.mrb[158].mxu1 }
0x1d6f   :  { %v9956_v15 = vpop.f32.mrb[159].mxu1 }
0x1d74   :  { %v6159_v54 = vpop.f32.mrb[160].mxu1 }
0x1d75   :  { %v9959_v32 = vpop.f32.mrb[161].mxu1 }
0x1d76   :  { %v6162_v1 = vpop.f32.mrb[162].mxu1 }
0x1d77   :  { %v9960_v63 = vpop.f32.mrb[163].mxu1 }
0x1d7c   :  { %v6167_v55 = vpop.f32.mrb[164].mxu1 }
0x1d7d   :  { %v9963_v3 = vpop.f32.mrb[165].mxu1 }
0x1d7e   :  { %v6170_v44 = vpop.f32.mrb[166].mxu1 }
0x1d7f   :  { %v9964_v2 = vpop.f32.mrb[167].mxu1 }
0x1d84   :  { %v6175_v20 = vpop.f32.mrb[168].mxu1 }
0x1d85   :  { %v9967_v7 = vpop.f32.mrb[169].mxu1 }
0x1d86   :  { %v6178_v53 = vpop.f32.mrb[170].mxu1 }
0x1d87   :  { %v9968_v35 = vpop.f32.mrb[171].mxu1 }
0x1d99   :  { %v6053_v5 = vpop.f32.mrb[140].mxu0 }
0x1d9a   :  { %v13510_v26 = vadd.f32 %v6143_v27, %v6053_v5  ;;  %v9929_v11 = vpop.f32.mrb[141].mxu0 }
0x1d9b   :  { %v6056_v36 = vpop.f32.mrb[142].mxu0 }
0x1d9c   :  { %v13512_v42 = vadd.f32 %v6146_v59, %v6056_v36  ;;  %v9930_v39 = vpop.f32.mrb[143].mxu0 }
0x1da1   :  { %v6061_v41 = vpop.f32.mrb[144].mxu0 }
0x1da2   :  { %v13514_v62 = vadd.f32 %v6151_v24, %v6061_v41  ;;  %v9933_v38 = vpop.f32.mrb[145].mxu0 }
0x1da3   :  { %v6064_v13 = vpop.f32.mrb[146].mxu0 }
0x1da4   :  { %v13516_v43 = vadd.f32 %v6154_v56, %v6064_v13  ;;  %v9934_v47 = vpop.f32.mrb[147].mxu0 }
0x1da9   :  { %v6069_v17 = vpop.f32.mrb[148].mxu0 }
0x1daa   :  { %v13518_v6 = vadd.f32 %v6159_v54, %v6069_v17  ;;  %v9937_v45 = vpop.f32.mrb[149].mxu0 }
0x1dab   :  { %v6072_v48 = vpop.f32.mrb[150].mxu0 }
0x1dac   :  { %v13520_v16 = vadd.f32 %v6162_v1, %v6072_v48  ;;  %v9938_v37 = vpop.f32.mrb[151].mxu0 }
0x1dcf   :  { %v6077_v21 = vpop.f32.mrb[152].mxu0 }
0x1dd0   :  { %v13522_v27 = vadd.f32 %v6167_v55, %v6077_v21  ;;  %v9941_v58 = vpop.f32.mrb[153].mxu0 }
0x1dd1   :  { %v6080_v59 = vpop.f32.mrb[154].mxu0 }
0x1dd2   :  { %v13524_v60 = vadd.f32 %v6170_v44, %v6080_v59  ;;  %v9942_v24 = vpop.f32.mrb[155].mxu0 }
0x1dd7   :  { %v6085_v31 = vpop.f32.mrb[156].mxu0 }
0x1dd8   :  { %v13526_v56 = vadd.f32 %v6175_v20, %v6085_v31  ;;  %v9945_v15 = vpop.f32.mrb[157].mxu0 }
0x1dd9   :  { %v6088_v32 = vpop.f32.mrb[158].mxu0 }
0x1dda   :  { %v9946_v54 = vpop.f32.mrb[159].mxu0 }
0x1ddf   :  { %v6265_v63 = vpop.f32.mrb[160].mxu0 }
0x1de0   :  { %v6303_v3 = vmul.f32 0.35355338, %v6265_v63  ;;  %v9981_v2 = vpop.f32.mrb[161].mxu0 }
0x1de1   :  { %v6268_v1 = vpop.f32.mrb[162].mxu0 }
0x1de2   :  { %v6304_v7 = vmul.f32 0.35355338, %v6268_v1  ;;  %v9982_v53 = vpop.f32.mrb[163].mxu0  ;;  %v6312_v55 = vsel %vm2925_vm13, %v6303_v3, -inf }
0x1de3   :  { %6313 = vmax.xlane.f32.xlu0 %v6312_v55 }
0x1de4   :  { %v6315_v35 = vsel %vm2925_vm13, %v6304_v7, -inf }
0x1de5   :  { %6316 = vmax.xlane.f32.xlu1 %v6315_v35 }
0x1de7   :  { %v6273_v44 = vpop.f32.mrb[164].mxu0 }
0x1de8   :  { %v6305_v5 = vmul.f32 0.35355338, %v6273_v44  ;;  %v9985_v11 = vpop.f32.mrb[165].mxu0 }
0x1de9   :  { %v6276_v20 = vpop.f32.mrb[166].mxu0 }
0x1dea   :  { %v6306_v36 = vmul.f32 0.35355338, %v6276_v20  ;;  %v9986_v39 = vpop.f32.mrb[167].mxu0  ;;  %v6318_v41 = vsel %vm2925_vm13, %v6305_v5, -inf }
0x1deb   :  { %6319 = vmax.xlane.f32.xlu0 %v6318_v41 }
0x1dec   :  { %v6321_v38 = vsel %vm2925_vm13, %v6306_v36, -inf }
0x1def   :  { %6322 = vmax.xlane.f32.xlu0 %v6321_v38  ;;  %v6281_v13 = vpop.f32.mrb[168].mxu0 }
0x1df0   :  { %v6307_v47 = vmul.f32 0.35355338, %v6281_v13  ;;  %v9989_v17 = vpop.f32.mrb[169].mxu0 }
0x1df1   :  { %v6284_v45 = vpop.f32.mrb[170].mxu0 }
0x1df2   :  { %v6308_v48 = vmul.f32 0.35355338, %v6284_v45  ;;  %v9990_v37 = vpop.f32.mrb[171].mxu0  ;;  %v6324_v21 = vsel %vm2925_vm13, %v6307_v47, -inf }
0x1df3   :  { %6325 = vmax.xlane.f32.xlu1 %v6324_v21 }
0x1df4   :  { %v6327_v58 = vsel %vm2925_vm13, %v6308_v48, -inf }
0x1df5   :  { %6328 = vmax.xlane.f32.xlu0 %v6327_v58 }
0x1df7   :  { %v6289_v59 = vpop.f32.mrb[172].mxu0 }
0x1df8   :  { %v13534_v24 = vmul.f32 0.35355338, %v6289_v59  ;;  %v9993_v31 = vpop.f32.mrb[173].mxu0 }
0x1df9   :  { %v6292_v15 = vpop.f32.mrb[174].mxu0 }
0x1dfa   :  { %v13536_v32 = vmul.f32 0.35355338, %v6292_v15  ;;  %v9994_v54 = vpop.f32.mrb[175].mxu0  ;;  %v6330_v63 = vsel %vm2925_vm13, %v13534_v24, -inf }
0x1dfb   :  { %6331 = vmax.xlane.f32.xlu1 %v6330_v63 }
0x1dfc   :  { %v6333_v2 = vsel %vm2925_vm13, %v13536_v32, -inf }
0x1dfd   :  { %6334 = vmax.xlane.f32.xlu0 %v6333_v2 }
0x1dff   :  { %v6297_v1 = vpop.f32.mrb[176].mxu0 }
0x1e00   :  { %v13542_v53 = vmul.f32 0.35355338, %v6297_v1  ;;  %v9997_v55 = vpop.f32.mrb[177].mxu0 }
0x1e01   :  { %v6300_v35 = vpop.f32.mrb[178].mxu0 }
0x1e02   :  { %v9998_v44 = vpop.f32.mrb[179].mxu0  ;;  %v6336_v11 = vsel %vm2925_vm13, %v13542_v53, -inf }
0x1e03   :  { %6337 = vmax.xlane.f32.xlu1 %v6336_v11 }
0x1e13   :  { %6643 = vrot.lane.b32.xlu0 %v13010_v40, %s10788_s10 }
0x1e14   :  { %6433 = vrot.lane.b32.xlu1 %v13026_v29, %s10787_s29 }
0x1e70   :  { %v6314_v20 = vpop.xlane.xlu0 %6313 }
0x1e71   :  { %v6339_v39 = vsub.f32 %v6303_v3, %v6314_v20 }
0x1e72   :  { %v6317_v41 = vpop.xlane.xlu1 %6316 }
0x1e73   :  { %v6348_v38 = vmul.f32 1.442695, %v6339_v39  ;;  %v6340_v13 = vsub.f32 %v6304_v7, %v6317_v41 }
0x1e75   :  { %10601 = vpow2.f32 %v6348_v38  ;;  %v6350_v17 = vmul.f32 1.442695, %v6340_v13 }
0x1e77   :  { %10603 = vpow2.f32 %v6350_v17 }
0x1e78   :  { %v6320_v45 = vpop.xlane.xlu0 %6319 }
0x1e79   :  { %v6341_v37 = vsub.f32 %v6305_v5, %v6320_v45 }
0x1e7b   :  { %v6352_v21 = vmul.f32 1.442695, %v6341_v37 }
0x1e7c   :  { %v6323_v58 = vpop.xlane.xlu0 %6322 }
0x1e7d   :  { %10605 = vpow2.f32 %v6352_v21  ;;  %v6342_v59 = vsub.f32 %v6306_v36, %v6323_v58 }
0x1e7f   :  { %v10602_v31 = vpop.eup %10601  ;;  %v6354_v15 = vmul.f32 1.442695, %v6342_v59 }
0x1e80   :  { %v6326_v54 = vpop.xlane.xlu1 %6325  ;;  %v13551_v63 = vmul.f32 %v13205_v10, %v10602_v31 }
0x1e81   :  { %v10604_v2 = vpop.eup %10603  ;;  %10607 = vpow2.f32 %v6354_v15  ;;  %v6343_v3 = vsub.f32 %v6307_v47, %v6326_v54 }
0x1e82   :  { %v6329_v1 = vpop.xlane.xlu0 %6328  ;;  %v6375_v7 = vsel %vm2925_vm13, %v13551_v63, 0.0  ;;  %v13556_v55 = vmul.f32 %v13213_v33, %v10604_v2 }
0x1e83   :  { %v6356_v5 = vmul.f32 1.442695, %v6343_v3  ;;  %v6344_v35 = vsub.f32 %v6308_v48, %v6329_v1  ;;  %6376 = vadd.xlane.f32.xlu0 %v6375_v7 }
0x1e84   :  { %v6378_v36 = vsel %vm2925_vm13, %v13556_v55, 0.0 }
0x1e85   :  { %10609 = vpow2.f32 %v6356_v5  ;;  %v6358_v44 = vmul.f32 1.442695, %v6344_v35  ;;  %6379 = vadd.xlane.f32.xlu1 %v6378_v36 }
0x1e87   :  { %v10606_v10 = vpop.eup %10605  ;;  %10611 = vpow2.f32 %v6358_v44 }
0x1e88   :  { %v13561_v47 = vmul.f32 %v13221_v34, %v10606_v10  ;;  %v6332_v33 = vpop.xlane.xlu1 %6331 }
0x1e8a   :  { %v6381_v11 = vsel %vm2925_vm13, %v13561_v47, 0.0 }
0x1e8b   :  { %v10608_v20 = vpop.eup %10607  ;;  %6382 = vadd.xlane.f32.xlu1 %v6381_v11 }
0x1e8c   :  { %v13566_v48 = vmul.f32 %v13230_v49, %v10608_v20 }
0x1e8e   :  { %v6384_v39 = vsel %vm2925_vm13, %v13566_v48, 0.0 }
0x1e8f   :  { %v10610_v41 = vpop.eup %10609  ;;  %6385 = vadd.xlane.f32.xlu1 %v6384_v39 }
0x1e90   :  { %v6338_v38 = vpop.xlane.xlu1 %6337  ;;  %v13571_v13 = vmul.f32 %v13237_v25, %v10610_v41  ;;  %v6335_v25 = vpop.xlane.xlu0 %6334 }
0x1e91   :  { %v10612_v34 = vpop.eup %10611  ;;  %v6346_v58 = vsub.f32 %v13536_v32, %v6335_v25  ;;  %v6347_v15 = vsub.f32 %v13542_v53, %v6338_v38 }
0x1e92   :  { %v6387_v17 = vsel %vm2925_vm13, %v13571_v13, 0.0  ;;  %v13576_v45 = vmul.f32 %v13245_v18, %v10612_v34  ;;  %v6345_v18 = vsub.f32 %v13534_v24, %v6332_v33 }
0x1e93   :  { %6388 = vadd.xlane.f32.xlu0 %v6387_v17  ;;  %v6362_v31 = vmul.f32 1.442695, %v6346_v58  ;;  %v6364_v54 = vmul.f32 1.442695, %v6347_v15 }
0x1e94   :  { %v6434_v37 = vpop.permute.xlu1 %6433  ;;  %v6390_v49 = vsel %vm2925_vm13, %v13576_v45, 0.0  ;;  %v6360_v59 = vmul.f32 1.442695, %v6345_v18 }
0x1e95   :  { %v6455_v21 = vsel %vm2444_vm9, %v6434_v37, 0  ;;  %6391 = vadd.xlane.f32.xlu1 %v6390_v49 }
0x1e96   :  { %10008 = vmatpush3.bf16.msra.mxu1 %v6455_v21  ;;  %10613 = vpow2.f32 %v6360_v59 }
0x1e97   :  { %10051 = vmatprep.subr.bf16.mxu1 %v10778_v51  ;;  %10615 = vpow2.f32 %v6362_v31 }
0x1e98   :  { %10617 = vpow2.f32 %v6364_v54 }
0x1ea0   :  { %v10614_v2 = vpop.eup %10613 }
0x1ea1   :  { %v10616_v3 = vpop.eup %10615  ;;  %v13590_v1 = vmul.f32 %v13252_v30, %v10614_v2  ;;  %v6644_v30 = vpop.permute.xlu0 %6643 }
0x1ea2   :  { %v13593_v7 = vmul.f32 %v13260_v23, %v10616_v3  ;;  %v10618_v5 = vpop.eup %10617  ;;  %v6669_v38 = vsel %vm2813_vm12, %v6644_v30, 0 }
0x1ea3   :  { %v6393_v24 = vsel %vm2925_vm13, %v13590_v1, 0.0  ;;  %v13600_v53 = vmul.f32 %v13268_v0, %v10618_v5 }
0x1ea4   :  { %v6396_v32 = vsel %vm2925_vm13, %v13593_v7, 0.0 }
0x1ea5   :  { %v6399_v35 = vsel %vm2925_vm13, %v13600_v53, 0.0 }
0x1ea6   :  { %6645 = vrot.lane.b32.xlu1 %v13014_v46, %s10788_s10 }
0x1ea9   :  { %6647 = vrot.lane.b32.xlu0 %v13018_v14, %s10788_s10 }
0x1ec8   :  { %6394 = vadd.xlane.f32.xlu0 %v6393_v24 }
0x1eca   :  { %6397 = vadd.xlane.f32.xlu1 %v6396_v32 }
0x1ece   :  { %6400 = vadd.xlane.f32.xlu1 %v6399_v35 }
0x1ede   :  { %6649 = vrot.lane.b32.xlu0 %v13022_v12, %s10788_s10 }
0x1edf   :  { %6651 = vrot.lane.b32.xlu1 %v13026_v29, %s10788_s10 }
0x1ee2   :  { %6633 = vrot.lane.b32.xlu0 %v13010_v40, %s10789_s11 }
0x1ee3   :  { %6635 = vrot.lane.b32.xlu1 %v13014_v46, %s10789_s11 }
0x1ee6   :  { %6637 = vrot.lane.b32.xlu0 %v13018_v14, %s10789_s11 }
0x1ee7   :  { %6639 = vrot.lane.b32.xlu1 %v13022_v12, %s10789_s11 }
0x1eea   :  { %6641 = vrot.lane.b32.xlu0 %v13026_v29, %s10789_s11 }
0x1f10   :  { %v6377_v23 = vpop.xlane.xlu0 %6376 }
0x1f11   :  { %10619 = vrcp.f32 %v6377_v23 }
0x1f12   :  { %v6380_v0 = vpop.xlane.xlu1 %6379 }
0x1f13   :  { %10621 = vrcp.f32 %v6380_v0 }
0x1f18   :  { %v6383_v36 = vpop.xlane.xlu1 %6382 }
0x1f19   :  { %10623 = vrcp.f32 %v6383_v36 }
0x1f1b   :  { %v10620_v44 = vpop.eup %10619 }
0x1f1c   :  { %v6386_v10 = vpop.xlane.xlu1 %6385  ;;  %v6411_v20 = vmul.f32 %v10620_v44, %v13551_v63 }
0x1f1d   :  { %v10622_v11 = vpop.eup %10621  ;;  %10625 = vrcp.f32 %v6386_v10 }
0x1f1e   :  { %v6412_v33 = vmul.f32 %v10622_v11, %v13556_v55 }
0x1f20   :  { %v6420_v39 = vpack.c.bf16 %v6412_v33, %v6411_v20  ;;  %v6389_v41 = vpop.xlane.xlu0 %6388 }
0x1f21   :  { %10627 = vrcp.f32 %v6389_v41 }
0x1f22   :  { %10010 = vmatmul.mubr.msk.bf16.vlgmr.msra.gmra.mrb[172].mxu1 %vm2925_vm13, %v6420_v39  ;;  %v6392_v34 = vpop.xlane.xlu1 %6391 }
0x1f23   :  { %10052 = vmatpush3.bf16.xpose.msra.mxu1 %v6669_v38  ;;  %10629 = vrcp.f32 %v6392_v34  ;;  %10013 = vmatprep.mubr.msk.bf16.mxu1 %vm10779_vm5, %v10778_v51  ;;  %v10624_v17 = vpop.eup %10623 }
0x1f24   :  { %10053 = vmatprep.subr.bf16.mxu1 %v10778_v51  ;;  %v6413_v55 = vmul.f32 %v10624_v17, %v13561_v47  ;;  %v6648_v31 = vpop.permute.xlu0 %6647 }
0x1f26   :  { %v6646_v63 = vpop.permute.xlu1 %6645 }
0x1f27   :  { %v10626_v37 = vpop.eup %10625  ;;  %v6672_v25 = vsel %vm2813_vm12, %v6646_v63, 0 }
0x1f28   :  { %v6414_v49 = vmul.f32 %v10626_v37, %v13566_v48  ;;  %v6675_v48 = vsel %vm2813_vm12, %v6648_v31, 0 }
0x1f2a   :  { %v6421_v21 = vpack.c.bf16 %v6414_v49, %v6413_v55 }
0x1f2b   :  { %10054 = vmatpush3.bf16.xpose.msra.mxu1 %v6672_v25  ;;  %v10628_v18 = vpop.eup %10627 }
0x1f2c   :  { %10014 = vmatmul.mubr.msk.bf16.gmra.mrb[176].mxu1 %vm2925_vm13, %v6421_v21  ;;  %10055 = vmatprep.subr.bf16.mxu1 %v10778_v51  ;;  %v6415_v47 = vmul.f32 %v10628_v18, %v13571_v13 }
0x1f2d   :  { %v10630_v58 = vpop.eup %10629  ;;  %10017 = vmatprep.mubr.msk.bf16.mxu1 %vm10779_vm5, %v10778_v51 }
0x1f2e   :  { %v6416_v59 = vmul.f32 %v10630_v58, %v13576_v45 }
0x1f30   :  { %v6422_v15 = vpack.c.bf16 %v6416_v59, %v6415_v47 }
0x1f33   :  { %10056 = vmatpush3.bf16.xpose.msra.mxu1 %v6675_v48 }
0x1f34   :  { %10018 = vmatmul.mubr.msk.bf16.gmra.mrb[180].mxu1 %vm2925_vm13, %v6422_v15  ;;  %10057 = vmatprep.subr.bf16.mxu1 %v10778_v51 }
0x1f35   :  { %10021 = vmatprep.mubr.msk.bf16.mxu1 %vm10779_vm5, %v10778_v51 }
0x1f55   :  { %v6395_v54 = vpop.xlane.xlu0 %6394 }
0x1f56   :  { %10631 = vrcp.f32 %v6395_v54 }
0x1f57   :  { %v6398_v2 = vpop.xlane.xlu1 %6397 }
0x1f58   :  { %10633 = vrcp.f32 %v6398_v2 }
0x1f59   :  { %v6650_v3 = vpop.permute.xlu0 %6649 }
0x1f5a   :  { %v6678_v45 = vsel %vm2813_vm12, %v6650_v3, 0 }
0x1f5b   :  { %10058 = vmatpush3.bf16.xpose.msra.mxu1 %v6678_v45  ;;  %v6401_v13 = vpop.xlane.xlu1 %6400 }
0x1f5c   :  { %10635 = vrcp.f32 %v6401_v13  ;;  %10059 = vmatprep.subr.bf16.mxu1 %v10778_v51 }
0x1f5f   :  { %v6652_v5 = vpop.permute.xlu1 %6651 }
0x1f60   :  { %v10632_v24 = vpop.eup %10631  ;;  %v6681_v35 = vsel %vm2813_vm12, %v6652_v5, 0 }
0x1f61   :  { %v6417_v30 = vmul.f32 %v10632_v24, %v13590_v1  ;;  %v6634_v1 = vpop.permute.xlu0 %6633 }
0x1f62   :  { %v10634_v32 = vpop.eup %10633 }
0x1f63   :  { %v6418_v23 = vmul.f32 %v10634_v32, %v13593_v7  ;;  %10060 = vmatpush3.bf16.xpose.msra.mxu1 %v6681_v35  ;;  %v5293_v7 = vld [vmem:[%s14156_s1 + $0xe8] sm:$0xf] }
0x1f64   :  { %10111 = vmatprep.subr.bf16.mxu1 %v10778_v51  ;;  %v6550_v11 = vsel %vm2444_vm9, %v5293_v7, 0 }
0x1f65   :  { %v6423_v0 = vpack.c.bf16 %v6418_v23, %v6417_v30  ;;  %10030 = vmatpush3.bf16.msra.mxu0 %v6550_v11  ;;  %v6638_v20 = vpop.permute.xlu0 %6637 }
0x1f66   :  { %v10636_v36 = vpop.eup %10635  ;;  %10081 = vmatprep.subr.bf16.mxu0 %v10778_v51 }
0x1f67   :  { %10022 = vmatmul.mubr.msk.bf16.gmra.mrb[184].mxu1 %vm2925_vm13, %v6423_v0  ;;  %v6419_v44 = vmul.f32 %v10636_v36, %v13600_v53  ;;  %v6636_v53 = vpop.permute.xlu1 %6635 }
0x1f68   :  { %10025 = vmatprep.mubr.msk.bf16.mxu1 %vm10779_vm5, %v10778_v51 }
0x1f69   :  { %v6424_v10 = vpack.c.bf16 %v6419_v44, %v6419_v44  ;;  %v6642_v39 = vpop.permute.xlu0 %6641 }
0x1f6b   :  { %v6640_v33 = vpop.permute.xlu1 %6639 }
0x1f6f   :  { %10026 = vmatmul.mubr.msk.bf16.gmra.mrb[188].mxu1 %vm2925_vm13, %v6424_v10 }
0x1f70   :  { %10061 = vmatprep.mubr.msk.bf16.mxu1 %vm10779_vm5, %v10778_v51 }
0x1f77   :  { %10062 = vmatmul.mubr.msk.bf16.vlgmr.msra.gmra.mrb[192].mxu1 %vm2813_vm12, %v6634_v1 }
0x1f78   :  { %10065 = vmatprep.mubr.msk.bf16.mxu1 %vm10779_vm5, %v10778_v51 }
0x1f7f   :  { %10066 = vmatmul.mubr.msk.bf16.gmra.mrb[196].mxu1 %vm2813_vm12, %v6636_v53 }
0x1f80   :  { %10069 = vmatprep.mubr.msk.bf16.mxu1 %vm10779_vm5, %v10778_v51 }
0x1f87   :  { %10070 = vmatmul.mubr.msk.bf16.gmra.mrb[200].mxu1 %vm2813_vm12, %v6638_v20 }
0x1f88   :  { %10073 = vmatprep.mubr.msk.bf16.mxu1 %vm10779_vm5, %v10778_v51 }
0x1f8f   :  { %10074 = vmatmul.mubr.msk.bf16.gmra.mrb[204].mxu1 %vm2813_vm12, %v6640_v33 }
0x1f90   :  { %10077 = vmatprep.mubr.msk.bf16.mxu1 %vm10779_vm5, %v10778_v51 }
0x1f97   :  { %10078 = vmatmul.mubr.msk.bf16.gmra.mrb[208].mxu1 %vm2813_vm12, %v6642_v39 }
0x1f98   :  { %10113 = vmatprep.mubr.msk.bf16.mxu1 %vm10779_vm5, %v10778_v51 }
0x1ff5   :  { %v6491_v41 = vpop.f32.mrb[172].mxu1 }
0x1ff6   :  { %v10011_v38 = vpop.f32.mrb[173].mxu1 }
0x1ff7   :  { %v6494_v34 = vpop.f32.mrb[174].mxu1 }
0x1ff8   :  { %v6529_v17 = vpack.c.bf16 %v6494_v34, %v6491_v41  ;;  %v10012_v37 = vpop.f32.mrb[175].mxu1 }
0x1ffa   :  { %10032 = vmatmul.mubr.msk.bf16.vlgmr.msra.gmra.mrb[180].mxu0 %vm2813_vm12, %v6529_v17 }
0x1ffb   :  { %10035 = vmatprep.mubr.msk.bf16.mxu0 %vm10779_vm5, %v10778_v51 }
0x1fff   :  { %v6499_v63 = vpop.f32.mrb[176].mxu1 }
0x2000   :  { %v10015_v55 = vpop.f32.mrb[177].mxu1 }
0x2001   :  { %v6502_v49 = vpop.f32.mrb[178].mxu1 }
0x2002   :  { %v6530_v21 = vpack.c.bf16 %v6502_v49, %v6499_v63  ;;  %v10016_v25 = vpop.f32.mrb[179].mxu1 }
0x2004   :  { %10036 = vmatmul.mubr.msk.bf16.gmra.mrb[184].mxu0 %vm2813_vm12, %v6530_v21 }
0x2005   :  { %10039 = vmatprep.mubr.msk.bf16.mxu0 %vm10779_vm5, %v10778_v51 }
0x2007   :  { %v6507_v18 = vpop.f32.mrb[180].mxu1 }
0x2008   :  { %v10019_v58 = vpop.f32.mrb[181].mxu1 }
0x2009   :  { %v6510_v59 = vpop.f32.mrb[182].mxu1 }
0x200a   :  { %v6531_v31 = vpack.c.bf16 %v6510_v59, %v6507_v18  ;;  %v10020_v47 = vpop.f32.mrb[183].mxu1 }
0x200c   :  { %10040 = vmatmul.mubr.msk.bf16.gmra.mrb[188].mxu0 %vm2813_vm12, %v6531_v31 }
0x200d   :  { %10043 = vmatprep.mubr.msk.bf16.mxu0 %vm10779_vm5, %v10778_v51 }
0x203a   :  { %v6515_v15 = vpop.f32.mrb[184].mxu1 }
0x203b   :  { %v10023_v48 = vpop.f32.mrb[185].mxu1 }
0x203c   :  { %v6518_v54 = vpop.f32.mrb[186].mxu1 }
0x203d   :  { %v6532_v2 = vpack.c.bf16 %v6518_v54, %v6515_v15  ;;  %v10024_v3 = vpop.f32.mrb[187].mxu1 }
0x203f   :  { %10044 = vmatmul.mubr.msk.bf16.gmra.mrb[192].mxu0 %vm2813_vm12, %v6532_v2 }
0x2040   :  { %10047 = vmatprep.mubr.msk.bf16.mxu0 %vm10779_vm5, %v10778_v51 }
0x2042   :  { %v6523_v45 = vpop.f32.mrb[188].mxu1 }
0x2043   :  { %v10027_v13 = vpop.f32.mrb[189].mxu1  ;;  %v6533_v24 = vpack.c.bf16 %v6523_v45, %v6523_v45 }
0x2044   :  { %v6526_v5 = vpop.f32.mrb[190].mxu1 }
0x2045   :  { %v10028_v32 = vpop.f32.mrb[191].mxu1 }
0x2047   :  { %10048 = vmatmul.mubr.msk.bf16.gmra.mrb[196].mxu0 %vm2813_vm12, %v6533_v24 }
0x2048   :  { %10091 = vmatprep.mubr.msk.bf16.mxu0 %vm10779_vm5, %v10778_v51 }
0x204a   :  { %v6717_v35 = vpop.f32.mrb[192].mxu1 }
0x204b   :  { %v13687_v30 = vmul.f32 0.35355338, %v6717_v35  ;;  %v10063_v23 = vpop.f32.mrb[193].mxu1 }
0x204c   :  { %v6720_v0 = vpop.f32.mrb[194].mxu1 }
0x204d   :  { %v13689_v36 = vmul.f32 0.35355338, %v6720_v0  ;;  %v10064_v44 = vpop.f32.mrb[195].mxu1  ;;  %v6764_v10 = vsel %vm2925_vm13, %v13687_v30, -inf }
0x204e   :  { %6765 = vmax.xlane.f32.xlu1 %v6764_v10 }
0x204f   :  { %v6767_v1 = vsel %vm2925_vm13, %v13689_v36, -inf }
0x2050   :  { %6768 = vmax.xlane.f32.xlu0 %v6767_v1 }
0x2052   :  { %v6725_v7 = vpop.f32.mrb[196].mxu1 }
0x2053   :  { %v13695_v11 = vmul.f32 0.35355338, %v6725_v7  ;;  %v10067_v53 = vpop.f32.mrb[197].mxu1 }
0x2054   :  { %v6728_v20 = vpop.f32.mrb[198].mxu1 }
0x2055   :  { %v10068_v33 = vpop.f32.mrb[199].mxu1  ;;  %v6770_v39 = vsel %vm2925_vm13, %v13695_v11, -inf }
0x2056   :  { %6771 = vmax.xlane.f32.xlu0 %v6770_v39 }
0x205a   :  { %v6733_v41 = vpop.f32.mrb[200].mxu1 }
0x205b   :  { %v13699_v38 = vmul.f32 0.35355338, %v6733_v41  ;;  %v10071_v34 = vpop.f32.mrb[201].mxu1 }
0x205c   :  { %v6736_v17 = vpop.f32.mrb[202].mxu1 }
0x205d   :  { %v10072_v37 = vpop.f32.mrb[203].mxu1  ;;  %v6776_v63 = vsel %vm2925_vm13, %v13699_v38, -inf  ;;  %v13715_v2 = vmul.f32 0.35355338, %v6736_v17 }
0x205e   :  { %6777 = vmax.xlane.f32.xlu0 %v6776_v63 }
0x205f   :  { %6877 = vrot.lane.b32.xlu1 %v13010_v40, %s10790_s14  ;;  %v13713_v40 = vmul.f32 0.35355338, %v6728_v20  ;;  %v6779_v13 = vsel %vm2925_vm13, %v13715_v2, -inf }
0x2061   :  { %v6773_v3 = vsel %vm2925_vm13, %v13713_v40, -inf }
0x2062   :  { %v6741_v55 = vpop.f32.mrb[204].mxu1 }
0x2063   :  { %v13705_v49 = vmul.f32 0.35355338, %v6741_v55  ;;  %v10075_v21 = vpop.f32.mrb[205].mxu1 }
0x2064   :  { %v6744_v25 = vpop.f32.mrb[206].mxu1 }
0x2065   :  { %v10076_v18 = vpop.f32.mrb[207].mxu1  ;;  %v6782_v58 = vsel %vm2925_vm13, %v13705_v49, -inf  ;;  %v13721_v45 = vmul.f32 0.35355338, %v6744_v25 }
0x2066   :  { %6783 = vmax.xlane.f32.xlu0 %v6782_v58  ;;  %v10717_v58 = vld [vmem:[#allocation2] sm:$0xff] }
0x2067   :  { %v6785_v5 = vsel %vm2925_vm13, %v13721_v45, -inf }
0x206a   :  { %v6749_v59 = vpop.f32.mrb[208].mxu1 }
0x206b   :  { %v13709_v31 = vmul.f32 0.35355338, %v6749_v59  ;;  %v10079_v47 = vpop.f32.mrb[209].mxu1 }
0x206c   :  { %v6752_v15 = vpop.f32.mrb[210].mxu1 }
0x206d   :  { %v10080_v48 = vpop.f32.mrb[211].mxu1  ;;  %v6788_v54 = vsel %vm2925_vm13, %v13709_v31, -inf }
0x206e   :  { %6789 = vmax.xlane.f32.xlu0 %v6788_v54  ;;  %v10718_v48 = vld [vmem:[#allocation2 + $0x8] sm:$0xff] }
0x2083   :  { %6774 = vmax.xlane.f32.xlu1 %v6773_v3 }
0x2084   :  { %6879 = vrot.lane.b32.xlu0 %v13014_v46, %s10790_s14 }
0x2087   :  { %6780 = vmax.xlane.f32.xlu1 %v6779_v13 }
0x208b   :  { %6786 = vmax.xlane.f32.xlu1 %v6785_v5  ;;  %v10719_v5 = vld [vmem:[#allocation2 + $0x10] sm:$0xff] }
0x209c   :  { %6881 = vrot.lane.b32.xlu1 %v13018_v14, %s10790_s14 }
0x20cd   :  { %v6586_v24 = vpop.f32.mrb[180].mxu0 }
0x20ce   :  { %v13730_v32 = vadd.f32 %v6586_v24, %v13510_v26  ;;  %v10033_v35 = vpop.f32.mrb[181].mxu0 }
0x20cf   :  { %v6589_v23 = vpop.f32.mrb[182].mxu0 }
0x20d0   :  { %v13733_v46 = vadd.f32 %v6589_v23, %v13512_v42  ;;  %v10034_v0 = vpop.f32.mrb[183].mxu0 }
0x20d7   :  { %v6594_v44 = vpop.f32.mrb[184].mxu0 }
0x20d8   :  { %v13736_v10 = vadd.f32 %v6594_v44, %v13514_v62  ;;  %v10037_v1 = vpop.f32.mrb[185].mxu0 }
0x20d9   :  { %v6597_v7 = vpop.f32.mrb[186].mxu0  ;;  %v10720_v1 = vld [vmem:[#allocation2 + $0x20] sm:$0xff] }
0x20da   :  { %v13739_v53 = vadd.f32 %v6597_v7, %v13516_v43  ;;  %v10038_v14 = vpop.f32.mrb[187].mxu0 }
0x20db   :  { %v6766_v20 = vpop.xlane.xlu1 %6765 }
0x20dc   :  { %v6791_v26 = vsub.f32 %v13687_v30, %v6766_v20 }
0x20dd   :  { %v6769_v33 = vpop.xlane.xlu0 %6768 }
0x20de   :  { %v6800_v39 = vmul.f32 1.442695, %v6791_v26  ;;  %v6792_v41 = vsub.f32 %v13689_v36, %v6769_v33  ;;  %v10721_v26 = vld [vmem:[#allocation2 + $0x30] sm:$0xff] }
0x20df   :  { %v6878_v42 = vpop.permute.xlu1 %6877  ;;  %v6602_v34 = vpop.f32.mrb[188].mxu0 }
0x20e0   :  { %10637 = vpow2.f32 %v6800_v39  ;;  %v6802_v17 = vmul.f32 1.442695, %v6792_v41  ;;  %v13744_v62 = vadd.f32 %v6602_v34, %v13518_v6  ;;  %v10041_v37 = vpop.f32.mrb[189].mxu0  ;;  %10082 = vmatpush3.bf16.msra.mxu0 %v6878_v42 }
0x20e1   :  { %v6605_v63 = vpop.f32.mrb[190].mxu0  ;;  %10083 = vmatprep.subr.bf16.mxu0 %v10778_v51 }
0x20e2   :  { %10639 = vpow2.f32 %v6802_v17  ;;  %v13748_v43 = vadd.f32 %v6605_v63, %v13520_v16  ;;  %v10042_v30 = vpop.f32.mrb[191].mxu0 }
0x20e3   :  { %v6772_v55 = vpop.xlane.xlu0 %6771 }
0x20e4   :  { %v6793_v36 = vsub.f32 %v13695_v11, %v6772_v55 }
0x20e6   :  { %v6804_v21 = vmul.f32 1.442695, %v6793_v36 }
0x20e8   :  { %10641 = vpow2.f32 %v6804_v21 }
0x20ea   :  { %v10638_v25 = vpop.eup %10637 }
0x20eb   :  { %v6778_v18 = vpop.xlane.xlu0 %6777  ;;  %v13751_v6 = vmul.f32 %v10717_v58, %v10638_v25 }
0x20ec   :  { %v10640_v59 = vpop.eup %10639  ;;  %v6795_v47 = vsub.f32 %v13699_v38, %v6778_v18 }
0x20ed   :  { %v6827_v15 = vsel %vm2925_vm13, %v13751_v6, 0.0  ;;  %v13756_v16 = vmul.f32 %v10718_v48, %v10640_v59 }
0x20ee   :  { %v6808_v54 = vmul.f32 1.442695, %v6795_v47  ;;  %6828 = vadd.xlane.f32.xlu1 %v6827_v15 }
0x20ef   :  { %v6830_v11 = vsel %vm2925_vm13, %v13756_v16, 0.0 }
0x20f0   :  { %10643 = vpow2.f32 %v6808_v54  ;;  %6831 = vadd.xlane.f32.xlu0 %v6830_v11 }
0x20f2   :  { %v10642_v3 = vpop.eup %10641 }
0x20f3   :  { %v6784_v13 = vpop.xlane.xlu0 %6783  ;;  %v13760_v24 = vmul.f32 %v10719_v5, %v10642_v3 }
0x20f4   :  { %v6797_v38 = vsub.f32 %v13705_v49, %v6784_v13 }
0x20f5   :  { %v6833_v35 = vsel %vm2925_vm13, %v13760_v24, 0.0 }
0x20f6   :  { %v6812_v23 = vmul.f32 1.442695, %v6797_v38  ;;  %6834 = vadd.xlane.f32.xlu1 %v6833_v35 }
0x20f8   :  { %10645 = vpow2.f32 %v6812_v23 }
0x20fa   :  { %v10644_v0 = vpop.eup %10643 }
0x20fb   :  { %v6790_v44 = vpop.xlane.xlu0 %6789  ;;  %v13765_v7 = vmul.f32 %v10720_v1, %v10644_v0  ;;  %v10724_v1 = vld [vmem:[#allocation2 + $0x38] sm:$0xff] }
0x20fc   :  { %v6799_v38 = vsub.f32 %v13709_v31, %v6790_v44 }
0x20fd   :  { %v6839_v14 = vsel %vm2925_vm13, %v13765_v7, 0.0 }
0x20fe   :  { %6840 = vadd.xlane.f32.xlu1 %v6839_v14  ;;  %v6816_v23 = vmul.f32 1.442695, %v6799_v38 }
0x20ff   :  { %v6880_v20 = vpop.permute.xlu0 %6879 }
0x2100   :  { %10084 = vmatpush3.bf16.msra.mxu0 %v6880_v20 }
0x2101   :  { %10085 = vmatprep.subr.bf16.mxu0 %v10778_v51 }
0x2102   :  { %v10646_v49 = vpop.eup %10645 }
0x2103   :  { %v13770_v33 = vmul.f32 %v10721_v26, %v10646_v49  ;;  %v10725_v26 = vld [vmem:[#allocation2 + $0x40] sm:$0xff] }
0x2105   :  { %v6845_v39 = vsel %vm2925_vm13, %v13770_v33, 0.0 }
0x2106   :  { %6846 = vadd.xlane.f32.xlu1 %v6845_v39 }
0x2110   :  { %v6775_v41 = vpop.xlane.xlu1 %6774 }
0x2111   :  { %v6794_v42 = vsub.f32 %v13713_v40, %v6775_v41 }
0x2112   :  { %v6610_v34 = vpop.f32.mrb[192].mxu0 }
0x2113   :  { %v6806_v17 = vmul.f32 1.442695, %v6794_v42  ;;  %v13776_v37 = vadd.f32 %v6610_v34, %v13522_v27  ;;  %v10045_v63 = vpop.f32.mrb[193].mxu0 }
0x2114   :  { %v6781_v30 = vpop.xlane.xlu1 %6780  ;;  %v6613_v55 = vpop.f32.mrb[194].mxu0 }
0x2115   :  { %10647 = vpow2.f32 %v6806_v17  ;;  %v6796_v36 = vsub.f32 %v13715_v2, %v6781_v30  ;;  %v13780_v21 = vadd.f32 %v6613_v55, %v13524_v60  ;;  %v10046_v25 = vpop.f32.mrb[195].mxu0  ;;  %v10722_v2 = vld [vmem:[#allocation2 + $0x18] sm:$0xff] }
0x2117   :  { %v6810_v18 = vmul.f32 1.442695, %v6796_v36  ;;  %6885 = vrot.lane.b32.xlu1 %v13026_v29, %s10790_s14  ;;  %v10723_v29 = vld [vmem:[#allocation2 + $0x28] sm:$0xff] }
0x2118   :  { %v6787_v40 = vpop.xlane.xlu1 %6786 }
0x2119   :  { %10649 = vpow2.f32 %v6810_v18 }
0x211a   :  { %v6618_v58 = vpop.f32.mrb[196].mxu0 }
0x211b   :  { %v13785_v27 = vadd.f32 %v6618_v58, %v13526_v56  ;;  %v10049_v59 = vpop.f32.mrb[197].mxu0  ;;  %v6798_v56 = vsub.f32 %v13721_v45, %v6787_v40 }
0x211c   :  { %v6882_v47 = vpop.permute.xlu1 %6881  ;;  %v6621_v15 = vpop.f32.mrb[198].mxu0 }
0x211d   :  { %v10050_v48 = vpop.f32.mrb[199].mxu0  ;;  %10086 = vmatpush3.bf16.msra.mxu0 %v6882_v47  ;;  %v6814_v35 = vmul.f32 1.442695, %v6798_v56 }
0x211e   :  { %10087 = vmatprep.subr.bf16.mxu0 %v10778_v51 }
0x211f   :  { %v10648_v60 = vpop.eup %10647  ;;  %10651 = vpow2.f32 %v6814_v35 }
0x2120   :  { %v6821_v54 = vmul.f32 %v10722_v2, %v10648_v60  ;;  %10653 = vpow2.f32 %v6816_v23 }
0x2122   :  { %v6836_v11 = vsel %vm2925_vm13, %v6821_v54, 0.0 }
0x2123   :  { %v10650_v3 = vpop.eup %10649  ;;  %6837 = vadd.xlane.f32.xlu0 %v6836_v11 }
0x2124   :  { %v6823_v13 = vmul.f32 %v10723_v29, %v10650_v3 }
0x2126   :  { %v6842_v5 = vsel %vm2925_vm13, %v6823_v13, 0.0 }
0x2127   :  { %6843 = vadd.xlane.f32.xlu0 %v6842_v5 }
0x2129   :  { %v10652_v0 = vpop.eup %10651 }
0x212a   :  { %v6825_v14 = vmul.f32 %v10724_v1, %v10652_v0  ;;  %v10654_v20 = vpop.eup %10653  ;;  %v5294_v0 = vld [vmem:[%s14156_s1 + $0xec] sm:$0xf] }
0x212b   :  { %v6826_v39 = vmul.f32 %v10725_v26, %v10654_v20 }
0x212c   :  { %v6848_v49 = vsel %vm2925_vm13, %v6825_v14, 0.0 }
0x212d   :  { %v6851_v41 = vsel %vm2925_vm13, %v6826_v39, 0.0 }
0x213d   :  { %6883 = vrot.lane.b32.xlu0 %v13022_v12, %s10790_s14 }
0x215c   :  { %6849 = vadd.xlane.f32.xlu0 %v6848_v49 }
0x2160   :  { %6852 = vadd.xlane.f32.xlu0 %v6851_v41 }
0x217b   :  { %v6829_v12 = vpop.xlane.xlu1 %6828 }
0x217d   :  { %v6832_v45 = vpop.xlane.xlu0 %6831 }
0x217e   :  { %10655 = vrcp.f32 %v6832_v45 }
0x217f   :  { %10657 = vrcp.f32 %v6829_v12 }
0x2183   :  { %v6835_v42 = vpop.xlane.xlu1 %6834 }
0x2188   :  { %v10656_v63 = vpop.eup %10655 }
0x2189   :  { %v10658_v55 = vpop.eup %10657  ;;  %v6864_v25 = vmul.f32 %v10656_v63, %v13756_v16 }
0x218a   :  { %v6863_v18 = vmul.f32 %v10658_v55, %v13751_v6 }
0x218b   :  { %v6841_v31 = vpop.xlane.xlu1 %6840 }
0x218c   :  { %v6872_v58 = vpack.c.bf16 %v6864_v25, %v6863_v18 }
0x2193   :  { %v6847_v34 = vpop.xlane.xlu1 %6846 }
0x2197   :  { %v6886_v36 = vpop.permute.xlu1 %6885 }
0x2198   :  { %v6907_v40 = vsel %vm2444_vm9, %v6886_v36, 0 }
0x21b0   :  { %v6838_v44 = vpop.xlane.xlu0 %6837 }
0x21b1   :  { %10659 = vrcp.f32 %v6838_v44 }
0x21b2   :  { %10661 = vrcp.f32 %v6835_v42 }
0x21b4   :  { %v6844_v17 = vpop.xlane.xlu0 %6843 }
0x21b5   :  { %10663 = vrcp.f32 %v6844_v17 }
0x21b6   :  { %10665 = vrcp.f32 %v6841_v31 }
0x21b7   :  { %10667 = vrcp.f32 %v6847_v34 }
0x21b8   :  { %v6884_v30 = vpop.permute.xlu0 %6883 }
0x21b9   :  { %10088 = vmatpush3.bf16.msra.mxu0 %v6884_v30 }
0x21ba   :  { %10089 = vmatprep.subr.bf16.mxu0 %v10778_v51 }
0x21bb   :  { %v10660_v59 = vpop.eup %10659 }
0x21bc   :  { %v10662_v47 = vpop.eup %10661  ;;  %v6866_v16 = vmul.f32 %v10660_v59, %v6821_v54 }
0x21bd   :  { %10090 = vmatpush3.bf16.msra.mxu0 %v6907_v40  ;;  %v6865_v15 = vmul.f32 %v10662_v47, %v13760_v24 }
0x21be   :  { %10133 = vmatprep.subr.bf16.mxu0 %v10778_v51 }
0x21bf   :  { %v6873_v48 = vpack.c.bf16 %v6866_v16, %v6865_v15  ;;  %v10664_v6 = vpop.eup %10663  ;;  %v7085_v15 = vld [vmem:[%s14157_s2 + $0x11] sm:$0x1] }
0x21c0   :  { %10092 = vmatmul.mubr.msk.bf16.vlgmr.msra.gmra.mrb[200].mxu0 %vm2925_vm13, %v6872_v58  ;;  %v10666_v60 = vpop.eup %10665  ;;  %v6868_v2 = vmul.f32 %v10664_v6, %v6823_v13 }
0x21c1   :  { %10095 = vmatprep.mubr.msk.bf16.mxu0 %vm10779_vm5, %v10778_v51  ;;  %v6867_v11 = vmul.f32 %v10666_v60, %v13765_v7  ;;  %v10668_v29 = vpop.eup %10667 }
0x21c2   :  { %v6869_v56 = vmul.f32 %v10668_v29, %v13770_v33  ;;  %v7002_v33 = vsel %vm2444_vm9, %v5294_v0, 0 }
0x21c3   :  { %v6874_v3 = vpack.c.bf16 %v6868_v2, %v6867_v11  ;;  %10112 = vmatpush3.bf16.msra.mxu1 %v7002_v33 }
0x21c4   :  { %10157 = vmatprep.subr.bf16.mxu1 %v10778_v51 }
0x21c8   :  { %10096 = vmatmul.mubr.msk.bf16.gmra.mrb[204].mxu0 %vm2925_vm13, %v6873_v48  ;;  %v7086_v48 = vmul.f32 0.5, %v7085_v15 }
0x21c9   :  { %10099 = vmatprep.mubr.msk.bf16.mxu0 %vm10779_vm5, %v10778_v51 }
0x21d0   :  { %10100 = vmatmul.mubr.msk.bf16.gmra.mrb[208].mxu0 %vm2925_vm13, %v6874_v3  ;;  %v13845_v3 = vld [vmem:[%s14157_s2 + $0x10] ss:$0 sm:$0xff] }
0x21d1   :  { %10103 = vmatprep.mubr.msk.bf16.mxu0 %vm10779_vm5, %v10778_v51 }
0x21e9   :  { %v6850_v54 = vpop.xlane.xlu0 %6849 }
0x21ea   :  { %10669 = vrcp.f32 %v6850_v54 }
0x21ed   :  { %v6853_v24 = vpop.xlane.xlu0 %6852 }
0x21ee   :  { %10671 = vrcp.f32 %v6853_v24 }
0x21ef   :  { %10673 = vtanh.f32 %v7086_v48 }
0x21f4   :  { %v10670_v5 = vpop.eup %10669 }
0x21f5   :  { %v6870_v38 = vmul.f32 %v10670_v5, %v6825_v14 }
0x21f7   :  { %v6875_v35 = vpack.c.bf16 %v6870_v38, %v6869_v56 }
0x21f8   :  { %v10672_v13 = vpop.eup %10671 }
0x21f9   :  { %10104 = vmatmul.mubr.msk.bf16.gmra.mrb[212].mxu0 %vm2925_vm13, %v6875_v35  ;;  %v6871_v7 = vmul.f32 %v10672_v13, %v6826_v39  ;;  %v10674_v6 = vpop.eup %10673 }
0x21fa   :  { %10107 = vmatprep.mubr.msk.bf16.mxu0 %vm10779_vm5, %v10778_v51  ;;  %v7088_v60 = vadd.f32 1.0, %v10674_v6 }
0x21fb   :  { %v6876_v23 = vpack.c.bf16 %v6871_v7, %v6871_v7 }
0x21fc   :  { %v7089_v2 = vmul.f32 0.5, %v7088_v60 }
0x21fe   :  { %v13849_v24 = vrot.slane %v7089_v2, %v12641_v28 }
0x2201   :  { %10108 = vmatmul.mubr.msk.bf16.gmra.mrb[216].mxu0 %vm2925_vm13, %v6876_v23 }
0x2202   :  { %10137 = vmatprep.mubr.msk.bf16.mxu0 %vm10779_vm5, %v10778_v51 }
0x2293   :  { %v6943_v1 = vpop.f32.mrb[200].mxu0 }
0x2294   :  { %v10093_v14 = vpop.f32.mrb[201].mxu0 }
0x2295   :  { %v6946_v20 = vpop.f32.mrb[202].mxu0 }
0x2296   :  { %v6981_v49 = vpack.c.bf16 %v6946_v20, %v6943_v1  ;;  %v10094_v26 = vpop.f32.mrb[203].mxu0 }
0x2298   :  { %10114 = vmatmul.mubr.msk.bf16.vlgmr.msra.gmra.mrb[212].mxu1 %vm2813_vm12, %v6981_v49 }
0x2299   :  { %10117 = vmatprep.mubr.msk.bf16.mxu1 %vm10779_vm5, %v10778_v51 }
0x229b   :  { %v6951_v39 = vpop.f32.mrb[204].mxu0 }
0x229c   :  { %v10097_v41 = vpop.f32.mrb[205].mxu0 }
0x229d   :  { %v6954_v12 = vpop.f32.mrb[206].mxu0 }
0x229e   :  { %v6982_v45 = vpack.c.bf16 %v6954_v12, %v6951_v39  ;;  %v10098_v42 = vpop.f32.mrb[207].mxu0 }
0x22a0   :  { %10118 = vmatmul.mubr.msk.bf16.gmra.mrb[216].mxu1 %vm2813_vm12, %v6982_v45 }
0x22a1   :  { %10121 = vmatprep.mubr.msk.bf16.mxu1 %vm10779_vm5, %v10778_v51 }
0x22a3   :  { %v6959_v31 = vpop.f32.mrb[208].mxu0 }
0x22a4   :  { %v10101_v44 = vpop.f32.mrb[209].mxu0 }
0x22a5   :  { %v6962_v34 = vpop.f32.mrb[210].mxu0 }
0x22a6   :  { %v6983_v17 = vpack.c.bf16 %v6962_v34, %v6959_v31  ;;  %v10102_v63 = vpop.f32.mrb[211].mxu0 }
0x22a8   :  { %10122 = vmatmul.mubr.msk.bf16.gmra.mrb[220].mxu1 %vm2813_vm12, %v6983_v17 }
0x22a9   :  { %10125 = vmatprep.mubr.msk.bf16.mxu1 %vm10779_vm5, %v10778_v51 }
0x22cc   :  { %v6967_v30 = vpop.f32.mrb[212].mxu0 }
0x22cd   :  { %v10105_v55 = vpop.f32.mrb[213].mxu0 }
0x22ce   :  { %v6970_v36 = vpop.f32.mrb[214].mxu0 }
0x22cf   :  { %v6984_v25 = vpack.c.bf16 %v6970_v36, %v6967_v30  ;;  %v10106_v18 = vpop.f32.mrb[215].mxu0 }
0x22d1   :  { %10126 = vmatmul.mubr.msk.bf16.gmra.mrb[224].mxu1 %vm2813_vm12, %v6984_v25 }
0x22d2   :  { %10129 = vmatprep.mubr.msk.bf16.mxu1 %vm10779_vm5, %v10778_v51 }
0x22d4   :  { %v6975_v40 = vpop.f32.mrb[216].mxu0 }
0x22d5   :  { %v10109_v58 = vpop.f32.mrb[217].mxu0  ;;  %v6985_v47 = vpack.c.bf16 %v6975_v40, %v6975_v40 }
0x22d6   :  { %v6978_v59 = vpop.f32.mrb[218].mxu0 }
0x22d7   :  { %v10110_v16 = vpop.f32.mrb[219].mxu0 }
0x22d9   :  { %10130 = vmatmul.mubr.msk.bf16.gmra.mrb[228].mxu1 %vm2813_vm12, %v6985_v47 }
0x22da   :  { %10161 = vmatprep.mubr.msk.bf16.mxu1 %vm10779_vm5, %v10778_v51 }
0x236b   :  { %v7038_v11 = vpop.f32.mrb[212].mxu1 }
0x236c   :  { %v7076_v54 = vadd.f32 %v7038_v11, %v13730_v32  ;;  %v10115_v29 = vpop.f32.mrb[213].mxu1 }
0x236d   :  { %v7041_v5 = vpop.f32.mrb[214].mxu1 }
0x236e   :  { %v7095_v56 = vadd.f32 %v13845_v3, %v7076_v54  ;;  %v7077_v38 = vadd.f32 %v7041_v5, %v13733_v46  ;;  %v10116_v35 = vpop.f32.mrb[215].mxu1 }
0x2370   :  { %v7108_v13 = vmul.f32 %v13849_v24, %v7095_v56  ;;  %v7096_v7 = vadd.f32 %v13845_v3, %v7077_v38 }
0x2372   :  { %v7109_v23 = vmul.f32 %v13849_v24, %v7096_v7  ;;  %v13857_v0 = vadd.f32 %v7108_v13, %v12860_v19 }
0x2373   :  { %v7046_v32 = vpop.f32.mrb[216].mxu1 }
0x2374   :  { %v7078_v33 = vadd.f32 %v7046_v32, %v13736_v10  ;;  %v10119_v1 = vpop.f32.mrb[217].mxu1  ;;  %v7128_v14 = vsel %vm2531_vm11, %v13857_v0, 0.0  ;;  %v13863_v20 = vadd.f32 %v7109_v23, %v12863_v52 }
0x2375   :  { %7129 = vadd.xlane.f32.xlu0 %v7128_v14  ;;  %v7049_v46 = vpop.f32.mrb[218].mxu1 }
0x2376   :  { %v7097_v49 = vadd.f32 %v13845_v3, %v7078_v33  ;;  %v7079_v26 = vadd.f32 %v7049_v46, %v13739_v53  ;;  %v10120_v39 = vpop.f32.mrb[219].mxu1  ;;  %v7131_v10 = vsel %vm2531_vm11, %v13863_v20, 0.0 }
0x2378   :  { %v7110_v19 = vmul.f32 %v13849_v24, %v7097_v49  ;;  %v7098_v41 = vadd.f32 %v13845_v3, %v7079_v26 }
0x2379   :  { %7132 = vadd.xlane.f32.xlu0 %v7131_v10 }
0x237a   :  { %v7111_v12 = vmul.f32 %v13849_v24, %v7098_v41  ;;  %v13873_v52 = vadd.f32 %v7110_v19, %v12870_v22 }
0x237b   :  { %v7054_v45 = vpop.f32.mrb[220].mxu1 }
0x237c   :  { %v7080_v42 = vadd.f32 %v7054_v45, %v13744_v62  ;;  %v10123_v31 = vpop.f32.mrb[221].mxu1  ;;  %v7134_v53 = vsel %vm2531_vm11, %v13873_v52, 0.0  ;;  %v13879_v44 = vadd.f32 %v7111_v12, %v12873_v61 }
0x237d   :  { %7135 = vadd.xlane.f32.xlu0 %v7134_v53  ;;  %v7057_v34 = vpop.f32.mrb[222].mxu1 }
0x237e   :  { %v7099_v17 = vadd.f32 %v13845_v3, %v7080_v42  ;;  %v7081_v63 = vadd.f32 %v7057_v34, %v13748_v43  ;;  %v10124_v30 = vpop.f32.mrb[223].mxu1  ;;  %v7137_v22 = vsel %vm2531_vm11, %v13879_v44, 0.0 }
0x237f   :  { %7138 = vadd.xlane.f32.xlu1 %v7137_v22 }
0x2380   :  { %v7112_v62 = vmul.f32 %v13849_v24, %v7099_v17  ;;  %v7100_v55 = vadd.f32 %v13845_v3, %v7081_v63 }
0x2382   :  { %v7113_v36 = vmul.f32 %v13849_v24, %v7100_v55  ;;  %v13889_v61 = vadd.f32 %v7112_v62, %v12880_v57 }
0x2384   :  { %v7140_v25 = vsel %vm2531_vm11, %v13889_v61, 0.0  ;;  %v13894_v18 = vadd.f32 %v7113_v36, %v12883_v8  ;;  %v10313_v36 = vld [vmem:[%s14156_s1 + $0xf0] sm:$0xff]  }
0x2385   :  { %7141 = vadd.xlane.f32.xlu0 %v7140_v25  ;;  %10134 = vmatpush3.bf16.msra.mxu0 %v10313_v36  ;;  %v10314_v25 = vld [vmem:[%s14156_s1 + $0xf8] sm:$0xff]  }
0x2386   :  { %v7143_v43 = vsel %vm2531_vm11, %v13894_v18, 0.0  ;;  %10135 = vmatprep.subr.bf16.mxu0 %v10778_v51 }
0x2389   :  { %7144 = vadd.xlane.f32.xlu0 %v7143_v43  ;;  %10136 = vmatpush3.bf16.msra.mxu0 %v10314_v25 }
0x238a   :  { %10181 = vmatprep.subr.bf16.mxu0 %v10778_v51 }
0x23a4   :  { %v7062_v40 = vpop.f32.mrb[224].mxu1 }
0x23a5   :  { %v7082_v58 = vadd.f32 %v7062_v40, %v13776_v37  ;;  %v10127_v59 = vpop.f32.mrb[225].mxu1 }
0x23a6   :  { %v7065_v47 = vpop.f32.mrb[226].mxu1 }
0x23a7   :  { %v7101_v16 = vadd.f32 %v13845_v3, %v7082_v58  ;;  %v7083_v57 = vadd.f32 %v7065_v47, %v13780_v21  ;;  %v10128_v15 = vpop.f32.mrb[227].mxu1 }
0x23a9   :  { %v7114_v48 = vmul.f32 %v13849_v24, %v7101_v16  ;;  %v7102_v8 = vadd.f32 %v13845_v3, %v7083_v57 }
0x23ab   :  { %v7115_v6 = vmul.f32 %v13849_v24, %v7102_v8  ;;  %v13905_v60 = vadd.f32 %v7114_v48, %v12890_v4 }
0x23ac   :  { %v7070_v2 = vpop.f32.mrb[228].mxu1 }
0x23ad   :  { %v7084_v11 = vadd.f32 %v7070_v2, %v13785_v27  ;;  %v10131_v37 = vpop.f32.mrb[229].mxu1  ;;  %v7146_v54 = vsel %vm2531_vm11, %v13905_v60, 0.0  ;;  %v13911_v29 = vadd.f32 %v7115_v6, %v12893_v9 }
0x23ae   :  { %7147 = vadd.xlane.f32.xlu0 %v7146_v54  ;;  %v7073_v21 = vpop.f32.mrb[230].mxu1 }
0x23af   :  { %v7103_v5 = vadd.f32 %v13845_v3, %v7084_v11  ;;  %v10132_v56 = vpop.f32.mrb[231].mxu1  ;;  %v7149_v4 = vsel %vm2531_vm11, %v13911_v29, 0.0 }
0x23b1   :  { %v7116_v38 = vmul.f32 %v13849_v24, %v7103_v5 }
0x23b2   :  { %7150 = vadd.xlane.f32.xlu0 %v7149_v4 }
0x23b3   :  { %v13918_v27 = vadd.f32 %v7116_v38, %v12900_v50 }
0x23b5   :  { %v7152_v35 = vsel %vm2531_vm11, %v13918_v27, 0.0 }
0x23b6   :  { %7153 = vadd.xlane.f32.xlu0 %v7152_v35 }
0x2402   :  { %v7130_v9 = vpop.xlane.xlu0 %7129 }
0x2403   :  { %v7155_v13 = vmul.f32 0.03125, %v7130_v9 }
0x2405   :  { %v13923_v7 = vsub.f32 %v13857_v0, %v7155_v13 }
0x2406   :  { %v7133_v3 = vpop.xlane.xlu0 %7132 }
0x2407   :  { %v7156_v23 = vmul.f32 0.03125, %v7133_v3  ;;  %v7173_v24 = vmul.f32 %v13923_v7, %v13923_v7 }
0x2409   :  { %v13928_v32 = vsub.f32 %v13863_v20, %v7156_v23  ;;  %v7182_v50 = vsel %vm2531_vm11, %v7173_v24, 0.0 }
0x240a   :  { %v7136_v33 = vpop.xlane.xlu0 %7135  ;;  %7183 = vadd.xlane.f32.xlu0 %v7182_v50 }
0x240b   :  { %v7157_v1 = vmul.f32 0.03125, %v7136_v33  ;;  %v7174_v14 = vmul.f32 %v13928_v32, %v13928_v32 }
0x240c   :  { %v7139_v46 = vpop.xlane.xlu1 %7138 }
0x240d   :  { %v13934_v49 = vsub.f32 %v13873_v52, %v7157_v1  ;;  %v7158_v26 = vmul.f32 0.03125, %v7139_v46  ;;  %v7185_v39 = vsel %vm2531_vm11, %v7174_v14, 0.0  ;;  %v13988_v46 = vld [vmem:[%s14157_s2 + $0x12] ss:$0 sm:$0xff] }
0x240e   :  { %7186 = vadd.xlane.f32.xlu0 %v7185_v39 }
0x240f   :  { %v13938_v19 = vsub.f32 %v13879_v44, %v7158_v26  ;;  %v7175_v41 = vmul.f32 %v13934_v49, %v13934_v49 }
0x2411   :  { %v7188_v10 = vsel %vm2531_vm11, %v7175_v41, 0.0  ;;  %v7176_v12 = vmul.f32 %v13938_v19, %v13938_v19 }
0x2412   :  { %v7142_v45 = vpop.xlane.xlu0 %7141  ;;  %7189 = vadd.xlane.f32.xlu0 %v7188_v10 }
0x2413   :  { %v7159_v42 = vmul.f32 0.03125, %v7142_v45  ;;  %v7191_v53 = vsel %vm2531_vm11, %v7176_v12, 0.0 }
0x2415   :  { %v13946_v31 = vsub.f32 %v13889_v61, %v7159_v42  ;;  %v8317_v42 = vld [vmem:[%s14157_s2 + $0x13] ss:$0 sm:$0xff] }
0x2416   :  { %v7145_v34 = vpop.xlane.xlu0 %7144  ;;  %7192 = vadd.xlane.f32.xlu0 %v7191_v53 }
0x2417   :  { %v7160_v17 = vmul.f32 0.03125, %v7145_v34  ;;  %v7177_v63 = vmul.f32 %v13946_v31, %v13946_v31 }
0x2419   :  { %v13952_v30 = vsub.f32 %v13894_v18, %v7160_v17  ;;  %v7194_v22 = vsel %vm2531_vm11, %v7177_v63, 0.0 }
0x241a   :  { %7195 = vadd.xlane.f32.xlu1 %v7194_v22 }
0x241b   :  { %v7178_v62 = vmul.f32 %v13952_v30, %v13952_v30 }
0x241d   :  { %v7197_v55 = vsel %vm2531_vm11, %v7178_v62, 0.0 }
0x241e   :  { %7198 = vadd.xlane.f32.xlu0 %v7197_v55 }
0x243b   :  { %v7148_v43 = vpop.xlane.xlu0 %7147 }
0x243c   :  { %v7161_v40 = vmul.f32 0.03125, %v7148_v43 }
0x243e   :  { %v13967_v58 = vsub.f32 %v13905_v60, %v7161_v40 }
0x243f   :  { %v7151_v59 = vpop.xlane.xlu0 %7150 }
0x2440   :  { %v7162_v47 = vmul.f32 0.03125, %v7151_v59  ;;  %v7179_v16 = vmul.f32 %v13967_v58, %v13967_v58 }
0x2442   :  { %v13972_v57 = vsub.f32 %v13911_v29, %v7162_v47  ;;  %v7200_v15 = vsel %vm2531_vm11, %v7179_v16, 0.0 }
0x2443   :  { %7201 = vadd.xlane.f32.xlu1 %v7200_v15  ;;  %v7154_v48 = vpop.xlane.xlu0 %7153 }
0x2444   :  { %v7163_v8 = vmul.f32 0.03125, %v7154_v48  ;;  %v7180_v6 = vmul.f32 %v13972_v57, %v13972_v57 }
0x2446   :  { %v13978_v2 = vsub.f32 %v13918_v27, %v7163_v8  ;;  %v7203_v11 = vsel %vm2531_vm11, %v7180_v6, 0.0 }
0x2447   :  { %7204 = vadd.xlane.f32.xlu0 %v7203_v11 }
0x2448   :  { %v7181_v37 = vmul.f32 %v13978_v2, %v13978_v2 }
0x244a   :  { %v7206_v54 = vsel %vm2531_vm11, %v7181_v37, 0.0 }
0x244b   :  { %7207 = vadd.xlane.f32.xlu1 %v7206_v54 }
0x2497   :  { %v7184_v21 = vpop.xlane.xlu0 %7183 }
0x2498   :  { %v7209_v5 = vmul.f32 0.03125, %v7184_v21 }
0x249a   :  { %v7218_v56 = vadd.f32 1e-05, %v7209_v5 }
0x249b   :  { %v7187_v38 = vpop.xlane.xlu0 %7186 }
0x249c   :  { %10675 = vrsqrt.f32 %v7218_v56  ;;  %v7210_v4 = vmul.f32 0.03125, %v7187_v38 }
0x249e   :  { %v7219_v35 = vadd.f32 1e-05, %v7210_v4 }
0x249f   :  { %v7190_v9 = vpop.xlane.xlu0 %7189 }
0x24a0   :  { %10677 = vrsqrt.f32 %v7219_v35  ;;  %v7211_v13 = vmul.f32 0.03125, %v7190_v9 }
0x24a2   :  { %v7220_v3 = vadd.f32 1e-05, %v7211_v13 }
0x24a3   :  { %v7193_v23 = vpop.xlane.xlu0 %7192 }
0x24a4   :  { %10679 = vrsqrt.f32 %v7220_v3  ;;  %v7212_v24 = vmul.f32 0.03125, %v7193_v23 }
0x24a6   :  { %v10676_v50 = vpop.eup %10675  ;;  %v7221_v33 = vadd.f32 1e-05, %v7212_v24 }
0x24a7   :  { %v7236_v1 = vmul.f32 %v10676_v50, %v13923_v7  ;;  %v7196_v14 = vpop.xlane.xlu1 %7195 }
0x24a8   :  { %10681 = vrsqrt.f32 %v7221_v33  ;;  %v7213_v26 = vmul.f32 0.03125, %v7196_v14 }
0x24a9   :  { %v7249_v10 = vmul.f32 %v13988_v46, %v7236_v1 }
0x24aa   :  { %v10678_v39 = vpop.eup %10677  ;;  %v7222_v41 = vadd.f32 1e-05, %v7213_v26 }
0x24ab   :  { %v7237_v12 = vmul.f32 %v10678_v39, %v13928_v32  ;;  %v7199_v45 = vpop.xlane.xlu0 %7198  ;;  %v7262_v63 = vadd.f32 %v8317_v42, %v7249_v10 }
0x24ac   :  { %10683 = vrsqrt.f32 %v7222_v41  ;;  %v7214_v7 = vmul.f32 0.03125, %v7199_v45 }
0x24ad   :  { %v7250_v53 = vmul.f32 %v13988_v46, %v7237_v12 }
0x24ae   :  { %v10680_v34 = vpop.eup %10679  ;;  %v7223_v17 = vadd.f32 1e-05, %v7214_v7 }
0x24af   :  { %v7263_v22 = vadd.f32 %v8317_v42, %v7250_v53  ;;  %v7238_v62 = vmul.f32 %v10680_v34, %v13934_v49 }
0x24b0   :  { %10685 = vrsqrt.f32 %v7223_v17 }
0x24b1   :  { %v7275_v55 = vpack.c.bf16 %v7263_v22, %v7262_v63  ;;  %v7251_v32 = vmul.f32 %v13988_v46, %v7238_v62 }
0x24b2   :  { %v10682_v36 = vpop.eup %10681 }
0x24b3   :  { %v7239_v25 = vmul.f32 %v10682_v36, %v13938_v19  ;;  %10138 = vmatmul.mubr.msk.bf16.vlgmr.msra.gmra.mrb[220].mxu0 %vm2531_vm11, %v7275_v55  ;;  %v7264_v59 = vadd.f32 %v8317_v42, %v7251_v32 }
0x24b4   :  { %10141 = vmatprep.mubr.msk.bf16.mxu0 %vm10779_vm5, %v10778_v51 }
0x24b5   :  { %v7252_v43 = vmul.f32 %v13988_v46, %v7239_v25 }
0x24b6   :  { %v10684_v40 = vpop.eup %10683 }
0x24b7   :  { %v7265_v47 = vadd.f32 %v8317_v42, %v7252_v43  ;;  %v7240_v16 = vmul.f32 %v10684_v40, %v13946_v31 }
0x24b9   :  { %v7276_v49 = vpack.c.bf16 %v7265_v47, %v7264_v59  ;;  %v7253_v48 = vmul.f32 %v13988_v46, %v7240_v16 }
0x24ba   :  { %v10686_v15 = vpop.eup %10685 }
0x24bb   :  { %v7241_v8 = vmul.f32 %v10686_v15, %v13952_v30  ;;  %10142 = vmatmul.mubr.msk.bf16.gmra.mrb[224].mxu0 %vm2531_vm11, %v7276_v49  ;;  %v7266_v6 = vadd.f32 %v8317_v42, %v7253_v48 }
0x24bc   :  { %10145 = vmatprep.mubr.msk.bf16.mxu0 %vm10779_vm5, %v10778_v51 }
0x24bd   :  { %v7254_v19 = vmul.f32 %v13988_v46, %v7241_v8 }
0x24bf   :  { %v7267_v11 = vadd.f32 %v8317_v42, %v7254_v19 }
0x24c1   :  { %v7277_v37 = vpack.c.bf16 %v7267_v11, %v7266_v6 }
0x24c3   :  { %10146 = vmatmul.mubr.msk.bf16.gmra.mrb[228].mxu0 %vm2531_vm11, %v7277_v37 }
0x24c4   :  { %10149 = vmatprep.mubr.msk.bf16.mxu0 %vm10779_vm5, %v10778_v51 }
0x24d0   :  { %v7202_v31 = vpop.xlane.xlu1 %7201 }
0x24d1   :  { %v7215_v54 = vmul.f32 0.03125, %v7202_v31 }
0x24d3   :  { %v7224_v21 = vadd.f32 1e-05, %v7215_v54 }
0x24d4   :  { %v7205_v5 = vpop.xlane.xlu0 %7204 }
0x24d5   :  { %10687 = vrsqrt.f32 %v7224_v21  ;;  %v7216_v30 = vmul.f32 0.03125, %v7205_v5 }
0x24d7   :  { %v7225_v56 = vadd.f32 1e-05, %v7216_v30 }
0x24d8   :  { %v7208_v38 = vpop.xlane.xlu1 %7207 }
0x24d9   :  { %10689 = vrsqrt.f32 %v7225_v56  ;;  %v7217_v4 = vmul.f32 0.03125, %v7208_v38 }
0x24db   :  { %v7226_v35 = vadd.f32 1e-05, %v7217_v4 }
0x24dd   :  { %10691 = vrsqrt.f32 %v7226_v35 }
0x24df   :  { %v10688_v9 = vpop.eup %10687 }
0x24e0   :  { %v7242_v13 = vmul.f32 %v10688_v9, %v13967_v58 }
0x24e2   :  { %v7255_v23 = vmul.f32 %v13988_v46, %v7242_v13 }
0x24e3   :  { %v10690_v3 = vpop.eup %10689 }
0x24e4   :  { %v7243_v24 = vmul.f32 %v10690_v3, %v13972_v57  ;;  %v7268_v1 = vadd.f32 %v8317_v42, %v7255_v23  ;;  %v10315_v57 = vld [vmem:[%s14156_s1 + $0x100] sm:$0xff]  }
0x24e5   :  { %10158 = vmatpush3.bf16.msra.mxu1 %v10315_v57 }
0x24e6   :  { %v7256_v50 = vmul.f32 %v13988_v46, %v7243_v24  ;;  %10159 = vmatprep.subr.bf16.mxu1 %v10778_v51 }
0x24e7   :  { %v10692_v33 = vpop.eup %10691 }
0x24e8   :  { %v7269_v14 = vadd.f32 %v8317_v42, %v7256_v50  ;;  %v7244_v26 = vmul.f32 %v10692_v33, %v13978_v2  ;;  %v10316_v2 = vld [vmem:[%s14156_s1 + $0x108] sm:$0xff]  }
0x24e9   :  { %10160 = vmatpush3.bf16.msra.mxu1 %v10316_v2 }
0x24ea   :  { %v7278_v39 = vpack.c.bf16 %v7269_v14, %v7268_v1  ;;  %v7257_v41 = vmul.f32 %v13988_v46, %v7244_v26  ;;  %v8318_v46 = vld [vmem:[%s14157_s2 + $0x14] ss:$0 sm:$0xff]  ;;  %v10318_v14 = vld [vmem:[%s14156_s1 + $0x118] sm:$0xff]   ;;  %v7393_v26 = vld [vmem:[%s14157_s2 + $0x16] sm:$0x1] }
0x24eb   :  { %v10317_v1 = vld [vmem:[%s14156_s1 + $0x110] sm:$0xff]  }
0x24ec   :  { %10150 = vmatmul.mubr.msk.bf16.gmra.mrb[232].mxu0 %vm2531_vm11, %v7278_v39  ;;  %v7270_v58 = vadd.f32 %v8317_v42, %v7257_v41  ;;  %v7394_v39 = vmul.f32 0.5, %v7393_v26 }
0x24ed   :  { %10153 = vmatprep.mubr.msk.bf16.mxu0 %vm10779_vm5, %v10778_v51  ;;  %10182 = vmatpush3.bf16.msra.mxu0 %v10317_v1 }
0x24ee   :  { %v7279_v10 = vpack.c.bf16 %v7270_v58, %v7270_v58  ;;  %10183 = vmatprep.subr.bf16.mxu0 %v10778_v51  ;;  %10693 = vtanh.f32 %v7394_v39 }
0x24f1   :  { %10184 = vmatpush3.bf16.msra.mxu0 %v10318_v14 }
0x24f2   :  { %10189 = vmatprep.subr.bf16.mxu0 %v10778_v51 }
0x24f4   :  { %10154 = vmatmul.mubr.msk.bf16.gmra.mrb[236].mxu0 %vm2531_vm11, %v7279_v10 }
0x24f5   :  { %10185 = vmatprep.mubr.msk.bf16.mxu0 %vm10779_vm5, %v10778_v51 }
0x24f8   :  { %v10694_v41 = vpop.eup %10693 }
0x24f9   :  { %v7396_v10 = vadd.f32 1.0, %v10694_v41 }
0x2586   :  { %v7346_v12 = vpop.f32.mrb[220].mxu0 }
0x2587   :  { %v7347_v45 = vadd.f32 %v8318_v46, %v7346_v12  ;;  %v10139_v42 = vpop.f32.mrb[221].mxu0  ;;  %v7397_v12 = vmul.f32 0.5, %v7396_v10 }
0x2588   :  { %v7349_v7 = vpop.f32.mrb[222].mxu0 }
0x2589   :  { %v7350_v53 = vadd.f32 %v8318_v46, %v7349_v7  ;;  %v10140_v34 = vpop.f32.mrb[223].mxu0  ;;  %v7384_v17 = vmax.f32 %v7347_v45, 0.0  ;;  %v8326_v45 = vld [vmem:[%s14157_s2 + $0x15] ss:$0 sm:$0xff]  ;;  %v7514_v7 = vrot.slane %v7397_v12, %v12641_v28 }
0x258b   :  { %v7385_v63 = vmax.f32 %v7350_v53, 0.0 }
0x258d   :  { %v7402_v22 = vpack.c.bf16 %v7385_v63, %v7384_v17 }
0x258e   :  { %v7354_v62 = vpop.f32.mrb[224].mxu0 }
0x258f   :  { %v7355_v55 = vadd.f32 %v8318_v46, %v7354_v62  ;;  %v10143_v36 = vpop.f32.mrb[225].mxu0  ;;  %10162 = vmatmul.mubr.msk.bf16.vlgmr.msra.gmra.mrb[232].mxu1 %vm2531_vm11, %v7402_v22 }
0x2590   :  { %v7357_v32 = vpop.f32.mrb[226].mxu0  ;;  %10165 = vmatprep.mubr.msk.bf16.mxu1 %vm10779_vm5, %v10778_v51 }
0x2591   :  { %v7358_v25 = vadd.f32 %v8318_v46, %v7357_v32  ;;  %v10144_v43 = vpop.f32.mrb[227].mxu0  ;;  %v7386_v40 = vmax.f32 %v7355_v55, 0.0 }
0x2593   :  { %v7387_v59 = vmax.f32 %v7358_v25, 0.0 }
0x2595   :  { %v7403_v47 = vpack.c.bf16 %v7387_v59, %v7386_v40 }
0x2596   :  { %v7362_v16 = vpop.f32.mrb[228].mxu0 }
0x2597   :  { %v7363_v49 = vadd.f32 %v8318_v46, %v7362_v16  ;;  %v10147_v15 = vpop.f32.mrb[229].mxu0  ;;  %10166 = vmatmul.mubr.msk.bf16.gmra.mrb[236].mxu1 %vm2531_vm11, %v7403_v47 }
0x2598   :  { %v7365_v48 = vpop.f32.mrb[230].mxu0  ;;  %10169 = vmatprep.mubr.msk.bf16.mxu1 %vm10779_vm5, %v10778_v51 }
0x2599   :  { %v7366_v8 = vadd.f32 %v8318_v46, %v7365_v48  ;;  %v10148_v19 = vpop.f32.mrb[231].mxu0  ;;  %v7388_v6 = vmax.f32 %v7363_v49, 0.0 }
0x259b   :  { %v7389_v11 = vmax.f32 %v7366_v8, 0.0 }
0x259d   :  { %v7404_v37 = vpack.c.bf16 %v7389_v11, %v7388_v6 }
0x259f   :  { %10170 = vmatmul.mubr.msk.bf16.gmra.mrb[240].mxu1 %vm2531_vm11, %v7404_v37 }
0x25a0   :  { %10173 = vmatprep.mubr.msk.bf16.mxu1 %vm10779_vm5, %v10778_v51 }
0x25bf   :  { %v7370_v31 = vpop.f32.mrb[232].mxu0 }
0x25c0   :  { %v7371_v54 = vadd.f32 %v8318_v46, %v7370_v31  ;;  %v10151_v21 = vpop.f32.mrb[233].mxu0 }
0x25c1   :  { %v7373_v5 = vpop.f32.mrb[234].mxu0 }
0x25c2   :  { %v7374_v30 = vadd.f32 %v8318_v46, %v7373_v5  ;;  %v10152_v56 = vpop.f32.mrb[235].mxu0  ;;  %v7390_v38 = vmax.f32 %v7371_v54, 0.0 }
0x25c4   :  { %v7391_v4 = vmax.f32 %v7374_v30, 0.0 }
0x25c6   :  { %v7405_v35 = vpack.c.bf16 %v7391_v4, %v7390_v38 }
0x25c7   :  { %v7378_v9 = vpop.f32.mrb[236].mxu0 }
0x25c8   :  { %v7379_v13 = vadd.f32 %v8318_v46, %v7378_v9  ;;  %v10155_v3 = vpop.f32.mrb[237].mxu0  ;;  %10174 = vmatmul.mubr.msk.bf16.gmra.mrb[244].mxu1 %vm2531_vm11, %v7405_v35 }
0x25c9   :  { %v7381_v23 = vpop.f32.mrb[238].mxu0  ;;  %10177 = vmatprep.mubr.msk.bf16.mxu1 %vm10779_vm5, %v10778_v51 }
0x25ca   :  { %v7392_v24 = vmax.f32 %v7379_v13, 0.0  ;;  %v10156_v50 = vpop.f32.mrb[239].mxu0 }
0x25cc   :  { %v7406_v33 = vpack.c.bf16 %v7392_v24, %v7392_v24 }
0x25d0   :  { %10178 = vmatmul.mubr.msk.bf16.gmra.mrb[248].mxu1 %vm2531_vm11, %v7406_v33 }
0x2662   :  { %v7473_v58 = vpop.f32.mrb[232].mxu1 }
0x2663   :  { %v10163_v57 = vpop.f32.mrb[233].mxu1  ;;  %v7474_v63 = vadd.f32 %v8326_v45, %v7473_v58 }
0x2664   :  { %v7476_v2 = vpop.f32.mrb[234].mxu1 }
0x2665   :  { %v10164_v46 = vpop.f32.mrb[235].mxu1  ;;  %v7477_v36 = vadd.f32 %v8326_v45, %v7476_v2  ;;  %v7515_v43 = vmul.f32 %v7514_v7, %v7474_v63 }
0x2667   :  { %v7516_v47 = vmul.f32 %v7514_v7, %v7477_v36  ;;  %v7524_v19 = vadd.f32 %v7515_v43, %v13857_v0 }
0x266a   :  { %v7481_v42 = vpop.f32.mrb[236].mxu1 }
0x266b   :  { %v7482_v53 = vadd.f32 %v8326_v45, %v7481_v42  ;;  %v10167_v34 = vpop.f32.mrb[237].mxu1 }
0x266c   :  { %v7484_v17 = vpop.f32.mrb[238].mxu1 }
0x266d   :  { %v7517_v22 = vmul.f32 %v7514_v7, %v7482_v53  ;;  %v7485_v62 = vadd.f32 %v8326_v45, %v7484_v17  ;;  %v10168_v55 = vpop.f32.mrb[239].mxu1 }
0x266f   :  { %v7526_v32 = vadd.f32 %v7517_v22, %v13873_v52  ;;  %v7518_v25 = vmul.f32 %v7514_v7, %v7485_v62  ;;  %v7525_v52 = vadd.f32 %v7516_v47, %v13863_v20  ;;  %v8334_v47 = vld [vmem:[%s14157_s2 + $0x17] ss:$0 sm:$0xff] }
0x2671   :  { %v7527_v40 = vadd.f32 %v7518_v25, %v13879_v44  ;;  %v7535_v16 = vsel %vm2531_vm11, %v7526_v32, -inf  ;;  %v7533_v44 = vsel %vm2531_vm11, %v7524_v19, -inf  ;;  %v7534_v21 = vsel %vm2531_vm11, %v7525_v52, -inf  ;;  %v10322_v52 = vld [vmem:[%s14156_s1 + $0x138] sm:$0xff]  }
0x2672   :  { %v7489_v59 = vpop.f32.mrb[240].mxu1 }
0x2673   :  { %v7536_v28 = vsel %vm2531_vm11, %v7527_v40, -inf  ;;  %v7490_v49 = vadd.f32 %v8326_v45, %v7489_v59  ;;  %v10171_v15 = vpop.f32.mrb[241].mxu1  ;;  %v10319_v40 = vld [vmem:[%s14156_s1 + $0x120] sm:$0xff]   ;;  %v10320_v59 = vld [vmem:[%s14156_s1 + $0x128] sm:$0xff]  }
0x2674   :  { %v7541_v48 = vmax.f32 %v7535_v16, %v7536_v28  ;;  %v7492_v8 = vpop.f32.mrb[242].mxu1 }
0x2675   :  { %v7519_v6 = vmul.f32 %v7514_v7, %v7490_v49  ;;  %v10172_v11 = vpop.f32.mrb[243].mxu1  ;;  %v7493_v3 = vadd.f32 %v8326_v45, %v7492_v8 }
0x2676   :  { %v10321_v11 = vld [vmem:[%s14156_s1 + $0x130] sm:$0xff]  }
0x2677   :  { %v7528_v37 = vadd.f32 %v7519_v6, %v13889_v61  ;;  %v7520_v50 = vmul.f32 %v7514_v7, %v7493_v3 }
0x2679   :  { %v7538_v31 = vsel %vm7537_vm14, %v7528_v37, -inf  ;;  %v7529_v2 = vadd.f32 %v7520_v50, %v13894_v18  ;;  %v7550_v46 = vsel %vm7549_vm15, %v7528_v37, -inf  ;;  %v8338_v37 = vld [vmem:[%s14157_s2 + $0x18] ss:$0 sm:$0xff] }
0x267a   :  { %v7539_v54 = vmax.f32 %v7533_v44, %v7538_v31 }
0x267b   :  { %v7551_v53 = vsel %vm2531_vm11, %v7529_v2, -inf }
0x267c   :  { %v7540_v5 = vmax.f32 %v7539_v54, %v7534_v21 }
0x267e   :  { %v7542_v30 = vmax.f32 %v7540_v5, %v7541_v48 }
0x2680   :  { %v7543_v57 = vrot.slane %v7542_v30, 4 }
0x2682   :  { %v7544_v12 = vmax.f32 %v7542_v30, %v7543_v57 }
0x269b   :  { %v7497_v56 = vpop.f32.mrb[244].mxu1 }
0x269c   :  { %v7498_v38 = vadd.f32 %v8326_v45, %v7497_v56  ;;  %v10175_v4 = vpop.f32.mrb[245].mxu1 }
0x269d   :  { %v7500_v35 = vpop.f32.mrb[246].mxu1  ;;  %v10323_v4 = vld [vmem:[%s14156_s1 + $0x140] sm:$0xff]  }
0x269e   :  { %v7521_v0 = vmul.f32 %v7514_v7, %v7498_v38  ;;  %v7501_v9 = vadd.f32 %v8326_v45, %v7500_v35  ;;  %v10176_v13 = vpop.f32.mrb[247].mxu1  ;;  %v10324_v35 = vld [vmem:[%s14156_s1 + $0x148] sm:$0xff]  }
0x26a0   :  { %v7530_v20 = vadd.f32 %v7521_v0, %v13905_v60  ;;  %v7522_v23 = vmul.f32 %v7514_v7, %v7501_v9  ;;  %v8342_v0 = vld [vmem:[%s14157_s2 + $0x19] ss:$0 sm:$0xff] }
0x26a2   :  { %v7531_v61 = vadd.f32 %v7522_v23, %v13911_v29  ;;  %v7552_v33 = vsel %vm2531_vm11, %v7530_v20, -inf }
0x26a3   :  { %v7505_v24 = vpop.f32.mrb[248].mxu1 }
0x26a4   :  { %v7553_v1 = vsel %vm2531_vm11, %v7531_v61, -inf  ;;  %v7506_v14 = vadd.f32 %v8326_v45, %v7505_v24  ;;  %v10179_v26 = vpop.f32.mrb[249].mxu1  ;;  %v7545_v45 = vrot.slane %v7544_v12, 2 }
0x26a5   :  { %v7557_v39 = vmax.f32 %v7552_v33, %v7553_v1  ;;  %v7508_v41 = vpop.f32.mrb[250].mxu1  ;;  %v10325_v33 = vld [vmem:[%s14156_s1 + $0x150] sm:$0xff]   ;;  %v10326_v1 = vld [vmem:[%s14156_s1 + $0x158] sm:$0xff]   ;;  %s10791_s1 = smov [#allocation5]  }
0x26a6   :  { %v7523_v58 = vmul.f32 %v7514_v7, %v7506_v14  ;;  %v10180_v10 = vpop.f32.mrb[251].mxu1  ;;  %v7546_v22 = vmax.f32 %v7544_v12, %v7545_v45  ;;  %v8346_v14 = vld [vmem:[%s14157_s2 + $0x1a] ss:$0 sm:$0xff] }
0x26a8   :  { %v7532_v60 = vadd.f32 %v7523_v58, %v13918_v27  ;;  %v7547_v55 = vrot.slane %v7546_v22, 1 }
0x26aa   :  { %v7554_v29 = vsel %vm2531_vm11, %v7532_v60, -inf  ;;  %v7548_v18 = vmax.f32 %v7546_v22, %v7547_v55 }
0x26ab   :  { %v7555_v42 = vmax.f32 %v7550_v46, %v7554_v29 }
0x26ad   :  { %v7556_v34 = vmax.f32 %v7555_v42, %v7551_v53 }
0x26af   :  { %v7558_v17 = vmax.f32 %v7556_v34, %v7557_v39 }
0x26b1   :  { %v7559_v63 = vrot.slane %v7558_v17, 4 }
0x26b3   :  { %v7560_v7 = vmax.f32 %v7558_v17, %v7559_v63 }
0x26b5   :  { %v7561_v62 = vrot.slane %v7560_v7, 2 }
0x26b7   :  { %v7562_v36 = vmax.f32 %v7560_v7, %v7561_v62 }
0x26b9   :  { %v7563_v32 = vrot.slane %v7562_v36, 1 }
0x26bb   :  { %v7564_v25 = vmax.f32 %v7562_v36, %v7563_v32 }
0x26bd   :  { %v7565_v27 = vsel %vm105_vm0, %v7548_v18, %v7564_v25  ;;  %vm7899_vm0 = vcmask 25600  }
0x26be   :  { %v7570_v43 = vpack.c.bf16 %v7565_v27, %v7565_v27 }
0x26c0   :  { %10186 = vmatmul.mubr.msk.bf16.vlgmr.msra.gmra.mrb[240].mxu0 %vm2531_vm11, %v7570_v43 }
0x26c1   :  { %10193 = vmatprep.mubr.msk.bf16.mxu0 %vm10779_vm5, %v10778_v51  ;;  %10190 = vmatpush3.bf16.msra.mxu0 %v10319_v40 }
0x26c2   :  { %10191 = vmatprep.subr.bf16.mxu0 %v10778_v51 }
0x26c5   :  { %10192 = vmatpush3.bf16.msra.mxu0 %v10320_v59 }
0x26c6   :  { %10197 = vmatprep.subr.bf16.mxu0 %v10778_v51 }
0x2793   :  { %v7625_v16 = vpop.f32.mrb[240].mxu0 }
0x2794   :  { %v7626_v28 = vadd.f32 %v8334_v47, %v7625_v16  ;;  %v10187_v49 = vpop.f32.mrb[241].mxu0 }
0x2795   :  { %v7628_v15 = vpop.f32.mrb[242].mxu0 }
0x2796   :  { %v7631_v48 = vadd.f32 %v7626_v28, %v7565_v27  ;;  %v10188_v8 = vpop.f32.mrb[243].mxu0 }
0x2798   :  { %v7632_v19 = vmax.f32 %v7631_v48, 0.0 }
0x279a   :  { %v7637_v6 = vpack.c.bf16 %v7632_v19, %v7632_v19 }
0x279c   :  { %10194 = vmatmul.mubr.msk.bf16.vlgmr.msra.gmra.mrb[244].mxu0 %vm2531_vm11, %v7637_v6 }
0x279d   :  { %10201 = vmatprep.mubr.msk.bf16.mxu0 %vm10779_vm5, %v10778_v51  ;;  %10198 = vmatpush3.bf16.msra.mxu0 %v10321_v11 }
0x279e   :  { %10199 = vmatprep.subr.bf16.mxu0 %v10778_v51 }
0x27a1   :  { %10200 = vmatpush3.bf16.msra.mxu0 %v10322_v52 }
0x27a2   :  { %10205 = vmatprep.subr.bf16.mxu0 %v10778_v51 }
0x286f   :  { %v7692_v44 = vpop.f32.mrb[244].mxu0 }
0x2870   :  { %v7693_v31 = vadd.f32 %v8338_v37, %v7692_v44  ;;  %v10195_v54 = vpop.f32.mrb[245].mxu0 }
0x2871   :  { %v7695_v21 = vpop.f32.mrb[246].mxu0 }
0x2872   :  { %v7698_v5 = vadd.f32 %v7693_v31, %v7632_v19  ;;  %v10196_v30 = vpop.f32.mrb[247].mxu0 }
0x2874   :  { %v7699_v56 = vmax.f32 %v7698_v5, 0.0 }
0x2876   :  { %v7704_v38 = vpack.c.bf16 %v7699_v56, %v7699_v56 }
0x2878   :  { %10202 = vmatmul.mubr.msk.bf16.vlgmr.msra.gmra.mrb[248].mxu0 %vm2531_vm11, %v7704_v38 }
0x2879   :  { %10209 = vmatprep.mubr.msk.bf16.mxu0 %vm10779_vm5, %v10778_v51  ;;  %10206 = vmatpush3.bf16.msra.mxu0 %v10323_v4 }
0x287a   :  { %10207 = vmatprep.subr.bf16.mxu0 %v10778_v51 }
0x287d   :  { %10208 = vmatpush3.bf16.msra.mxu0 %v10324_v35 }
0x287e   :  { %10213 = vmatprep.subr.bf16.mxu0 %v10778_v51 }
0x294b   :  { %v7759_v9 = vpop.f32.mrb[248].mxu0 }
0x294c   :  { %v7760_v13 = vadd.f32 %v8342_v0, %v7759_v9  ;;  %v10203_v3 = vpop.f32.mrb[249].mxu0 }
0x294d   :  { %v7762_v20 = vpop.f32.mrb[250].mxu0 }
0x294e   :  { %v7765_v23 = vadd.f32 %v7760_v13, %v7699_v56  ;;  %v10204_v61 = vpop.f32.mrb[251].mxu0 }
0x2950   :  { %v7766_v24 = vmax.f32 %v7765_v23, 0.0 }
0x2952   :  { %v7771_v50 = vpack.c.bf16 %v7766_v24, %v7766_v24 }
0x2954   :  { %10210 = vmatmul.mubr.msk.bf16.vlgmr.msra.gmra.mrb[252].mxu0 %vm2531_vm11, %v7771_v50 }
0x2955   :  { %10217 = vmatprep.mubr.msk.bf16.mxu0 %vm10779_vm5, %v10778_v51  ;;  %10214 = vmatpush3.bf16.msra.mxu0 %v10325_v33 }
0x2956   :  { %10215 = vmatprep.subr.bf16.mxu0 %v10778_v51  ;;  %v8350_v51 = vld [vmem:[%s14157_s2 + $0x1b] ss:$0 sm:$0xff]  ;;  %s7919_s2 = sshll.u32 %s10791_s1, 4  ;;  %s7920_s2 = int_to_ptr.vmem [resolvable:$true] %s7919_s2 }
0x2957   :  { %s10748_s27 = scalar_lea.vmem %s7920_s2, 32  ;;  %p10753_p9 = scmp.lt.s32.totalorder %s7920_s2, %s7920_s2 }
0x2958   :  { %p10749_p8 = scmp.ne.s32.totalorder %s7920_s2, %s10748_s27  ;;  %p10754_p10 = scmp.lt.s32.totalorder %s10748_s27, %s10748_s27 }
0x2959   :  { %10216 = vmatpush3.bf16.msra.mxu0 %v10326_v1 }
0x295a   :  { %p10755_p11 = por %p10754_p10, %p10753_p9 }
0x295c   :  { %p10756_p12 = pnand %p10755_p11, %p10749_p8 }
0x2a27   :  { %v7826_v26 = vpop.f32.mrb[252].mxu0 }
0x2a28   :  { %v7827_v39 = vadd.f32 %v8346_v14, %v7826_v26  ;;  %v10211_v41 = vpop.f32.mrb[253].mxu0 }
0x2a29   :  { %v7829_v58 = vpop.f32.mrb[254].mxu0 }
0x2a2a   :  { %v7832_v10 = vadd.f32 %v7827_v39, %v7766_v24  ;;  %v10212_v57 = vpop.f32.mrb[255].mxu0 }
0x2a2c   :  { %v7833_v2 = vmax.f32 %v7832_v10, 0.0 }
0x2a2e   :  { %v7838_v60 = vpack.c.bf16 %v7833_v2, %v7833_v2 }
0x2a30   :  { %10218 = vmatmul.mubr.msk.bf16.vlgmr.msra.gmra.mrb[0].mxu0 %vm2531_vm11, %v7838_v60 }
0x2b03   :  { %v7893_v46 = vpop.f32.mrb[0].mxu0 }
0x2b04   :  { %v7894_v29 = vadd.f32 %v8350_v51, %v7893_v46  ;;  %v10219_v12 = vpop.f32.mrb[1].mxu0 }
0x2b05   :  { %v7896_v42 = vpop.f32.mrb[2].mxu0 }
0x2b06   :  { %v10220_v53 = vpop.f32.mrb[3].mxu0  ;;  %v7900_v34 = vsel %vm7899_vm0, %v7894_v29, -inf }
0x2b07   :  { %7901 = vmax.xlane.f32.xlu0 %v7900_v34 }
0x2b94   :  { %v7902_v45 = vpop.xlane.xlu0 %7901 }
0x2b95   :  { %v7903_v17 = vsub.f32 %v7894_v29, %v7902_v45 }
0x2b97   :  { %v7904_v63 = vmul.f32 1.442695, %v7903_v17 }
0x2b99   :  { %10695 = vpow2.f32 %v7904_v63 }
0x2ba3   :  { %v10696_v22 = vpop.eup %10695 }
0x2ba4   :  { %v7906_v7 = vsel %vm7899_vm0, %v10696_v22, 0.0 }
0x2ba5   :  { %7907 = vadd.xlane.f32.xlu1 %v7906_v7 }
0x2c32   :  { %v7908_v62 = vpop.xlane.xlu1 %7907 }
0x2c33   :  { %10697 = vlog2.f32 %v7908_v62 }
0x2c3d   :  { %v10698_v55 = vpop.eup %10697 }
0x2c3e   :  { %v7910_v36 = vmul.f32 0.6931472, %v10698_v55 }
0x2c40   :  { %v7911_v32 = vsub.f32 %v7903_v17, %v7910_v36 }
0x2c42   :  { %7912 = vst.msk [vmem:[#allocation5] sm:$0x3] %vm7899_vm0, %v7911_v32 }
0x2c43   :  { %10759 = shalt.err (!%p10756_p12)
}
0x2c44   :  { %s10760_s29 = scalar_lea.hbm %s14161_s6, 32 }
0x2c45   :  { %p10761_p13 = scmp.ne.s32.totalorder %s14161_s6, %s10760_s29  ;;  %p10764_p0 = scmp.lt.u32.totalorder %s10760_s29, %s14161_s6 }
0x2c47   :  { %p10766_p1 = pnand %p10764_p0, %p10761_p13 }
0x2c49   :  { %10769 = shalt.err (!%p10766_p1)
}
0x2c4a   :  { %7922 = dma.vmem_to_hbm [thread:$0]  %s7920_s2, 32, %s14161_s6, [#allocation4]  }
0x2c4b   :  { %10772 = dma.done.wait [#allocation4], 32  }
0x2c4c   :  { %10773 = vsyncadd [#allocation4], 4294967264 }
0x2c4d   :  { %7926 = vsyncpa [#allocation3], 1 }
0x2c4e   :  { %7927 = vsyncpa [#allocation4], 1 }

</bundles_post_ra>
